<compile_context>
chip_gen: v7x
topology: tpu7x:2x2x1
jax: 0.10.0
libtpu: 0.0.40
codegen_flags: <defaults>
</compile_context>

<pallas_src>
import functools

import jax
import jax.numpy as jnp
import numpy as np
from jax.experimental import pallas as pl
from jax.experimental.pallas import tpu as pltpu

EPS = 1e-3  # BatchNorm2d eps used by the module


def _silu(y):
    return y * jax.nn.sigmoid(y)


# --------------------------------------------------------------------------
# Kernel 1: cv1 + cv2 fused (two 1x1 convs sharing the same input read)
# --------------------------------------------------------------------------

def _split_kernel(x_ref, w1_ref, s1_ref, b1_ref, w2_ref, s2_ref, b2_ref,
                  a_ref, b_ref):
    x = x_ref[...]                                           # (tm, c1) bf16
    ya = jnp.dot(x, w1_ref[...], preferred_element_type=jnp.float32)
    ya = ya * s1_ref[...] + b1_ref[...]
    a_ref[...] = _silu(ya).astype(a_ref.dtype)
    yb = jnp.dot(x, w2_ref[...], preferred_element_type=jnp.float32)
    yb = yb * s2_ref[...] + b2_ref[...]
    b_ref[...] = _silu(yb).astype(b_ref.dtype)


def pw_split_cv1_cv2(x, cv1, cv2, tm=512):
    """x: (N,H,W,c1) -> (a, b) both (N,H,W,c_); cv1/cv2 1x1 conv + BN + SiLU."""
    N, H, W, c1 = x.shape
    (w1, s1, b1), (w2, s2, b2) = cv1, cv2
    c_ = w1.shape[1]
    M = N * H * W
    tm = min(tm, M)                     # tm==M (full) or tm==512 (8-divisible)
    x2d = x.reshape(M, c1).astype(jnp.bfloat16)
    bf = jnp.bfloat16
    a2d, b2d = pl.pallas_call(
        _split_kernel,
        out_shape=(jax.ShapeDtypeStruct((M, c_), jnp.bfloat16),
                   jax.ShapeDtypeStruct((M, c_), jnp.bfloat16)),
        grid=(pl.cdiv(M, tm),),
        in_specs=[pl.BlockSpec((tm, c1), lambda i: (i, 0)),
                  pl.BlockSpec((c1, c_), lambda i: (0, 0)),
                  pl.BlockSpec((1, c_), lambda i: (0, 0)),
                  pl.BlockSpec((1, c_), lambda i: (0, 0)),
                  pl.BlockSpec((c1, c_), lambda i: (0, 0)),
                  pl.BlockSpec((1, c_), lambda i: (0, 0)),
                  pl.BlockSpec((1, c_), lambda i: (0, 0))],
        out_specs=(pl.BlockSpec((tm, c_), lambda i: (i, 0)),
                   pl.BlockSpec((tm, c_), lambda i: (i, 0))),
        compiler_params=pltpu.CompilerParams(
            dimension_semantics=("parallel",)),
    )(x2d, w1.astype(bf), s1.reshape(1, c_), b1.reshape(1, c_),
      w2.astype(bf), s2.reshape(1, c_), b2.reshape(1, c_))
    return a2d.reshape(N, H, W, c_), b2d.reshape(N, H, W, c_)


# --------------------------------------------------------------------------
# Kernel 2: fused CSPNeXt bottleneck (1x1 conv -> 3x3 conv -> +residual)
# --------------------------------------------------------------------------

def _bottleneck_kernel(a_ref, w1_ref, s1_ref, b1_ref, w3_ref, s3_ref, b3_ref,
                       o_ref, tp_ref, *, add):
    _, H, W, c = a_ref.shape
    a = a_ref[...].reshape(H * W, c)                         # bf16
    # --- bottleneck cv1: 1x1 conv + BN + SiLU, kept entirely in VMEM -------
    t = jnp.dot(a, w1_ref[...], preferred_element_type=jnp.float32)
    t = _silu(t * s1_ref[...] + b1_ref[...])                 # (H*W, c) f32
    # --- zero-padded copy of t in a VMEM scratch (replaces XLA jnp.pad) ----
    # 1-row halo top/bottom; 8-column halo left so the interior store stays
    # sublane-aligned (reads below may be unaligned, which is cheap).
    tp_ref[...] = jnp.zeros_like(tp_ref)
    tp_ref[1:H + 1, 8:W + 8, :] = t.reshape(H, W, c)
    # --- bottleneck cv2: 3x3 conv as 9 shifted bf16 matmuls, f32 accum -----
    acc = jnp.zeros((H * W, c), jnp.float32)
    for dy in range(3):
        for dx in range(3):
            patch = tp_ref[dy:dy + H, 7 + dx:7 + dx + W, :]
            patch = patch.reshape(H * W, c).astype(jnp.bfloat16)
            acc = acc + jnp.dot(patch, w3_ref[dy * 3 + dx],
                                preferred_element_type=jnp.float32)
    y = _silu(acc * s3_ref[...] + b3_ref[...])
    if add:                                   # residual uses the already-loaded
        y = y + a.astype(jnp.float32)         # input block -> no extra DMA
    o_ref[...] = y.reshape(1, H, W, c).astype(o_ref.dtype)


def bottleneck_fused(a, cv1, cv2, add=True):
    """One CSPNeXtBottleneck(c_, c_, shortcut, e=1.0) as a single kernel."""
    N, H, W, c = a.shape
    (w1, s1, b1), (w3, s3, b3) = cv1, cv2
    bf = jnp.bfloat16
    kern = functools.partial(_bottleneck_kernel, add=add)
    return pl.pallas_call(
        kern,
        out_shape=jax.ShapeDtypeStruct((N, H, W, c), jnp.bfloat16),
        grid=(N,),
        in_specs=[pl.BlockSpec((1, H, W, c), lambda n: (n, 0, 0, 0)),
                  pl.BlockSpec((c, c), lambda n: (0, 0)),
                  pl.BlockSpec((1, c), lambda n: (0, 0)),
                  pl.BlockSpec((1, c), lambda n: (0, 0)),
                  pl.BlockSpec((9, c, c), lambda n: (0, 0, 0)),
                  pl.BlockSpec((1, c), lambda n: (0, 0)),
                  pl.BlockSpec((1, c), lambda n: (0, 0))],
        out_specs=pl.BlockSpec((1, H, W, c), lambda n: (n, 0, 0, 0)),
        scratch_shapes=[pltpu.VMEM((H + 2, W + 16, c), jnp.float32)],
        compiler_params=pltpu.CompilerParams(
            dimension_semantics=("parallel",)),
    )(a, w1.astype(bf), s1.reshape(1, c), b1.reshape(1, c),
      w3.astype(bf), s3.reshape(1, c), b3.reshape(1, c))


# --------------------------------------------------------------------------
# Kernel 3: channel attention + cv3 fused (no materialized concat / scaled cat)
# --------------------------------------------------------------------------

def _att_cv3_kernel(ma_ref, b_ref, waa_ref, wba_ref, wab_ref, wbb_ref,
                    baa_ref, bab_ref, w3a_ref, w3b_ref, s_ref, bb_ref, o_ref):
    _, H, W, c = ma_ref.shape
    c2 = o_ref.shape[3]
    ma = ma_ref[...].reshape(H * W, c)                       # bf16
    bx = b_ref[...].reshape(H * W, c)
    ma32 = ma.astype(jnp.float32)
    bx32 = bx.astype(jnp.float32)
    # global average pool of cat([m(a), b]) done per half (no concat needed)
    pa = jnp.mean(ma32, axis=0, keepdims=True).astype(jnp.bfloat16)   # (1, c)
    pb = jnp.mean(bx32, axis=0, keepdims=True).astype(jnp.bfloat16)
    # attention 1x1 conv (with bias), weights pre-split into quadrants
    za = (jnp.dot(pa, waa_ref[...], preferred_element_type=jnp.float32)
          + jnp.dot(pb, wba_ref[...], preferred_element_type=jnp.float32)
          + baa_ref[...])
    zb = (jnp.dot(pa, wab_ref[...], preferred_element_type=jnp.float32)
          + jnp.dot(pb, wbb_ref[...], preferred_element_type=jnp.float32)
          + bab_ref[...])
    att_a = jnp.clip(za / 6.0 + 0.5, 0.0, 1.0)               # Hardsigmoid
    att_b = jnp.clip(zb / 6.0 + 0.5, 0.0, 1.0)
    # scale each half and apply cv3 as two half-K matmuls (== concat @ W3)
    xa = (ma32 * att_a).astype(jnp.bfloat16)
    xb = (bx32 * att_b).astype(jnp.bfloat16)
    y = (jnp.dot(xa, w3a_ref[...], preferred_element_type=jnp.float32)
         + jnp.dot(xb, w3b_ref[...], preferred_element_type=jnp.float32))
    y = _silu(y * s_ref[...] + bb_ref[...])
    o_ref[...] = y.reshape(1, H, W, c2).astype(o_ref.dtype)


def att_cv3_fused(ma, b, att_w, att_b, cv3):
    N, H, W, c = ma.shape
    w3, s3, b3 = cv3
    c2 = w3.shape[1]
    bf = jnp.bfloat16
    waa = att_w[:c, :c].astype(bf)
    wba = att_w[c:, :c].astype(bf)
    wab = att_w[:c, c:].astype(bf)
    wbb = att_w[c:, c:].astype(bf)
    baa = att_b[:c].reshape(1, c)
    bab = att_b[c:].reshape(1, c)
    w3a = w3[:c].astype(bf)
    w3b = w3[c:].astype(bf)
    return pl.pallas_call(
        _att_cv3_kernel,
        out_shape=jax.ShapeDtypeStruct((N, H, W, c2), jnp.float32),
        grid=(N,),
        in_specs=[pl.BlockSpec((1, H, W, c), lambda n: (n, 0, 0, 0)),
                  pl.BlockSpec((1, H, W, c), lambda n: (n, 0, 0, 0)),
                  pl.BlockSpec((c, c), lambda n: (0, 0)),
                  pl.BlockSpec((c, c), lambda n: (0, 0)),
                  pl.BlockSpec((c, c), lambda n: (0, 0)),
                  pl.BlockSpec((c, c), lambda n: (0, 0)),
                  pl.BlockSpec((1, c), lambda n: (0, 0)),
                  pl.BlockSpec((1, c), lambda n: (0, 0)),
                  pl.BlockSpec((c, c2), lambda n: (0, 0)),
                  pl.BlockSpec((c, c2), lambda n: (0, 0)),
                  pl.BlockSpec((1, c2), lambda n: (0, 0)),
                  pl.BlockSpec((1, c2), lambda n: (0, 0))],
        out_specs=pl.BlockSpec((1, H, W, c2), lambda n: (n, 0, 0, 0)),
        compiler_params=pltpu.CompilerParams(
            dimension_semantics=("parallel",)),
    )(ma, b, waa, wba, wab, wbb, baa, bab, w3a, w3b,
      s3.reshape(1, c2), b3.reshape(1, c2))


# --------------------------------------------------------------------------
# Parameters (deterministic synthetic init; BN folded to scale/bias)
# --------------------------------------------------------------------------

def _fold_bn(key, cout):
    kg, kb, km, kv = jax.random.split(key, 4)
    gamma = jax.random.uniform(kg, (cout,), jnp.float32, 0.5, 1.5)
    beta = 0.1 * jax.random.normal(kb, (cout,), jnp.float32)
    mean = 0.1 * jax.random.normal(km, (cout,), jnp.float32)
    var = jax.random.uniform(kv, (cout,), jnp.float32, 0.5, 1.5)
    scale = gamma / jnp.sqrt(var + EPS)
    bias = beta - mean * scale
    return scale, bias


def _conv_params(key, cin, cout, k=1):
    kw, kbn = jax.random.split(key)
    if k == 1:
        w = 0.1 * jax.random.normal(kw, (cin, cout), jnp.float32)
    else:
        w = 0.1 * jax.random.normal(kw, (k * k, cin, cout), jnp.float32)
    scale, bias = _fold_bn(kbn, cout)
    return (w, scale, bias)


def init_params(key, c1, c2, n=1, e=0.5):
    c_ = int(c2 * e)
    keys = jax.random.split(key, 4 + 2 * n)
    params = {
        "cv1": _conv_params(keys[0], c1, c_, 1),
        "cv2": _conv_params(keys[1], c1, c_, 1),
        "cv3": _conv_params(keys[2], 2 * c_, c2, 1),
        "m": [],
    }
    for i in range(n):
        params["m"].append({
            "cv1": _conv_params(keys[4 + 2 * i], c_, c_, 1),
            "cv2": _conv_params(keys[5 + 2 * i], c_, c_, 3),  # e=1.0 bottleneck
        })
    ka, kb = jax.random.split(keys[3])
    params["att_w"] = 0.1 * jax.random.normal(ka, (2 * c_, 2 * c_), jnp.float32)
    params["att_b"] = 0.1 * jax.random.normal(kb, (2 * c_,), jnp.float32)
    return params


# --------------------------------------------------------------------------
# Forward (NCHW in / NCHW out, matching the PyTorch module)
# --------------------------------------------------------------------------

def c3_forward(x_nchw, p):
    x = jnp.transpose(x_nchw, (0, 2, 3, 1)).astype(jnp.float32)   # -> NHWC
    a, b = pw_split_cv1_cv2(x, p["cv1"], p["cv2"])
    for blk in p["m"]:   # CSPNeXtBottleneck(c_, c_, shortcut=True, e=1.0)
        a = bottleneck_fused(a, blk["cv1"], blk["cv2"], add=True)
    out = att_cv3_fused(a, b, p["att_w"], p["att_b"], p["cv3"])
    return jnp.transpose(out, (0, 3, 1, 2))                       # -> NCHW


# --------------------------------------------------------------------------
# Pure-JAX reference (f32 / HIGHEST precision, for correctness check only)
# --------------------------------------------------------------------------

def ref_c3(x_nchw, p):
    x = jnp.transpose(x_nchw, (0, 2, 3, 1)).astype(jnp.float32)

    def conv_bn_silu(x, w, scale, bias):
        if w.ndim == 2:
            wh = w.reshape(1, 1, *w.shape)
        else:
            wh = w.reshape(3, 3, w.shape[1], w.shape[2])
        y = jax.lax.conv_general_dilated(
            x, wh, (1, 1), "SAME",
            dimension_numbers=("NHWC", "HWIO", "NHWC"),
            precision=jax.lax.Precision.HIGHEST)
        y = y * scale + bias
        return y * jax.nn.sigmoid(y)

    a = conv_bn_silu(x, *p["cv1"])
    for blk in p["m"]:
        a = a + conv_bn_silu(conv_bn_silu(a, *blk["cv1"]), *blk["cv2"])
    b = conv_bn_silu(x, *p["cv2"])
    cat = jnp.concatenate([a, b], axis=-1)
    pooled = jnp.mean(cat, axis=(1, 2))
    att = jnp.clip((pooled @ p["att_w"] + p["att_b"]) / 6.0 + 0.5, 0.0, 1.0)
    cat = cat * att[:, None, None, :]
    out = conv_bn_silu(cat, *p["cv3"])
    return jnp.transpose(out, (0, 3, 1, 2))


if __name__ == "__main__":
    key = jax.random.PRNGKey(0)
    kx, kp = jax.random.split(key)
    N, c1, c2, H, W, n = 2, 8, 8, 16, 16, 1
    x = jax.random.normal(kx, (N, c1, H, W), jnp.float32)   # NCHW, like PyTorch
    params = init_params(kp, c1, c2, n=n, e=0.5)

    out = jax.block_until_ready(jax.jit(c3_forward)(x, params))
    ref = jax.block_until_ready(ref_c3(x, params))
    # Kernel path uses bf16 MXU operands + bf16 inter-kernel activations
    # (per perf review); reference is f32/HIGHEST, hence the bf16-level tol.
    np.testing.assert_allclose(np.asarray(out), np.asarray(ref),
                               atol=2e-2, rtol=2e-2)
    print("KERNEL_OK")
</pallas_src>

<mosaic_0001>
module attributes {stable_mosaic.version = 11 : i64} {
  func.func @_split_kernel(%arg0: i32, %arg1: memref<512x8xbf16, #tpu.memory_space<vmem>>, %arg2: memref<8x4xbf16, #tpu.memory_space<vmem>>, %arg3: memref<1x4xf32, #tpu.memory_space<vmem>>, %arg4: memref<1x4xf32, #tpu.memory_space<vmem>>, %arg5: memref<8x4xbf16, #tpu.memory_space<vmem>>, %arg6: memref<1x4xf32, #tpu.memory_space<vmem>>, %arg7: memref<1x4xf32, #tpu.memory_space<vmem>>, %arg8: memref<512x4xbf16, #tpu.memory_space<vmem>>, %arg9: memref<512x4xbf16, #tpu.memory_space<vmem>>) attributes {dimension_semantics = [#tpu.dimension_semantics<parallel>], iteration_bounds = array<i64: 1>, scalar_prefetch = 0 : i64, scratch_operands = 0 : i64, tpu.core_type = #tpu.core_type<tc>, window_params = [{transform_indices = @transform_0, window_bounds = array<i64: 512, 8>}, {pipeline_mode = #tpu.pipeline_mode<synchronous>, transform_indices = @transform_1, window_bounds = array<i64: 8, 4>}, {pipeline_mode = #tpu.pipeline_mode<synchronous>, transform_indices = @transform_2, window_bounds = array<i64: 1, 4>}, {pipeline_mode = #tpu.pipeline_mode<synchronous>, transform_indices = @transform_3, window_bounds = array<i64: 1, 4>}, {pipeline_mode = #tpu.pipeline_mode<synchronous>, transform_indices = @transform_4, window_bounds = array<i64: 8, 4>}, {pipeline_mode = #tpu.pipeline_mode<synchronous>, transform_indices = @transform_5, window_bounds = array<i64: 1, 4>}, {pipeline_mode = #tpu.pipeline_mode<synchronous>, transform_indices = @transform_6, window_bounds = array<i64: 1, 4>}, {transform_indices = @transform_7, window_bounds = array<i64: 512, 4>}, {transform_indices = @transform_8, window_bounds = array<i64: 512, 4>}]} {
    %c0 = arith.constant 0 : index
    %c0_0 = arith.constant 0 : index
    %0 = vector.load %arg1[%c0, %c0_0] : memref<512x8xbf16, #tpu.memory_space<vmem>>, vector<512x8xbf16>
    %c0_1 = arith.constant 0 : index
    %c0_2 = arith.constant 0 : index
    %1 = vector.load %arg2[%c0_1, %c0_2] : memref<8x4xbf16, #tpu.memory_space<vmem>>, vector<8x4xbf16>
    %cst = arith.constant dense<0.000000e+00> : vector<512x4xf32>
    %2 = tpu.matmul %0, %1, %cst {dimension_numbers = #tpu.dot_dimension_numbers<[1], [0], [0], [1], [0, 0, 1, 1], [], []>} : vector<512x8xbf16>, vector<8x4xbf16>, vector<512x4xf32> -> vector<512x4xf32>
    %c0_3 = arith.constant 0 : index
    %c0_4 = arith.constant 0 : index
    %3 = vector.load %arg3[%c0_3, %c0_4] : memref<1x4xf32, #tpu.memory_space<vmem>>, vector<1x4xf32>
    %4 = vector.broadcast %3 : vector<1x4xf32> to vector<512x4xf32>
    %5 = arith.mulf %2, %4 : vector<512x4xf32>
    %c0_5 = arith.constant 0 : index
    %c0_6 = arith.constant 0 : index
    %6 = vector.load %arg4[%c0_5, %c0_6] : memref<1x4xf32, #tpu.memory_space<vmem>>, vector<1x4xf32>
    %7 = vector.broadcast %6 : vector<1x4xf32> to vector<512x4xf32>
    %8 = arith.addf %5, %7 : vector<512x4xf32>
    %9 = arith.negf %8 : vector<512x4xf32>
    %10 = math.exp %9 : vector<512x4xf32>
    %cst_7 = arith.constant 1.000000e+00 : f32
    %11 = vector.broadcast %cst_7 : f32 to vector<512x4xf32>
    %12 = arith.addf %11, %10 : vector<512x4xf32>
    %13 = arith.divf %11, %12 : vector<512x4xf32>
    %14 = arith.mulf %8, %13 : vector<512x4xf32>
    %15 = arith.truncf %14 : vector<512x4xf32> to vector<512x4xbf16>
    %c0_8 = arith.constant 0 : index
    %c0_9 = arith.constant 0 : index
    %16 = vector.load %arg8[%c0_8, %c0_9] : memref<512x4xbf16, #tpu.memory_space<vmem>>, vector<512x4xbf16>
    tpu.vector_store %arg8[%c0_8, %c0_9], %15 {strides = array<i32>} : memref<512x4xbf16, #tpu.memory_space<vmem>>, vector<512x4xbf16>,
    %c0_10 = arith.constant 0 : index
    %c0_11 = arith.constant 0 : index
    %17 = vector.load %arg5[%c0_10, %c0_11] : memref<8x4xbf16, #tpu.memory_space<vmem>>, vector<8x4xbf16>
    %cst_12 = arith.constant dense<0.000000e+00> : vector<512x4xf32>
    %18 = tpu.matmul %0, %17, %cst_12 {dimension_numbers = #tpu.dot_dimension_numbers<[1], [0], [0], [1], [0, 0, 1, 1], [], []>} : vector<512x8xbf16>, vector<8x4xbf16>, vector<512x4xf32> -> vector<512x4xf32>
    %c0_13 = arith.constant 0 : index
    %c0_14 = arith.constant 0 : index
    %19 = vector.load %arg6[%c0_13, %c0_14] : memref<1x4xf32, #tpu.memory_space<vmem>>, vector<1x4xf32>
    %20 = vector.broadcast %19 : vector<1x4xf32> to vector<512x4xf32>
    %21 = arith.mulf %18, %20 : vector<512x4xf32>
    %c0_15 = arith.constant 0 : index
    %c0_16 = arith.constant 0 : index
    %22 = vector.load %arg7[%c0_15, %c0_16] : memref<1x4xf32, #tpu.memory_space<vmem>>, vector<1x4xf32>
    %23 = vector.broadcast %22 : vector<1x4xf32> to vector<512x4xf32>
    %24 = arith.addf %21, %23 : vector<512x4xf32>
    %25 = arith.negf %24 : vector<512x4xf32>
    %26 = math.exp %25 : vector<512x4xf32>
    %cst_17 = arith.constant 1.000000e+00 : f32
    %27 = vector.broadcast %cst_17 : f32 to vector<512x4xf32>
    %28 = arith.addf %27, %26 : vector<512x4xf32>
    %29 = arith.divf %27, %28 : vector<512x4xf32>
    %30 = arith.mulf %24, %29 : vector<512x4xf32>
    %31 = arith.truncf %30 : vector<512x4xf32> to vector<512x4xbf16>
    %c0_18 = arith.constant 0 : index
    %c0_19 = arith.constant 0 : index
    %32 = vector.load %arg9[%c0_18, %c0_19] : memref<512x4xbf16, #tpu.memory_space<vmem>>, vector<512x4xbf16>
    tpu.vector_store %arg9[%c0_18, %c0_19], %31 {strides = array<i32>} : memref<512x4xbf16, #tpu.memory_space<vmem>>, vector<512x4xbf16>,
    return
  }
  func.func @transform_0(%arg0: i32) -> (i32, i32) {
    %c0_i32 = arith.constant 0 : i32
    %c0_i32_0 = arith.constant 0 : i32
    return %arg0, %c0_i32 : i32, i32
  }
  func.func @transform_1(%arg0: i32) -> (i32, i32) {
    %c0_i32 = arith.constant 0 : i32
    %c0_i32_0 = arith.constant 0 : i32
    %c0_i32_1 = arith.constant 0 : i32
    return %c0_i32, %c0_i32_0 : i32, i32
  }
  func.func @transform_2(%arg0: i32) -> (i32, i32) {
    %c0_i32 = arith.constant 0 : i32
    %c0_i32_0 = arith.constant 0 : i32
    %c0_i32_1 = arith.constant 0 : i32
    return %c0_i32, %c0_i32_0 : i32, i32
  }
  func.func @transform_3(%arg0: i32) -> (i32, i32) {
    %c0_i32 = arith.constant 0 : i32
    %c0_i32_0 = arith.constant 0 : i32
    %c0_i32_1 = arith.constant 0 : i32
    return %c0_i32, %c0_i32_0 : i32, i32
  }
  func.func @transform_4(%arg0: i32) -> (i32, i32) {
    %c0_i32 = arith.constant 0 : i32
    %c0_i32_0 = arith.constant 0 : i32
    %c0_i32_1 = arith.constant 0 : i32
    return %c0_i32, %c0_i32_0 : i32, i32
  }
  func.func @transform_5(%arg0: i32) -> (i32, i32) {
    %c0_i32 = arith.constant 0 : i32
    %c0_i32_0 = arith.constant 0 : i32
    %c0_i32_1 = arith.constant 0 : i32
    return %c0_i32, %c0_i32_0 : i32, i32
  }
  func.func @transform_6(%arg0: i32) -> (i32, i32) {
    %c0_i32 = arith.constant 0 : i32
    %c0_i32_0 = arith.constant 0 : i32
    %c0_i32_1 = arith.constant 0 : i32
    return %c0_i32, %c0_i32_0 : i32, i32
  }
  func.func @transform_7(%arg0: i32) -> (i32, i32) {
    %c0_i32 = arith.constant 0 : i32
    %c0_i32_0 = arith.constant 0 : i32
    return %arg0, %c0_i32 : i32, i32
  }
  func.func @transform_8(%arg0: i32) -> (i32, i32) {
    %c0_i32 = arith.constant 0 : i32
    %c0_i32_0 = arith.constant 0 : i32
    return %arg0, %c0_i32 : i32, i32
  }
}

module attributes {stable_mosaic.version = 11 : i64} {
  func.func @_att_cv3_kernel(%arg0: i32, %arg1: memref<1x16x16x4xbf16, #tpu.memory_space<vmem>>, %arg2: memref<1x16x16x4xbf16, #tpu.memory_space<vmem>>, %arg3: memref<4x4xbf16, #tpu.memory_space<vmem>>, %arg4: memref<4x4xbf16, #tpu.memory_space<vmem>>, %arg5: memref<4x4xbf16, #tpu.memory_space<vmem>>, %arg6: memref<4x4xbf16, #tpu.memory_space<vmem>>, %arg7: memref<1x4xf32, #tpu.memory_space<vmem>>, %arg8: memref<1x4xf32, #tpu.memory_space<vmem>>, %arg9: memref<4x8xbf16, #tpu.memory_space<vmem>>, %arg10: memref<4x8xbf16, #tpu.memory_space<vmem>>, %arg11: memref<1x8xf32, #tpu.memory_space<vmem>>, %arg12: memref<1x8xf32, #tpu.memory_space<vmem>>, %arg13: memref<1x16x16x8xf32, #tpu.memory_space<vmem>>) attributes {dimension_semantics = [#tpu.dimension_semantics<parallel>], iteration_bounds = array<i64: 2>, scalar_prefetch = 0 : i64, scratch_operands = 0 : i64, tpu.core_type = #tpu.core_type<tc>, window_params = [{transform_indices = @transform_0, window_bounds = array<i64: 1, 16, 16, 4>}, {transform_indices = @transform_1, window_bounds = array<i64: 1, 16, 16, 4>}, {pipeline_mode = #tpu.pipeline_mode<synchronous>, transform_indices = @transform_2, window_bounds = array<i64: 4, 4>}, {pipeline_mode = #tpu.pipeline_mode<synchronous>, transform_indices = @transform_3, window_bounds = array<i64: 4, 4>}, {pipeline_mode = #tpu.pipeline_mode<synchronous>, transform_indices = @transform_4, window_bounds = array<i64: 4, 4>}, {pipeline_mode = #tpu.pipeline_mode<synchronous>, transform_indices = @transform_5, window_bounds = array<i64: 4, 4>}, {pipeline_mode = #tpu.pipeline_mode<synchronous>, transform_indices = @transform_6, window_bounds = array<i64: 1, 4>}, {pipeline_mode = #tpu.pipeline_mode<synchronous>, transform_indices = @transform_7, window_bounds = array<i64: 1, 4>}, {pipeline_mode = #tpu.pipeline_mode<synchronous>, transform_indices = @transform_8, window_bounds = array<i64: 4, 8>}, {pipeline_mode = #tpu.pipeline_mode<synchronous>, transform_indices = @transform_9, window_bounds = array<i64: 4, 8>}, {pipeline_mode = #tpu.pipeline_mode<synchronous>, transform_indices = @transform_10, window_bounds = array<i64: 1, 8>}, {pipeline_mode = #tpu.pipeline_mode<synchronous>, transform_indices = @transform_11, window_bounds = array<i64: 1, 8>}, {transform_indices = @transform_12, window_bounds = array<i64: 1, 16, 16, 8>}]} {
    %c0 = arith.constant 0 : index
    %c0_0 = arith.constant 0 : index
    %c0_1 = arith.constant 0 : index
    %c0_2 = arith.constant 0 : index
    %0 = vector.load %arg1[%c0, %c0_0, %c0_1, %c0_2] : memref<1x16x16x4xbf16, #tpu.memory_space<vmem>>, vector<1x16x16x4xbf16>
    %1 = vector.shape_cast %0 : vector<1x16x16x4xbf16> to vector<256x4xbf16>
    %c0_3 = arith.constant 0 : index
    %c0_4 = arith.constant 0 : index
    %c0_5 = arith.constant 0 : index
    %c0_6 = arith.constant 0 : index
    %2 = vector.load %arg2[%c0_3, %c0_4, %c0_5, %c0_6] : memref<1x16x16x4xbf16, #tpu.memory_space<vmem>>, vector<1x16x16x4xbf16>
    %3 = vector.shape_cast %2 : vector<1x16x16x4xbf16> to vector<256x4xbf16>
    %4 = arith.extf %1 : vector<256x4xbf16> to vector<256x4xf32>
    %5 = arith.extf %3 : vector<256x4xbf16> to vector<256x4xf32>
    %cst = arith.constant dense<0.000000e+00> : vector<4xf32>
    %6 = vector.multi_reduction <add>, %4, %cst [0] : vector<256x4xf32> to vector<4xf32>
    %7 = vector.shape_cast %6 : vector<4xf32> to vector<1x4xf32>
    %cst_7 = arith.constant 2.560000e+02 : f32
    %8 = vector.broadcast %cst_7 : f32 to vector<1x4xf32>
    %9 = arith.divf %7, %8 : vector<1x4xf32>
    %10 = arith.truncf %9 : vector<1x4xf32> to vector<1x4xbf16>
    %cst_8 = arith.constant dense<0.000000e+00> : vector<4xf32>
    %11 = vector.multi_reduction <add>, %5, %cst_8 [0] : vector<256x4xf32> to vector<4xf32>
    %12 = vector.shape_cast %11 : vector<4xf32> to vector<1x4xf32>
    %cst_9 = arith.constant 2.560000e+02 : f32
    %13 = vector.broadcast %cst_9 : f32 to vector<1x4xf32>
    %14 = arith.divf %12, %13 : vector<1x4xf32>
    %15 = arith.truncf %14 : vector<1x4xf32> to vector<1x4xbf16>
    %c0_10 = arith.constant 0 : index
    %c0_11 = arith.constant 0 : index
    %16 = vector.load %arg3[%c0_10, %c0_11] : memref<4x4xbf16, #tpu.memory_space<vmem>>, vector<4x4xbf16>
    %cst_12 = arith.constant dense<0.000000e+00> : vector<1x4xf32>
    %17 = tpu.matmul %10, %16, %cst_12 {dimension_numbers = #tpu.dot_dimension_numbers<[1], [0], [0], [1], [0, 0, 1, 1], [], []>} : vector<1x4xbf16>, vector<4x4xbf16>, vector<1x4xf32> -> vector<1x4xf32>
    %c0_13 = arith.constant 0 : index
    %c0_14 = arith.constant 0 : index
    %18 = vector.load %arg4[%c0_13, %c0_14] : memref<4x4xbf16, #tpu.memory_space<vmem>>, vector<4x4xbf16>
    %cst_15 = arith.constant dense<0.000000e+00> : vector<1x4xf32>
    %19 = tpu.matmul %15, %18, %cst_15 {dimension_numbers = #tpu.dot_dimension_numbers<[1], [0], [0], [1], [0, 0, 1, 1], [], []>} : vector<1x4xbf16>, vector<4x4xbf16>, vector<1x4xf32> -> vector<1x4xf32>
    %20 = arith.addf %17, %19 : vector<1x4xf32>
    %c0_16 = arith.constant 0 : index
    %c0_17 = arith.constant 0 : index
    %21 = vector.load %arg7[%c0_16, %c0_17] : memref<1x4xf32, #tpu.memory_space<vmem>>, vector<1x4xf32>
    %22 = arith.addf %20, %21 : vector<1x4xf32>
    %c0_18 = arith.constant 0 : index
    %c0_19 = arith.constant 0 : index
    %23 = vector.load %arg5[%c0_18, %c0_19] : memref<4x4xbf16, #tpu.memory_space<vmem>>, vector<4x4xbf16>
    %cst_20 = arith.constant dense<0.000000e+00> : vector<1x4xf32>
    %24 = tpu.matmul %10, %23, %cst_20 {dimension_numbers = #tpu.dot_dimension_numbers<[1], [0], [0], [1], [0, 0, 1, 1], [], []>} : vector<1x4xbf16>, vector<4x4xbf16>, vector<1x4xf32> -> vector<1x4xf32>
    %c0_21 = arith.constant 0 : index
    %c0_22 = arith.constant 0 : index
    %25 = vector.load %arg6[%c0_21, %c0_22] : memref<4x4xbf16, #tpu.memory_space<vmem>>, vector<4x4xbf16>
    %cst_23 = arith.constant dense<0.000000e+00> : vector<1x4xf32>
    %26 = tpu.matmul %15, %25, %cst_23 {dimension_numbers = #tpu.dot_dimension_numbers<[1], [0], [0], [1], [0, 0, 1, 1], [], []>} : vector<1x4xbf16>, vector<4x4xbf16>, vector<1x4xf32> -> vector<1x4xf32>
    %27 = arith.addf %24, %26 : vector<1x4xf32>
    %c0_24 = arith.constant 0 : index
    %c0_25 = arith.constant 0 : index
    %28 = vector.load %arg8[%c0_24, %c0_25] : memref<1x4xf32, #tpu.memory_space<vmem>>, vector<1x4xf32>
    %29 = arith.addf %27, %28 : vector<1x4xf32>
    %cst_26 = arith.constant 6.000000e+00 : f32
    %30 = vector.broadcast %cst_26 : f32 to vector<1x4xf32>
    %31 = arith.divf %22, %30 : vector<1x4xf32>
    %cst_27 = arith.constant 5.000000e-01 : f32
    %32 = vector.broadcast %cst_27 : f32 to vector<1x4xf32>
    %33 = arith.addf %31, %32 : vector<1x4xf32>
    %cst_28 = arith.constant 0.000000e+00 : f32
    %cst_29 = arith.constant 1.000000e+00 : f32
    %34 = vector.broadcast %cst_28 : f32 to vector<1x4xf32>
    %35 = arith.maximumf %34, %33 : vector<1x4xf32>
    %36 = vector.broadcast %cst_29 : f32 to vector<1x4xf32>
    %37 = arith.minimumf %36, %35 : vector<1x4xf32>
    %cst_30 = arith.constant 6.000000e+00 : f32
    %38 = vector.broadcast %cst_30 : f32 to vector<1x4xf32>
    %39 = arith.divf %29, %38 : vector<1x4xf32>
    %cst_31 = arith.constant 5.000000e-01 : f32
    %40 = vector.broadcast %cst_31 : f32 to vector<1x4xf32>
    %41 = arith.addf %39, %40 : vector<1x4xf32>
    %cst_32 = arith.constant 0.000000e+00 : f32
    %cst_33 = arith.constant 1.000000e+00 : f32
    %42 = vector.broadcast %cst_32 : f32 to vector<1x4xf32>
    %43 = arith.maximumf %42, %41 : vector<1x4xf32>
    %44 = vector.broadcast %cst_33 : f32 to vector<1x4xf32>
    %45 = arith.minimumf %44, %43 : vector<1x4xf32>
    %46 = vector.broadcast %37 : vector<1x4xf32> to vector<256x4xf32>
    %47 = arith.mulf %4, %46 : vector<256x4xf32>
    %48 = arith.truncf %47 : vector<256x4xf32> to vector<256x4xbf16>
    %49 = vector.broadcast %45 : vector<1x4xf32> to vector<256x4xf32>
    %50 = arith.mulf %5, %49 : vector<256x4xf32>
    %51 = arith.truncf %50 : vector<256x4xf32> to vector<256x4xbf16>
    %c0_34 = arith.constant 0 : index
    %c0_35 = arith.constant 0 : index
    %52 = vector.load %arg9[%c0_34, %c0_35] : memref<4x8xbf16, #tpu.memory_space<vmem>>, vector<4x8xbf16>
    %cst_36 = arith.constant dense<0.000000e+00> : vector<256x8xf32>
    %53 = tpu.matmul %48, %52, %cst_36 {dimension_numbers = #tpu.dot_dimension_numbers<[1], [0], [0], [1], [0, 0, 1, 1], [], []>} : vector<256x4xbf16>, vector<4x8xbf16>, vector<256x8xf32> -> vector<256x8xf32>
    %c0_37 = arith.constant 0 : index
    %c0_38 = arith.constant 0 : index
    %54 = vector.load %arg10[%c0_37, %c0_38] : memref<4x8xbf16, #tpu.memory_space<vmem>>, vector<4x8xbf16>
    %cst_39 = arith.constant dense<0.000000e+00> : vector<256x8xf32>
    %55 = tpu.matmul %51, %54, %cst_39 {dimension_numbers = #tpu.dot_dimension_numbers<[1], [0], [0], [1], [0, 0, 1, 1], [], []>} : vector<256x4xbf16>, vector<4x8xbf16>, vector<256x8xf32> -> vector<256x8xf32>
    %56 = arith.addf %53, %55 : vector<256x8xf32>
    %c0_40 = arith.constant 0 : index
    %c0_41 = arith.constant 0 : index
    %57 = vector.load %arg11[%c0_40, %c0_41] : memref<1x8xf32, #tpu.memory_space<vmem>>, vector<1x8xf32>
    %58 = vector.broadcast %57 : vector<1x8xf32> to vector<256x8xf32>
    %59 = arith.mulf %56, %58 : vector<256x8xf32>
    %c0_42 = arith.constant 0 : index
    %c0_43 = arith.constant 0 : index
    %60 = vector.load %arg12[%c0_42, %c0_43] : memref<1x8xf32, #tpu.memory_space<vmem>>, vector<1x8xf32>
    %61 = vector.broadcast %60 : vector<1x8xf32> to vector<256x8xf32>
    %62 = arith.addf %59, %61 : vector<256x8xf32>
    %63 = arith.negf %62 : vector<256x8xf32>
    %64 = math.exp %63 : vector<256x8xf32>
    %cst_44 = arith.constant 1.000000e+00 : f32
    %65 = vector.broadcast %cst_44 : f32 to vector<256x8xf32>
    %66 = arith.addf %65, %64 : vector<256x8xf32>
    %67 = arith.divf %65, %66 : vector<256x8xf32>
    %68 = arith.mulf %62, %67 : vector<256x8xf32>
    %69 = vector.shape_cast %68 : vector<256x8xf32> to vector<1x16x16x8xf32>
    %c0_45 = arith.constant 0 : index
    %c0_46 = arith.constant 0 : index
    %c0_47 = arith.constant 0 : index
    %c0_48 = arith.constant 0 : index
    %70 = vector.load %arg13[%c0_45, %c0_46, %c0_47, %c0_48] : memref<1x16x16x8xf32, #tpu.memory_space<vmem>>, vector<1x16x16x8xf32>
    tpu.vector_store %arg13[%c0_45, %c0_46, %c0_47, %c0_48], %69 {strides = array<i32>} : memref<1x16x16x8xf32, #tpu.memory_space<vmem>>, vector<1x16x16x8xf32>,
    return
  }
  func.func @transform_0(%arg0: i32) -> (i32, i32, i32, i32) {
    %c0_i32 = arith.constant 0 : i32
    %c0_i32_0 = arith.constant 0 : i32
    %c0_i32_1 = arith.constant 0 : i32
    %c0_i32_2 = arith.constant 0 : i32
    return %arg0, %c0_i32, %c0_i32_0, %c0_i32_1 : i32, i32, i32, i32
  }
  func.func @transform_1(%arg0: i32) -> (i32, i32, i32, i32) {
    %c0_i32 = arith.constant 0 : i32
    %c0_i32_0 = arith.constant 0 : i32
    %c0_i32_1 = arith.constant 0 : i32
    %c0_i32_2 = arith.constant 0 : i32
    return %arg0, %c0_i32, %c0_i32_0, %c0_i32_1 : i32, i32, i32, i32
  }
  func.func @transform_2(%arg0: i32) -> (i32, i32) {
    %c0_i32 = arith.constant 0 : i32
    %c0_i32_0 = arith.constant 0 : i32
    %c0_i32_1 = arith.constant 0 : i32
    return %c0_i32, %c0_i32_0 : i32, i32
  }
  func.func @transform_3(%arg0: i32) -> (i32, i32) {
    %c0_i32 = arith.constant 0 : i32
    %c0_i32_0 = arith.constant 0 : i32
    %c0_i32_1 = arith.constant 0 : i32
    return %c0_i32, %c0_i32_0 : i32, i32
  }
  func.func @transform_4(%arg0: i32) -> (i32, i32) {
    %c0_i32 = arith.constant 0 : i32
    %c0_i32_0 = arith.constant 0 : i32
    %c0_i32_1 = arith.constant 0 : i32
    return %c0_i32, %c0_i32_0 : i32, i32
  }
  func.func @transform_5(%arg0: i32) -> (i32, i32) {
    %c0_i32 = arith.constant 0 : i32
    %c0_i32_0 = arith.constant 0 : i32
    %c0_i32_1 = arith.constant 0 : i32
    return %c0_i32, %c0_i32_0 : i32, i32
  }
  func.func @transform_6(%arg0: i32) -> (i32, i32) {
    %c0_i32 = arith.constant 0 : i32
    %c0_i32_0 = arith.constant 0 : i32
    %c0_i32_1 = arith.constant 0 : i32
    return %c0_i32, %c0_i32_0 : i32, i32
  }
  func.func @transform_7(%arg0: i32) -> (i32, i32) {
    %c0_i32 = arith.constant 0 : i32
    %c0_i32_0 = arith.constant 0 : i32
    %c0_i32_1 = arith.constant 0 : i32
    return %c0_i32, %c0_i32_0 : i32, i32
  }
  func.func @transform_8(%arg0: i32) -> (i32, i32) {
    %c0_i32 = arith.constant 0 : i32
    %c0_i32_0 = arith.constant 0 : i32
    %c0_i32_1 = arith.constant 0 : i32
    return %c0_i32, %c0_i32_0 : i32, i32
  }
  func.func @transform_9(%arg0: i32) -> (i32, i32) {
    %c0_i32 = arith.constant 0 : i32
    %c0_i32_0 = arith.constant 0 : i32
    %c0_i32_1 = arith.constant 0 : i32
    return %c0_i32, %c0_i32_0 : i32, i32
  }
  func.func @transform_10(%arg0: i32) -> (i32, i32) {
    %c0_i32 = arith.constant 0 : i32
    %c0_i32_0 = arith.constant 0 : i32
    %c0_i32_1 = arith.constant 0 : i32
    return %c0_i32, %c0_i32_0 : i32, i32
  }
  func.func @transform_11(%arg0: i32) -> (i32, i32) {
    %c0_i32 = arith.constant 0 : i32
    %c0_i32_0 = arith.constant 0 : i32
    %c0_i32_1 = arith.constant 0 : i32
    return %c0_i32, %c0_i32_0 : i32, i32
  }
  func.func @transform_12(%arg0: i32) -> (i32, i32, i32, i32) {
    %c0_i32 = arith.constant 0 : i32
    %c0_i32_0 = arith.constant 0 : i32
    %c0_i32_1 = arith.constant 0 : i32
    %c0_i32_2 = arith.constant 0 : i32
    return %arg0, %c0_i32, %c0_i32_0, %c0_i32_1 : i32, i32, i32, i32
  }
}

module attributes {stable_mosaic.version = 11 : i64} {
  func.func @_bottleneck_kernel(%arg0: i32, %arg1: memref<1x16x16x4xbf16, #tpu.memory_space<vmem>>, %arg2: memref<4x4xbf16, #tpu.memory_space<vmem>>, %arg3: memref<1x4xf32, #tpu.memory_space<vmem>>, %arg4: memref<1x4xf32, #tpu.memory_space<vmem>>, %arg5: memref<9x4x4xbf16, #tpu.memory_space<vmem>>, %arg6: memref<1x4xf32, #tpu.memory_space<vmem>>, %arg7: memref<1x4xf32, #tpu.memory_space<vmem>>, %arg8: memref<1x16x16x4xbf16, #tpu.memory_space<vmem>>, %arg9: memref<18x32x4xf32, #tpu.memory_space<vmem>>) attributes {dimension_semantics = [#tpu.dimension_semantics<parallel>], iteration_bounds = array<i64: 2>, scalar_prefetch = 0 : i64, scratch_operands = 1 : i64, tpu.core_type = #tpu.core_type<tc>, window_params = [{transform_indices = @transform_0, window_bounds = array<i64: 1, 16, 16, 4>}, {pipeline_mode = #tpu.pipeline_mode<synchronous>, transform_indices = @transform_1, window_bounds = array<i64: 4, 4>}, {pipeline_mode = #tpu.pipeline_mode<synchronous>, transform_indices = @transform_2, window_bounds = array<i64: 1, 4>}, {pipeline_mode = #tpu.pipeline_mode<synchronous>, transform_indices = @transform_3, window_bounds = array<i64: 1, 4>}, {pipeline_mode = #tpu.pipeline_mode<synchronous>, transform_indices = @transform_4, window_bounds = array<i64: 9, 4, 4>}, {pipeline_mode = #tpu.pipeline_mode<synchronous>, transform_indices = @transform_5, window_bounds = array<i64: 1, 4>}, {pipeline_mode = #tpu.pipeline_mode<synchronous>, transform_indices = @transform_6, window_bounds = array<i64: 1, 4>}, {transform_indices = @transform_7, window_bounds = array<i64: 1, 16, 16, 4>}]} {
    %c0 = arith.constant 0 : index
    %c0_0 = arith.constant 0 : index
    %c0_1 = arith.constant 0 : index
    %c0_2 = arith.constant 0 : index
    %0 = vector.load %arg1[%c0, %c0_0, %c0_1, %c0_2] : memref<1x16x16x4xbf16, #tpu.memory_space<vmem>>, vector<1x16x16x4xbf16>
    %1 = vector.shape_cast %0 : vector<1x16x16x4xbf16> to vector<256x4xbf16>
    %c0_3 = arith.constant 0 : index
    %c0_4 = arith.constant 0 : index
    %2 = vector.load %arg2[%c0_3, %c0_4] : memref<4x4xbf16, #tpu.memory_space<vmem>>, vector<4x4xbf16>
    %cst = arith.constant dense<0.000000e+00> : vector<256x4xf32>
    %3 = tpu.matmul %1, %2, %cst {dimension_numbers = #tpu.dot_dimension_numbers<[1], [0], [0], [1], [0, 0, 1, 1], [], []>} : vector<256x4xbf16>, vector<4x4xbf16>, vector<256x4xf32> -> vector<256x4xf32>
    %c0_5 = arith.constant 0 : index
    %c0_6 = arith.constant 0 : index
    %4 = vector.load %arg3[%c0_5, %c0_6] : memref<1x4xf32, #tpu.memory_space<vmem>>, vector<1x4xf32>
    %5 = vector.broadcast %4 : vector<1x4xf32> to vector<256x4xf32>
    %6 = arith.mulf %3, %5 : vector<256x4xf32>
    %c0_7 = arith.constant 0 : index
    %c0_8 = arith.constant 0 : index
    %7 = vector.load %arg4[%c0_7, %c0_8] : memref<1x4xf32, #tpu.memory_space<vmem>>, vector<1x4xf32>
    %8 = vector.broadcast %7 : vector<1x4xf32> to vector<256x4xf32>
    %9 = arith.addf %6, %8 : vector<256x4xf32>
    %10 = arith.negf %9 : vector<256x4xf32>
    %11 = math.exp %10 : vector<256x4xf32>
    %cst_9 = arith.constant 1.000000e+00 : f32
    %12 = vector.broadcast %cst_9 : f32 to vector<256x4xf32>
    %13 = arith.addf %12, %11 : vector<256x4xf32>
    %14 = arith.divf %12, %13 : vector<256x4xf32>
    %15 = arith.mulf %9, %14 : vector<256x4xf32>
    %cst_10 = arith.constant 0.000000e+00 : f32
    %16 = vector.broadcast %cst_10 : f32 to vector<18x32x4xf32>
    %c0_11 = arith.constant 0 : index
    %c0_12 = arith.constant 0 : index
    %c0_13 = arith.constant 0 : index
    %17 = vector.load %arg9[%c0_11, %c0_12, %c0_13] : memref<18x32x4xf32, #tpu.memory_space<vmem>>, vector<18x32x4xf32>
    tpu.vector_store %arg9[%c0_11, %c0_12, %c0_13], %16 {strides = array<i32>} : memref<18x32x4xf32, #tpu.memory_space<vmem>>, vector<18x32x4xf32>,
    %18 = vector.shape_cast %15 : vector<256x4xf32> to vector<16x16x4xf32>
    %c1 = arith.constant 1 : index
    %c8 = arith.constant 8 : index
    %c0_14 = arith.constant 0 : index
    %19 = vector.load %arg9[%c1, %c8, %c0_14] : memref<18x32x4xf32, #tpu.memory_space<vmem>>, vector<16x16x4xf32>
    tpu.vector_store %arg9[%c1, %c8, %c0_14], %18 {strides = array<i32>} : memref<18x32x4xf32, #tpu.memory_space<vmem>>, vector<16x16x4xf32>,
    %cst_15 = arith.constant 0.000000e+00 : f32
    %20 = vector.broadcast %cst_15 : f32 to vector<256x4xf32>
    %c0_16 = arith.constant 0 : index
    %c7 = arith.constant 7 : index
    %c0_17 = arith.constant 0 : index
    %21 = vector.load %arg9[%c0_16, %c7, %c0_17] : memref<18x32x4xf32, #tpu.memory_space<vmem>>, vector<16x16x4xf32>
    %22 = vector.shape_cast %21 : vector<16x16x4xf32> to vector<256x4xf32>
    %23 = arith.truncf %22 : vector<256x4xf32> to vector<256x4xbf16>
    %c0_18 = arith.constant 0 : index
    %c0_19 = arith.constant 0 : index
    %c0_20 = arith.constant 0 : index
    %24 = vector.load %arg5[%c0_18, %c0_19, %c0_20] : memref<9x4x4xbf16, #tpu.memory_space<vmem>>, vector<1x4x4xbf16>
    %25 = vector.shape_cast %24 : vector<1x4x4xbf16> to vector<4x4xbf16>
    %cst_21 = arith.constant dense<0.000000e+00> : vector<256x4xf32>
    %26 = tpu.matmul %23, %25, %cst_21 {dimension_numbers = #tpu.dot_dimension_numbers<[1], [0], [0], [1], [0, 0, 1, 1], [], []>} : vector<256x4xbf16>, vector<4x4xbf16>, vector<256x4xf32> -> vector<256x4xf32>
    %27 = arith.addf %20, %26 : vector<256x4xf32>
    %c0_22 = arith.constant 0 : index
    %c8_23 = arith.constant 8 : index
    %c0_24 = arith.constant 0 : index
    %28 = vector.load %arg9[%c0_22, %c8_23, %c0_24] : memref<18x32x4xf32, #tpu.memory_space<vmem>>, vector<16x16x4xf32>
    %29 = vector.shape_cast %28 : vector<16x16x4xf32> to vector<256x4xf32>
    %30 = arith.truncf %29 : vector<256x4xf32> to vector<256x4xbf16>
    %c1_25 = arith.constant 1 : index
    %c0_26 = arith.constant 0 : index
    %c0_27 = arith.constant 0 : index
    %31 = vector.load %arg5[%c1_25, %c0_26, %c0_27] : memref<9x4x4xbf16, #tpu.memory_space<vmem>>, vector<1x4x4xbf16>
    %32 = vector.shape_cast %31 : vector<1x4x4xbf16> to vector<4x4xbf16>
    %cst_28 = arith.constant dense<0.000000e+00> : vector<256x4xf32>
    %33 = tpu.matmul %30, %32, %cst_28 {dimension_numbers = #tpu.dot_dimension_numbers<[1], [0], [0], [1], [0, 0, 1, 1], [], []>} : vector<256x4xbf16>, vector<4x4xbf16>, vector<256x4xf32> -> vector<256x4xf32>
    %34 = arith.addf %27, %33 : vector<256x4xf32>
    %c0_29 = arith.constant 0 : index
    %c9 = arith.constant 9 : index
    %c0_30 = arith.constant 0 : index
    %35 = vector.load %arg9[%c0_29, %c9, %c0_30] : memref<18x32x4xf32, #tpu.memory_space<vmem>>, vector<16x16x4xf32>
    %36 = vector.shape_cast %35 : vector<16x16x4xf32> to vector<256x4xf32>
    %37 = arith.truncf %36 : vector<256x4xf32> to vector<256x4xbf16>
    %c2 = arith.constant 2 : index
    %c0_31 = arith.constant 0 : index
    %c0_32 = arith.constant 0 : index
    %38 = vector.load %arg5[%c2, %c0_31, %c0_32] : memref<9x4x4xbf16, #tpu.memory_space<vmem>>, vector<1x4x4xbf16>
    %39 = vector.shape_cast %38 : vector<1x4x4xbf16> to vector<4x4xbf16>
    %cst_33 = arith.constant dense<0.000000e+00> : vector<256x4xf32>
    %40 = tpu.matmul %37, %39, %cst_33 {dimension_numbers = #tpu.dot_dimension_numbers<[1], [0], [0], [1], [0, 0, 1, 1], [], []>} : vector<256x4xbf16>, vector<4x4xbf16>, vector<256x4xf32> -> vector<256x4xf32>
    %41 = arith.addf %34, %40 : vector<256x4xf32>
    %c1_34 = arith.constant 1 : index
    %c7_35 = arith.constant 7 : index
    %c0_36 = arith.constant 0 : index
    %42 = vector.load %arg9[%c1_34, %c7_35, %c0_36] : memref<18x32x4xf32, #tpu.memory_space<vmem>>, vector<16x16x4xf32>
    %43 = vector.shape_cast %42 : vector<16x16x4xf32> to vector<256x4xf32>
    %44 = arith.truncf %43 : vector<256x4xf32> to vector<256x4xbf16>
    %c3 = arith.constant 3 : index
    %c0_37 = arith.constant 0 : index
    %c0_38 = arith.constant 0 : index
    %45 = vector.load %arg5[%c3, %c0_37, %c0_38] : memref<9x4x4xbf16, #tpu.memory_space<vmem>>, vector<1x4x4xbf16>
    %46 = vector.shape_cast %45 : vector<1x4x4xbf16> to vector<4x4xbf16>
    %cst_39 = arith.constant dense<0.000000e+00> : vector<256x4xf32>
    %47 = tpu.matmul %44, %46, %cst_39 {dimension_numbers = #tpu.dot_dimension_numbers<[1], [0], [0], [1], [0, 0, 1, 1], [], []>} : vector<256x4xbf16>, vector<4x4xbf16>, vector<256x4xf32> -> vector<256x4xf32>
    %48 = arith.addf %41, %47 : vector<256x4xf32>
    %c1_40 = arith.constant 1 : index
    %c8_41 = arith.constant 8 : index
    %c0_42 = arith.constant 0 : index
    %49 = vector.load %arg9[%c1_40, %c8_41, %c0_42] : memref<18x32x4xf32, #tpu.memory_space<vmem>>, vector<16x16x4xf32>
    %50 = vector.shape_cast %49 : vector<16x16x4xf32> to vector<256x4xf32>
    %51 = arith.truncf %50 : vector<256x4xf32> to vector<256x4xbf16>
    %c4 = arith.constant 4 : index
    %c0_43 = arith.constant 0 : index
    %c0_44 = arith.constant 0 : index
    %52 = vector.load %arg5[%c4, %c0_43, %c0_44] : memref<9x4x4xbf16, #tpu.memory_space<vmem>>, vector<1x4x4xbf16>
    %53 = vector.shape_cast %52 : vector<1x4x4xbf16> to vector<4x4xbf16>
    %cst_45 = arith.constant dense<0.000000e+00> : vector<256x4xf32>
    %54 = tpu.matmul %51, %53, %cst_45 {dimension_numbers = #tpu.dot_dimension_numbers<[1], [0], [0], [1], [0, 0, 1, 1], [], []>} : vector<256x4xbf16>, vector<4x4xbf16>, vector<256x4xf32> -> vector<256x4xf32>
    %55 = arith.addf %48, %54 : vector<256x4xf32>
    %c1_46 = arith.constant 1 : index
    %c9_47 = arith.constant 9 : index
    %c0_48 = arith.constant 0 : index
    %56 = vector.load %arg9[%c1_46, %c9_47, %c0_48] : memref<18x32x4xf32, #tpu.memory_space<vmem>>, vector<16x16x4xf32>
    %57 = vector.shape_cast %56 : vector<16x16x4xf32> to vector<256x4xf32>
    %58 = arith.truncf %57 : vector<256x4xf32> to vector<256x4xbf16>
    %c5 = arith.constant 5 : index
    %c0_49 = arith.constant 0 : index
    %c0_50 = arith.constant 0 : index
    %59 = vector.load %arg5[%c5, %c0_49, %c0_50] : memref<9x4x4xbf16, #tpu.memory_space<vmem>>, vector<1x4x4xbf16>
    %60 = vector.shape_cast %59 : vector<1x4x4xbf16> to vector<4x4xbf16>
    %cst_51 = arith.constant dense<0.000000e+00> : vector<256x4xf32>
    %61 = tpu.matmul %58, %60, %cst_51 {dimension_numbers = #tpu.dot_dimension_numbers<[1], [0], [0], [1], [0, 0, 1, 1], [], []>} : vector<256x4xbf16>, vector<4x4xbf16>, vector<256x4xf32> -> vector<256x4xf32>
    %62 = arith.addf %55, %61 : vector<256x4xf32>
    %c2_52 = arith.constant 2 : index
    %c7_53 = arith.constant 7 : index
    %c0_54 = arith.constant 0 : index
    %63 = vector.load %arg9[%c2_52, %c7_53, %c0_54] : memref<18x32x4xf32, #tpu.memory_space<vmem>>, vector<16x16x4xf32>
    %64 = vector.shape_cast %63 : vector<16x16x4xf32> to vector<256x4xf32>
    %65 = arith.truncf %64 : vector<256x4xf32> to vector<256x4xbf16>
    %c6 = arith.constant 6 : index
    %c0_55 = arith.constant 0 : index
    %c0_56 = arith.constant 0 : index
    %66 = vector.load %arg5[%c6, %c0_55, %c0_56] : memref<9x4x4xbf16, #tpu.memory_space<vmem>>, vector<1x4x4xbf16>
    %67 = vector.shape_cast %66 : vector<1x4x4xbf16> to vector<4x4xbf16>
    %cst_57 = arith.constant dense<0.000000e+00> : vector<256x4xf32>
    %68 = tpu.matmul %65, %67, %cst_57 {dimension_numbers = #tpu.dot_dimension_numbers<[1], [0], [0], [1], [0, 0, 1, 1], [], []>} : vector<256x4xbf16>, vector<4x4xbf16>, vector<256x4xf32> -> vector<256x4xf32>
    %69 = arith.addf %62, %68 : vector<256x4xf32>
    %c2_58 = arith.constant 2 : index
    %c8_59 = arith.constant 8 : index
    %c0_60 = arith.constant 0 : index
    %70 = vector.load %arg9[%c2_58, %c8_59, %c0_60] : memref<18x32x4xf32, #tpu.memory_space<vmem>>, vector<16x16x4xf32>
    %71 = vector.shape_cast %70 : vector<16x16x4xf32> to vector<256x4xf32>
    %72 = arith.truncf %71 : vector<256x4xf32> to vector<256x4xbf16>
    %c7_61 = arith.constant 7 : index
    %c0_62 = arith.constant 0 : index
    %c0_63 = arith.constant 0 : index
    %73 = vector.load %arg5[%c7_61, %c0_62, %c0_63] : memref<9x4x4xbf16, #tpu.memory_space<vmem>>, vector<1x4x4xbf16>
    %74 = vector.shape_cast %73 : vector<1x4x4xbf16> to vector<4x4xbf16>
    %cst_64 = arith.constant dense<0.000000e+00> : vector<256x4xf32>
    %75 = tpu.matmul %72, %74, %cst_64 {dimension_numbers = #tpu.dot_dimension_numbers<[1], [0], [0], [1], [0, 0, 1, 1], [], []>} : vector<256x4xbf16>, vector<4x4xbf16>, vector<256x4xf32> -> vector<256x4xf32>
    %76 = arith.addf %69, %75 : vector<256x4xf32>
    %c2_65 = arith.constant 2 : index
    %c9_66 = arith.constant 9 : index
    %c0_67 = arith.constant 0 : index
    %77 = vector.load %arg9[%c2_65, %c9_66, %c0_67] : memref<18x32x4xf32, #tpu.memory_space<vmem>>, vector<16x16x4xf32>
    %78 = vector.shape_cast %77 : vector<16x16x4xf32> to vector<256x4xf32>
    %79 = arith.truncf %78 : vector<256x4xf32> to vector<256x4xbf16>
    %c8_68 = arith.constant 8 : index
    %c0_69 = arith.constant 0 : index
    %c0_70 = arith.constant 0 : index
    %80 = vector.load %arg5[%c8_68, %c0_69, %c0_70] : memref<9x4x4xbf16, #tpu.memory_space<vmem>>, vector<1x4x4xbf16>
    %81 = vector.shape_cast %80 : vector<1x4x4xbf16> to vector<4x4xbf16>
    %cst_71 = arith.constant dense<0.000000e+00> : vector<256x4xf32>
    %82 = tpu.matmul %79, %81, %cst_71 {dimension_numbers = #tpu.dot_dimension_numbers<[1], [0], [0], [1], [0, 0, 1, 1], [], []>} : vector<256x4xbf16>, vector<4x4xbf16>, vector<256x4xf32> -> vector<256x4xf32>
    %83 = arith.addf %76, %82 : vector<256x4xf32>
    %c0_72 = arith.constant 0 : index
    %c0_73 = arith.constant 0 : index
    %84 = vector.load %arg6[%c0_72, %c0_73] : memref<1x4xf32, #tpu.memory_space<vmem>>, vector<1x4xf32>
    %85 = vector.broadcast %84 : vector<1x4xf32> to vector<256x4xf32>
    %86 = arith.mulf %83, %85 : vector<256x4xf32>
    %c0_74 = arith.constant 0 : index
    %c0_75 = arith.constant 0 : index
    %87 = vector.load %arg7[%c0_74, %c0_75] : memref<1x4xf32, #tpu.memory_space<vmem>>, vector<1x4xf32>
    %88 = vector.broadcast %87 : vector<1x4xf32> to vector<256x4xf32>
    %89 = arith.addf %86, %88 : vector<256x4xf32>
    %90 = arith.negf %89 : vector<256x4xf32>
    %91 = math.exp %90 : vector<256x4xf32>
    %cst_76 = arith.constant 1.000000e+00 : f32
    %92 = vector.broadcast %cst_76 : f32 to vector<256x4xf32>
    %93 = arith.addf %92, %91 : vector<256x4xf32>
    %94 = arith.divf %92, %93 : vector<256x4xf32>
    %95 = arith.mulf %89, %94 : vector<256x4xf32>
    %96 = arith.extf %1 : vector<256x4xbf16> to vector<256x4xf32>
    %97 = arith.addf %95, %96 : vector<256x4xf32>
    %98 = vector.shape_cast %97 : vector<256x4xf32> to vector<1x16x16x4xf32>
    %99 = arith.truncf %98 : vector<1x16x16x4xf32> to vector<1x16x16x4xbf16>
    %c0_77 = arith.constant 0 : index
    %c0_78 = arith.constant 0 : index
    %c0_79 = arith.constant 0 : index
    %c0_80 = arith.constant 0 : index
    %100 = vector.load %arg8[%c0_77, %c0_78, %c0_79, %c0_80] : memref<1x16x16x4xbf16, #tpu.memory_space<vmem>>, vector<1x16x16x4xbf16>
    tpu.vector_store %arg8[%c0_77, %c0_78, %c0_79, %c0_80], %99 {strides = array<i32>} : memref<1x16x16x4xbf16, #tpu.memory_space<vmem>>, vector<1x16x16x4xbf16>,
    return
  }
  func.func @transform_0(%arg0: i32) -> (i32, i32, i32, i32) {
    %c0_i32 = arith.constant 0 : i32
    %c0_i32_0 = arith.constant 0 : i32
    %c0_i32_1 = arith.constant 0 : i32
    %c0_i32_2 = arith.constant 0 : i32
    return %arg0, %c0_i32, %c0_i32_0, %c0_i32_1 : i32, i32, i32, i32
  }
  func.func @transform_1(%arg0: i32) -> (i32, i32) {
    %c0_i32 = arith.constant 0 : i32
    %c0_i32_0 = arith.constant 0 : i32
    %c0_i32_1 = arith.constant 0 : i32
    return %c0_i32, %c0_i32_0 : i32, i32
  }
  func.func @transform_2(%arg0: i32) -> (i32, i32) {
    %c0_i32 = arith.constant 0 : i32
    %c0_i32_0 = arith.constant 0 : i32
    %c0_i32_1 = arith.constant 0 : i32
    return %c0_i32, %c0_i32_0 : i32, i32
  }
  func.func @transform_3(%arg0: i32) -> (i32, i32) {
    %c0_i32 = arith.constant 0 : i32
    %c0_i32_0 = arith.constant 0 : i32
    %c0_i32_1 = arith.constant 0 : i32
    return %c0_i32, %c0_i32_0 : i32, i32
  }
  func.func @transform_4(%arg0: i32) -> (i32, i32, i32) {
    %c0_i32 = arith.constant 0 : i32
    %c0_i32_0 = arith.constant 0 : i32
    %c0_i32_1 = arith.constant 0 : i32
    %c0_i32_2 = arith.constant 0 : i32
    return %c0_i32, %c0_i32_0, %c0_i32_1 : i32, i32, i32
  }
  func.func @transform_5(%arg0: i32) -> (i32, i32) {
    %c0_i32 = arith.constant 0 : i32
    %c0_i32_0 = arith.constant 0 : i32
    %c0_i32_1 = arith.constant 0 : i32
    return %c0_i32, %c0_i32_0 : i32, i32
  }
  func.func @transform_6(%arg0: i32) -> (i32, i32) {
    %c0_i32 = arith.constant 0 : i32
    %c0_i32_0 = arith.constant 0 : i32
    %c0_i32_1 = arith.constant 0 : i32
    return %c0_i32, %c0_i32_0 : i32, i32
  }
  func.func @transform_7(%arg0: i32) -> (i32, i32, i32, i32) {
    %c0_i32 = arith.constant 0 : i32
    %c0_i32_0 = arith.constant 0 : i32
    %c0_i32_1 = arith.constant 0 : i32
    %c0_i32_2 = arith.constant 0 : i32
    return %arg0, %c0_i32, %c0_i32_0, %c0_i32_1 : i32, i32, i32, i32
  }
}

</mosaic_0001>

<bundles_post_ra>
// kernel: c3_forward.5
= control target key start
LH: loop header
LB: loop body
LE: loop exit
PB: predicated region body
PF: predicated region fallthrough
CT: control target
= control target key end

     0   :  { %s2460_s21 = smov 0   ;;  %s3384_s0 = inlined_call_operand.vmem [shape: bf16[2,16,16,4], index: 0, kind: input, shape index: {}]   ;;  %s3385_s1 = inlined_call_operand.vmem [shape: bf16[2,16,16,4], index: 1, kind: input, shape index: {}]   ;;  %s3386_s2 = inlined_call_operand.vmem [shape: bf16[4,4], index: 2, kind: input, shape index: {}]   ;;  %s3387_s3 = inlined_call_operand.vmem [shape: bf16[4,4], index: 3, kind: input, shape index: {}]   ;;  %s3388_s4 = inlined_call_operand.vmem [shape: bf16[4,4], index: 4, kind: input, shape index: {}]   ;;  %s3389_s5 = inlined_call_operand.vmem [shape: bf16[4,4], index: 5, kind: input, shape index: {}]   ;;  %s3390_s6 = inlined_call_operand.vmem [shape: f32[1,4], index: 6, kind: input, shape index: {}]   ;;  %s3391_s7 = inlined_call_operand.vmem [shape: f32[1,4], index: 7, kind: input, shape index: {}]   ;;  %s3392_s8 = inlined_call_operand.vmem [shape: bf16[4,8], index: 8, kind: input, shape index: {}]   ;;  %s3393_s9 = inlined_call_operand.vmem [shape: bf16[4,8], index: 9, kind: input, shape index: {}]   ;;  %s3394_s10 = inlined_call_operand.vmem [shape: f32[1,8], index: 10, kind: input, shape index: {}]   ;;  %s3395_s11 = inlined_call_operand.vmem [shape: f32[1,8], index: 11, kind: input, shape index: {}]   ;;  %s3396_s12 = inlined_call_operand.vmem [shape: f32[2,16,16,8], index: 12, kind: output, shape index: {}]  }
   0x1 LB: > { %s1835_s22 = sadd.s32 4294967295, %s2391_s21   ;;  %p1839_p0 = scmp.ge.s32.totalorder %s2391_s21, 1  ;;  %s2391_s21 = sphi %s2460_s21, %s22_s21  }
   0x2   : > { %p372_p1 = scmp.lt.s32.totalorder %s2391_s21, 3 }
   0x4   : > { %p373_p2 = pnand %p1839_p0, %p372_p1 }
   0x5   : > { %v708_v0 = vld [vmem:[%s3387_s3] sm:$0x3] (!%p373_p2)  ;;  %vm712_vm0 = vcmask (!%p373_p2), 1041408   ;;  %v2393_v2 = vmov (!%p373_p2), 0.0   ;;  %p419_p3 = scmp.lt.s32.totalorder (!%p373_p2), %s1835_s22, 1  ;;  %vm2394_vm1 = vmmov (!%p373_p2), 0  }
   0x6   : > { %376 = sbr.rel (%p373_p2) target bundleno = 665 (0x299), region = 68  ;;  %v707_v1 = vld [vmem:[%s3386_s2] sm:$0x3] (!%p373_p2)  ;;  %2121 = vmatprep.subr.bf16.mxu0 (!%p373_p2), %v2393_v2  ;;  %2127 = vmatprep.subr.bf16.mxu1 (!%p373_p2), %v2393_v2  ;;  %v714_v3 = vsel (!%p373_p2), %vm712_vm0, %v708_v0, 0  ;;  %vm563_vm2 = vcmask (!%p373_p2), 31744   ;;  %vm1735_vm3 = vcmask (!%p373_p2), 64512  }
   0x7   : > { %v760_v4 = vsel (!%p373_p2), %vm712_vm0, %v707_v1, 0  ;;  %2122 = vmatpush3.bf16.msra.mxu0 (!%p373_p2), %v714_v3  ;;  %2123 = vmatprep.mubr.msk.bf16.mxu0 (!%p373_p2), %vm2394_vm1, %v2393_v2 }
   0x8   : > { %2128 = vmatpush3.bf16.msra.mxu1 (!%p373_p2), %v760_v4  ;;  %2129 = vmatprep.mubr.msk.bf16.mxu1 (!%p373_p2), %vm2394_vm1, %v2393_v2 }
   0x9   : > { %2133 = vmatprep.subr.bf16.mxu0 (!%p373_p2), %v2393_v2  ;;  %2139 = vmatprep.subr.bf16.mxu1 (!%p373_p2), %v2393_v2 }
   0xd   : > { %s3504_s22 = smov (!%p419_p3, %s1835_s22), 1 }
   0xe   : > { %s1918_s27 = sshll.u32 %s3504_s22, 7  ;;  %s1920_s16 = sshll.u32 %s3504_s22, 8 }
   0xf   : > { %s2490_s30 = scalar_lea.vmem %s3385_s1, %s1918_s27  ;;  %s2540_s15 = scalar_lea.vmem %s3384_s0, %s1918_s27 }
  0x10   : > { %v2493_v5 = vld [vmem:[%s2490_s30] sm:$0xff]   ;;  %v2496_v6 = vld [vmem:[%s2490_s30 + $0x8] sm:$0xff]   ;;  %v2502_v10 = vld [vmem:[%s2490_s30 + $0x10] sm:$0xff]   ;;  %s3197_s18 = scalar_lea.vmem %s3396_s12, %s1920_s16 }
  0x11   : > { %v1987_v7 = vunpack.c.l.bf16 %v2493_v5  ;;  %v3449_v8 = vunpack.c.h.bf16 %v2493_v5  ;;  %v3448_v9 = vunpack.c.l.bf16 %v2496_v6  ;;  %v3442_v11 = vunpack.c.h.bf16 %v2496_v6  ;;  %v2516_v16 = vld [vmem:[%s2490_s30 + $0x18] sm:$0xff]   ;;  %v2527_v23 = vld [vmem:[%s2490_s30 + $0x20] sm:$0xff]   ;;  %v2543_v30 = vld [vmem:[%s2490_s30 + $0x28] sm:$0xff]  }
  0x12   : > { %v3439_v12 = vunpack.c.l.bf16 %v2502_v10  ;;  %v3429_v18 = vunpack.c.h.bf16 %v2502_v10  ;;  %v3426_v21 = vunpack.c.l.bf16 %v2516_v16  ;;  %v3423_v25 = vunpack.c.h.bf16 %v2516_v16  ;;  %v2550_v35 = vld [vmem:[%s2540_s15] sm:$0xff]   ;;  %v2553_v36 = vld [vmem:[%s2540_s15 + $0x8] sm:$0xff]   ;;  %v2561_v40 = vld [vmem:[%s2490_s30 + $0x30] sm:$0xff]  }
  0x13   : > { %v636_v13 = vsel %vm563_vm2, %v1987_v7, 0.0  ;;  %v637_v14 = vsel %vm563_vm2, %v3449_v8, 0.0  ;;  %v639_v15 = vsel %vm563_vm2, %v3448_v9, 0.0  ;;  %v641_v19 = vsel %vm563_vm2, %v3442_v11, 0.0  ;;  %v2570_v47 = vld [vmem:[%s2540_s15 + $0x10] sm:$0xff]   ;;  %v2579_v52 = vld [vmem:[%s2490_s30 + $0x38] sm:$0xff]  }
  0x14   : > { %v638_v17 = vadd.f32 %v637_v14, %v636_v13  ;;  %v643_v22 = vsel %vm563_vm2, %v3439_v12, 0.0  ;;  %v645_v26 = vsel %vm563_vm2, %v3429_v18, 0.0  ;;  %v3416_v28 = vunpack.c.l.bf16 %v2527_v23  ;;  %v2595_v60 = vld [vmem:[%s2540_s15 + $0x18] sm:$0xff]   ;;  %v2606_v3 = vld [vmem:[%s2490_s30 + $0x40] sm:$0xff]  }
  0x15   : > { %v647_v29 = vsel %vm563_vm2, %v3426_v21, 0.0  ;;  %v3411_v32 = vunpack.c.h.bf16 %v2527_v23  ;;  %v649_v33 = vsel %vm563_vm2, %v3423_v25, 0.0  ;;  %v3408_v37 = vunpack.c.l.bf16 %v2543_v30  ;;  %v2771_v25 = vld [vmem:[%s2540_s15 + $0x58] sm:$0xff]  }
  0x16   : > { %v640_v20 = vadd.f32 %v639_v15, %v638_v17  ;;  %v651_v38 = vsel %vm563_vm2, %v3416_v28, 0.0  ;;  %v3406_v39 = vunpack.c.h.bf16 %v2543_v30  ;;  %v1923_v43 = vunpack.c.l.bf16 %v2550_v35 }
  0x17   : > { %v653_v42 = vsel %vm563_vm2, %v3411_v32, 0.0  ;;  %v1924_v44 = vunpack.c.h.bf16 %v2550_v35  ;;  %v1927_v45 = vunpack.c.l.bf16 %v2553_v36  ;;  %v3405_v48 = vunpack.c.l.bf16 %v2561_v40  ;;  %v2727_v32 = vld [vmem:[%s2540_s15 + $0x48] sm:$0xff]  }
  0x18   : > { %v642_v24 = vadd.f32 %v641_v19, %v640_v20  ;;  %v655_v49 = vsel %vm563_vm2, %v3408_v37, 0.0  ;;  %v1928_v50 = vunpack.c.h.bf16 %v2553_v36  ;;  %v3404_v51 = vunpack.c.h.bf16 %v2561_v40 }
  0x19   : > { %v657_v54 = vsel %vm563_vm2, %v3406_v39, 0.0  ;;  %v1931_v55 = vunpack.c.l.bf16 %v2570_v47  ;;  %v564_v56 = vsel %vm563_vm2, %v1923_v43, 0.0  ;;  %v565_v57 = vsel %vm563_vm2, %v1924_v44, 0.0 }
  0x1a   : > { %v644_v27 = vadd.f32 %v643_v22, %v642_v24  ;;  %v567_v58 = vsel %vm563_vm2, %v1927_v45, 0.0  ;;  %v566_v61 = vadd.f32 %v565_v57, %v564_v56  ;;  %v3402_v62 = vunpack.c.l.bf16 %v2579_v52  ;;  %v2617_v22 = vld [vmem:[%s2540_s15 + $0x20] sm:$0xff]  }
  0x1b   : > { %v659_v63 = vsel %vm563_vm2, %v3405_v48, 0.0  ;;  %v1932_v0 = vunpack.c.h.bf16 %v2570_v47  ;;  %v569_v1 = vsel %vm563_vm2, %v1928_v50, 0.0  ;;  %v3400_v14 = vunpack.c.h.bf16 %v2579_v52  ;;  %v2705_v48 = vld [vmem:[%s2540_s15 + $0x40] sm:$0xff]  }
  0x1c   : > { %v646_v31 = vadd.f32 %v645_v26, %v644_v27  ;;  %v568_v13 = vadd.f32 %v567_v58, %v566_v61  ;;  %v661_v15 = vsel %vm563_vm2, %v3404_v51, 0.0  ;;  %v1935_v17 = vunpack.c.l.bf16 %v2595_v60 }
  0x1d   : > { %v571_v19 = vsel %vm563_vm2, %v1931_v55, 0.0  ;;  %v3399_v26 = vunpack.c.l.bf16 %v2606_v3  ;;  %v663_v27 = vsel %vm563_vm2, %v3402_v62, 0.0 }
  0x1e   : > { %v648_v34 = vadd.f32 %v647_v29, %v646_v31  ;;  %v570_v24 = vadd.f32 %v569_v1, %v568_v13  ;;  %v1936_v29 = vunpack.c.h.bf16 %v2595_v60  ;;  %v573_v31 = vsel %vm563_vm2, %v1932_v0, 0.0 }
  0x1f   : > { %v667_v58 = vsel %vm563_vm2, %v3399_v26, 0.0  ;;  %v2683_v26 = vld [vmem:[%s2540_s15 + $0x38] sm:$0xff]   ;;  %v3451_v60 = vunpack.c.l.bf16 %v2496_v6 }
  0x20   : > { %v650_v41 = vadd.f32 %v649_v33, %v648_v34  ;;  %v2628_v33 = vld [vmem:[%s2490_s30 + $0x48] sm:$0xff]   ;;  %v577_v61 = vsel %vm563_vm2, %v1936_v29, 0.0 }
  0x21   : > { %v3397_v57 = vunpack.c.l.bf16 %v2628_v33  ;;  %v3401_v13 = vunpack.c.h.bf16 %v2628_v33 }
  0x22   : > { %v652_v46 = vadd.f32 %v651_v38, %v650_v41  ;;  %v572_v38 = vadd.f32 %v571_v19, %v570_v24  ;;  %v3398_v41 = vunpack.c.h.bf16 %v2606_v3 }
  0x24   : > { %v654_v53 = vadd.f32 %v653_v42, %v652_v46  ;;  %v665_v42 = vsel %vm563_vm2, %v3400_v14, 0.0  ;;  %v1939_v46 = vunpack.c.l.bf16 %v2617_v22  ;;  %v574_v56 = vadd.f32 %v573_v31, %v572_v38 }
  0x25   : > { %v671_v38 = vsel %vm563_vm2, %v3397_v57, 0.0 }
  0x26   : > { %v656_v59 = vadd.f32 %v655_v49, %v654_v53  ;;  %v575_v49 = vsel %vm563_vm2, %v1935_v17, 0.0 }
  0x28   : > { %v658_v4 = vadd.f32 %v657_v54, %v656_v59  ;;  %v2639_v54 = vld [vmem:[%s2540_s15 + $0x28] sm:$0xff]   ;;  %v1940_v59 = vunpack.c.h.bf16 %v2617_v22  ;;  %v3453_v22 = vunpack.c.l.bf16 %v2502_v10 }
  0x29   : > { %v3421_v19 = vunpack.c.l.bf16 %v2639_v54 }
  0x2a   : > { %v660_v20 = vadd.f32 %v659_v63, %v658_v4  ;;  %v2650_v63 = vld [vmem:[%s2490_s30 + $0x50] sm:$0xff]   ;;  %v576_v4 = vadd.f32 %v575_v49, %v574_v56  ;;  %v581_v49 = vsel %vm563_vm2, %v1940_v59, 0.0 }
  0x2b   : > { %v583_v57 = vsel %vm563_vm2, %v3421_v19, 0.0 }
  0x2c   : > { %v662_v34 = vadd.f32 %v661_v15, %v660_v20  ;;  %v669_v15 = vsel %vm563_vm2, %v3398_v41, 0.0  ;;  %v579_v20 = vsel %vm563_vm2, %v1939_v46, 0.0  ;;  %v578_v31 = vadd.f32 %v577_v61, %v576_v4 }
  0x2d   : > { %v673_v61 = vsel %vm563_vm2, %v3401_v13, 0.0  ;;  %v2694_v13 = vld [vmem:[%s2490_s30 + $0x60] sm:$0xff]  }
  0x2e   : > { %v664_v53 = vadd.f32 %v663_v27, %v662_v34  ;;  %v2661_v27 = vld [vmem:[%s2540_s15 + $0x30] sm:$0xff]   ;;  %v3403_v34 = vunpack.c.l.bf16 %v2650_v63 }
  0x2f   : > { %v3410_v4 = vunpack.c.l.bf16 %v2661_v27 }
  0x30   : > { %v666_v1 = vadd.f32 %v665_v42, %v664_v53  ;;  %v3417_v42 = vunpack.c.h.bf16 %v2639_v54  ;;  %v2672_v53 = vld [vmem:[%s2490_s30 + $0x58] sm:$0xff]  }
  0x32   : > { %v668_v24 = vadd.f32 %v667_v58, %v666_v1  ;;  %v580_v58 = vadd.f32 %v579_v20, %v578_v31  ;;  %v3407_v1 = vunpack.c.h.bf16 %v2650_v63  ;;  %v675_v20 = vsel %vm563_vm2, %v3403_v34, 0.0 }
  0x33   : > { %v585_v31 = vsel %vm563_vm2, %v3417_v42, 0.0  ;;  %v587_v34 = vsel %vm563_vm2, %v3410_v4, 0.0  ;;  %v2749_v42 = vld [vmem:[%s2540_s15 + $0x50] sm:$0xff]  }
  0x34   : > { %v670_v56 = vadd.f32 %v669_v15, %v668_v24  ;;  %v582_v14 = vadd.f32 %v581_v49, %v580_v58  ;;  %v3409_v15 = vunpack.c.l.bf16 %v2672_v53  ;;  %v3412_v24 = vunpack.c.h.bf16 %v2661_v27 }
  0x35   : > { %v677_v49 = vsel %vm563_vm2, %v3407_v1, 0.0  ;;  %v3414_v58 = vunpack.c.l.bf16 %v2683_v26  ;;  %v2716_v1 = vld [vmem:[%s2490_s30 + $0x68] sm:$0xff]  }
  0x36   : > { %v672_v41 = vadd.f32 %v671_v38, %v670_v56  ;;  %v584_v38 = vadd.f32 %v583_v57, %v582_v14  ;;  %v3413_v56 = vunpack.c.h.bf16 %v2672_v53  ;;  %v679_v14 = vsel %vm563_vm2, %v3409_v15, 0.0 }
  0x37   : > { %v3418_v57 = vunpack.c.h.bf16 %v2683_v26  ;;  %v591_v15 = vsel %vm563_vm2, %v3414_v58, 0.0 }
  0x38   : > { %v674_v62 = vadd.f32 %v673_v61, %v672_v41  ;;  %v586_v39 = vadd.f32 %v585_v31, %v584_v38  ;;  %v3415_v41 = vunpack.c.l.bf16 %v2694_v13  ;;  %v589_v61 = vsel %vm563_vm2, %v3412_v24, 0.0 }
  0x39   : > { %v681_v31 = vsel %vm563_vm2, %v3413_v56, 0.0  ;;  %v3420_v38 = vunpack.c.l.bf16 %v2705_v48  ;;  %v2738_v56 = vld [vmem:[%s2490_s30 + $0x70] sm:$0xff]  }
  0x3a   : > { %v676_v51 = vadd.f32 %v675_v20, %v674_v62  ;;  %v588_v62 = vadd.f32 %v587_v34, %v586_v39  ;;  %v3419_v20 = vunpack.c.h.bf16 %v2694_v13  ;;  %v683_v39 = vsel %vm563_vm2, %v3415_v41, 0.0 }
  0x3b   : > { %v3424_v34 = vunpack.c.h.bf16 %v2705_v48  ;;  %v595_v41 = vsel %vm563_vm2, %v3420_v38, 0.0 }
  0x3c   : > { %v678_v37 = vadd.f32 %v677_v49, %v676_v51  ;;  %v590_v24 = vadd.f32 %v589_v61, %v588_v62  ;;  %v3422_v51 = vunpack.c.l.bf16 %v2716_v1  ;;  %v593_v49 = vsel %vm563_vm2, %v3418_v57, 0.0 }
  0x3d   : > { %v685_v61 = vsel %vm563_vm2, %v3419_v20, 0.0  ;;  %v3427_v62 = vunpack.c.l.bf16 %v2727_v32  ;;  %v2760_v20 = vld [vmem:[%s2490_s30 + $0x78] sm:$0xff]  }
  0x3e   : > { %v680_v4 = vadd.f32 %v679_v14, %v678_v37  ;;  %v592_v37 = vadd.f32 %v591_v15, %v590_v24  ;;  %v3425_v14 = vunpack.c.h.bf16 %v2716_v1  ;;  %v687_v15 = vsel %vm563_vm2, %v3422_v51, 0.0 }
  0x3f   : > { %v3433_v24 = vunpack.c.h.bf16 %v2727_v32 }
  0x40   : > { %v682_v58 = vadd.f32 %v681_v31, %v680_v4  ;;  %v594_v57 = vadd.f32 %v593_v49, %v592_v37  ;;  %v3428_v4 = vunpack.c.l.bf16 %v2738_v56  ;;  %v597_v31 = vsel %vm563_vm2, %v3424_v34, 0.0 }
  0x41   : > { %v3432_v49 = vunpack.c.l.bf16 %v2749_v42  ;;  %v599_v37 = vsel %vm563_vm2, %v3427_v62, 0.0  ;;  %v3434_v62 = vunpack.c.h.bf16 %v2760_v20 }
  0x42   : > { %v684_v28 = vadd.f32 %v683_v39, %v682_v58  ;;  %v596_v19 = vadd.f32 %v595_v41, %v594_v57  ;;  %v3430_v58 = vunpack.c.h.bf16 %v2738_v56  ;;  %v689_v39 = vsel %vm563_vm2, %v3425_v14, 0.0 }
  0x43   : > { %v691_v41 = vsel %vm563_vm2, %v3428_v4, 0.0  ;;  %v3436_v57 = vunpack.c.h.bf16 %v2749_v42  ;;  %v2790_v4 = vld [vmem:[%s2540_s15 + $0x60] sm:$0xff]  }
  0x44   : > { %v686_v38 = vadd.f32 %v685_v61, %v684_v28  ;;  %v598_v34 = vadd.f32 %v597_v31, %v596_v19  ;;  %v3431_v28 = vunpack.c.l.bf16 %v2760_v20  ;;  %v601_v61 = vsel %vm563_vm2, %v3433_v24, 0.0 }
  0x45   : > { %v693_v19 = vsel %vm563_vm2, %v3430_v58, 0.0  ;;  %v3440_v24 = vunpack.c.h.bf16 %v2790_v4 }
  0x46   : > { %v688_v51 = vadd.f32 %v687_v15, %v686_v38  ;;  %v600_v21 = vadd.f32 %v599_v37, %v598_v34  ;;  %v3435_v38 = vunpack.c.l.bf16 %v2771_v25  ;;  %v603_v15 = vsel %vm563_vm2, %v3432_v49, 0.0 }
  0x47   : > { %v3437_v34 = vunpack.c.h.bf16 %v2771_v25 }
  0x48   : > { %v690_v14 = vadd.f32 %v689_v39, %v688_v51  ;;  %v602_v18 = vadd.f32 %v601_v61, %v600_v21  ;;  %v695_v51 = vsel %vm563_vm2, %v3431_v28, 0.0  ;;  %v605_v39 = vsel %vm563_vm2, %v3436_v57, 0.0  ;;  %v2807_v28 = vld [vmem:[%s2540_s15 + $0x68] sm:$0xff]  }
  0x49   : > { %v607_v21 = vsel %vm563_vm2, %v3435_v38, 0.0 }
  0x4a   : > { %v692_v31 = vadd.f32 %v691_v41, %v690_v14  ;;  %v604_v58 = vadd.f32 %v603_v15, %v602_v18  ;;  %v697_v14 = vsel %vm563_vm2, %v3434_v62, 0.0  ;;  %v3438_v41 = vunpack.c.l.bf16 %v2790_v4 }
  0x4b   : > { %v609_v18 = vsel %vm563_vm2, %v3437_v34, 0.0 }
  0x4c   : > { %v694_v37 = vadd.f32 %v693_v19, %v692_v31  ;;  %v606_v49 = vadd.f32 %v605_v39, %v604_v58  ;;  %v3441_v31 = vunpack.c.l.bf16 %v2807_v28  ;;  %v611_v62 = vsel %vm563_vm2, %v3438_v41, 0.0 }
  0x4d   : > { %v3447_v58 = vunpack.c.h.bf16 %v2807_v28  ;;  %v613_v39 = vsel %vm563_vm2, %v3440_v24, 0.0 }
  0x4e   : > { %v696_v61 = vadd.f32 %v695_v51, %v694_v37  ;;  %v608_v15 = vadd.f32 %v607_v21, %v606_v49  ;;  %v2818_v51 = vld [vmem:[%s2540_s15 + $0x70] sm:$0xff]  }
  0x4f   : > { %v3443_v49 = vunpack.c.l.bf16 %v2818_v51 }
  0x50   : > { %v698_v19 = vadd.f32 %v697_v14, %v696_v61  ;;  %v610_v37 = vadd.f32 %v609_v18, %v608_v15  ;;  %v615_v14 = vsel %vm563_vm2, %v3441_v31, 0.0  ;;  %v2829_v61 = vld [vmem:[%s2540_s15 + $0x78] sm:$0xff]   ;;  %v3444_v18 = vunpack.c.h.bf16 %v2818_v51 }
  0x51   : > { %v617_v15 = vsel %vm563_vm2, %v3447_v58, 0.0  ;;  %v3445_v31 = vunpack.c.h.bf16 %v2829_v61 }
  0x52   : > { %v699_v38 = vrot.slane %v698_v19, 4  ;;  %v612_v34 = vadd.f32 %v611_v62, %v610_v37  ;;  %v3446_v62 = vunpack.c.l.bf16 %v2829_v61 }
  0x54   : > { %v700_v57 = vadd.f32 %v699_v38, %v698_v19  ;;  %v614_v41 = vadd.f32 %v613_v39, %v612_v34  ;;  %v619_v38 = vsel %vm563_vm2, %v3443_v49, 0.0  ;;  %v621_v34 = vsel %vm563_vm2, %v3444_v18, 0.0 }
  0x56   : > { %v701_v21 = vrot.slane %v700_v57, 2  ;;  %v616_v24 = vadd.f32 %v615_v14, %v614_v41  ;;  %v805_v41 = vld [vmem:[%s3389_s5] sm:$0x3] }
  0x57   : > { %v807_v18 = vsel %vm712_vm0, %v805_v41, 0 }
  0x58   : > { %v702_v12 = vadd.f32 %v701_v21, %v700_v57  ;;  %v618_v37 = vadd.f32 %v617_v15, %v616_v24  ;;  %v623_v57 = vsel %vm563_vm2, %v3446_v62, 0.0  ;;  %v625_v24 = vsel %vm563_vm2, %v3445_v31, 0.0 }
  0x5a   : > { %v703_v19 = vrot.slane %v702_v12, 1  ;;  %v620_v11 = vadd.f32 %v619_v38, %v618_v37 }
  0x5c   : > { %v704_v39 = vadd.f32 %v703_v19, %v702_v12  ;;  %v622_v21 = vadd.f32 %v621_v34, %v620_v11 }
  0x5e   : > { %v705_v14 = vmul.f32 0.00390625, %v704_v39  ;;  %v624_v49 = vadd.f32 %v623_v57, %v622_v21  ;;  %v804_v57 = vld [vmem:[%s3388_s4] sm:$0x3] }
  0x60   : > { %v706_v15 = vpack.c.bf16 %v705_v14, %v705_v14  ;;  %v626_v12 = vadd.f32 %v625_v24, %v624_v49  ;;  %v850_v49 = vsel %vm712_vm0, %v804_v57, 0  ;;  %v1008_v24 = vld [vmem:[%s3393_s9] sm:$0x3] }
  0x62   : > { %2124 = vmatmul.mubr.msk.bf16.vlgmr.msra.gmra.mrb[0].mxu0 %vm563_vm2, %v706_v15  ;;  %v627_v38 = vrot.slane %v626_v12, 4 }
  0x63   : > { %2134 = vmatpush3.bf16.msra.mxu0 %v807_v18  ;;  %2135 = vmatprep.mubr.msk.bf16.mxu0 %vm2394_vm1, %v2393_v2  ;;  %v1007_v18 = vld [vmem:[%s3392_s8] sm:$0x3] }
  0x64   : > { %v628_v19 = vadd.f32 %v627_v38, %v626_v12  ;;  %2246 = vmatprep.subr.msk.bf16.mxu0 %vm712_vm0, %v1007_v18  ;;  %v1270_v21 = vsel %vm712_vm0, %v1007_v18, 0 }
  0x66   : > { %v629_v37 = vrot.slane %v628_v19, 2 }
  0x68   : > { %v630_v39 = vadd.f32 %v629_v37, %v628_v19 }
  0x6a   : > { %2136 = vmatmul.mubr.msk.bf16.vlgmr.msra.gmra.mrb[4].mxu0 %vm563_vm2, %v706_v15  ;;  %v631_v11 = vrot.slane %v630_v39, 1  ;;  %v1058_v15 = vsel %vm712_vm0, %v1008_v24, 0 }
  0x6b   : > { %2180 = vmatpush3.bf16.msra.mxu0 %v1270_v21 }
  0x6c   : > { %v632_v34 = vadd.f32 %v631_v11, %v630_v39 }
  0x6e   : > { %v634_v41 = vmul.f32 0.00390625, %v632_v34 }
  0x70   : > { %v635_v14 = vpack.c.bf16 %v634_v41, %v634_v41  ;;  %v802_v41 = vld [vmem:[%s3390_s6] sm:$0x1] }
  0x72   : > { %2130 = vmatmul.mubr.msk.bf16.vlgmr.msra.gmra.mrb[0].mxu1 %vm563_vm2, %v635_v14 }
  0x73   : > { %2140 = vmatpush3.bf16.msra.mxu1 %v850_v49  ;;  %2141 = vmatprep.mubr.msk.bf16.mxu1 %vm2394_vm1, %v2393_v2  ;;  %v903_v49 = vlaneseq }
  0x74   : > { %2245 = vmatprep.subr.msk.bf16.mxu1 %vm712_vm0, %v1008_v24 }
  0x75   : > { %v904_v62 = vshrl.u32 %v903_v49, 7 }
  0x7a   : > { %2142 = vmatmul.mubr.msk.bf16.vlgmr.msra.gmra.mrb[4].mxu1 %vm563_vm2, %v635_v14 }
  0x7b   : > { %2146 = vmatpush3.bf16.msra.mxu1 %v1058_v15 }
 0x135   : > { %v750_v2 = vpop.f32.mrb[0].mxu0 }
 0x136   : > { %v2125_v12 = vpop.f32.mrb[1].mxu0 }
 0x137   : > { %v753_v38 = vpop.f32.mrb[2].mxu0 }
 0x138   : > { %v2126_v19 = vpop.f32.mrb[3].mxu0 }
 0x139   : > { %v892_v19 = vld [vmem:[%s3391_s7] sm:$0x1] }
 0x13d   : > { %v843_v37 = vpop.f32.mrb[4].mxu0 }
 0x13e   : > { %v2137_v39 = vpop.f32.mrb[5].mxu0 }
 0x13f   : > { %v846_v11 = vpop.f32.mrb[6].mxu0 }
 0x140   : > { %v2138_v34 = vpop.f32.mrb[7].mxu0  ;;  %v905_v11 = vsub.s32 0, %v904_v62 }
 0x145   : > { %v796_v57 = vpop.f32.mrb[0].mxu1 }
 0x146   : > { %v797_v14 = vadd.f32 %v796_v57, %v750_v2  ;;  %v2131_v18 = vpop.f32.mrb[1].mxu1 }
 0x147   : > { %v799_v21 = vpop.f32.mrb[2].mxu1 }
 0x148   : > { %v803_v31 = vadd.f32 %v802_v41, %v797_v14  ;;  %v2132_v24 = vpop.f32.mrb[3].mxu1 }
 0x149   : > { %v3450_v24 = vunpack.c.h.bf16 %v2493_v5 }
 0x14a   : > { %v895_v15 = vmul.f32 0.16666667, %v803_v31 }
 0x14c   : > { %v896_v12 = vadd.f32 0.5, %v895_v15  ;;  %v3452_v15 = vunpack.c.h.bf16 %v2496_v6  ;;  %v3455_v6 = vunpack.c.l.bf16 %v2516_v16 }
 0x14d   : > { %v886_v38 = vpop.f32.mrb[4].mxu1 }
 0x14e   : > { %v897_v39 = vmax.f32 %v896_v12, 0.0  ;;  %v887_v34 = vadd.f32 %v886_v38, %v843_v37  ;;  %v2143_v58 = vpop.f32.mrb[5].mxu1  ;;  %v3454_v12 = vunpack.c.h.bf16 %v2502_v10 }
 0x14f   : > { %v889_v9 = vpop.f32.mrb[6].mxu1 }
 0x150   : > { %v898_v8 = vmin.f32 %v897_v39, 1.0  ;;  %v893_v2 = vadd.f32 %v892_v19, %v887_v34  ;;  %v2144_v57 = vpop.f32.mrb[7].mxu1  ;;  %v3456_v34 = vunpack.c.h.bf16 %v2516_v16  ;;  %v3461_v16 = vunpack.c.l.bf16 %v2661_v27 }
 0x151   : > { %v3457_v57 = vunpack.c.l.bf16 %v2639_v54 }
 0x152   : > { %v2881_v18 = vrot.slane %v898_v8, %v905_v11  ;;  %v899_v41 = vmul.f32 0.16666667, %v893_v2 }
 0x154   : > { %v900_v14 = vadd.f32 0.5, %v899_v41  ;;  %v907_v31 = vmul.f32 %v1923_v43, %v2881_v18  ;;  %v908_v49 = vmul.f32 %v1924_v44, %v2881_v18  ;;  %v909_v58 = vmul.f32 %v1927_v45, %v2881_v18 }
 0x155   : > { %v910_v9 = vmul.f32 %v1928_v50, %v2881_v18  ;;  %v911_v8 = vmul.f32 %v1931_v55, %v2881_v18  ;;  %v912_v43 = vmul.f32 %v1932_v0, %v2881_v18  ;;  %v913_v36 = vmul.f32 %v1935_v17, %v2881_v18 }
 0x156   : > { %v901_v62 = vmax.f32 %v900_v14, 0.0  ;;  %v939_v37 = vpack.c.bf16 %v908_v49, %v907_v31  ;;  %v914_v47 = vmul.f32 %v1936_v29, %v2881_v18  ;;  %v915_v50 = vmul.f32 %v1939_v46, %v2881_v18 }
 0x157   : > { %v940_v35 = vpack.c.bf16 %v910_v9, %v909_v58  ;;  %v941_v21 = vpack.c.bf16 %v912_v43, %v911_v8  ;;  %v916_v55 = vmul.f32 %v1940_v59, %v2881_v18  ;;  %v917_v41 = vmul.f32 %v3457_v57, %v2881_v18 }
 0x158   : > { %v902_v44 = vmin.f32 %v901_v62, 1.0  ;;  %2181 = vmatprep.mubr.msk.bf16.mxu0 %vm563_vm2, %v939_v37  ;;  %v942_v5 = vpack.c.bf16 %v914_v47, %v913_v36  ;;  %v3458_v14 = vunpack.c.h.bf16 %v2639_v54  ;;  %v3459_v49 = vunpack.c.l.bf16 %v2527_v23 }
 0x159   : > { %2182 = vmatmul.mubr.msk.bf16.vlgmr.msra.gmra.mrb[8].mxu0 %vm563_vm2, %v940_v35  ;;  %v3460_v9 = vunpack.c.h.bf16 %v2527_v23  ;;  %v919_v43 = vmul.f32 %v3461_v16, %v2881_v18  ;;  %v3462_v62 = vunpack.c.h.bf16 %v2661_v27  ;;  %v3463_v23 = vunpack.c.l.bf16 %v2543_v30 }
 0x15a   : > { %v2903_v45 = vrot.slane %v902_v44, %v905_v11  ;;  %2185 = vmatprep.mubr.msk.bf16.mxu0 %vm563_vm2, %v941_v21  ;;  %v943_v11 = vpack.c.bf16 %v916_v55, %v915_v50  ;;  %v918_v31 = vmul.f32 %v3458_v14, %v2881_v18  ;;  %v3464_v27 = vunpack.c.h.bf16 %v2543_v30 }
 0x15b   : > { %v920_v37 = vmul.f32 %v3462_v62, %v2881_v18  ;;  %v3465_v50 = vunpack.c.l.bf16 %v2683_v26  ;;  %v3469_v30 = vunpack.c.l.bf16 %v2705_v48  ;;  %v3476_v57 = vunpack.c.h.bf16 %v2606_v3 }
 0x15c   : > { %v959_v0 = vmul.f32 %v1987_v7, %v2903_v45  ;;  %v960_v17 = vmul.f32 %v3450_v24, %v2903_v45  ;;  %v961_v29 = vmul.f32 %v3451_v60, %v2903_v45  ;;  %v962_v46 = vmul.f32 %v3452_v15, %v2903_v45 }
 0x15d   : > { %v963_v59 = vmul.f32 %v3453_v22, %v2903_v45  ;;  %v964_v7 = vmul.f32 %v3454_v12, %v2903_v45  ;;  %v965_v10 = vmul.f32 %v3455_v6, %v2903_v45  ;;  %v966_v2 = vmul.f32 %v3456_v34, %v2903_v45 }
 0x15e   : > { %v991_v38 = vpack.c.bf16 %v960_v17, %v959_v0  ;;  %v992_v19 = vpack.c.bf16 %v962_v46, %v961_v29  ;;  %v967_v58 = vmul.f32 %v3459_v49, %v2903_v45  ;;  %v968_v8 = vmul.f32 %v3460_v9, %v2903_v45 }
 0x15f   : > { %v993_v39 = vpack.c.bf16 %v964_v7, %v963_v59  ;;  %v994_v35 = vpack.c.bf16 %v966_v2, %v965_v10  ;;  %v944_v44 = vpack.c.bf16 %v918_v31, %v917_v41  ;;  %v945_v21 = vpack.c.bf16 %v920_v37, %v919_v43 }
 0x160   : > { %2147 = vmatprep.mubr.msk.bf16.mxu1 %vm563_vm2, %v991_v38  ;;  %v995_v54 = vpack.c.bf16 %v968_v8, %v967_v58  ;;  %v969_v36 = vmul.f32 %v3463_v23, %v2903_v45  ;;  %v970_v47 = vmul.f32 %v3464_v27, %v2903_v45  ;;  %v921_v55 = vmul.f32 %v3465_v50, %v2881_v18 }
 0x161   : > { %2148 = vmatmul.mubr.msk.bf16.vlgmr.msra.gmra.mrb[8].mxu1 %vm563_vm2, %v992_v19  ;;  %2186 = vmatmul.mubr.msk.bf16.gmra.mrb[12].mxu0 %vm563_vm2, %v942_v5  ;;  %v3466_v0 = vunpack.c.h.bf16 %v2683_v26  ;;  %v3467_v17 = vunpack.c.l.bf16 %v2561_v40  ;;  %v3468_v29 = vunpack.c.h.bf16 %v2561_v40  ;;  %v923_v46 = vmul.f32 %v3469_v30, %v2881_v18 }
 0x162   : > { %2151 = vmatprep.mubr.msk.bf16.mxu1 %vm563_vm2, %v993_v39  ;;  %2189 = vmatprep.mubr.msk.bf16.mxu0 %vm563_vm2, %v943_v11  ;;  %v3470_v22 = vunpack.c.h.bf16 %v2705_v48  ;;  %v996_v12 = vpack.c.bf16 %v970_v47, %v969_v36  ;;  %v3471_v40 = vunpack.c.l.bf16 %v2579_v52  ;;  %v3472_v48 = vunpack.c.h.bf16 %v2579_v52 }
 0x163   : > { %v922_v24 = vmul.f32 %v3466_v0, %v2881_v18  ;;  %v971_v60 = vmul.f32 %v3467_v17, %v2903_v45  ;;  %v972_v15 = vmul.f32 %v3468_v29, %v2903_v45  ;;  %v3473_v39 = vunpack.c.l.bf16 %v2727_v32 }
 0x164   : > { %v924_v59 = vmul.f32 %v3470_v22, %v2881_v18  ;;  %v973_v19 = vmul.f32 %v3471_v40, %v2903_v45  ;;  %v974_v5 = vmul.f32 %v3472_v48, %v2903_v45  ;;  %v3474_v6 = vunpack.c.h.bf16 %v2727_v32 }
 0x165   : > { %v946_v7 = vpack.c.bf16 %v922_v24, %v921_v55  ;;  %v997_v26 = vpack.c.bf16 %v972_v15, %v971_v60  ;;  %v925_v11 = vmul.f32 %v3473_v39, %v2881_v18  ;;  %v3475_v34 = vunpack.c.l.bf16 %v2606_v3 }
 0x166   : > { %v947_v38 = vpack.c.bf16 %v924_v59, %v923_v46  ;;  %v926_v10 = vmul.f32 %v3474_v6, %v2881_v18  ;;  %v976_v41 = vmul.f32 %v3476_v57, %v2903_v45  ;;  %v3477_v52 = vunpack.c.l.bf16 %v2749_v42 }
 0x167   : > { %v975_v2 = vmul.f32 %v3475_v34, %v2903_v45  ;;  %v3478_v31 = vunpack.c.h.bf16 %v2749_v42  ;;  %v998_v58 = vpack.c.bf16 %v974_v5, %v973_v19  ;;  %v3479_v3 = vunpack.c.l.bf16 %v2628_v33 }
 0x168   : > { %v927_v14 = vmul.f32 %v3477_v52, %v2881_v18  ;;  %v948_v9 = vpack.c.bf16 %v926_v10, %v925_v11  ;;  %v3480_v42 = vunpack.c.h.bf16 %v2628_v33  ;;  %v3481_v62 = vunpack.c.l.bf16 %v2771_v25 }
 0x169   : > { %2152 = vmatmul.mubr.msk.bf16.gmra.mrb[12].mxu1 %vm563_vm2, %v994_v35  ;;  %2190 = vmatmul.mubr.msk.bf16.gmra.mrb[16].mxu0 %vm563_vm2, %v944_v44  ;;  %v928_v49 = vmul.f32 %v3478_v31, %v2881_v18  ;;  %v999_v32 = vpack.c.bf16 %v976_v41, %v975_v2  ;;  %v977_v16 = vmul.f32 %v3479_v3, %v2903_v45  ;;  %v3482_v35 = vunpack.c.h.bf16 %v2771_v25 }
 0x16a   : > { %2155 = vmatprep.mubr.msk.bf16.mxu1 %vm563_vm2, %v995_v54  ;;  %2193 = vmatprep.mubr.msk.bf16.mxu0 %vm563_vm2, %v945_v21  ;;  %v978_v43 = vmul.f32 %v3480_v42, %v2903_v45  ;;  %v929_v37 = vmul.f32 %v3481_v62, %v2881_v18  ;;  %v3483_v54 = vunpack.c.l.bf16 %v2650_v63  ;;  %v3484_v23 = vunpack.c.h.bf16 %v2650_v63 }
 0x16b   : > { %v949_v8 = vpack.c.bf16 %v928_v49, %v927_v14  ;;  %v930_v44 = vmul.f32 %v3482_v35, %v2881_v18  ;;  %v3485_v33 = vunpack.c.l.bf16 %v2790_v4  ;;  %v3486_v47 = vunpack.c.h.bf16 %v2790_v4 }
 0x16c   : > { %v979_v21 = vmul.f32 %v3483_v54, %v2903_v45  ;;  %v980_v36 = vmul.f32 %v3484_v23, %v2903_v45  ;;  %v1000_v55 = vpack.c.bf16 %v978_v43, %v977_v16  ;;  %v3487_v63 = vunpack.c.l.bf16 %v2672_v53  ;;  %v3112_v43 = vld [vmem:[%s3394_s10] ss:$0 sm:$0xff] }
 0x16d   : > { %v931_v27 = vmul.f32 %v3485_v33, %v2881_v18  ;;  %v932_v50 = vmul.f32 %v3486_v47, %v2881_v18  ;;  %v950_v0 = vpack.c.bf16 %v930_v44, %v929_v37  ;;  %v3488_v4 = vunpack.c.h.bf16 %v2672_v53 }
 0x16e   : > { %v1001_v25 = vpack.c.bf16 %v980_v36, %v979_v21  ;;  %v981_v17 = vmul.f32 %v3487_v63, %v2903_v45  ;;  %v3489_v29 = vunpack.c.l.bf16 %v2807_v28  ;;  %v3490_v30 = vunpack.c.h.bf16 %v2807_v28 }
 0x16f   : > { %v951_v24 = vpack.c.bf16 %v932_v50, %v931_v27  ;;  %v982_v60 = vmul.f32 %v3488_v4, %v2903_v45  ;;  %v3491_v22 = vunpack.c.l.bf16 %v2694_v13  ;;  %v3493_v53 = vunpack.c.l.bf16 %v2818_v51 }
 0x170   : > { %v933_v15 = vmul.f32 %v3489_v29, %v2881_v18  ;;  %v934_v46 = vmul.f32 %v3490_v30, %v2881_v18  ;;  %v3497_v6 = vunpack.c.l.bf16 %v2829_v61  ;;  %v3498_v34 = vunpack.c.h.bf16 %v2829_v61 }
 0x171   : > { %2156 = vmatmul.mubr.msk.bf16.gmra.mrb[16].mxu1 %vm563_vm2, %v996_v12  ;;  %2194 = vmatmul.mubr.msk.bf16.gmra.mrb[20].mxu0 %vm563_vm2, %v946_v7  ;;  %v983_v59 = vmul.f32 %v3491_v22, %v2903_v45  ;;  %v3492_v12 = vunpack.c.h.bf16 %v2694_v13  ;;  %v1002_v19 = vpack.c.bf16 %v982_v60, %v981_v17  ;;  %v3495_v13 = vunpack.c.l.bf16 %v2716_v1 }
 0x172   : > { %2159 = vmatprep.mubr.msk.bf16.mxu1 %vm563_vm2, %v997_v26  ;;  %2197 = vmatprep.mubr.msk.bf16.mxu0 %vm563_vm2, %v947_v38  ;;  %v935_v26 = vmul.f32 %v3493_v53, %v2881_v18  ;;  %v3494_v38 = vunpack.c.h.bf16 %v2818_v51  ;;  %v952_v48 = vpack.c.bf16 %v934_v46, %v933_v15  ;;  %v3496_v51 = vunpack.c.h.bf16 %v2716_v1 }
 0x173   : > { %v984_v7 = vmul.f32 %v3492_v12, %v2903_v45  ;;  %v985_v39 = vmul.f32 %v3495_v13, %v2903_v45  ;;  %v937_v10 = vmul.f32 %v3497_v6, %v2881_v18  ;;  %v938_v2 = vmul.f32 %v3498_v34, %v2881_v18 }
 0x174   : > { %v936_v40 = vmul.f32 %v3494_v38, %v2881_v18  ;;  %v986_v11 = vmul.f32 %v3496_v51, %v2903_v45  ;;  %v3499_v57 = vunpack.c.l.bf16 %v2738_v56  ;;  %v3500_v52 = vunpack.c.h.bf16 %v2738_v56 }
 0x175   : > { %v1003_v28 = vpack.c.bf16 %v984_v7, %v983_v59  ;;  %v954_v49 = vpack.c.bf16 %v938_v2, %v937_v10  ;;  %v3501_v61 = vunpack.c.l.bf16 %v2760_v20 }
 0x176   : > { %v953_v5 = vpack.c.bf16 %v936_v40, %v935_v26  ;;  %v987_v41 = vmul.f32 %v3499_v57, %v2903_v45  ;;  %v988_v14 = vmul.f32 %v3500_v52, %v2903_v45  ;;  %v1004_v31 = vpack.c.bf16 %v986_v11, %v985_v39 }
 0x177   : > { %v989_v18 = vmul.f32 %v3501_v61, %v2903_v45 }
 0x178   : > { %v1005_v1 = vpack.c.bf16 %v988_v14, %v987_v41 }
 0x179   : > { %2160 = vmatmul.mubr.msk.bf16.gmra.mrb[20].mxu1 %vm563_vm2, %v998_v58  ;;  %2198 = vmatmul.mubr.msk.bf16.gmra.mrb[24].mxu0 %vm563_vm2, %v948_v9  ;;  %v3502_v58 = vunpack.c.h.bf16 %v2760_v20  ;;  %v3117_v20 = vld [vmem:[%s3395_s11] ss:$0 sm:$0xff] }
 0x17a   : > { %2163 = vmatprep.mubr.msk.bf16.mxu1 %vm563_vm2, %v999_v32  ;;  %2201 = vmatprep.mubr.msk.bf16.mxu0 %vm563_vm2, %v949_v8 }
 0x17b   : > { %v990_v9 = vmul.f32 %v3502_v58, %v2903_v45 }
 0x17d   : > { %v1006_v32 = vpack.c.bf16 %v990_v9, %v989_v18 }
 0x181   : > { %2164 = vmatmul.mubr.msk.bf16.gmra.mrb[24].mxu1 %vm563_vm2, %v1000_v55  ;;  %2202 = vmatmul.mubr.msk.bf16.gmra.mrb[28].mxu0 %vm563_vm2, %v950_v0 }
 0x182   : > { %2167 = vmatprep.mubr.msk.bf16.mxu1 %vm563_vm2, %v1001_v25  ;;  %2205 = vmatprep.mubr.msk.bf16.mxu0 %vm563_vm2, %v951_v24 }
 0x189   : > { %2168 = vmatmul.mubr.msk.bf16.gmra.mrb[28].mxu1 %vm563_vm2, %v1002_v19  ;;  %2206 = vmatmul.mubr.msk.bf16.gmra.mrb[32].mxu0 %vm563_vm2, %v952_v48 }
 0x18a   : > { %2171 = vmatprep.mubr.msk.bf16.mxu1 %vm563_vm2, %v1003_v28  ;;  %2209 = vmatprep.mubr.msk.bf16.mxu0 %vm563_vm2, %v953_v5 }
 0x191   : > { %2172 = vmatmul.mubr.msk.bf16.gmra.mrb[32].mxu1 %vm563_vm2, %v1004_v31  ;;  %2210 = vmatmul.mubr.msk.bf16.gmra.mrb[36].mxu0 %vm563_vm2, %v954_v49 }
 0x192   : > { %2175 = vmatprep.mubr.msk.bf16.mxu1 %vm563_vm2, %v1005_v1 }
 0x199   : > { %2176 = vmatmul.mubr.msk.bf16.gmra.mrb[36].mxu1 %vm563_vm2, %v1006_v32 }
 0x22c   : > { %v2183_v56 = vpop.f32.mrb[8].mxu0 }
 0x22d   : > { %v1306_v8 = vpop.f32.mrb[9].mxu0 }
 0x22e   : > { %v2184_v3 = vpop.f32.mrb[10].mxu0 }
 0x22f   : > { %v1309_v16 = vpop.f32.mrb[11].mxu0 }
 0x234   : > { %v2149_v42 = vpop.f32.mrb[8].mxu1  ;;  %v2187_v62 = vpop.f32.mrb[12].mxu0 }
 0x235   : > { %v1315_v37 = vadd.f32 %v2183_v56, %v2149_v42  ;;  %v1094_v35 = vpop.f32.mrb[9].mxu1  ;;  %v1322_v44 = vpop.f32.mrb[13].mxu0 }
 0x236   : > { %v1307_v45 = vadd.f32 %v1306_v8, %v1094_v35  ;;  %v2150_v54 = vpop.f32.mrb[10].mxu1  ;;  %v2188_v21 = vpop.f32.mrb[14].mxu0 }
 0x237   : > { %v1442_v23 = vmul.f32 %v3112_v43, %v1315_v37  ;;  %v1318_v36 = vadd.f32 %v2184_v3, %v2150_v54  ;;  %v1097_v33 = vpop.f32.mrb[11].mxu1  ;;  %v1325_v27 = vpop.f32.mrb[15].mxu0 }
 0x238   : > { %v1440_v47 = vmul.f32 %v3112_v43, %v1307_v45  ;;  %v1310_v50 = vadd.f32 %v1309_v16, %v1097_v33 }
 0x239   : > { %v3122_v55 = vadd.f32 %v3117_v20, %v1442_v23  ;;  %v1443_v0 = vmul.f32 %v3112_v43, %v1318_v36 }
 0x23a   : > { %v3126_v25 = vadd.f32 %v3117_v20, %v1440_v47  ;;  %v1441_v24 = vmul.f32 %v3112_v43, %v1310_v50 }
 0x23b   : > { %v1886_v63 = vmul.f32 -1.442695, %v3122_v55  ;;  %v3131_v17 = vadd.f32 %v3117_v20, %v1443_v0 }
 0x23c   : > { %v1884_v4 = vmul.f32 -1.442695, %v3126_v25  ;;  %v3135_v60 = vadd.f32 %v3117_v20, %v1441_v24  ;;  %v2153_v29 = vpop.f32.mrb[12].mxu1  ;;  %v2191_v15 = vpop.f32.mrb[16].mxu0 }
 0x23d   : > { %2257 = vpow2.f32 %v1886_v63  ;;  %v1887_v30 = vmul.f32 -1.442695, %v3131_v17  ;;  %v1331_v46 = vadd.f32 %v2187_v62, %v2153_v29  ;;  %v1110_v22 = vpop.f32.mrb[13].mxu1  ;;  %v1338_v59 = vpop.f32.mrb[17].mxu0 }
 0x23e   : > { %2259 = vpow2.f32 %v1884_v4  ;;  %v1885_v12 = vmul.f32 -1.442695, %v3135_v60  ;;  %v1323_v7 = vadd.f32 %v1322_v44, %v1110_v22  ;;  %v2154_v53 = vpop.f32.mrb[14].mxu1  ;;  %v2192_v26 = vpop.f32.mrb[18].mxu0 }
 0x23f   : > { %2261 = vpow2.f32 %v1887_v30  ;;  %v1446_v38 = vmul.f32 %v3112_v43, %v1331_v46  ;;  %v1334_v40 = vadd.f32 %v2188_v21, %v2154_v53  ;;  %v1113_v19 = vpop.f32.mrb[15].mxu1  ;;  %v1341_v48 = vpop.f32.mrb[19].mxu0 }
 0x240   : > { %2263 = vpow2.f32 %v1885_v12  ;;  %v1444_v28 = vmul.f32 %v3112_v43, %v1323_v7  ;;  %v1326_v5 = vadd.f32 %v1325_v27, %v1113_v19 }
 0x241   : > { %v3142_v13 = vadd.f32 %v3117_v20, %v1446_v38  ;;  %v1447_v39 = vmul.f32 %v3112_v43, %v1334_v40 }
 0x242   : > { %v3146_v51 = vadd.f32 %v3117_v20, %v1444_v28  ;;  %v1445_v11 = vmul.f32 %v3112_v43, %v1326_v5 }
 0x243   : > { %v1890_v6 = vmul.f32 -1.442695, %v3142_v13  ;;  %v3151_v10 = vadd.f32 %v3117_v20, %v1447_v39 }
 0x244   : > { %v1888_v34 = vmul.f32 -1.442695, %v3146_v51  ;;  %v3155_v2 = vadd.f32 %v3117_v20, %v1445_v11  ;;  %v2157_v57 = vpop.f32.mrb[16].mxu1  ;;  %v2195_v41 = vpop.f32.mrb[20].mxu0 }
 0x245   : > { %2265 = vpow2.f32 %v1890_v6  ;;  %v1891_v52 = vmul.f32 -1.442695, %v3151_v10  ;;  %v1347_v14 = vadd.f32 %v2191_v15, %v2157_v57  ;;  %v1126_v31 = vpop.f32.mrb[17].mxu1  ;;  %v1354_v49 = vpop.f32.mrb[21].mxu0 }
 0x246   : > { %2267 = vpow2.f32 %v1888_v34  ;;  %v1889_v1 = vmul.f32 -1.442695, %v3155_v2  ;;  %v1339_v61 = vadd.f32 %v1338_v59, %v1126_v31  ;;  %v2158_v18 = vpop.f32.mrb[18].mxu1  ;;  %v2196_v58 = vpop.f32.mrb[22].mxu0 }
 0x247   : > { %v2258_v9 = vpop.eup %2257  ;;  %2269 = vpow2.f32 %v1891_v52  ;;  %v1450_v32 = vmul.f32 %v3112_v43, %v1347_v14  ;;  %v1350_v56 = vadd.f32 %v2192_v26, %v2158_v18  ;;  %v1129_v8 = vpop.f32.mrb[19].mxu1 }
 0x248   : > { %v1357_v3 = vpop.f32.mrb[23].mxu0  ;;  %v2260_v16 = vpop.eup %2259  ;;  %v1609_v42 = vadd.f32 1.0, %v2258_v9  ;;  %2271 = vpow2.f32 %v1889_v1  ;;  %v1448_v62 = vmul.f32 %v3112_v43, %v1339_v61  ;;  %v1342_v37 = vadd.f32 %v1341_v48, %v1129_v8 }
 0x249   : > { %v2262_v35 = vpop.eup %2261  ;;  %v1607_v44 = vadd.f32 1.0, %v2260_v16  ;;  %v3162_v45 = vadd.f32 %v3117_v20, %v1450_v32  ;;  %v1451_v54 = vmul.f32 %v3112_v43, %v1350_v56 }
 0x24a   : > { %v2264_v21 = vpop.eup %2263  ;;  %2273 = vrcp.f32 %v1609_v42  ;;  %v1610_v23 = vadd.f32 1.0, %v2262_v35  ;;  %v3166_v36 = vadd.f32 %v3117_v20, %v1448_v62  ;;  %v1449_v33 = vmul.f32 %v3112_v43, %v1342_v37 }
 0x24b   : > { %2275 = vrcp.f32 %v1607_v44  ;;  %v1608_v27 = vadd.f32 1.0, %v2264_v21  ;;  %v1894_v47 = vmul.f32 -1.442695, %v3162_v45  ;;  %v3171_v50 = vadd.f32 %v3117_v20, %v1451_v54 }
 0x24c   : > { %2277 = vrcp.f32 %v1610_v23  ;;  %v1892_v0 = vmul.f32 -1.442695, %v3166_v36  ;;  %v3175_v24 = vadd.f32 %v3117_v20, %v1449_v33  ;;  %v2161_v63 = vpop.f32.mrb[20].mxu1  ;;  %v2199_v4 = vpop.f32.mrb[24].mxu0 }
 0x24d   : > { %2279 = vrcp.f32 %v1608_v27  ;;  %v1895_v29 = vmul.f32 -1.442695, %v3171_v50  ;;  %v1363_v15 = vadd.f32 %v2195_v41, %v2161_v63  ;;  %v1142_v30 = vpop.f32.mrb[21].mxu1  ;;  %v1370_v46 = vpop.f32.mrb[25].mxu0 }
 0x24e   : > { %2281 = vpow2.f32 %v1894_v47  ;;  %v1893_v22 = vmul.f32 -1.442695, %v3175_v24  ;;  %v1355_v59 = vadd.f32 %v1354_v49, %v1142_v30  ;;  %v2162_v12 = vpop.f32.mrb[22].mxu1  ;;  %v2200_v7 = vpop.f32.mrb[26].mxu0 }
 0x24f   : > { %v2266_v53 = vpop.eup %2265  ;;  %2283 = vpow2.f32 %v1892_v0  ;;  %v1454_v26 = vmul.f32 %v3112_v43, %v1363_v15  ;;  %v1366_v38 = vadd.f32 %v2196_v58, %v2162_v12  ;;  %v1145_v40 = vpop.f32.mrb[23].mxu1 }
 0x250   : > { %v1373_v19 = vpop.f32.mrb[27].mxu0  ;;  %v2268_v48 = vpop.eup %2267  ;;  %v1613_v28 = vadd.f32 1.0, %v2266_v53  ;;  %2285 = vpow2.f32 %v1895_v29  ;;  %v1452_v5 = vmul.f32 %v3112_v43, %v1355_v59  ;;  %v1358_v39 = vadd.f32 %v1357_v3, %v1145_v40 }
 0x251   : > { %v2270_v11 = vpop.eup %2269  ;;  %v1611_v6 = vadd.f32 1.0, %v2268_v48  ;;  %2287 = vpow2.f32 %v1893_v22  ;;  %v3183_v34 = vadd.f32 %v3117_v20, %v1454_v26  ;;  %v1455_v57 = vmul.f32 %v3112_v43, %v1366_v38 }
 0x252   : > { %v2272_v41 = vpop.eup %2271  ;;  %2289 = vrcp.f32 %v1613_v28  ;;  %v1614_v52 = vadd.f32 1.0, %v2270_v11  ;;  %v3187_v14 = vadd.f32 %v3117_v20, %v1452_v5  ;;  %v1453_v31 = vmul.f32 %v3112_v43, %v1358_v39 }
 0x253   : > { %2291 = vrcp.f32 %v1611_v6  ;;  %v1612_v49 = vadd.f32 1.0, %v2272_v41  ;;  %v1898_v1 = vmul.f32 -1.442695, %v3183_v34  ;;  %v3192_v61 = vadd.f32 %v3117_v20, %v1455_v57 }
 0x254   : > { %v2274_v18 = vpop.eup %2273  ;;  %2293 = vrcp.f32 %v1614_v52  ;;  %v1896_v58 = vmul.f32 -1.442695, %v3187_v14  ;;  %v3201_v9 = vadd.f32 %v3117_v20, %v1453_v31  ;;  %v2165_v32 = vpop.f32.mrb[24].mxu1 }
 0x255   : > { %v2203_v56 = vpop.f32.mrb[28].mxu0  ;;  %v2276_v8 = vpop.eup %2275  ;;  %v1705_v3 = vmul.f32 %v2274_v18, %v3122_v55  ;;  %2295 = vrcp.f32 %v1612_v49  ;;  %v1899_v16 = vmul.f32 -1.442695, %v3192_v61  ;;  %v1379_v42 = vadd.f32 %v2199_v4, %v2165_v32 }
 0x256   : > { %v1158_v62 = vpop.f32.mrb[25].mxu1  ;;  %v1386_v37 = vpop.f32.mrb[29].mxu0  ;;  %v1703_v44 = vmul.f32 %v2276_v8, %v3126_v25  ;;  %2297 = vpow2.f32 %v1898_v1  ;;  %v1897_v54 = vmul.f32 -1.442695, %v3201_v9 }
 0x257   : > { %v2278_v35 = vpop.eup %2277  ;;  %v1371_v21 = vadd.f32 %v1370_v46, %v1158_v62  ;;  %v2166_v23 = vpop.f32.mrb[26].mxu1  ;;  %1738 = vst.msk [vmem:[%s3197_s18 + $0x10] sm:$0xff] %vm1735_vm3, %v1705_v3  ;;  %2299 = vpow2.f32 %v1896_v58  ;;  %v1458_v47 = vmul.f32 %v3112_v43, %v1379_v42 }
 0x258   : > { %v2204_v33 = vpop.f32.mrb[30].mxu0  ;;  %v2280_v27 = vpop.eup %2279  ;;  %v1706_v55 = vmul.f32 %v2278_v35, %v3131_v17  ;;  %v1382_v0 = vadd.f32 %v2200_v7, %v2166_v23  ;;  %1736 = vst.msk [vmem:[%s3197_s18] sm:$0xff] %vm1735_vm3, %v1703_v44  ;;  %2301 = vpow2.f32 %v1899_v16 }
 0x259   : > { %v1161_v63 = vpop.f32.mrb[27].mxu1  ;;  %v1389_v4 = vpop.f32.mrb[31].mxu0  ;;  %v1704_v29 = vmul.f32 %v2280_v27, %v3135_v60  ;;  %v1456_v15 = vmul.f32 %v3112_v43, %v1371_v21  ;;  %2303 = vpow2.f32 %v1897_v54  ;;  %v3218_v22 = vadd.f32 %v3117_v20, %v1458_v47 }
 0x25a   : > { %v2282_v25 = vpop.eup %2281  ;;  %v1374_v30 = vadd.f32 %v1373_v19, %v1161_v63  ;;  %1739 = vst.msk [vmem:[%s3197_s18 + $0x18] sm:$0xff] %vm1735_vm3, %v1706_v55  ;;  %v1459_v59 = vmul.f32 %v3112_v43, %v1382_v0 }
 0x25b   : > { %v2284_v46 = vpop.eup %2283  ;;  %v1617_v17 = vadd.f32 1.0, %v2282_v25  ;;  %1737 = vst.msk [vmem:[%s3197_s18 + $0x8] sm:$0xff] %vm1735_vm3, %v1704_v29  ;;  %v3224_v60 = vadd.f32 %v3117_v20, %v1456_v15  ;;  %v1902_v40 = vmul.f32 -1.442695, %v3218_v22 }
 0x25c   : > { %v2286_v12 = vpop.eup %2285  ;;  %v1615_v7 = vadd.f32 1.0, %v2284_v46  ;;  %v1457_v53 = vmul.f32 %v3112_v43, %v1374_v30  ;;  %v3229_v19 = vadd.f32 %v3117_v20, %v1459_v59  ;;  %v2169_v11 = vpop.f32.mrb[28].mxu1 }
 0x25d   : > { %v2288_v26 = vpop.eup %2287  ;;  %2305 = vrcp.f32 %v1617_v17  ;;  %v1618_v38 = vadd.f32 1.0, %v2286_v12  ;;  %v1900_v5 = vmul.f32 -1.442695, %v3224_v60  ;;  %v2207_v6 = vpop.f32.mrb[32].mxu0  ;;  %v1395_v31 = vadd.f32 %v2203_v56, %v2169_v11 }
 0x25e   : > { %v2290_v48 = vpop.eup %2289  ;;  %2307 = vrcp.f32 %v1615_v7  ;;  %v1616_v28 = vadd.f32 1.0, %v2288_v26  ;;  %v3233_v39 = vadd.f32 %v3117_v20, %v1457_v53  ;;  %v1903_v52 = vmul.f32 -1.442695, %v3229_v19  ;;  %v1174_v49 = vpop.f32.mrb[29].mxu1 }
 0x25f   : > { %v2292_v57 = vpop.eup %2291  ;;  %v1709_v41 = vmul.f32 %v2290_v48, %v3142_v13  ;;  %2309 = vrcp.f32 %v1618_v38  ;;  %v1402_v1 = vpop.f32.mrb[33].mxu0  ;;  %v1387_v8 = vadd.f32 %v1386_v37, %v1174_v49  ;;  %v1462_v56 = vmul.f32 %v3112_v43, %v1395_v31 }
 0x260   : > { %v2294_v18 = vpop.eup %2293  ;;  %v1707_v58 = vmul.f32 %v2292_v57, %v3146_v51  ;;  %2311 = vrcp.f32 %v1616_v28  ;;  %v1901_v32 = vmul.f32 -1.442695, %v3233_v39  ;;  %v2170_v3 = vpop.f32.mrb[30].mxu1 }
 0x261   : > { %v2208_v16 = vpop.f32.mrb[34].mxu0  ;;  %v2296_v42 = vpop.eup %2295  ;;  %1742 = vst.msk [vmem:[%s3197_s18 + $0x30] sm:$0xff] %vm1735_vm3, %v1709_v41  ;;  %v1710_v13 = vmul.f32 %v2294_v18, %v3151_v10  ;;  %2313 = vpow2.f32 %v1902_v40  ;;  %v1398_v62 = vadd.f32 %v2204_v33, %v2170_v3  ;;  %v1460_v54 = vmul.f32 %v3112_v43, %v1387_v8 }
 0x262   : > { %v1177_v35 = vpop.f32.mrb[31].mxu1  ;;  %v1405_v44 = vpop.f32.mrb[35].mxu0  ;;  %1740 = vst.msk [vmem:[%s3197_s18 + $0x20] sm:$0xff] %vm1735_vm3, %v1707_v58  ;;  %v1708_v37 = vmul.f32 %v2296_v42, %v3155_v2  ;;  %2315 = vpow2.f32 %v1900_v5  ;;  %v3250_v27 = vadd.f32 %v3117_v20, %v1462_v56 }
 0x263   : > { %v2298_v51 = vpop.eup %2297  ;;  %v1390_v21 = vadd.f32 %v1389_v4, %v1177_v35  ;;  %1743 = vst.msk [vmem:[%s3197_s18 + $0x38] sm:$0xff] %vm1735_vm3, %v1710_v13  ;;  %2317 = vpow2.f32 %v1903_v52  ;;  %v1463_v33 = vmul.f32 %v3112_v43, %v1398_v62  ;;  %v3256_v2 = vadd.f32 %v3117_v20, %v1460_v54 }
 0x264   : > { %v2300_v23 = vpop.eup %2299  ;;  %v1621_v10 = vadd.f32 1.0, %v2298_v51  ;;  %1741 = vst.msk [vmem:[%s3197_s18 + $0x28] sm:$0xff] %vm1735_vm3, %v1708_v37  ;;  %2319 = vpow2.f32 %v1901_v32  ;;  %v1906_v25 = vmul.f32 -1.442695, %v3250_v27  ;;  %v2173_v17 = vpop.f32.mrb[32].mxu1 }
 0x265   : > { %v2302_v55 = vpop.eup %2301  ;;  %v1619_v47 = vadd.f32 1.0, %v2300_v23  ;;  %v1461_v0 = vmul.f32 %v3112_v43, %v1390_v21  ;;  %v3261_v29 = vadd.f32 %v3117_v20, %v1463_v33  ;;  %v1904_v30 = vmul.f32 -1.442695, %v3256_v2  ;;  %v2211_v59 = vpop.f32.mrb[36].mxu0 }
 0x266   : > { %v2304_v63 = vpop.eup %2303  ;;  %2321 = vrcp.f32 %v1621_v10  ;;  %v1622_v4 = vadd.f32 1.0, %v2302_v55  ;;  %v1411_v53 = vadd.f32 %v2207_v6, %v2173_v17  ;;  %v1190_v26 = vpop.f32.mrb[33].mxu1 }
 0x267   : > { %2323 = vrcp.f32 %v1619_v47  ;;  %v1620_v15 = vadd.f32 1.0, %v2304_v63  ;;  %v3265_v46 = vadd.f32 %v3117_v20, %v1461_v0  ;;  %v2306_v12 = vpop.eup %2305  ;;  %v1907_v7 = vmul.f32 -1.442695, %v3261_v29  ;;  %v1418_v38 = vpop.f32.mrb[37].mxu0 }
 0x268   : > { %2325 = vrcp.f32 %v1622_v4  ;;  %v2308_v40 = vpop.eup %2307  ;;  %v1713_v48 = vmul.f32 %v2306_v12, %v3162_v45  ;;  %v1403_v5 = vadd.f32 %v1402_v1, %v1190_v26  ;;  %v2174_v11 = vpop.f32.mrb[34].mxu1  ;;  %v1466_v31 = vmul.f32 %v3112_v43, %v1411_v53 }
 0x269   : > { %2327 = vrcp.f32 %v1620_v15  ;;  %v1905_v28 = vmul.f32 -1.442695, %v3265_v46  ;;  %v2212_v57 = vpop.f32.mrb[38].mxu0  ;;  %v2310_v41 = vpop.eup %2309  ;;  %v1711_v52 = vmul.f32 %v2308_v40, %v3166_v36  ;;  %v1414_v6 = vadd.f32 %v2208_v16, %v2174_v11 }
 0x26a   : > { %2329 = vpow2.f32 %v1906_v25  ;;  %v1193_v49 = vpop.f32.mrb[35].mxu1  ;;  %v1421_v18 = vpop.f32.mrb[39].mxu0  ;;  %1746 = vst.msk [vmem:[%s3197_s18 + $0x50] sm:$0xff] %vm1735_vm3, %v1713_v48  ;;  %v1714_v45 = vmul.f32 %v2310_v41, %v3171_v50  ;;  %v1464_v1 = vmul.f32 %v3112_v43, %v1403_v5  ;;  %v3280_v3 = vadd.f32 %v3117_v20, %v1466_v31 }
 0x26b   : > { %v2312_v58 = vpop.eup %2311  ;;  %2331 = vpow2.f32 %v1904_v30  ;;  %v1406_v32 = vadd.f32 %v1405_v44, %v1193_v49  ;;  %1744 = vst.msk [vmem:[%s3197_s18 + $0x40] sm:$0xff] %vm1735_vm3, %v1711_v52  ;;  %v1467_v16 = vmul.f32 %v3112_v43, %v1414_v6 }
 0x26c   : > { %v2314_v8 = vpop.eup %2313  ;;  %v1712_v36 = vmul.f32 %v2312_v58, %v3175_v24  ;;  %2333 = vpow2.f32 %v1907_v7  ;;  %1747 = vst.msk [vmem:[%s3197_s18 + $0x58] sm:$0xff] %vm1735_vm3, %v1714_v45  ;;  %v3286_v13 = vadd.f32 %v3117_v20, %v1464_v1  ;;  %v1910_v35 = vmul.f32 -1.442695, %v3280_v3  ;;  %v2177_v23 = vpop.f32.mrb[36].mxu1 }
 0x26d   : > { %v2316_v42 = vpop.eup %2315  ;;  %v1625_v50 = vadd.f32 1.0, %v2314_v8  ;;  %2335 = vpow2.f32 %v1905_v28  ;;  %v1465_v56 = vmul.f32 %v3112_v43, %v1406_v32  ;;  %v3293_v44 = vadd.f32 %v3117_v20, %v1467_v16  ;;  %v1206_v0 = vpop.f32.mrb[37].mxu1 }
 0x26e   : > { %v2318_v62 = vpop.eup %2317  ;;  %1745 = vst.msk [vmem:[%s3197_s18 + $0x48] sm:$0xff] %vm1735_vm3, %v1712_v36  ;;  %v1623_v24 = vadd.f32 1.0, %v2316_v42  ;;  %v1908_v54 = vmul.f32 -1.442695, %v3286_v13  ;;  %v1427_v47 = vadd.f32 %v2211_v59, %v2177_v23  ;;  %v1419_v15 = vadd.f32 %v1418_v38, %v1206_v0  ;;  %v2178_v30 = vpop.f32.mrb[38].mxu1 }
 0x26f   : > { %v2320_v51 = vpop.eup %2319  ;;  %2337 = vrcp.f32 %v1625_v50  ;;  %v1626_v37 = vadd.f32 1.0, %v2318_v62  ;;  %v3297_v21 = vadd.f32 %v3117_v20, %v1465_v56  ;;  %v1911_v55 = vmul.f32 -1.442695, %v3293_v44  ;;  %v1209_v26 = vpop.f32.mrb[39].mxu1 }
 0x270   : > { %v2322_v10 = vpop.eup %2321  ;;  %2339 = vrcp.f32 %v1623_v24  ;;  %v1624_v33 = vadd.f32 1.0, %v2320_v51  ;;  %v1470_v7 = vmul.f32 %v3112_v43, %v1427_v47  ;;  %v1430_v53 = vadd.f32 %v2212_v57, %v2178_v30 }
 0x271   : > { %v2324_v63 = vpop.eup %2323  ;;  %v1717_v4 = vmul.f32 %v2322_v10, %v3183_v34  ;;  %2341 = vrcp.f32 %v1626_v37  ;;  %v1909_v25 = vmul.f32 -1.442695, %v3297_v21  ;;  %v1468_v40 = vmul.f32 %v3112_v43, %v1419_v15 }
 0x272   : > { %v2326_v17 = vpop.eup %2325  ;;  %v1715_v12 = vmul.f32 %v2324_v63, %v3187_v14  ;;  %2343 = vrcp.f32 %v1624_v33  ;;  %v1422_v38 = vadd.f32 %v1421_v18, %v1209_v26  ;;  %v3312_v28 = vadd.f32 %v3117_v20, %v1470_v7 }
 0x273   : > { %v2328_v59 = vpop.eup %2327  ;;  %1750 = vst.msk [vmem:[%s3197_s18 + $0x70] sm:$0xff] %vm1735_vm3, %v1717_v4  ;;  %v1718_v34 = vmul.f32 %v2326_v17, %v3192_v61  ;;  %2345 = vpow2.f32 %v1910_v35  ;;  %v1471_v5 = vmul.f32 %v3112_v43, %v1430_v53  ;;  %v3318_v57 = vadd.f32 %v3117_v20, %v1468_v40 }
 0x274   : > { %v2330_v48 = vpop.eup %2329  ;;  %1748 = vst.msk [vmem:[%s3197_s18 + $0x60] sm:$0xff] %vm1735_vm3, %v1715_v12  ;;  %v1716_v14 = vmul.f32 %v2328_v59, %v3201_v9  ;;  %2347 = vpow2.f32 %v1908_v54  ;;  %v1469_v41 = vmul.f32 %v3112_v43, %v1422_v38  ;;  %v1914_v18 = vmul.f32 -1.442695, %v3312_v28 }
 0x275   : > { %v2332_v11 = vpop.eup %2331  ;;  %1751 = vst.msk [vmem:[%s3197_s18 + $0x78] sm:$0xff] %vm1735_vm3, %v1718_v34  ;;  %v1629_v61 = vadd.f32 1.0, %v2330_v48  ;;  %2349 = vpow2.f32 %v1911_v55  ;;  %v3324_v31 = vadd.f32 %v3117_v20, %v1471_v5  ;;  %v1912_v43 = vmul.f32 -1.442695, %v3318_v57 }
 0x276   : > { %v2334_v52 = vpop.eup %2333  ;;  %1749 = vst.msk [vmem:[%s3197_s18 + $0x68] sm:$0xff] %vm1735_vm3, %v1716_v14  ;;  %v1627_v9 = vadd.f32 1.0, %v2332_v11  ;;  %2351 = vpow2.f32 %v1909_v25  ;;  %v3328_v58 = vadd.f32 %v3117_v20, %v1469_v41 }
 0x277   : > { %v2336_v6 = vpop.eup %2335  ;;  %2353 = vrcp.f32 %v1629_v61  ;;  %v1630_v49 = vadd.f32 1.0, %v2334_v52  ;;  %v1915_v32 = vmul.f32 -1.442695, %v3324_v31 }
 0x278   : > { %2355 = vrcp.f32 %v1627_v9  ;;  %v1628_v45 = vadd.f32 1.0, %v2336_v6  ;;  %v1913_v16 = vmul.f32 -1.442695, %v3328_v58 }
 0x279   : > { %v2338_v1 = vpop.eup %2337  ;;  %2357 = vrcp.f32 %v1630_v49 }
 0x27a   : > { %v2340_v8 = vpop.eup %2339  ;;  %v1721_v36 = vmul.f32 %v2338_v1, %v3218_v22  ;;  %2359 = vrcp.f32 %v1628_v45 }
 0x27b   : > { %v2342_v42 = vpop.eup %2341  ;;  %v1719_v20 = vmul.f32 %v2340_v8, %v3224_v60  ;;  %2361 = vpow2.f32 %v1914_v18 }
 0x27c   : > { %v2344_v50 = vpop.eup %2343  ;;  %1754 = vst.msk [vmem:[%s3197_s18 + $0x90] sm:$0xff] %vm1735_vm3, %v1721_v36  ;;  %v1722_v56 = vmul.f32 %v2342_v42, %v3229_v19  ;;  %2363 = vpow2.f32 %v1912_v43 }
 0x27d   : > { %v2346_v62 = vpop.eup %2345  ;;  %1752 = vst.msk [vmem:[%s3197_s18 + $0x80] sm:$0xff] %vm1735_vm3, %v1719_v20  ;;  %v1720_v24 = vmul.f32 %v2344_v50, %v3233_v39  ;;  %2365 = vpow2.f32 %v1915_v32 }
 0x27e   : > { %v2348_v22 = vpop.eup %2347  ;;  %1755 = vst.msk [vmem:[%s3197_s18 + $0x98] sm:$0xff] %vm1735_vm3, %v1722_v56  ;;  %v1633_v35 = vadd.f32 1.0, %v2346_v62  ;;  %2367 = vpow2.f32 %v1913_v16 }
 0x27f   : > { %v2350_v51 = vpop.eup %2349  ;;  %1753 = vst.msk [vmem:[%s3197_s18 + $0x88] sm:$0xff] %vm1735_vm3, %v1720_v24  ;;  %v1631_v60 = vadd.f32 1.0, %v2348_v22 }
 0x280   : > { %v2352_v37 = vpop.eup %2351  ;;  %2369 = vrcp.f32 %v1633_v35  ;;  %v1634_v19 = vadd.f32 1.0, %v2350_v51 }
 0x281   : > { %v2354_v54 = vpop.eup %2353  ;;  %2371 = vrcp.f32 %v1631_v60  ;;  %v1632_v23 = vadd.f32 1.0, %v2352_v37 }
 0x282   : > { %v2356_v39 = vpop.eup %2355  ;;  %v1725_v10 = vmul.f32 %v2354_v54, %v3250_v27  ;;  %2373 = vrcp.f32 %v1634_v19 }
 0x283   : > { %v2358_v33 = vpop.eup %2357  ;;  %v1723_v55 = vmul.f32 %v2356_v39, %v3256_v2  ;;  %2375 = vrcp.f32 %v1632_v23 }
 0x284   : > { %v2360_v47 = vpop.eup %2359  ;;  %1758 = vst.msk [vmem:[%s3197_s18 + $0xb0] sm:$0xff] %vm1735_vm3, %v1725_v10  ;;  %v1726_v0 = vmul.f32 %v2358_v33, %v3261_v29 }
 0x285   : > { %v2362_v63 = vpop.eup %2361  ;;  %1756 = vst.msk [vmem:[%s3197_s18 + $0xa0] sm:$0xff] %vm1735_vm3, %v1723_v55  ;;  %v1724_v4 = vmul.f32 %v2360_v47, %v3265_v46 }
 0x286   : > { %v2364_v25 = vpop.eup %2363  ;;  %1759 = vst.msk [vmem:[%s3197_s18 + $0xb8] sm:$0xff] %vm1735_vm3, %v1726_v0  ;;  %v1637_v15 = vadd.f32 1.0, %v2362_v63 }
 0x287   : > { %v2366_v27 = vpop.eup %2365  ;;  %1757 = vst.msk [vmem:[%s3197_s18 + $0xa8] sm:$0xff] %vm1735_vm3, %v1724_v4  ;;  %v1635_v2 = vadd.f32 1.0, %v2364_v25 }
 0x288   : > { %v2368_v30 = vpop.eup %2367  ;;  %2377 = vrcp.f32 %v1637_v15  ;;  %v1638_v17 = vadd.f32 1.0, %v2366_v27 }
 0x289   : > { %2379 = vrcp.f32 %v1635_v2  ;;  %v1636_v29 = vadd.f32 1.0, %v2368_v30 }
 0x28a   : > { %v2370_v12 = vpop.eup %2369  ;;  %2381 = vrcp.f32 %v1638_v17 }
 0x28b   : > { %v2372_v46 = vpop.eup %2371  ;;  %v1729_v7 = vmul.f32 %v2370_v12, %v3280_v3  ;;  %2383 = vrcp.f32 %v1636_v29 }
 0x28c   : > { %v2374_v53 = vpop.eup %2373  ;;  %v1727_v26 = vmul.f32 %v2372_v46, %v3286_v13 }
 0x28d   : > { %v2376_v59 = vpop.eup %2375  ;;  %1762 = vst.msk [vmem:[%s3197_s18 + $0xd0] sm:$0xff] %vm1735_vm3, %v1729_v7  ;;  %v1730_v34 = vmul.f32 %v2374_v53, %v3293_v44 }
 0x28e   : > { %1760 = vst.msk [vmem:[%s3197_s18 + $0xc0] sm:$0xff] %vm1735_vm3, %v1727_v26  ;;  %v1728_v40 = vmul.f32 %v2376_v59, %v3297_v21 }
 0x28f   : > { %1763 = vst.msk [vmem:[%s3197_s18 + $0xd8] sm:$0xff] %vm1735_vm3, %v1730_v34 }
 0x290   : > { %1761 = vst.msk [vmem:[%s3197_s18 + $0xc8] sm:$0xff] %vm1735_vm3, %v1728_v40 }
 0x292   : > { %v2378_v3 = vpop.eup %2377 }
 0x293   : > { %v2380_v38 = vpop.eup %2379  ;;  %v1733_v13 = vmul.f32 %v2378_v3, %v3312_v28 }
 0x294   : > { %v2382_v48 = vpop.eup %2381  ;;  %v1731_v14 = vmul.f32 %v2380_v38, %v3318_v57 }
 0x295   : > { %v2384_v5 = vpop.eup %2383  ;;  %1766 = vst.msk [vmem:[%s3197_s18 + $0xf0] sm:$0xff] %vm1735_vm3, %v1733_v13  ;;  %v1734_v44 = vmul.f32 %v2382_v48, %v3324_v31 }
 0x296   : > { %1764 = vst.msk [vmem:[%s3197_s18 + $0xe0] sm:$0xff] %vm1735_vm3, %v1731_v14  ;;  %v1732_v21 = vmul.f32 %v2384_v5, %v3328_v58 }
 0x297   : > { %1767 = vst.msk [vmem:[%s3197_s18 + $0xf8] sm:$0xff] %vm1735_vm3, %v1734_v44 }
 0x298   : > { %1765 = vst.msk [vmem:[%s3197_s18 + $0xe8] sm:$0xff] %vm1735_vm3, %v1732_v21 }
 0x299 PF: > { %s22_s21 = sadd.s32 1, %s2391_s21  }
 0x29a   : > { %p19_p4 = scmp.ge.s32.totalorder %s22_s21, 4  }
 0x29c   :  { %21 = sbr.rel (!%p19_p4) target bundleno = 1 (0x1), region = 101 }

// kernel: c3_forward.3
= control target key start
LH: loop header
LB: loop body
LE: loop exit
PB: predicated region body
PF: predicated region fallthrough
CT: control target
= control target key end

     0   :  { %vm351_vm0 = vcmask 1043456   ;;  %vm254_vm1 = vcmask 64512   ;;  %vm1490_vm2 = vcmask 27648   ;;  %s5949_s1 = inlined_call_operand.vmem [shape: bf16[8,4], index: 1, kind: input, shape index: {}]   ;;  %s5950_s4 = inlined_call_operand.vmem [shape: bf16[8,4], index: 4, kind: input, shape index: {}]   ;;  %s5951_s0 = inlined_call_operand.vmem [shape: bf16[512,8], index: 0, kind: input, shape index: {}]   ;;  %s5952_s2 = inlined_call_operand.vmem [shape: f32[1,4], index: 2, kind: input, shape index: {}]   ;;  %s5953_s5 = inlined_call_operand.vmem [shape: f32[1,4], index: 5, kind: input, shape index: {}]   ;;  %s5954_s3 = inlined_call_operand.vmem [shape: f32[1,4], index: 3, kind: input, shape index: {}]   ;;  %s5955_s6 = inlined_call_operand.vmem [shape: f32[1,4], index: 6, kind: input, shape index: {}]   ;;  %s5956_s7 = inlined_call_operand.vmem [shape: bf16[512,4], index: 7, kind: output, shape index: {0}]   ;;  %s5957_s8 = inlined_call_operand.vmem [shape: bf16[512,4], index: 8, kind: output, shape index: {1}]  }
   0x1   :  { %v93_v0 = vld [vmem:[%s5949_s1] sm:$0xf]  ;;  %v3451_v5 = vld [vmem:[%s5951_s0 + $0x8] sm:$0xff]   ;;  %v3452_v6 = vld [vmem:[%s5951_s0 + $0x10] sm:$0xff]  }
   0x2   :  { %v1555_v1 = vld [vmem:[%s5950_s4] sm:$0xf]  ;;  %3448 = vmatprep.subr.msk.bf16.mxu0 %vm351_vm0, %v93_v0  ;;  %v353_v2 = vsel %vm351_vm0, %v93_v0, 0  ;;  %v3453_v7 = vld [vmem:[%s5951_s0 + $0x18] sm:$0xff]   ;;  %v3455_v9 = vld [vmem:[%s5951_s0 + $0x28] sm:$0xff]  }
   0x3   :  { %3449 = vmatprep.subr.msk.bf16.mxu1 %vm351_vm0, %v1555_v1  ;;  %v1557_v3 = vsel %vm351_vm0, %v1555_v1, 0  ;;  %v3450_v4 = vld [vmem:[%s5951_s0] sm:$0xff]   ;;  %3317 = vmatpush3.bf16.msra.mxu0 %v353_v2  ;;  %v3456_v10 = vld [vmem:[%s5951_s0 + $0x30] sm:$0xff]   ;;  %v3457_v11 = vld [vmem:[%s5951_s0 + $0x38] sm:$0xff]  }
   0x4   :  { %3383 = vmatpush3.bf16.msra.mxu1 %v1557_v3  ;;  %3318 = vmatprep.mubr.msk.bf16.mxu0 %vm254_vm1, %v3450_v4  ;;  %v3454_v8 = vld [vmem:[%s5951_s0 + $0x20] sm:$0xff]   ;;  %v3459_v13 = vld [vmem:[%s5951_s0 + $0x48] sm:$0xff]   ;;  %v3460_v14 = vld [vmem:[%s5951_s0 + $0x50] sm:$0xff]  }
   0x5   :  { %3384 = vmatprep.mubr.msk.bf16.mxu1 %vm254_vm1, %v3450_v4  ;;  %v3458_v12 = vld [vmem:[%s5951_s0 + $0x40] sm:$0xff]   ;;  %v3461_v15 = vld [vmem:[%s5951_s0 + $0x58] sm:$0xff]   ;;  %v3463_v17 = vld [vmem:[%s5951_s0 + $0x68] sm:$0xff]  }
   0x6   :  { %3319 = vmatmul.mubr.msk.bf16.vlgmr.msra.gmra.mrb[0].mxu0 %vm254_vm1, %v3451_v5  ;;  %v3462_v16 = vld [vmem:[%s5951_s0 + $0x60] sm:$0xff]   ;;  %v3464_v18 = vld [vmem:[%s5951_s0 + $0x70] sm:$0xff]   ;;  %v3465_v19 = vld [vmem:[%s5951_s0 + $0x78] sm:$0xff]  }
   0x7   :  { %3385 = vmatmul.mubr.msk.bf16.vlgmr.msra.gmra.mrb[0].mxu1 %vm254_vm1, %v3451_v5  ;;  %3322 = vmatprep.mubr.msk.bf16.mxu0 %vm254_vm1, %v3452_v6  ;;  %v3466_v20 = vld [vmem:[%s5951_s0 + $0x80] sm:$0xff]   ;;  %v3467_v21 = vld [vmem:[%s5951_s0 + $0x88] sm:$0xff]   ;;  %v3468_v22 = vld [vmem:[%s5951_s0 + $0x90] sm:$0xff]  }
   0x8   :  { %3388 = vmatprep.mubr.msk.bf16.mxu1 %vm254_vm1, %v3452_v6  ;;  %v3469_v23 = vld [vmem:[%s5951_s0 + $0x98] sm:$0xff]   ;;  %v3470_v24 = vld [vmem:[%s5951_s0 + $0xa0] sm:$0xff]   ;;  %v3471_v25 = vld [vmem:[%s5951_s0 + $0xa8] sm:$0xff]  }
   0x9   :  { %v3472_v26 = vld [vmem:[%s5951_s0 + $0xb0] sm:$0xff]   ;;  %v3473_v27 = vld [vmem:[%s5951_s0 + $0xb8] sm:$0xff]   ;;  %v3474_v28 = vld [vmem:[%s5951_s0 + $0xc0] sm:$0xff]  }
   0xa   :  { %v3475_v29 = vld [vmem:[%s5951_s0 + $0xc8] sm:$0xff]   ;;  %v3476_v30 = vld [vmem:[%s5951_s0 + $0xd0] sm:$0xff]   ;;  %v3477_v31 = vld [vmem:[%s5951_s0 + $0xd8] sm:$0xff]  }
   0xb   :  { %v3478_v32 = vld [vmem:[%s5951_s0 + $0xe0] sm:$0xff]   ;;  %v3479_v33 = vld [vmem:[%s5951_s0 + $0xe8] sm:$0xff]   ;;  %v3480_v34 = vld [vmem:[%s5951_s0 + $0xf0] sm:$0xff]  }
   0xc   :  { %v3481_v35 = vld [vmem:[%s5951_s0 + $0xf8] sm:$0xff]   ;;  %v4216_v36 = vld [vmem:[%s5952_s2] ss:$0 sm:$0xff] }
   0xd   :  { %v4221_v37 = vld [vmem:[%s5953_s5] ss:$0 sm:$0xff] }
   0xe   :  { %3323 = vmatmul.mubr.msk.bf16.gmra.mrb[4].mxu0 %vm254_vm1, %v3453_v7  ;;  %v4226_v39 = vld [vmem:[%s5954_s3] ss:$0 sm:$0xff] }
   0xf   :  { %3389 = vmatmul.mubr.msk.bf16.gmra.mrb[4].mxu1 %vm254_vm1, %v3453_v7  ;;  %3326 = vmatprep.mubr.msk.bf16.mxu0 %vm254_vm1, %v3454_v8  ;;  %v4231_v41 = vld [vmem:[%s5955_s6] ss:$0 sm:$0xff] }
  0x10   :  { %3392 = vmatprep.mubr.msk.bf16.mxu1 %vm254_vm1, %v3454_v8 }
  0x16   :  { %3327 = vmatmul.mubr.msk.bf16.gmra.mrb[8].mxu0 %vm254_vm1, %v3455_v9 }
  0x17   :  { %3393 = vmatmul.mubr.msk.bf16.gmra.mrb[8].mxu1 %vm254_vm1, %v3455_v9  ;;  %3330 = vmatprep.mubr.msk.bf16.mxu0 %vm254_vm1, %v3456_v10 }
  0x18   :  { %3396 = vmatprep.mubr.msk.bf16.mxu1 %vm254_vm1, %v3456_v10 }
  0x1e   :  { %3331 = vmatmul.mubr.msk.bf16.gmra.mrb[12].mxu0 %vm254_vm1, %v3457_v11 }
  0x1f   :  { %3397 = vmatmul.mubr.msk.bf16.gmra.mrb[12].mxu1 %vm254_vm1, %v3457_v11  ;;  %3334 = vmatprep.mubr.msk.bf16.mxu0 %vm254_vm1, %v3458_v12 }
  0x20   :  { %3400 = vmatprep.mubr.msk.bf16.mxu1 %vm254_vm1, %v3458_v12 }
  0x26   :  { %3335 = vmatmul.mubr.msk.bf16.gmra.mrb[16].mxu0 %vm254_vm1, %v3459_v13 }
  0x27   :  { %3401 = vmatmul.mubr.msk.bf16.gmra.mrb[16].mxu1 %vm254_vm1, %v3459_v13  ;;  %3338 = vmatprep.mubr.msk.bf16.mxu0 %vm254_vm1, %v3460_v14 }
  0x28   :  { %3404 = vmatprep.mubr.msk.bf16.mxu1 %vm254_vm1, %v3460_v14 }
  0x2e   :  { %3339 = vmatmul.mubr.msk.bf16.gmra.mrb[20].mxu0 %vm254_vm1, %v3461_v15 }
  0x2f   :  { %3405 = vmatmul.mubr.msk.bf16.gmra.mrb[20].mxu1 %vm254_vm1, %v3461_v15  ;;  %3342 = vmatprep.mubr.msk.bf16.mxu0 %vm254_vm1, %v3462_v16 }
  0x30   :  { %3408 = vmatprep.mubr.msk.bf16.mxu1 %vm254_vm1, %v3462_v16 }
  0x36   :  { %3343 = vmatmul.mubr.msk.bf16.gmra.mrb[24].mxu0 %vm254_vm1, %v3463_v17 }
  0x37   :  { %3409 = vmatmul.mubr.msk.bf16.gmra.mrb[24].mxu1 %vm254_vm1, %v3463_v17  ;;  %3346 = vmatprep.mubr.msk.bf16.mxu0 %vm254_vm1, %v3464_v18 }
  0x38   :  { %3412 = vmatprep.mubr.msk.bf16.mxu1 %vm254_vm1, %v3464_v18 }
  0x3e   :  { %3347 = vmatmul.mubr.msk.bf16.gmra.mrb[28].mxu0 %vm254_vm1, %v3465_v19 }
  0x3f   :  { %3413 = vmatmul.mubr.msk.bf16.gmra.mrb[28].mxu1 %vm254_vm1, %v3465_v19  ;;  %3350 = vmatprep.mubr.msk.bf16.mxu0 %vm254_vm1, %v3466_v20 }
  0x40   :  { %3416 = vmatprep.mubr.msk.bf16.mxu1 %vm254_vm1, %v3466_v20 }
  0x46   :  { %3351 = vmatmul.mubr.msk.bf16.gmra.mrb[32].mxu0 %vm254_vm1, %v3467_v21 }
  0x47   :  { %3417 = vmatmul.mubr.msk.bf16.gmra.mrb[32].mxu1 %vm254_vm1, %v3467_v21  ;;  %3354 = vmatprep.mubr.msk.bf16.mxu0 %vm254_vm1, %v3468_v22 }
  0x48   :  { %3420 = vmatprep.mubr.msk.bf16.mxu1 %vm254_vm1, %v3468_v22 }
  0x4e   :  { %3355 = vmatmul.mubr.msk.bf16.gmra.mrb[36].mxu0 %vm254_vm1, %v3469_v23 }
  0x4f   :  { %3421 = vmatmul.mubr.msk.bf16.gmra.mrb[36].mxu1 %vm254_vm1, %v3469_v23  ;;  %3358 = vmatprep.mubr.msk.bf16.mxu0 %vm254_vm1, %v3470_v24 }
  0x50   :  { %3424 = vmatprep.mubr.msk.bf16.mxu1 %vm254_vm1, %v3470_v24 }
  0x56   :  { %3359 = vmatmul.mubr.msk.bf16.gmra.mrb[40].mxu0 %vm254_vm1, %v3471_v25 }
  0x57   :  { %3425 = vmatmul.mubr.msk.bf16.gmra.mrb[40].mxu1 %vm254_vm1, %v3471_v25  ;;  %3362 = vmatprep.mubr.msk.bf16.mxu0 %vm254_vm1, %v3472_v26 }
  0x58   :  { %3428 = vmatprep.mubr.msk.bf16.mxu1 %vm254_vm1, %v3472_v26 }
  0x5e   :  { %3363 = vmatmul.mubr.msk.bf16.gmra.mrb[44].mxu0 %vm254_vm1, %v3473_v27 }
  0x5f   :  { %3429 = vmatmul.mubr.msk.bf16.gmra.mrb[44].mxu1 %vm254_vm1, %v3473_v27  ;;  %3366 = vmatprep.mubr.msk.bf16.mxu0 %vm254_vm1, %v3474_v28 }
  0x60   :  { %3432 = vmatprep.mubr.msk.bf16.mxu1 %vm254_vm1, %v3474_v28 }
  0x66   :  { %3367 = vmatmul.mubr.msk.bf16.gmra.mrb[48].mxu0 %vm254_vm1, %v3475_v29 }
  0x67   :  { %3433 = vmatmul.mubr.msk.bf16.gmra.mrb[48].mxu1 %vm254_vm1, %v3475_v29  ;;  %3370 = vmatprep.mubr.msk.bf16.mxu0 %vm254_vm1, %v3476_v30 }
  0x68   :  { %3436 = vmatprep.mubr.msk.bf16.mxu1 %vm254_vm1, %v3476_v30 }
  0x6e   :  { %3371 = vmatmul.mubr.msk.bf16.gmra.mrb[52].mxu0 %vm254_vm1, %v3477_v31 }
  0x6f   :  { %3437 = vmatmul.mubr.msk.bf16.gmra.mrb[52].mxu1 %vm254_vm1, %v3477_v31  ;;  %3374 = vmatprep.mubr.msk.bf16.mxu0 %vm254_vm1, %v3478_v32 }
  0x70   :  { %3440 = vmatprep.mubr.msk.bf16.mxu1 %vm254_vm1, %v3478_v32 }
  0x76   :  { %3375 = vmatmul.mubr.msk.bf16.gmra.mrb[56].mxu0 %vm254_vm1, %v3479_v33 }
  0x77   :  { %3441 = vmatmul.mubr.msk.bf16.gmra.mrb[56].mxu1 %vm254_vm1, %v3479_v33  ;;  %3378 = vmatprep.mubr.msk.bf16.mxu0 %vm254_vm1, %v3480_v34 }
  0x78   :  { %3444 = vmatprep.mubr.msk.bf16.mxu1 %vm254_vm1, %v3480_v34 }
  0x7e   :  { %3379 = vmatmul.mubr.msk.bf16.gmra.mrb[60].mxu0 %vm254_vm1, %v3481_v35 }
  0x7f   :  { %3445 = vmatmul.mubr.msk.bf16.gmra.mrb[60].mxu1 %vm254_vm1, %v3481_v35 }
  0xd9   :  { %v3320_v38 = vpop.f32.mrb[0].mxu0 }
  0xda   :  { %v3386_v40 = vpop.f32.mrb[0].mxu1  ;;  %v653_v42 = vmul.f32 %v3320_v38, %v4216_v36  ;;  %v389_v44 = vpop.f32.mrb[1].mxu0 }
  0xdb   :  { %v1857_v43 = vmul.f32 %v3386_v40, %v4221_v37  ;;  %v1593_v45 = vpop.f32.mrb[1].mxu1  ;;  %v651_v46 = vmul.f32 %v4216_v36, %v389_v44  ;;  %v3321_v48 = vpop.f32.mrb[2].mxu0 }
  0xdc   :  { %v1855_v47 = vmul.f32 %v4221_v37, %v1593_v45  ;;  %v3387_v49 = vpop.f32.mrb[2].mxu1  ;;  %v4238_v50 = vadd.f32 %v4226_v39, %v653_v42  ;;  %v654_v52 = vmul.f32 %v3321_v48, %v4216_v36  ;;  %v392_v54 = vpop.f32.mrb[3].mxu0 }
  0xdd   :  { %v4241_v51 = vadd.f32 %v4231_v41, %v1857_v43  ;;  %v1858_v53 = vmul.f32 %v3387_v49, %v4221_v37  ;;  %v1596_v55 = vpop.f32.mrb[3].mxu1  ;;  %v4246_v56 = vadd.f32 %v4226_v39, %v651_v46  ;;  %v652_v58 = vmul.f32 %v4216_v36, %v392_v54 }
  0xde   :  { %v4249_v57 = vadd.f32 %v4231_v41, %v1855_v47  ;;  %v1856_v59 = vmul.f32 %v4221_v37, %v1596_v55  ;;  %v2834_v60 = vmul.f32 -1.442695, %v4238_v50  ;;  %v4256_v62 = vadd.f32 %v4226_v39, %v654_v52 }
  0xdf   :  { %v2996_v61 = vmul.f32 -1.442695, %v4241_v51  ;;  %v4259_v63 = vadd.f32 %v4231_v41, %v1858_v53  ;;  %v2832_v0 = vmul.f32 -1.442695, %v4246_v56  ;;  %v4264_v2 = vadd.f32 %v4226_v39, %v652_v58 }
  0xe0   :  { %v2994_v1 = vmul.f32 -1.442695, %v4249_v57  ;;  %v4267_v3 = vadd.f32 %v4231_v41, %v1856_v59  ;;  %3482 = vpow2.f32 %v2834_v60  ;;  %v2835_v4 = vmul.f32 -1.442695, %v4256_v62 }
  0xe1   :  { %3484 = vpow2.f32 %v2996_v61  ;;  %v2997_v5 = vmul.f32 -1.442695, %v4259_v63  ;;  %v3324_v6 = vpop.f32.mrb[4].mxu0  ;;  %v2833_v8 = vmul.f32 -1.442695, %v4264_v2 }
  0xe2   :  { %v3390_v7 = vpop.f32.mrb[4].mxu1  ;;  %3486 = vpow2.f32 %v2832_v0  ;;  %v657_v9 = vmul.f32 %v3324_v6, %v4216_v36  ;;  %v405_v11 = vpop.f32.mrb[5].mxu0  ;;  %v2995_v13 = vmul.f32 -1.442695, %v4267_v3 }
  0xe3   :  { %v1861_v10 = vmul.f32 %v3390_v7, %v4221_v37  ;;  %v1609_v12 = vpop.f32.mrb[5].mxu1  ;;  %3488 = vpow2.f32 %v2994_v1  ;;  %v655_v14 = vmul.f32 %v4216_v36, %v405_v11  ;;  %v3325_v16 = vpop.f32.mrb[6].mxu0 }
  0xe4   :  { %v1859_v15 = vmul.f32 %v4221_v37, %v1609_v12  ;;  %v3391_v17 = vpop.f32.mrb[6].mxu1  ;;  %3490 = vpow2.f32 %v2835_v4  ;;  %v4278_v18 = vadd.f32 %v4226_v39, %v657_v9  ;;  %v658_v20 = vmul.f32 %v3325_v16, %v4216_v36  ;;  %v408_v21 = vpop.f32.mrb[7].mxu0 }
  0xe5   :  { %v4281_v19 = vadd.f32 %v4231_v41, %v1861_v10  ;;  %v1612_v22 = vpop.f32.mrb[7].mxu1  ;;  %3492 = vpow2.f32 %v2997_v5  ;;  %v4285_v23 = vadd.f32 %v4226_v39, %v655_v14  ;;  %v1862_v25 = vmul.f32 %v3391_v17, %v4221_v37 }
  0xe6   :  { %v4288_v24 = vadd.f32 %v4231_v41, %v1859_v15  ;;  %3494 = vpow2.f32 %v2833_v8  ;;  %v2838_v26 = vmul.f32 -1.442695, %v4278_v18  ;;  %v4294_v28 = vadd.f32 %v4226_v39, %v658_v20 }
  0xe7   :  { %v3000_v27 = vmul.f32 -1.442695, %v4281_v19  ;;  %3496 = vpow2.f32 %v2995_v13  ;;  %v2836_v29 = vmul.f32 -1.442695, %v4285_v23  ;;  %v656_v32 = vmul.f32 %v4216_v36, %v408_v21 }
  0xe8   :  { %v2998_v30 = vmul.f32 -1.442695, %v4288_v24  ;;  %3498 = vpow2.f32 %v2838_v26  ;;  %v2839_v31 = vmul.f32 -1.442695, %v4294_v28  ;;  %v1860_v33 = vmul.f32 %v4221_v37, %v1612_v22 }
  0xe9   :  { %3500 = vpow2.f32 %v3000_v27  ;;  %v4302_v34 = vadd.f32 %v4231_v41, %v1862_v25  ;;  %v3328_v35 = vpop.f32.mrb[8].mxu0  ;;  %v4305_v42 = vadd.f32 %v4226_v39, %v656_v32 }
  0xea   :  { %v3394_v38 = vpop.f32.mrb[8].mxu1  ;;  %v3483_v40 = vpop.eup %3482  ;;  %3502 = vpow2.f32 %v2836_v29  ;;  %v4308_v47 = vadd.f32 %v4231_v41, %v1860_v33  ;;  %v661_v48 = vmul.f32 %v3328_v35, %v4216_v36 }
  0xeb   :  { %v421_v43 = vpop.f32.mrb[9].mxu0  ;;  %v1625_v44 = vpop.f32.mrb[9].mxu1  ;;  %v980_v46 = vadd.f32 1.0, %v3483_v40  ;;  %3504 = vpow2.f32 %v2998_v30  ;;  %v1865_v55 = vmul.f32 %v3394_v38, %v4221_v37  ;;  %v4314_v0 = vmul.f32 -1.442695, %v4302_v34 }
  0xec   :  { %v3485_v45 = vpop.eup %3484  ;;  %v3329_v49 = vpop.f32.mrb[10].mxu0  ;;  %3506 = vpow2.f32 %v2839_v31  ;;  %v659_v58 = vmul.f32 %v4216_v36, %v421_v43  ;;  %v4317_v6 = vmul.f32 -1.442695, %v4305_v42  ;;  %v1863_v7 = vmul.f32 %v4221_v37, %v1625_v44 }
  0xed   :  { %v3395_v52 = vpop.f32.mrb[10].mxu1  ;;  %v3487_v53 = vpop.eup %3486  ;;  %v2184_v54 = vadd.f32 1.0, %v3485_v45  ;;  %3508 = vrcp.f32 %v980_v46  ;;  %v4321_v10 = vmul.f32 -1.442695, %v4308_v47  ;;  %v4324_v11 = vadd.f32 %v4226_v39, %v661_v48 }
  0xee   :  { %v424_v59 = vpop.f32.mrb[11].mxu0  ;;  %v3489_v60 = vpop.eup %3488  ;;  %v978_v61 = vadd.f32 1.0, %v3487_v53  ;;  %v4327_v14 = vadd.f32 %v4231_v41, %v1865_v55  ;;  %v4330_v15 = vadd.f32 %v4226_v39, %v659_v58  ;;  %v662_v20 = vmul.f32 %v3329_v49, %v4216_v36 }
  0xef   :  { %v1628_v1 = vpop.f32.mrb[11].mxu1  ;;  %v3491_v4 = vpop.eup %3490  ;;  %3510 = vrcp.f32 %v2184_v54  ;;  %v2182_v5 = vadd.f32 1.0, %v3489_v60  ;;  %v1866_v21 = vmul.f32 %v3395_v52, %v4221_v37  ;;  %v4335_v29 = vadd.f32 %v4231_v41, %v1863_v7 }
  0xf0   :  { %v3493_v8 = vpop.eup %3492  ;;  %3512 = vrcp.f32 %v978_v61  ;;  %v981_v9 = vadd.f32 1.0, %v3491_v4  ;;  %v660_v30 = vmul.f32 %v4216_v36, %v424_v59  ;;  %v4341_v38 = vmul.f32 -1.442695, %v4324_v11 }
  0xf1   :  { %v3495_v12 = vpop.eup %3494  ;;  %3514 = vrcp.f32 %v2182_v5  ;;  %v2185_v13 = vadd.f32 1.0, %v3493_v8  ;;  %v3332_v22 = vpop.f32.mrb[12].mxu0  ;;  %v4344_v40 = vadd.f32 %v4226_v39, %v662_v20  ;;  %v4351_v48 = vadd.f32 %v4231_v41, %v1866_v21 }
  0xf2   :  { %v3497_v16 = vpop.eup %3496  ;;  %3516 = vrcp.f32 %v981_v9  ;;  %v979_v17 = vadd.f32 1.0, %v3495_v12  ;;  %v3398_v25 = vpop.f32.mrb[12].mxu1  ;;  %v1864_v49 = vmul.f32 %v4221_v37, %v1628_v1  ;;  %v3004_v58 = vmul.f32 -1.442695, %v4327_v14 }
  0xf3   :  { %v3499_v26 = vpop.eup %3498  ;;  %3518 = vrcp.f32 %v2185_v13  ;;  %v2183_v27 = vadd.f32 1.0, %v3497_v16  ;;  %v437_v31 = vpop.f32.mrb[13].mxu0  ;;  %v4360_v59 = vadd.f32 %v4226_v39, %v660_v30  ;;  %v2840_v4 = vmul.f32 -1.442695, %v4330_v15 }
  0xf4   :  { %v4338_v32 = vpop.f32.mrb[13].mxu1  ;;  %v3501_v33 = vpop.eup %3500  ;;  %3520 = vrcp.f32 %v979_v17  ;;  %v984_v35 = vadd.f32 1.0, %v3499_v26  ;;  %v4364_v5 = vmul.f32 -1.442695, %v4335_v29  ;;  %v4367_v8 = vmul.f32 -1.442695, %v4344_v40 }
  0xf5   :  { %v4346_v43 = vpop.f32.mrb[14].mxu0  ;;  %v4348_v44 = vpop.f32.mrb[14].mxu1  ;;  %3522 = vrcp.f32 %v2183_v27  ;;  %v2188_v46 = vadd.f32 1.0, %v3501_v33  ;;  %v4370_v9 = vadd.f32 %v4231_v41, %v1864_v49  ;;  %v4374_v16 = vmul.f32 -1.442695, %v4351_v48 }
  0xf6   :  { %v3503_v45 = vpop.eup %3502  ;;  %v4354_v52 = vpop.f32.mrb[15].mxu0  ;;  %3524 = vrcp.f32 %v984_v35  ;;  %v665_v17 = vmul.f32 %v3332_v22, %v4216_v36  ;;  %v4379_v26 = vmul.f32 -1.442695, %v4360_v59  ;;  %v1869_v27 = vmul.f32 %v3398_v25, %v4221_v37 }
  0xf7   :  { %v4356_v53 = vpop.f32.mrb[15].mxu1  ;;  %v3505_v54 = vpop.eup %3504  ;;  %v982_v55 = vadd.f32 1.0, %v3503_v45  ;;  %3526 = vrcp.f32 %v2188_v46  ;;  %v663_v22 = vmul.f32 %v4216_v36, %v437_v31 }
  0xf8   :  { %v3507_v60 = vpop.eup %3506  ;;  %v2186_v61 = vadd.f32 1.0, %v3505_v54 }
  0xf9   :  { %v3509_v1 = vpop.eup %3508  ;;  %3528 = vrcp.f32 %v982_v55  ;;  %v985_v7 = vadd.f32 1.0, %v3507_v60  ;;  %v4382_v30 = vpop.f32.mrb[16].mxu0  ;;  %v4396_v55 = vmul.f32 -1.442695, %v4370_v9 }
  0xfa   :  { %v3511_v12 = vpop.eup %3510  ;;  %v1172_v13 = vmul.f32 %v3509_v1, %v4238_v50  ;;  %3530 = vrcp.f32 %v2186_v61  ;;  %v4384_v33 = vpop.f32.mrb[16].mxu1 }
  0xfb   :  { %v3513_v20 = vpop.eup %3512  ;;  %v2376_v21 = vmul.f32 %v3511_v12, %v4241_v51  ;;  %3532 = vrcp.f32 %v985_v7  ;;  %v4389_v46 = vpop.f32.mrb[17].mxu0 }
  0xfc   :  { %v3515_v50 = vpop.eup %3514  ;;  %v3124_v35 = vpack.c.bf16 %v1172_v13, %v1172_v13  ;;  %v1170_v45 = vmul.f32 %v3513_v20, %v4246_v56  ;;  %3534 = vpow2.f32 %v4314_v0  ;;  %v4391_v51 = vpop.f32.mrb[17].mxu1 }
  0xfd   :  { %v3517_v49 = vpop.eup %3516  ;;  %v3188_v54 = vpack.c.bf16 %v2376_v21, %v2376_v21  ;;  %v2374_v25 = vmul.f32 %v3515_v50, %v4249_v57  ;;  %3536 = vpow2.f32 %v4317_v6  ;;  %v4398_v60 = vpop.f32.mrb[18].mxu0  ;;  %v4409_v57 = vadd.f32 %v4226_v39, %v665_v17 }
  0xfe   :  { %v4400_v56 = vpop.f32.mrb[18].mxu1  ;;  %v3519_v0 = vpop.eup %3518  ;;  %1493 = vst.msk [vmem:[%s5956_s7 + $0x8] sm:$0xf] %vm1490_vm2, %v3124_v35  ;;  %v3122_v31 = vpack.c.bf16 %v1170_v45, %v1170_v45  ;;  %v1173_v61 = vmul.f32 %v3517_v49, %v4256_v62  ;;  %3538 = vpow2.f32 %v4321_v10  ;;  %v4422_v62 = vadd.f32 %v4231_v41, %v1869_v27 }
  0xff   :  { %v4411_v6 = vpop.f32.mrb[19].mxu0  ;;  %v4413_v1 = vpop.f32.mrb[19].mxu1  ;;  %2696 = vst.msk [vmem:[%s5957_s8 + $0x8] sm:$0xf] %vm1490_vm2, %v3188_v54  ;;  %v3186_v12 = vpack.c.bf16 %v2374_v25, %v2374_v25  ;;  %v2377_v13 = vmul.f32 %v3519_v0, %v4259_v63  ;;  %3540 = vpow2.f32 %v4341_v38  ;;  %v4430_v21 = vadd.f32 %v4226_v39, %v663_v22 }
 0x100   :  { %v3521_v7 = vpop.eup %3520  ;;  %1491 = vst.msk [vmem:[%s5956_s7] sm:$0xf] %vm1490_vm2, %v3122_v31  ;;  %v3125_v17 = vpack.c.bf16 %v1173_v61, %v1173_v61  ;;  %3542 = vpow2.f32 %v3004_v58  ;;  %v1867_v27 = vmul.f32 %v4221_v37, %v4338_v32  ;;  %v2846_v45 = vmul.f32 -1.442695, %v4409_v57 }
 0x101   :  { %v3523_v10 = vpop.eup %3522  ;;  %v1171_v20 = vmul.f32 %v3521_v7, %v4264_v2  ;;  %2694 = vst.msk [vmem:[%s5957_s8] sm:$0xf] %vm1490_vm2, %v3186_v12  ;;  %v3189_v63 = vpack.c.bf16 %v2377_v13, %v2377_v13  ;;  %3544 = vpow2.f32 %v2840_v4  ;;  %v3008_v4 = vmul.f32 -1.442695, %v4422_v62  ;;  %v4453_v49 = vpop.f32.mrb[20].mxu0 }
 0x102   :  { %v3525_v50 = vpop.eup %3524  ;;  %v2375_v38 = vmul.f32 %v3523_v10, %v4267_v3  ;;  %1494 = vst.msk [vmem:[%s5956_s7 + $0xc] sm:$0xf] %vm1490_vm2, %v3125_v17  ;;  %3546 = vpow2.f32 %v4364_v5 }
 0x103   :  { %v3527_v35 = vpop.eup %3526  ;;  %v3123_v2 = vpack.c.bf16 %v1171_v20, %v1171_v20  ;;  %v1176_v58 = vmul.f32 %v3525_v50, %v4278_v18  ;;  %2697 = vst.msk [vmem:[%s5957_s8 + $0xc] sm:$0xf] %vm1490_vm2, %v3189_v63  ;;  %3548 = vpow2.f32 %v4367_v8  ;;  %v4455_v18 = vpop.f32.mrb[20].mxu1 }
 0x104   :  { %v3529_v22 = vpop.eup %3528  ;;  %v3187_v3 = vpack.c.bf16 %v2375_v38, %v2375_v38  ;;  %v2380_v32 = vmul.f32 %v3527_v35, %v4281_v19  ;;  %3550 = vpow2.f32 %v4374_v16  ;;  %v666_v19 = vmul.f32 %v4346_v43, %v4216_v36  ;;  %v4465_v8 = vpop.f32.mrb[21].mxu0 }
 0x105   :  { %v3531_v5 = vpop.eup %3530  ;;  %1492 = vst.msk [vmem:[%s5956_s7 + $0x4] sm:$0xf] %vm1490_vm2, %v3123_v2  ;;  %v3128_v54 = vpack.c.bf16 %v1176_v58, %v1176_v58  ;;  %v1174_v25 = vmul.f32 %v3529_v22, %v4285_v23  ;;  %v4467_v0 = vpop.f32.mrb[21].mxu1  ;;  %3552 = vpow2.f32 %v4379_v26  ;;  %v4476_v23 = vadd.f32 %v4231_v41, %v1867_v27 }
 0x106   :  { %v3533_v31 = vpop.eup %3532  ;;  %2695 = vst.msk [vmem:[%s5957_s8 + $0x4] sm:$0xf] %vm1490_vm2, %v3187_v3  ;;  %v3192_v61 = vpack.c.bf16 %v2380_v32, %v2380_v32  ;;  %v2378_v7 = vmul.f32 %v3531_v5, %v4288_v24  ;;  %v4478_v16 = vpop.f32.mrb[22].mxu0  ;;  %3554 = vpow2.f32 %v4396_v55  ;;  %v1870_v24 = vmul.f32 %v4348_v44, %v4221_v37 }
 0x107   :  { %v4480_v43 = vpop.f32.mrb[22].mxu1  ;;  %v3535_v12 = vpop.eup %3534  ;;  %1497 = vst.msk [vmem:[%s5956_s7 + $0x18] sm:$0xf] %vm1490_vm2, %v3128_v54  ;;  %v3126_v13 = vpack.c.bf16 %v1174_v25, %v1174_v25  ;;  %v1177_v10 = vmul.f32 %v3533_v31, %v4294_v28  ;;  %3556 = vpow2.f32 %v2846_v45  ;;  %v664_v28 = vmul.f32 %v4216_v36, %v4354_v52 }
 0x108   :  { %v4490_v26 = vpop.f32.mrb[23].mxu0  ;;  %v4492_v17 = vpop.f32.mrb[23].mxu1  ;;  %2700 = vst.msk [vmem:[%s5957_s8 + $0x18] sm:$0xf] %vm1490_vm2, %v3192_v61  ;;  %v3190_v50 = vpack.c.bf16 %v2378_v7, %v2378_v7  ;;  %v2189_v63 = vadd.f32 1.0, %v3535_v12  ;;  %3558 = vpow2.f32 %v3008_v4  ;;  %v4505_v27 = vadd.f32 %v4226_v39, %v666_v19 }
 0x109   :  { %v3537_v20 = vpop.eup %3536  ;;  %1495 = vst.msk [vmem:[%s5956_s7 + $0x10] sm:$0xf] %vm1490_vm2, %v3126_v13  ;;  %v3129_v44 = vpack.c.bf16 %v1177_v10, %v1177_v10  ;;  %v4512_v2 = vmul.f32 -1.442695, %v4430_v21  ;;  %v4515_v58 = vadd.f32 %v4231_v41, %v1870_v24  ;;  %v4522_v3 = vadd.f32 %v4226_v39, %v664_v28  ;;  %v4531_v19 = vpop.f32.mrb[24].mxu0 }
 0x10a   :  { %v3539_v55 = vpop.eup %3538  ;;  %v983_v38 = vadd.f32 1.0, %v3537_v20  ;;  %2698 = vst.msk [vmem:[%s5957_s8 + $0x10] sm:$0xf] %vm1490_vm2, %v3190_v50  ;;  %3560 = vrcp.f32 %v2189_v63  ;;  %v1868_v32 = vmul.f32 %v4221_v37, %v4356_v53  ;;  %v4527_v54 = vmul.f32 -1.442695, %v4476_v23  ;;  %v4533_v31 = vpop.f32.mrb[24].mxu1 }
 0x10b   :  { %v3541_v35 = vpop.eup %3540  ;;  %v2187_v52 = vadd.f32 1.0, %v3539_v55  ;;  %1498 = vst.msk [vmem:[%s5956_s7 + $0x1c] sm:$0xf] %vm1490_vm2, %v3129_v44  ;;  %v669_v25 = vmul.f32 %v4382_v30, %v4216_v36  ;;  %v4536_v12 = vmul.f32 -1.442695, %v4505_v27  ;;  %v1873_v53 = vmul.f32 %v4384_v33, %v4221_v37  ;;  %v4540_v13 = vpop.f32.mrb[25].mxu0 }
 0x10c   :  { %v3543_v45 = vpop.eup %3542  ;;  %3562 = vrcp.f32 %v983_v38  ;;  %v988_v22 = vadd.f32 1.0, %v3541_v35  ;;  %v4542_v10 = vpop.f32.mrb[25].mxu1  ;;  %v4545_v20 = vmul.f32 -1.442695, %v4515_v58  ;;  %v667_v50 = vmul.f32 %v4216_v36, %v4389_v46 }
 0x10d   :  { %v3545_v4 = vpop.eup %3544  ;;  %3564 = vrcp.f32 %v2187_v52  ;;  %v2192_v5 = vadd.f32 1.0, %v3543_v45  ;;  %v4549_v63 = vpop.f32.mrb[26].mxu0  ;;  %v4554_v44 = vmul.f32 -1.442695, %v4522_v3  ;;  %v4557_v38 = vadd.f32 %v4231_v41, %v1868_v32 }
 0x10e   :  { %v3547_v61 = vpop.eup %3546  ;;  %3566 = vrcp.f32 %v988_v22  ;;  %v986_v7 = vadd.f32 1.0, %v3545_v4  ;;  %v4551_v28 = vpop.f32.mrb[26].mxu1  ;;  %v4564_v22 = vadd.f32 %v4226_v39, %v669_v25  ;;  %v1871_v4 = vmul.f32 %v4221_v37, %v4391_v51 }
 0x10f   :  { %v3549_v24 = vpop.eup %3548  ;;  %3568 = vrcp.f32 %v2192_v5  ;;  %v2190_v30 = vadd.f32 1.0, %v3547_v61  ;;  %5960 = vst [vmem:[#allocation2_spill] sm:$0xff] %v4551_v28  ;;  %v4559_v35 = vpop.f32.mrb[27].mxu0  ;;  %v670_v32 = vmul.f32 %v4398_v60, %v4216_v36 }
 0x110   :  { %v3551_v55 = vpop.eup %3550  ;;  %3570 = vrcp.f32 %v986_v7  ;;  %v989_v33 = vadd.f32 1.0, %v3549_v24  ;;  %5961 = vst [vmem:[#allocation3_spill] sm:$0xff] %v4559_v35  ;;  %v4561_v52 = vpop.f32.mrb[27].mxu1  ;;  %v4569_v7 = vadd.f32 %v4231_v41, %v1873_v53  ;;  %v4577_v25 = vadd.f32 %v4231_v41, %v1871_v4 }
 0x111   :  { %5962 = vst [vmem:[#allocation4_spill] sm:$0xff] %v4561_v52  ;;  %v3553_v45 = vpop.eup %3552  ;;  %3572 = vrcp.f32 %v2190_v30  ;;  %v2193_v46 = vadd.f32 1.0, %v3551_v55  ;;  %v4574_v30 = vadd.f32 %v4226_v39, %v667_v50  ;;  %v1874_v53 = vmul.f32 %v4400_v56, %v4221_v37 }
 0x112   :  { %v3555_v5 = vpop.eup %3554  ;;  %3574 = vrcp.f32 %v989_v33  ;;  %v987_v61 = vadd.f32 1.0, %v3553_v45  ;;  %5963 = vst [vmem:[#allocation5_spill] sm:$0xff] %v4569_v7  ;;  %5964 = vst [vmem:[#allocation6_spill] sm:$0xff] %v4577_v25  ;;  %v3007_v33 = vmul.f32 -1.442695, %v4557_v38  ;;  %v668_v50 = vmul.f32 %v4216_v36, %v4411_v6  ;;  %v4587_v4 = vpop.f32.mrb[28].mxu1 }
 0x113   :  { %v3557_v24 = vpop.eup %3556  ;;  %3576 = vrcp.f32 %v2193_v46  ;;  %v2191_v52 = vadd.f32 1.0, %v3555_v5  ;;  %v2850_v46 = vmul.f32 -1.442695, %v4564_v22  ;;  %v4585_v5 = vpop.f32.mrb[28].mxu0  ;;  %5966 = vst [vmem:[#allocation8_spill] sm:$0xff] %v4587_v4  ;;  %v4592_v56 = vadd.f32 %v4226_v39, %v670_v32 }
 0x114   :  { %v3559_v55 = vpop.eup %3558  ;;  %3578 = vrcp.f32 %v987_v61  ;;  %v992_v51 = vadd.f32 1.0, %v3557_v24  ;;  %5965 = vst [vmem:[#allocation7_spill] sm:$0xff] %v4585_v5  ;;  %v3012_v24 = vmul.f32 -1.442695, %v4569_v7  ;;  %v2848_v5 = vmul.f32 -1.442695, %v4574_v30 }
 0x115   :  { %v3561_v45 = vpop.eup %3560  ;;  %3580 = vrcp.f32 %v2191_v52  ;;  %v2196_v60 = vadd.f32 1.0, %v3559_v55  ;;  %v4594_v52 = vpop.f32.mrb[29].mxu0  ;;  %v4601_v4 = vmul.f32 -1.442695, %v4577_v25 }
 0x116   :  { %v3563_v35 = vpop.eup %3562  ;;  %v2381_v61 = vmul.f32 %v3561_v45, %v4302_v34  ;;  %3582 = vrcp.f32 %v992_v51  ;;  %5967 = vst [vmem:[#allocation9_spill] sm:$0xff] %v4594_v52  ;;  %v4596_v55 = vpop.f32.mrb[29].mxu1 }
 0x117   :  { %5968 = vst [vmem:[#allocation10_spill] sm:$0xff] %v4596_v55  ;;  %v3565_v28 = vpop.eup %3564  ;;  %v1175_v6 = vmul.f32 %v3563_v35, %v4305_v42  ;;  %3584 = vrcp.f32 %v2196_v60  ;;  %v4603_v34 = vpop.f32.mrb[30].mxu0  ;;  %v4610_v55 = vadd.f32 %v4231_v41, %v1874_v53 }
 0x118   :  { %v4605_v51 = vpop.f32.mrb[30].mxu1  ;;  %v3567_v45 = vpop.eup %3566  ;;  %v3193_v32 = vpack.c.bf16 %v2381_v61, %v2381_v61  ;;  %v2379_v7 = vmul.f32 %v3565_v28, %v4308_v47  ;;  %3586 = vpow2.f32 %v4512_v2  ;;  %v2851_v28 = vmul.f32 -1.442695, %v4592_v56 }
 0x119   :  { %5969 = vst [vmem:[#allocation11_spill] sm:$0xff] %v4605_v51  ;;  %v4612_v42 = vpop.f32.mrb[31].mxu0  ;;  %v4614_v35 = vpop.f32.mrb[31].mxu1  ;;  %v3127_v52 = vpack.c.bf16 %v1175_v6, %v1175_v6  ;;  %v1180_v25 = vmul.f32 %v3567_v45, %v4324_v11  ;;  %3588 = vpow2.f32 %v4527_v54  ;;  %v4619_v51 = vadd.f32 %v4226_v39, %v668_v50 }
 0x11a   :  { %v3569_v60 = vpop.eup %3568  ;;  %2701 = vst.msk [vmem:[%s5957_s8 + $0x1c] sm:$0xf] %vm1490_vm2, %v3193_v32  ;;  %v3191_v47 = vpack.c.bf16 %v2379_v7, %v2379_v7  ;;  %3590 = vpow2.f32 %v4536_v12  ;;  %v1872_v7 = vmul.f32 %v4221_v37, %v4413_v1  ;;  %v4649_v6 = vpop.f32.mrb[32].mxu0 }
 0x11b   :  { %v3571_v61 = vpop.eup %3570  ;;  %v2384_v2 = vmul.f32 %v3569_v60, %v4327_v14  ;;  %1496 = vst.msk [vmem:[%s5956_s7 + $0x14] sm:$0xf] %vm1490_vm2, %v3127_v52  ;;  %v3132_v11 = vpack.c.bf16 %v1180_v25, %v1180_v25  ;;  %3592 = vpow2.f32 %v4545_v20  ;;  %v3013_v25 = vmul.f32 -1.442695, %v4610_v55  ;;  %v4651_v45 = vpop.f32.mrb[32].mxu1 }
 0x11c   :  { %v3573_v53 = vpop.eup %3572  ;;  %v1178_v54 = vmul.f32 %v3571_v61, %v4330_v15  ;;  %2699 = vst.msk [vmem:[%s5957_s8 + $0x14] sm:$0xf] %vm1490_vm2, %v3191_v47  ;;  %3594 = vpow2.f32 %v4554_v44  ;;  %v2849_v20 = vmul.f32 -1.442695, %v4619_v51  ;;  %v4662_v60 = vpop.f32.mrb[33].mxu1 }
 0x11d   :  { %v3575_v50 = vpop.eup %3574  ;;  %v3196_v14 = vpack.c.bf16 %v2384_v2, %v2384_v2  ;;  %v2382_v12 = vmul.f32 %v3573_v53, %v4335_v29  ;;  %1501 = vst.msk [vmem:[%s5956_s7 + $0x28] sm:$0xf] %vm1490_vm2, %v3132_v11  ;;  %3596 = vpow2.f32 %v3007_v33  ;;  %v4660_v33 = vpop.f32.mrb[33].mxu0 }
 0x11e   :  { %v3577_v52 = vpop.eup %3576  ;;  %v3130_v15 = vpack.c.bf16 %v1178_v54, %v1178_v54  ;;  %v1181_v1 = vmul.f32 %v3575_v50, %v4344_v40  ;;  %3598 = vpow2.f32 %v2850_v46  ;;  %v673_v40 = vmul.f32 %v4453_v49, %v4216_v36  ;;  %v4671_v46 = vpop.f32.mrb[34].mxu0 }
 0x11f   :  { %v3579_v29 = vpop.eup %3578  ;;  %2704 = vst.msk [vmem:[%s5957_s8 + $0x28] sm:$0xf] %vm1490_vm2, %v3196_v14  ;;  %v3194_v44 = vpack.c.bf16 %v2382_v12, %v2382_v12  ;;  %v2385_v32 = vmul.f32 %v3577_v52, %v4351_v48  ;;  %3600 = vpow2.f32 %v3012_v24  ;;  %v1877_v48 = vmul.f32 %v4455_v18, %v4221_v37  ;;  %v4673_v49 = vpop.f32.mrb[34].mxu1 }
 0x120   :  { %v3581_v61 = vpop.eup %3580  ;;  %1499 = vst.msk [vmem:[%s5956_s7 + $0x20] sm:$0xf] %vm1490_vm2, %v3130_v15  ;;  %v3133_v47 = vpack.c.bf16 %v1181_v1, %v1181_v1  ;;  %v1179_v2 = vmul.f32 %v3579_v29, %v4360_v59  ;;  %3602 = vpow2.f32 %v2848_v5  ;;  %v4681_v59 = vadd.f32 %v4231_v41, %v1872_v7  ;;  %v4683_v24 = vpop.f32.mrb[35].mxu0 }
 0x121   :  { %v3583_v53 = vpop.eup %3582  ;;  %2702 = vst.msk [vmem:[%s5957_s8 + $0x20] sm:$0xf] %vm1490_vm2, %v3194_v44  ;;  %v3197_v11 = vpack.c.bf16 %v2385_v32, %v2385_v32  ;;  %v2383_v54 = vmul.f32 %v3581_v61, %v4370_v9  ;;  %v4685_v18 = vpop.f32.mrb[35].mxu1  ;;  %3604 = vpow2.f32 %v4601_v4  ;;  %v671_v9 = vmul.f32 %v4216_v36, %v4465_v8 }
 0x122   :  { %v3585_v50 = vpop.eup %3584  ;;  %1502 = vst.msk [vmem:[%s5956_s7 + $0x2c] sm:$0xf] %vm1490_vm2, %v3133_v47  ;;  %v3131_v14 = vpack.c.bf16 %v1179_v2, %v1179_v2  ;;  %v1184_v12 = vmul.f32 %v3583_v53, %v4409_v57  ;;  %3606 = vpow2.f32 %v2851_v28  ;;  %v4701_v15 = vadd.f32 %v4226_v39, %v673_v40  ;;  %v4725_v47 = vpop.f32.mrb[36].mxu0 }
 0x123   :  { %v3587_v5 = vpop.eup %3586  ;;  %2705 = vst.msk [vmem:[%s5957_s8 + $0x2c] sm:$0xf] %vm1490_vm2, %v3197_v11  ;;  %v3195_v7 = vpack.c.bf16 %v2383_v54, %v2383_v54  ;;  %v2388_v52 = vmul.f32 %v3585_v50, %v4422_v62  ;;  %3608 = vpow2.f32 %v3013_v25  ;;  %v4708_v4 = vadd.f32 %v4231_v41, %v1877_v48  ;;  %v4739_v11 = vpop.f32.mrb[37].mxu0 }
 0x124   :  { %v3589_v1 = vpop.eup %3588  ;;  %1500 = vst.msk [vmem:[%s5956_s7 + $0x24] sm:$0xf] %vm1490_vm2, %v3131_v14  ;;  %v3136_v57 = vpack.c.bf16 %v1184_v12, %v1184_v12  ;;  %v990_v8 = vadd.f32 1.0, %v3587_v5  ;;  %3610 = vpow2.f32 %v2849_v20  ;;  %v1875_v44 = vmul.f32 %v4221_v37, %v4467_v0  ;;  %v4727_v20 = vpop.f32.mrb[36].mxu1 }
 0x125   :  { %v3591_v29 = vpop.eup %3590  ;;  %2703 = vst.msk [vmem:[%s5957_s8 + $0x24] sm:$0xf] %vm1490_vm2, %v3195_v7  ;;  %v3200_v62 = vpack.c.bf16 %v2388_v52, %v2388_v52  ;;  %v2194_v28 = vadd.f32 1.0, %v3589_v1  ;;  %v4721_v40 = vadd.f32 %v4226_v39, %v671_v9  ;;  %v674_v61 = vmul.f32 %v4478_v16, %v4216_v36  ;;  %v4741_v16 = vpop.f32.mrb[37].mxu1 }
 0x126   :  { %v3593_v32 = vpop.eup %3592  ;;  %1505 = vst.msk [vmem:[%s5956_s7 + $0x38] sm:$0xf] %vm1490_vm2, %v3136_v57  ;;  %3612 = vrcp.f32 %v990_v8  ;;  %v993_v25 = vadd.f32 1.0, %v3591_v29  ;;  %v4734_v48 = vmul.f32 -1.442695, %v4681_v59  ;;  %v4737_v53 = vadd.f32 %v4231_v41, %v1875_v44  ;;  %v4748_v9 = vpop.f32.mrb[38].mxu0 }
 0x127   :  { %v3595_v2 = vpop.eup %3594  ;;  %2708 = vst.msk [vmem:[%s5957_s8 + $0x38] sm:$0xf] %vm1490_vm2, %v3200_v62  ;;  %3614 = vrcp.f32 %v2194_v28  ;;  %v2197_v0 = vadd.f32 1.0, %v3593_v32  ;;  %v4744_v14 = vmul.f32 -1.442695, %v4701_v15  ;;  %v1878_v12 = vmul.f32 %v4480_v43, %v4221_v37  ;;  %v4750_v5 = vpop.f32.mrb[38].mxu1 }
 0x128   :  { %v3597_v54 = vpop.eup %3596  ;;  %3616 = vrcp.f32 %v993_v25  ;;  %v991_v50 = vadd.f32 1.0, %v3595_v2  ;;  %5970 = vst [vmem:[#allocation12_spill] sm:$0xff] %v4750_v5  ;;  %v4753_v1 = vmul.f32 -1.442695, %v4708_v4  ;;  %v672_v57 = vmul.f32 %v4216_v36, %v4490_v26  ;;  %v4757_v8 = vpop.f32.mrb[39].mxu0 }
 0x129   :  { %v3599_v7 = vpop.eup %3598  ;;  %3618 = vrcp.f32 %v2197_v0  ;;  %v2195_v52 = vadd.f32 1.0, %v3597_v54  ;;  %5971 = vst [vmem:[#allocation13_spill] sm:$0xff] %v4757_v8  ;;  %v4759_v29 = vpop.f32.mrb[39].mxu1  ;;  %v4762_v28 = vmul.f32 -1.442695, %v4721_v40  ;;  %v4765_v44 = vadd.f32 %v4226_v39, %v674_v61 }
 0x12a   :  { %5972 = vst [vmem:[#allocation14_spill] sm:$0xff] %v4759_v29  ;;  %v3601_v62 = vpop.eup %3600  ;;  %3620 = vrcp.f32 %v991_v50  ;;  %v996_v43 = vadd.f32 1.0, %v3599_v7  ;;  %v4768_v2 = vmul.f32 -1.442695, %v4737_v53  ;;  %v1876_v26 = vmul.f32 %v4221_v37, %v4492_v17 }
 0x12b   :  { %v3603_v32 = vpop.eup %3602  ;;  %3622 = vrcp.f32 %v2195_v52  ;;  %v2200_v25 = vadd.f32 1.0, %v3601_v62  ;;  %v4773_v50 = vadd.f32 %v4231_v41, %v1878_v12  ;;  %v677_v7 = vmul.f32 %v4531_v19, %v4216_v36  ;;  %v4790_v19 = vpop.f32.mrb[40].mxu1 }
 0x12c   :  { %v3605_v0 = vpop.eup %3604  ;;  %3624 = vrcp.f32 %v996_v43  ;;  %v994_v54 = vadd.f32 1.0, %v3603_v32  ;;  %v4778_v52 = vadd.f32 %v4226_v39, %v672_v57  ;;  %v4781_v62 = vadd.f32 %v4231_v41, %v1876_v26  ;;  %v4788_v32 = vpop.f32.mrb[40].mxu0  ;;  %5973 = vst [vmem:[#allocation15_spill] sm:$0xff] %v4790_v19 }
 0x12d   :  { %v3607_v61 = vpop.eup %3606  ;;  %3626 = vrcp.f32 %v2200_v25  ;;  %v2198_v29 = vadd.f32 1.0, %v3605_v0  ;;  %v4784_v43 = vadd.f32 %v4226_v39, %v677_v7  ;;  %v1881_v12 = vmul.f32 %v4533_v31, %v4221_v37  ;;  %v4793_v26 = vpop.f32.mrb[41].mxu0 }
 0x12e   :  { %v3609_v8 = vpop.eup %3608  ;;  %3628 = vrcp.f32 %v994_v54  ;;  %v997_v17 = vadd.f32 1.0, %v3607_v61  ;;  %v2855_v0 = vmul.f32 -1.442695, %v4765_v44  ;;  %5974 = vst [vmem:[#allocation16_spill] sm:$0xff] %v4793_v26  ;;  %v4795_v5 = vpop.f32.mrb[41].mxu1  ;;  %v675_v37 = vmul.f32 %v4216_v36, %v4540_v13 }
 0x12f   :  { %v3611_v25 = vpop.eup %3610  ;;  %3630 = vrcp.f32 %v2198_v29  ;;  %v2201_v57 = vadd.f32 1.0, %v3609_v8  ;;  %5975 = vst [vmem:[#allocation17_spill] sm:$0xff] %v4795_v5  ;;  %v4798_v7 = vmul.f32 -1.442695, %v4773_v50  ;;  %v4802_v31 = vpop.f32.mrb[42].mxu0 }
 0x130   :  { %v3613_v54 = vpop.eup %3612  ;;  %3632 = vrcp.f32 %v997_v17  ;;  %v995_v39 = vadd.f32 1.0, %v3611_v25  ;;  %5976 = vst [vmem:[#allocation18_spill] sm:$0xff] %v4802_v31  ;;  %v4804_v61 = vpop.f32.mrb[42].mxu1  ;;  %v4808_v26 = vmul.f32 -1.442695, %v4778_v52 }
 0x131   :  { %5977 = vst [vmem:[#allocation19_spill] sm:$0xff] %v4804_v61  ;;  %v3615_v8 = vpop.eup %3614  ;;  %v1182_v29 = vmul.f32 %v3613_v54, %v4430_v21  ;;  %3634 = vrcp.f32 %v2201_v57  ;;  %v4811_v17 = vmul.f32 -1.442695, %v4781_v62  ;;  %v4813_v25 = vpop.f32.mrb[43].mxu0  ;;  %v4819_v13 = vmul.f32 -1.442695, %v4784_v43 }
 0x132   :  { %5978 = vst [vmem:[#allocation20_spill] sm:$0xff] %v4813_v25  ;;  %v4815_v5 = vpop.f32.mrb[43].mxu1  ;;  %v3617_v19 = vpop.eup %3616  ;;  %v2386_v36 = vmul.f32 %v3615_v8, %v4476_v23  ;;  %3636 = vrcp.f32 %v995_v39  ;;  %v4822_v21 = vadd.f32 %v4231_v41, %v1881_v12  ;;  %v4838_v41 = vld [vmem:[%s5954_s3] ss:$0 sm:$0xff] }
 0x133   :  { %5979 = vst [vmem:[#allocation21_spill] sm:$0xff] %v4815_v5  ;;  %v3619_v57 = vpop.eup %3618  ;;  %v3134_v54 = vpack.c.bf16 %v1182_v29, %v1182_v29  ;;  %v1185_v61 = vmul.f32 %v3617_v19, %v4505_v27  ;;  %3638 = vpow2.f32 %v4734_v48  ;;  %v4829_v5 = vld [vmem:[%s5953_s5] ss:$0 sm:$0xff]  ;;  %v4841_v27 = vadd.f32 %v4838_v41, %v675_v37  ;;  %v4865_v29 = vpop.f32.mrb[44].mxu1 }
 0x134   :  { %v1879_v23 = vmul.f32 %v4829_v5, %v4542_v10  ;;  %v3621_v39 = vpop.eup %3620  ;;  %v3198_v8 = vpack.c.bf16 %v2386_v36, %v2386_v36  ;;  %v2389_v25 = vmul.f32 %v3619_v57, %v4515_v58  ;;  %3640 = vpow2.f32 %v4744_v14  ;;  %v4852_v58 = vld [vmem:[%s5952_s2] ss:$0 sm:$0xff]  ;;  %5981 = vst [vmem:[#allocation23_spill] sm:$0xff] %v4865_v29 }
 0x135   :  { %v3623_v48 = vpop.eup %3622  ;;  %1503 = vst.msk [vmem:[%s5956_s7 + $0x30] sm:$0xf] %vm1490_vm2, %v3134_v54  ;;  %v3137_v10 = vpack.c.bf16 %v1185_v61, %v1185_v61  ;;  %v1183_v12 = vmul.f32 %v3621_v39, %v4522_v3  ;;  %3642 = vpow2.f32 %v4753_v1  ;;  %v678_v14 = vmul.f32 %v4852_v58, %v4549_v63  ;;  %v4863_v1 = vpop.f32.mrb[44].mxu0 }
 0x136   :  { %v3625_v19 = vpop.eup %3624  ;;  %2706 = vst.msk [vmem:[%s5957_s8 + $0x30] sm:$0xf] %vm1490_vm2, %v3198_v8  ;;  %v3201_v37 = vpack.c.bf16 %v2389_v25, %v2389_v25  ;;  %v2387_v61 = vmul.f32 %v3623_v48, %v4557_v38  ;;  %3644 = vpow2.f32 %v4762_v28  ;;  %v3020_v3 = vmul.f32 -1.442695, %v4822_v21  ;;  %5980 = vst [vmem:[#allocation22_spill] sm:$0xff] %v4863_v1  ;;  %v4881_v25 = vpop.f32.mrb[45].mxu0 }
 0x137   :  { %v3627_v36 = vpop.eup %3626  ;;  %1506 = vst.msk [vmem:[%s5956_s7 + $0x3c] sm:$0xf] %vm1490_vm2, %v3137_v10  ;;  %v3135_v63 = vpack.c.bf16 %v1183_v12, %v1183_v12  ;;  %v1188_v57 = vmul.f32 %v3625_v19, %v4564_v22  ;;  %3646 = vpow2.f32 %v4768_v2  ;;  %v4876_v38 = vld [vmem:[%s5955_s6] ss:$0 sm:$0xff]  ;;  %5982 = vst [vmem:[#allocation24_spill] sm:$0xff] %v4881_v25  ;;  %v4883_v54 = vpop.f32.mrb[45].mxu1 }
 0x138   :  { %v4879_v28 = vadd.f32 %v4876_v38, %v1879_v23  ;;  %5983 = vst [vmem:[#allocation25_spill] sm:$0xff] %v4883_v54  ;;  %v3629_v39 = vpop.eup %3628  ;;  %2709 = vst.msk [vmem:[%s5957_s8 + $0x3c] sm:$0xf] %vm1490_vm2, %v3201_v37  ;;  %v3199_v22 = vpack.c.bf16 %v2387_v61, %v2387_v61  ;;  %v5984_v2 = vld [vmem:[#allocation5_spill] sm:$0xff]  ;;  %3648 = vpow2.f32 %v2855_v0  ;;  %v2856_v48 = vmul.f32 -1.442695, %v4841_v27 }
 0x139   :  { %v2392_v8 = vmul.f32 %v3627_v36, %v5984_v2  ;;  %v4891_v10 = vpop.f32.mrb[46].mxu0  ;;  %v4893_v23 = vpop.f32.mrb[46].mxu1  ;;  %1504 = vst.msk [vmem:[%s5956_s7 + $0x34] sm:$0xf] %vm1490_vm2, %v3135_v63  ;;  %v3140_v19 = vpack.c.bf16 %v1188_v57, %v1188_v57  ;;  %v1186_v54 = vmul.f32 %v3629_v39, %v4574_v30  ;;  %3650 = vpow2.f32 %v4798_v7  ;;  %v5989_v63 = vld [vmem:[#allocation6_spill] sm:$0xff] }
 0x13a   :  { %5985 = vst [vmem:[#allocation5_spill] sm:$0xff] %v4891_v10  ;;  %5986 = vst [vmem:[#allocation26_spill] sm:$0xff] %v4893_v23  ;;  %v3631_v12 = vpop.eup %3630  ;;  %v4902_v37 = vadd.f32 %v4838_v41, %v678_v14  ;;  %v4904_v0 = vpop.f32.mrb[47].mxu0  ;;  %3652 = vpow2.f32 %v4808_v26  ;;  %v5990_v30 = vld [vmem:[#allocation2_spill] sm:$0xff] }
 0x13b   :  { %5987 = vst [vmem:[#allocation27_spill] sm:$0xff] %v4904_v0  ;;  %v4906_v61 = vpop.f32.mrb[47].mxu1  ;;  %v3633_v36 = vpop.eup %3632  ;;  %2707 = vst.msk [vmem:[%s5957_s8 + $0x34] sm:$0xf] %vm1490_vm2, %v3199_v22  ;;  %v3204_v2 = vpack.c.bf16 %v2392_v8, %v2392_v8  ;;  %v2390_v57 = vmul.f32 %v3631_v12, %v5989_v63  ;;  %v1882_v7 = vmul.f32 %v4829_v5, %v5990_v30  ;;  %3654 = vpow2.f32 %v4811_v17  ;;  %v5991_v63 = vld [vmem:[#allocation3_spill] sm:$0xff] }
 0x13c   :  { %5988 = vst [vmem:[#allocation28_spill] sm:$0xff] %v4906_v61  ;;  %v3635_v14 = vpop.eup %3634  ;;  %1509 = vst.msk [vmem:[%s5956_s7 + $0x48] sm:$0xf] %vm1490_vm2, %v3140_v19  ;;  %v3138_v39 = vpack.c.bf16 %v1186_v54, %v1186_v54  ;;  %v1189_v61 = vmul.f32 %v3633_v36, %v4592_v56  ;;  %v3018_v22 = vmul.f32 -1.442695, %v4879_v28  ;;  %3656 = vpow2.f32 %v4819_v13  ;;  %v5992_v36 = vld [vmem:[#allocation4_spill] sm:$0xff] }
 0x13d   :  { %v3637_v8 = vpop.eup %3636  ;;  %2712 = vst.msk [vmem:[%s5957_s8 + $0x48] sm:$0xf] %vm1490_vm2, %v3204_v2  ;;  %v3202_v26 = vpack.c.bf16 %v2390_v57, %v2390_v57  ;;  %v2393_v12 = vmul.f32 %v3635_v14, %v4610_v55  ;;  %v676_v54 = vmul.f32 %v4852_v58, %v5991_v63  ;;  %3658 = vpow2.f32 %v3020_v3  ;;  %v4945_v14 = vpop.f32.mrb[48].mxu0 }
 0x13e   :  { %v3639_v19 = vpop.eup %3638  ;;  %1507 = vst.msk [vmem:[%s5956_s7 + $0x40] sm:$0xf] %vm1490_vm2, %v3138_v39  ;;  %v3141_v56 = vpack.c.bf16 %v1189_v61, %v1189_v61  ;;  %v1187_v17 = vmul.f32 %v3637_v8, %v4619_v51  ;;  %v1880_v2 = vmul.f32 %v4829_v5, %v5992_v36  ;;  %3660 = vpow2.f32 %v2856_v48  ;;  %5993 = vst [vmem:[#allocation6_spill] sm:$0xff] %v4945_v14  ;;  %v4947_v61 = vpop.f32.mrb[48].mxu1  ;;  %v5995_v8 = vld [vmem:[#allocation7_spill] sm:$0xff] }
 0x13f   :  { %v3641_v57 = vpop.eup %3640  ;;  %2710 = vst.msk [vmem:[%s5957_s8 + $0x40] sm:$0xf] %vm1490_vm2, %v3202_v26  ;;  %v3205_v55 = vpack.c.bf16 %v2393_v12, %v2393_v12  ;;  %v2199_v13 = vadd.f32 1.0, %v3639_v19  ;;  %v4943_v30 = vadd.f32 %v4876_v38, %v1882_v7  ;;  %5994 = vst [vmem:[#allocation2_spill] sm:$0xff] %v4947_v61  ;;  %3662 = vpow2.f32 %v3018_v22  ;;  %v4955_v48 = vpop.f32.mrb[49].mxu0 }
 0x140   :  { %v3643_v51 = vpop.eup %3642  ;;  %1510 = vst.msk [vmem:[%s5956_s7 + $0x4c] sm:$0xf] %vm1490_vm2, %v3141_v56  ;;  %v3139_v3 = vpack.c.bf16 %v1187_v17, %v1187_v17  ;;  %v1000_v39 = vadd.f32 1.0, %v3641_v57  ;;  %v681_v26 = vmul.f32 %v4852_v58, %v5995_v8  ;;  %5996 = vst [vmem:[#allocation3_spill] sm:$0xff] %v4955_v48  ;;  %v4957_v7 = vpop.f32.mrb[49].mxu1  ;;  %v4967_v22 = vadd.f32 %v4838_v41, %v676_v54  ;;  %v6003_v48 = vld [vmem:[#allocation9_spill] sm:$0xff] }
 0x141   :  { %5997 = vst [vmem:[#allocation4_spill] sm:$0xff] %v4957_v7  ;;  %v3645_v12 = vpop.eup %3644  ;;  %2713 = vst.msk [vmem:[%s5957_s8 + $0x4c] sm:$0xf] %vm1490_vm2, %v3205_v55  ;;  %3664 = vrcp.f32 %v2199_v13  ;;  %v2204_v63 = vadd.f32 1.0, %v3643_v51  ;;  %v4964_v19 = vmul.f32 -1.442695, %v4902_v37  ;;  %v4978_v55 = vadd.f32 %v4876_v38, %v1880_v2 }
 0x142   :  { %v4969_v56 = vpop.f32.mrb[50].mxu0  ;;  %v4971_v17 = vpop.f32.mrb[50].mxu1  ;;  %1508 = vst.msk [vmem:[%s5956_s7 + $0x44] sm:$0xf] %vm1490_vm2, %v3139_v3  ;;  %3666 = vrcp.f32 %v1000_v39  ;;  %v998_v57 = vadd.f32 1.0, %v3645_v12  ;;  %v6000_v13 = vld [vmem:[#allocation8_spill] sm:$0xff]  ;;  %v679_v3 = vmul.f32 %v4852_v58, %v6003_v48  ;;  %v4992_v12 = vadd.f32 %v4838_v41, %v681_v26 }
 0x143   :  { %5998 = vst [vmem:[#allocation7_spill] sm:$0xff] %v4969_v56  ;;  %5999 = vst [vmem:[#allocation29_spill] sm:$0xff] %v4971_v17  ;;  %v3647_v36 = vpop.eup %3646  ;;  %v1885_v51 = vmul.f32 %v4829_v5, %v6000_v13  ;;  %v4982_v54 = vpop.f32.mrb[51].mxu0  ;;  %3668 = vrcp.f32 %v2204_v63  ;;  %v4987_v7 = vmul.f32 -1.442695, %v4943_v30  ;;  %v6004_v13 = vld [vmem:[#allocation10_spill] sm:$0xff] }
 0x144   :  { %6001 = vst [vmem:[#allocation8_spill] sm:$0xff] %v4982_v54  ;;  %v4984_v8 = vpop.f32.mrb[51].mxu1  ;;  %v3649_v56 = vpop.eup %3648  ;;  %v2202_v17 = vadd.f32 1.0, %v3647_v36  ;;  %3670 = vrcp.f32 %v998_v57  ;;  %v1883_v54 = vmul.f32 %v4829_v5, %v6004_v13  ;;  %v4997_v63 = vmul.f32 -1.442695, %v4967_v22 }
 0x145   :  { %6002 = vst [vmem:[#allocation30_spill] sm:$0xff] %v4984_v8  ;;  %v3651_v39 = vpop.eup %3650  ;;  %v1001_v2 = vadd.f32 1.0, %v3649_v56  ;;  %v682_v36 = vmul.f32 %v4852_v58, %v4603_v34  ;;  %v5002_v56 = vmul.f32 -1.442695, %v4978_v55  ;;  %v5005_v26 = vadd.f32 %v4876_v38, %v1885_v51  ;;  %v5012_v23 = vpop.f32.mrb[52].mxu0 }
 0x146   :  { %v3653_v61 = vpop.eup %3652  ;;  %3672 = vrcp.f32 %v2202_v17  ;;  %v2205_v8 = vadd.f32 1.0, %v3651_v39  ;;  %v5008_v17 = vadd.f32 %v4838_v41, %v679_v3  ;;  %v6005_v39 = vld [vmem:[#allocation11_spill] sm:$0xff]  ;;  %6006 = vst [vmem:[#allocation9_spill] sm:$0xff] %v5012_v23  ;;  %v5014_v34 = vpop.f32.mrb[52].mxu1  ;;  %v5017_v10 = vmul.f32 -1.442695, %v4992_v12 }
 0x147   :  { %v3655_v14 = vpop.eup %3654  ;;  %3674 = vrcp.f32 %v1001_v2  ;;  %v999_v48 = vadd.f32 1.0, %v3653_v61  ;;  %v1886_v0 = vmul.f32 %v4829_v5, %v6005_v39  ;;  %6007 = vst [vmem:[#allocation10_spill] sm:$0xff] %v5014_v34  ;;  %v5020_v51 = vadd.f32 %v4876_v38, %v1883_v54 }
 0x148   :  { %v3657_v57 = vpop.eup %3656  ;;  %3676 = vrcp.f32 %v2205_v8  ;;  %v2203_v13 = vadd.f32 1.0, %v3655_v14  ;;  %v5022_v14 = vpop.f32.mrb[53].mxu0  ;;  %v5027_v23 = vadd.f32 %v4838_v41, %v682_v36 }
 0x149   :  { %v3659_v61 = vpop.eup %3658  ;;  %3678 = vrcp.f32 %v999_v48  ;;  %v1004_v2 = vadd.f32 1.0, %v3657_v57  ;;  %6008 = vst [vmem:[#allocation11_spill] sm:$0xff] %v5022_v14  ;;  %v5024_v8 = vpop.f32.mrb[53].mxu1  ;;  %v680_v48 = vmul.f32 %v4852_v58, %v4612_v42  ;;  %v3024_v14 = vmul.f32 -1.442695, %v5005_v26 }
 0x14a   :  { %6009 = vst [vmem:[#allocation31_spill] sm:$0xff] %v5024_v8  ;;  %v3661_v3 = vpop.eup %3660  ;;  %3680 = vrcp.f32 %v2203_v13  ;;  %v2208_v39 = vadd.f32 1.0, %v3659_v61  ;;  %v5031_v57 = vpop.f32.mrb[54].mxu0  ;;  %v2860_v61 = vmul.f32 -1.442695, %v5008_v17  ;;  %v5042_v42 = vadd.f32 %v4876_v38, %v1886_v0 }
 0x14b   :  { %6010 = vst [vmem:[#allocation32_spill] sm:$0xff] %v5031_v57  ;;  %v5033_v34 = vpop.f32.mrb[54].mxu1  ;;  %v3663_v25 = vpop.eup %3662  ;;  %3682 = vrcp.f32 %v1004_v2  ;;  %v1002_v54 = vadd.f32 1.0, %v3661_v3  ;;  %v3022_v2 = vmul.f32 -1.442695, %v5020_v51  ;;  %v1884_v3 = vmul.f32 %v4829_v5, %v4614_v35 }
 0x14c   :  { %6011 = vst [vmem:[#allocation33_spill] sm:$0xff] %v5033_v34  ;;  %v5036_v29 = vpop.f32.mrb[55].mxu0  ;;  %v5038_v8 = vpop.f32.mrb[55].mxu1  ;;  %3684 = vrcp.f32 %v2208_v39  ;;  %v2206_v36 = vadd.f32 1.0, %v3663_v25  ;;  %v2863_v25 = vmul.f32 -1.442695, %v5027_v23  ;;  %v5051_v39 = vadd.f32 %v4838_v41, %v680_v48 }
 0x14d   :  { %6012 = vst [vmem:[#allocation34_spill] sm:$0xff] %v5036_v29  ;;  %6013 = vst [vmem:[#allocation35_spill] sm:$0xff] %v5038_v8  ;;  %v3665_v13 = vpop.eup %3664  ;;  %3686 = vrcp.f32 %v1002_v54  ;;  %v5062_v48 = vpop.f32.mrb[56].mxu1 }
 0x14e   :  { %v3667_v57 = vpop.eup %3666  ;;  %v2391_v34 = vmul.f32 %v3665_v13, %v4681_v59  ;;  %3688 = vrcp.f32 %v2206_v36  ;;  %v685_v59 = vmul.f32 %v4852_v58, %v4649_v6 }
 0x14f   :  { %v3669_v29 = vpop.eup %3668  ;;  %v1192_v8 = vmul.f32 %v3667_v57, %v4701_v15  ;;  %3690 = vpow2.f32 %v4964_v19  ;;  %v3025_v15 = vmul.f32 -1.442695, %v5042_v42  ;;  %v5060_v57 = vpop.f32.mrb[56].mxu0 }
 0x150   :  { %v3671_v0 = vpop.eup %3670  ;;  %v3203_v1 = vpack.c.bf16 %v2391_v34, %v2391_v34  ;;  %v2396_v31 = vmul.f32 %v3669_v29, %v4708_v4  ;;  %3692 = vpow2.f32 %v4987_v7  ;;  %v5073_v29 = vpop.f32.mrb[57].mxu0 }
 0x151   :  { %v3673_v54 = vpop.eup %3672  ;;  %v3144_v35 = vpack.c.bf16 %v1192_v8, %v1192_v8  ;;  %v1190_v13 = vmul.f32 %v3671_v0, %v4721_v40  ;;  %3694 = vpow2.f32 %v4997_v63  ;;  %v5071_v40 = vadd.f32 %v4876_v38, %v1884_v3  ;;  %v5075_v7 = vpop.f32.mrb[57].mxu1 }
 0x152   :  { %v3675_v34 = vpop.eup %3674  ;;  %2711 = vst.msk [vmem:[%s5957_s8 + $0x44] sm:$0xf] %vm1490_vm2, %v3203_v1  ;;  %v3208_v4 = vpack.c.bf16 %v2396_v31, %v2396_v31  ;;  %v2394_v6 = vmul.f32 %v3673_v54, %v4737_v53  ;;  %3696 = vpow2.f32 %v5002_v56  ;;  %v2861_v53 = vmul.f32 -1.442695, %v5051_v39  ;;  %v5084_v1 = vpop.f32.mrb[58].mxu0 }
 0x153   :  { %v3677_v19 = vpop.eup %3676  ;;  %1513 = vst.msk [vmem:[%s5956_s7 + $0x58] sm:$0xf] %vm1490_vm2, %v3144_v35  ;;  %v3142_v8 = vpack.c.bf16 %v1190_v13, %v1190_v13  ;;  %v1193_v31 = vmul.f32 %v3675_v34, %v4765_v44  ;;  %v5086_v63 = vpop.f32.mrb[58].mxu1  ;;  %3698 = vpow2.f32 %v5017_v10  ;;  %v5095_v44 = vadd.f32 %v4838_v41, %v685_v59 }
 0x154   :  { %v3679_v36 = vpop.eup %3678  ;;  %2716 = vst.msk [vmem:[%s5957_s8 + $0x58] sm:$0xf] %vm1490_vm2, %v3208_v4  ;;  %v3206_v3 = vpack.c.bf16 %v2394_v6, %v2394_v6  ;;  %v2397_v0 = vmul.f32 %v3677_v19, %v4773_v50  ;;  %v5097_v56 = vpop.f32.mrb[59].mxu0  ;;  %3700 = vpow2.f32 %v3024_v14  ;;  %v1889_v50 = vmul.f32 %v4829_v5, %v4651_v45 }
 0x155   :  { %v5099_v54 = vpop.f32.mrb[59].mxu1  ;;  %v3681_v35 = vpop.eup %3680  ;;  %1511 = vst.msk [vmem:[%s5956_s7 + $0x50] sm:$0xf] %vm1490_vm2, %v3142_v8  ;;  %v3145_v13 = vpack.c.bf16 %v1193_v31, %v1193_v31  ;;  %v1191_v34 = vmul.f32 %v3679_v36, %v4778_v52  ;;  %3702 = vpow2.f32 %v2860_v61  ;;  %v3023_v6 = vmul.f32 -1.442695, %v5071_v40 }
 0x156   :  { %v3683_v10 = vpop.eup %3682  ;;  %2714 = vst.msk [vmem:[%s5957_s8 + $0x50] sm:$0xf] %vm1490_vm2, %v3206_v3  ;;  %v3209_v59 = vpack.c.bf16 %v2397_v0, %v2397_v0  ;;  %v2395_v4 = vmul.f32 %v3681_v35, %v4781_v62  ;;  %3704 = vpow2.f32 %v3022_v2  ;;  %v683_v14 = vmul.f32 %v4852_v58, %v4660_v33  ;;  %v5134_v3 = vpop.f32.mrb[60].mxu0 }
 0x157   :  { %v3685_v19 = vpop.eup %3684  ;;  %1514 = vst.msk [vmem:[%s5956_s7 + $0x5c] sm:$0xf] %vm1490_vm2, %v3145_v13  ;;  %v3143_v52 = vpack.c.bf16 %v1191_v34, %v1191_v34  ;;  %v1196_v45 = vmul.f32 %v3683_v10, %v4784_v43  ;;  %3706 = vpow2.f32 %v2863_v25  ;;  %v2866_v31 = vmul.f32 -1.442695, %v5095_v44  ;;  %v5136_v0 = vpop.f32.mrb[60].mxu1 }
 0x158   :  { %v3687_v8 = vpop.eup %3686  ;;  %2717 = vst.msk [vmem:[%s5957_s8 + $0x5c] sm:$0xf] %vm1490_vm2, %v3209_v59  ;;  %v3207_v62 = vpack.c.bf16 %v2395_v4, %v2395_v4  ;;  %v2400_v61 = vmul.f32 %v3685_v19, %v4822_v21  ;;  %3708 = vpow2.f32 %v3025_v15  ;;  %v1887_v2 = vmul.f32 %v4829_v5, %v4662_v60  ;;  %v5146_v15 = vpop.f32.mrb[61].mxu0 }
 0x159   :  { %v3689_v36 = vpop.eup %3688  ;;  %1512 = vst.msk [vmem:[%s5956_s7 + $0x54] sm:$0xf] %vm1490_vm2, %v3143_v52  ;;  %v3148_v43 = vpack.c.bf16 %v1196_v45, %v1196_v45  ;;  %v1194_v33 = vmul.f32 %v3687_v8, %v4841_v27  ;;  %3710 = vpow2.f32 %v2861_v53  ;;  %v5144_v27 = vadd.f32 %v4876_v38, %v1889_v50  ;;  %v5148_v60 = vpop.f32.mrb[61].mxu1 }
 0x15a   :  { %v3691_v21 = vpop.eup %3690  ;;  %2715 = vst.msk [vmem:[%s5957_s8 + $0x54] sm:$0xf] %vm1490_vm2, %v3207_v62  ;;  %v3212_v25 = vpack.c.bf16 %v2400_v61, %v2400_v61  ;;  %v2398_v35 = vmul.f32 %v3689_v36, %v4879_v28  ;;  %3712 = vpow2.f32 %v3023_v6  ;;  %v5155_v59 = vadd.f32 %v4838_v41, %v683_v14  ;;  %v5157_v28 = vpop.f32.mrb[62].mxu0 }
 0x15b   :  { %v3693_v13 = vpop.eup %3692  ;;  %1517 = vst.msk [vmem:[%s5956_s7 + $0x68] sm:$0xf] %vm1490_vm2, %v3148_v43  ;;  %v3146_v34 = vpack.c.bf16 %v1194_v33, %v1194_v33  ;;  %v1005_v10 = vadd.f32 1.0, %v3691_v21  ;;  %6014 = vst [vmem:[#allocation36_spill] sm:$0xff] %v5157_v28  ;;  %v5159_v53 = vpop.f32.mrb[62].mxu1  ;;  %3714 = vpow2.f32 %v2866_v31  ;;  %v686_v52 = vmul.f32 %v4852_v58, %v4671_v46 }
 0x15c   :  { %6015 = vst [vmem:[#allocation37_spill] sm:$0xff] %v5159_v53  ;;  %v3695_v50 = vpop.eup %3694  ;;  %2720 = vst.msk [vmem:[%s5957_s8 + $0x68] sm:$0xf] %vm1490_vm2, %v3212_v25  ;;  %v3210_v4 = vpack.c.bf16 %v2398_v35, %v2398_v35  ;;  %v2209_v19 = vadd.f32 1.0, %v3693_v13  ;;  %v5167_v6 = vpop.f32.mrb[63].mxu0  ;;  %v5176_v62 = vadd.f32 %v4876_v38, %v1887_v2  ;;  %v1890_v61 = vmul.f32 %v4829_v5, %v4673_v49 }
 0x15d   :  { %6016 = vst [vmem:[#allocation38_spill] sm:$0xff] %v5167_v6  ;;  %v5169_v45 = vpop.f32.mrb[63].mxu1  ;;  %v3697_v14 = vpop.eup %3696  ;;  %1515 = vst.msk [vmem:[%s5956_s7 + $0x60] sm:$0xf] %vm1490_vm2, %v3146_v34  ;;  %3716 = vrcp.f32 %v1005_v10  ;;  %v1003_v8 = vadd.f32 1.0, %v3695_v50  ;;  %v684_v43 = vmul.f32 %v4852_v58, %v4683_v24  ;;  %v1888_v49 = vmul.f32 %v4829_v5, %v4685_v18 }
 0x15e   :  { %6017 = vst [vmem:[#allocation39_spill] sm:$0xff] %v5169_v45  ;;  %v3699_v31 = vpop.eup %3698  ;;  %2718 = vst.msk [vmem:[%s5957_s8 + $0x60] sm:$0xf] %vm1490_vm2, %v3210_v4  ;;  %3718 = vrcp.f32 %v2209_v19  ;;  %v2207_v46 = vadd.f32 1.0, %v3697_v14  ;;  %v3028_v36 = vmul.f32 -1.442695, %v5144_v27  ;;  %v5191_v13 = vadd.f32 %v4838_v41, %v686_v52 }
 0x15f   :  { %v3701_v33 = vpop.eup %3700  ;;  %3720 = vrcp.f32 %v1003_v8  ;;  %v1008_v2 = vadd.f32 1.0, %v3699_v31  ;;  %v2864_v21 = vmul.f32 -1.442695, %v5155_v59  ;;  %v689_v34 = vmul.f32 %v4852_v58, %v4725_v47 }
 0x160   :  { %v3703_v25 = vpop.eup %3702  ;;  %3722 = vrcp.f32 %v2207_v46  ;;  %v2212_v35 = vadd.f32 1.0, %v3701_v33  ;;  %v3026_v50 = vmul.f32 -1.442695, %v5176_v62  ;;  %v5197_v4 = vadd.f32 %v4876_v38, %v1890_v61 }
 0x161   :  { %v3705_v10 = vpop.eup %3704  ;;  %3724 = vrcp.f32 %v1008_v2  ;;  %v1006_v24 = vadd.f32 1.0, %v3703_v25  ;;  %v5200_v14 = vadd.f32 %v4838_v41, %v684_v43  ;;  %v1893_v52 = vmul.f32 %v4829_v5, %v4727_v20 }
 0x162   :  { %v3707_v19 = vpop.eup %3706  ;;  %3726 = vrcp.f32 %v2212_v35  ;;  %v2210_v18 = vadd.f32 1.0, %v3705_v10  ;;  %v5205_v31 = vadd.f32 %v4876_v38, %v1888_v49  ;;  %v687_v46 = vmul.f32 %v4852_v58, %v4739_v11 }
 0x163   :  { %v3709_v8 = vpop.eup %3708  ;;  %3728 = vrcp.f32 %v1006_v24  ;;  %v1009_v47 = vadd.f32 1.0, %v3707_v19  ;;  %v2867_v2 = vmul.f32 -1.442695, %v5191_v13  ;;  %v5211_v43 = vadd.f32 %v4838_v41, %v689_v34 }
 0x164   :  { %v3711_v61 = vpop.eup %3710  ;;  %3730 = vrcp.f32 %v2210_v18  ;;  %v2213_v33 = vadd.f32 1.0, %v3709_v8  ;;  %v5214_v35 = vadd.f32 %v4876_v38, %v1893_v52  ;;  %v1891_v49 = vmul.f32 %v4829_v5, %v4741_v16 }
 0x165   :  { %v3713_v25 = vpop.eup %3712  ;;  %3732 = vrcp.f32 %v1009_v47  ;;  %v1007_v20 = vadd.f32 1.0, %v3711_v61  ;;  %v3029_v24 = vmul.f32 -1.442695, %v5197_v4  ;;  %v2865_v19 = vmul.f32 -1.442695, %v5200_v14 }
 0x166   :  { %v3715_v10 = vpop.eup %3714  ;;  %3734 = vrcp.f32 %v2213_v33  ;;  %v2211_v11 = vadd.f32 1.0, %v3713_v25  ;;  %v3027_v8 = vmul.f32 -1.442695, %v5205_v31  ;;  %v5222_v47 = vadd.f32 %v4838_v41, %v687_v46 }
 0x167   :  { %v3717_v18 = vpop.eup %3716  ;;  %3736 = vrcp.f32 %v1007_v20  ;;  %v1012_v34 = vadd.f32 1.0, %v3715_v10  ;;  %v2870_v16 = vmul.f32 -1.442695, %v5211_v43  ;;  %v690_v33 = vmul.f32 %v4852_v58, %v4748_v9 }
 0x168   :  { %v3719_v52 = vpop.eup %3718  ;;  %v1197_v61 = vmul.f32 %v3717_v18, %v4902_v37  ;;  %3738 = vrcp.f32 %v2211_v11  ;;  %v3032_v20 = vmul.f32 -1.442695, %v5214_v35  ;;  %v5231_v10 = vadd.f32 %v4876_v38, %v1891_v49  ;;  %v6018_v37 = vld [vmem:[#allocation12_spill] sm:$0xff] }
 0x169   :  { %v3721_v25 = vpop.eup %3720  ;;  %v2401_v45 = vmul.f32 %v3719_v52, %v4943_v30  ;;  %3740 = vrcp.f32 %v1012_v34  ;;  %v1894_v11 = vmul.f32 %v4829_v5, %v6018_v37  ;;  %v2868_v30 = vmul.f32 -1.442695, %v5222_v47 }
 0x16a   :  { %v3723_v46 = vpop.eup %3722  ;;  %v3149_v6 = vpack.c.bf16 %v1197_v61, %v1197_v61  ;;  %v1195_v53 = vmul.f32 %v3721_v25, %v4967_v22  ;;  %3742 = vpow2.f32 %v3028_v36  ;;  %v5244_v36 = vadd.f32 %v4838_v41, %v690_v33  ;;  %v6019_v61 = vld [vmem:[#allocation13_spill] sm:$0xff] }
 0x16b   :  { %v3725_v18 = vpop.eup %3724  ;;  %v3213_v28 = vpack.c.bf16 %v2401_v45, %v2401_v45  ;;  %v2399_v9 = vmul.f32 %v3723_v46, %v4978_v55  ;;  %3744 = vpow2.f32 %v2864_v21  ;;  %v3030_v21 = vmul.f32 -1.442695, %v5231_v10 }
 0x16c   :  { %v3727_v34 = vpop.eup %3726  ;;  %1518 = vst.msk [vmem:[%s5956_s7 + $0x6c] sm:$0xf] %vm1490_vm2, %v3149_v6  ;;  %v3147_v49 = vpack.c.bf16 %v1195_v53, %v1195_v53  ;;  %v1200_v22 = vmul.f32 %v3725_v18, %v4992_v12  ;;  %3746 = vpow2.f32 %v3026_v50  ;;  %v5258_v50 = vadd.f32 %v4876_v38, %v1894_v11  ;;  %v6020_v11 = vld [vmem:[#allocation14_spill] sm:$0xff] }
 0x16d   :  { %v3729_v52 = vpop.eup %3728  ;;  %2721 = vst.msk [vmem:[%s5957_s8 + $0x6c] sm:$0xf] %vm1490_vm2, %v3213_v28  ;;  %v3211_v55 = vpack.c.bf16 %v2399_v9, %v2399_v9  ;;  %v2404_v45 = vmul.f32 %v3727_v34, %v5005_v26  ;;  %3748 = vpow2.f32 %v2867_v2  ;;  %v688_v33 = vmul.f32 %v4852_v58, %v6019_v61  ;;  %v6022_v61 = vld [vmem:[#allocation16_spill] sm:$0xff] }
 0x16e   :  { %v3731_v6 = vpop.eup %3730  ;;  %1516 = vst.msk [vmem:[%s5956_s7 + $0x64] sm:$0xf] %vm1490_vm2, %v3147_v49  ;;  %v3152_v12 = vpack.c.bf16 %v1200_v22, %v1200_v22  ;;  %v1198_v53 = vmul.f32 %v3729_v52, %v5008_v17  ;;  %3750 = vpow2.f32 %v3029_v24  ;;  %v2871_v46 = vmul.f32 -1.442695, %v5244_v36 }
 0x16f   :  { %v3733_v28 = vpop.eup %3732  ;;  %2719 = vst.msk [vmem:[%s5957_s8 + $0x64] sm:$0xf] %vm1490_vm2, %v3211_v55  ;;  %v3216_v26 = vpack.c.bf16 %v2404_v45, %v2404_v45  ;;  %v2402_v2 = vmul.f32 %v3731_v6, %v5020_v51  ;;  %3752 = vpow2.f32 %v2865_v19  ;;  %v1892_v18 = vmul.f32 %v4829_v5, %v6020_v11 }
 0x170   :  { %v3735_v25 = vpop.eup %3734  ;;  %1521 = vst.msk [vmem:[%s5956_s7 + $0x78] sm:$0xf] %vm1490_vm2, %v3152_v12  ;;  %v3150_v17 = vpack.c.bf16 %v1198_v53, %v1198_v53  ;;  %v1201_v24 = vmul.f32 %v3733_v28, %v5027_v23  ;;  %3754 = vpow2.f32 %v3027_v8  ;;  %v3033_v34 = vmul.f32 -1.442695, %v5258_v50 }
 0x171   :  { %v3737_v37 = vpop.eup %3736  ;;  %2724 = vst.msk [vmem:[%s5957_s8 + $0x78] sm:$0xf] %vm1490_vm2, %v3216_v26  ;;  %v3214_v51 = vpack.c.bf16 %v2402_v2, %v2402_v2  ;;  %v2405_v19 = vmul.f32 %v3735_v25, %v5042_v42  ;;  %3756 = vpow2.f32 %v2870_v16  ;;  %v5292_v22 = vadd.f32 %v4838_v41, %v688_v33 }
 0x172   :  { %v3739_v9 = vpop.eup %3738  ;;  %1519 = vst.msk [vmem:[%s5956_s7 + $0x70] sm:$0xf] %vm1490_vm2, %v3150_v17  ;;  %v3153_v23 = vpack.c.bf16 %v1201_v24, %v1201_v24  ;;  %v1199_v8 = vmul.f32 %v3737_v37, %v5051_v39  ;;  %3758 = vpow2.f32 %v3032_v20  ;;  %v693_v55 = vmul.f32 %v4852_v58, %v4788_v32 }
 0x173   :  { %v3741_v49 = vpop.eup %3740  ;;  %2722 = vst.msk [vmem:[%s5957_s8 + $0x70] sm:$0xf] %vm1490_vm2, %v3214_v51  ;;  %v3217_v42 = vpack.c.bf16 %v2405_v19, %v2405_v19  ;;  %v2403_v16 = vmul.f32 %v3739_v9, %v5071_v40  ;;  %3760 = vpow2.f32 %v2868_v30  ;;  %v5306_v6 = vadd.f32 %v4876_v38, %v1892_v18  ;;  %v6024_v18 = vld [vmem:[#allocation18_spill] sm:$0xff] }
 0x174   :  { %v3743_v52 = vpop.eup %3742  ;;  %1522 = vst.msk [vmem:[%s5956_s7 + $0x7c] sm:$0xf] %vm1490_vm2, %v3153_v23  ;;  %v3151_v39 = vpack.c.bf16 %v1199_v8, %v1199_v8  ;;  %v1204_v20 = vmul.f32 %v3741_v49, %v5095_v44  ;;  %3762 = vpow2.f32 %v3030_v21  ;;  %v6021_v21 = vld [vmem:[#allocation15_spill] sm:$0xff]  ;;  %v5319_v2 = vmul.f32 -1.442695, %v5292_v22 }
 0x175   :  { %v3745_v45 = vpop.eup %3744  ;;  %2725 = vst.msk [vmem:[%s5957_s8 + $0x7c] sm:$0xf] %vm1490_vm2, %v3217_v42  ;;  %v3215_v40 = vpack.c.bf16 %v2403_v16, %v2403_v16  ;;  %v2216_v30 = vadd.f32 1.0, %v3743_v52  ;;  %3764 = vpow2.f32 %v2871_v46  ;;  %v1897_v53 = vmul.f32 %v4829_v5, %v6021_v21  ;;  %v6023_v46 = vld [vmem:[#allocation17_spill] sm:$0xff]  ;;  %v6025_v49 = vld [vmem:[#allocation19_spill] sm:$0xff] }
 0x176   :  { %v3747_v12 = vpop.eup %3746  ;;  %1520 = vst.msk [vmem:[%s5956_s7 + $0x74] sm:$0xf] %vm1490_vm2, %v3151_v39  ;;  %v3156_v44 = vpack.c.bf16 %v1204_v20, %v1204_v20  ;;  %v1010_v32 = vadd.f32 1.0, %v3745_v45  ;;  %3766 = vpow2.f32 %v3033_v34  ;;  %v691_v33 = vmul.f32 %v4852_v58, %v6022_v61  ;;  %v6026_v20 = vld [vmem:[#allocation20_spill] sm:$0xff] }
 0x177   :  { %v3749_v28 = vpop.eup %3748  ;;  %2723 = vst.msk [vmem:[%s5957_s8 + $0x74] sm:$0xf] %vm1490_vm2, %v3215_v40  ;;  %3768 = vrcp.f32 %v2216_v30  ;;  %v2214_v26 = vadd.f32 1.0, %v3747_v12  ;;  %v5328_v24 = vadd.f32 %v4838_v41, %v693_v55  ;;  %v1895_v37 = vmul.f32 %v4829_v5, %v6023_v46 }
 0x178   :  { %v3751_v25 = vpop.eup %3750  ;;  %1525 = vst.msk [vmem:[%s5956_s7 + $0x88] sm:$0xf] %vm1490_vm2, %v3156_v44  ;;  %3770 = vrcp.f32 %v1010_v32  ;;  %v1013_v17 = vadd.f32 1.0, %v3749_v28  ;;  %v3031_v11 = vmul.f32 -1.442695, %v5306_v6  ;;  %v694_v9 = vmul.f32 %v4852_v58, %v6024_v18 }
 0x179   :  { %v3753_v51 = vpop.eup %3752  ;;  %3772 = vrcp.f32 %v2214_v26  ;;  %v2217_v19 = vadd.f32 1.0, %v3751_v25  ;;  %v5336_v34 = vadd.f32 %v4876_v38, %v1897_v53  ;;  %v1898_v42 = vmul.f32 %v4829_v5, %v6025_v49  ;;  %v6027_v53 = vld [vmem:[#allocation21_spill] sm:$0xff] }
 0x17a   :  { %v3755_v23 = vpop.eup %3754  ;;  %3774 = vrcp.f32 %v1013_v17  ;;  %v1011_v8 = vadd.f32 1.0, %v3753_v51  ;;  %v5341_v39 = vadd.f32 %v4838_v41, %v691_v33  ;;  %v692_v55 = vmul.f32 %v4852_v58, %v6026_v20 }
 0x17b   :  { %v3757_v16 = vpop.eup %3756  ;;  %3776 = vrcp.f32 %v2217_v19  ;;  %v2215_v52 = vadd.f32 1.0, %v3755_v23  ;;  %v2874_v30 = vmul.f32 -1.442695, %v5328_v24  ;;  %v5347_v12 = vadd.f32 %v4876_v38, %v1895_v37  ;;  %v6028_v23 = vld [vmem:[#allocation22_spill] sm:$0xff] }
 0x17c   :  { %v3759_v45 = vpop.eup %3758  ;;  %3778 = vrcp.f32 %v1011_v8  ;;  %v1016_v40 = vadd.f32 1.0, %v3757_v16  ;;  %v5350_v21 = vadd.f32 %v4838_v41, %v694_v9  ;;  %v1896_v28 = vmul.f32 %v4829_v5, %v6027_v53 }
 0x17d   :  { %v3761_v44 = vpop.eup %3760  ;;  %3780 = vrcp.f32 %v2215_v52  ;;  %v2220_v32 = vadd.f32 1.0, %v3759_v45  ;;  %v3036_v33 = vmul.f32 -1.442695, %v5336_v34  ;;  %v5356_v25 = vadd.f32 %v4876_v38, %v1898_v42 }
 0x17e   :  { %v3763_v26 = vpop.eup %3762  ;;  %3782 = vrcp.f32 %v1016_v40  ;;  %v1014_v61 = vadd.f32 1.0, %v3761_v44  ;;  %v2872_v37 = vmul.f32 -1.442695, %v5341_v39  ;;  %v5360_v51 = vadd.f32 %v4838_v41, %v692_v55  ;;  %v6029_v40 = vld [vmem:[#allocation23_spill] sm:$0xff] }
 0x17f   :  { %v3765_v17 = vpop.eup %3764  ;;  %3784 = vrcp.f32 %v2220_v32  ;;  %v2218_v46 = vadd.f32 1.0, %v3763_v26  ;;  %v3034_v9 = vmul.f32 -1.442695, %v5347_v12  ;;  %v697_v8 = vmul.f32 %v4852_v58, %v6028_v23 }
 0x180   :  { %v3767_v19 = vpop.eup %3766  ;;  %3786 = vrcp.f32 %v1014_v61  ;;  %v1017_v18 = vadd.f32 1.0, %v3765_v17  ;;  %v2875_v16 = vmul.f32 -1.442695, %v5350_v21  ;;  %v5367_v52 = vadd.f32 %v4876_v38, %v1896_v28  ;;  %v6030_v61 = vld [vmem:[#allocation24_spill] sm:$0xff] }
 0x181   :  { %v3769_v49 = vpop.eup %3768  ;;  %3788 = vrcp.f32 %v2218_v46  ;;  %v2221_v42 = vadd.f32 1.0, %v3767_v19  ;;  %v3037_v45 = vmul.f32 -1.442695, %v5356_v25  ;;  %v1901_v44 = vmul.f32 %v4829_v5, %v6029_v40 }
 0x182   :  { %v3771_v20 = vpop.eup %3770  ;;  %v2408_v55 = vmul.f32 %v3769_v49, %v5144_v27  ;;  %3790 = vrcp.f32 %v1017_v18  ;;  %v2873_v26 = vmul.f32 -1.442695, %v5360_v51  ;;  %v695_v17 = vmul.f32 %v4852_v58, %v6030_v61 }
 0x183   :  { %v3773_v32 = vpop.eup %3772  ;;  %v1202_v53 = vmul.f32 %v3771_v20, %v5155_v59  ;;  %3792 = vrcp.f32 %v2221_v42  ;;  %v5380_v27 = vadd.f32 %v4838_v41, %v697_v8  ;;  %v3035_v59 = vmul.f32 -1.442695, %v5367_v52 }
 0x184   :  { %v3775_v28 = vpop.eup %3774  ;;  %v3220_v46 = vpack.c.bf16 %v2408_v55, %v2408_v55  ;;  %v2406_v19 = vmul.f32 %v3773_v32, %v5176_v62  ;;  %3794 = vpow2.f32 %v5319_v2  ;;  %v5390_v2 = vadd.f32 %v4876_v38, %v1901_v44 }
 0x185   :  { %v3777_v18 = vpop.eup %3776  ;;  %v3154_v23 = vpack.c.bf16 %v1202_v53, %v1202_v53  ;;  %v1205_v49 = vmul.f32 %v3775_v28, %v5191_v13  ;;  %3796 = vpow2.f32 %v3031_v11  ;;  %v5398_v55 = vadd.f32 %v4838_v41, %v695_v17 }
 0x186   :  { %v3779_v42 = vpop.eup %3778  ;;  %2728 = vst.msk [vmem:[%s5957_s8 + $0x88] sm:$0xf] %vm1490_vm2, %v3220_v46  ;;  %v3218_v20 = vpack.c.bf16 %v2406_v19, %v2406_v19  ;;  %v2409_v62 = vmul.f32 %v3777_v18, %v5197_v4  ;;  %3798 = vpow2.f32 %v2874_v30  ;;  %v2878_v44 = vmul.f32 -1.442695, %v5380_v27  ;;  %v6032_v19 = vld [vmem:[#allocation5_spill] sm:$0xff] }
 0x187   :  { %v3781_v8 = vpop.eup %3780  ;;  %1523 = vst.msk [vmem:[%s5956_s7 + $0x80] sm:$0xf] %vm1490_vm2, %v3154_v23  ;;  %v3157_v13 = vpack.c.bf16 %v1205_v49, %v1205_v49  ;;  %v1203_v11 = vmul.f32 %v3779_v42, %v5200_v14  ;;  %3800 = vpow2.f32 %v3036_v33  ;;  %v6031_v33 = vld [vmem:[#allocation25_spill] sm:$0xff]  ;;  %v3040_v17 = vmul.f32 -1.442695, %v5390_v2 }
 0x188   :  { %v3783_v40 = vpop.eup %3782  ;;  %2726 = vst.msk [vmem:[%s5957_s8 + $0x80] sm:$0xf] %vm1490_vm2, %v3218_v20  ;;  %v3221_v4 = vpack.c.bf16 %v2409_v62, %v2409_v62  ;;  %v2407_v30 = vmul.f32 %v3781_v8, %v5205_v31  ;;  %3802 = vpow2.f32 %v2872_v37  ;;  %v1899_v53 = vmul.f32 %v4829_v5, %v6031_v33  ;;  %v5452_v20 = vld [vmem:[%s5953_s5] ss:$0 sm:$0xff] }
 0x189   :  { %v3785_v32 = vpop.eup %3784  ;;  %1526 = vst.msk [vmem:[%s5956_s7 + $0x8c] sm:$0xf] %vm1490_vm2, %v3157_v13  ;;  %v3155_v41 = vpack.c.bf16 %v1203_v11, %v1203_v11  ;;  %v1208_v14 = vmul.f32 %v3783_v40, %v5211_v43  ;;  %3804 = vpow2.f32 %v3034_v9  ;;  %v2876_v9 = vmul.f32 -1.442695, %v5398_v55  ;;  %v6033_v62 = vld [vmem:[#allocation26_spill] sm:$0xff] }
 0x18a   :  { %v3787_v61 = vpop.eup %3786  ;;  %2729 = vst.msk [vmem:[%s5957_s8 + $0x8c] sm:$0xf] %vm1490_vm2, %v3221_v4  ;;  %v3219_v31 = vpack.c.bf16 %v2407_v30, %v2407_v30  ;;  %v2412_v37 = vmul.f32 %v3785_v32, %v5214_v35  ;;  %3806 = vpow2.f32 %v2875_v16  ;;  %v698_v18 = vmul.f32 %v4852_v58, %v6032_v19  ;;  %v5463_v11 = vld [vmem:[%s5954_s3] ss:$0 sm:$0xff]  ;;  %v6034_v32 = vld [vmem:[#allocation27_spill] sm:$0xff] }
 0x18b   :  { %v3789_v28 = vpop.eup %3788  ;;  %1524 = vst.msk [vmem:[%s5956_s7 + $0x84] sm:$0xf] %vm1490_vm2, %v3155_v41  ;;  %v3160_v43 = vpack.c.bf16 %v1208_v14, %v1208_v14  ;;  %v1206_v5 = vmul.f32 %v3787_v61, %v5222_v47  ;;  %3808 = vpow2.f32 %v3037_v45  ;;  %v5443_v58 = vadd.f32 %v4876_v38, %v1899_v53  ;;  %v6035_v14 = vld [vmem:[#allocation28_spill] sm:$0xff] }
 0x18c   :  { %v3791_v46 = vpop.eup %3790  ;;  %2727 = vst.msk [vmem:[%s5957_s8 + $0x84] sm:$0xf] %vm1490_vm2, %v3219_v31  ;;  %v3224_v35 = vpack.c.bf16 %v2412_v37, %v2412_v37  ;;  %v2410_v16 = vmul.f32 %v3789_v28, %v5231_v10  ;;  %3810 = vpow2.f32 %v2873_v26  ;;  %v5466_v40 = vadd.f32 %v5463_v11, %v698_v18  ;;  %v6036_v37 = vld [vmem:[#allocation6_spill] sm:$0xff] }
 0x18d   :  { %v3793_v23 = vpop.eup %3792  ;;  %1529 = vst.msk [vmem:[%s5956_s7 + $0x98] sm:$0xf] %vm1490_vm2, %v3160_v43  ;;  %v3158_v47 = vpack.c.bf16 %v1206_v5, %v1206_v5  ;;  %v1209_v45 = vmul.f32 %v3791_v46, %v5244_v36  ;;  %3812 = vpow2.f32 %v3035_v59  ;;  %v1900_v33 = vmul.f32 %v5452_v20, %v6035_v14  ;;  %v5491_v5 = vld [vmem:[%s5955_s6] ss:$0 sm:$0xff]  ;;  %v6040_v14 = vld [vmem:[#allocation7_spill] sm:$0xff] }
 0x18e   :  { %v3795_v49 = vpop.eup %3794  ;;  %2732 = vst.msk [vmem:[%s5957_s8 + $0x98] sm:$0xf] %vm1490_vm2, %v3224_v35  ;;  %v3222_v10 = vpack.c.bf16 %v2410_v16, %v2410_v16  ;;  %v2413_v26 = vmul.f32 %v3793_v23, %v5258_v50  ;;  %3814 = vpow2.f32 %v2878_v44  ;;  %v1902_v50 = vmul.f32 %v5452_v20, %v6033_v62  ;;  %v5475_v44 = vld [vmem:[%s5952_s2] ss:$0 sm:$0xff]  ;;  %v6038_v23 = vld [vmem:[#allocation3_spill] sm:$0xff]  ;;  %v6039_v62 = vld [vmem:[#allocation4_spill] sm:$0xff] }
 0x18f   :  { %v3797_v42 = vpop.eup %3796  ;;  %1527 = vst.msk [vmem:[%s5956_s7 + $0x90] sm:$0xf] %vm1490_vm2, %v3158_v47  ;;  %v3161_v36 = vpack.c.bf16 %v1209_v45, %v1209_v45  ;;  %v1015_v59 = vadd.f32 1.0, %v3795_v49  ;;  %3816 = vpow2.f32 %v3040_v17  ;;  %v696_v41 = vmul.f32 %v5475_v44, %v6034_v32  ;;  %v6037_v46 = vld [vmem:[#allocation2_spill] sm:$0xff] }
 0x190   :  { %v3799_v8 = vpop.eup %3798  ;;  %2730 = vst.msk [vmem:[%s5957_s8 + $0x90] sm:$0xf] %vm1490_vm2, %v3222_v10  ;;  %v3225_v38 = vpack.c.bf16 %v2413_v26, %v2413_v26  ;;  %v2219_v13 = vadd.f32 1.0, %v3797_v42  ;;  %3818 = vpow2.f32 %v2876_v9  ;;  %v3038_v31 = vmul.f32 -1.442695, %v5443_v58 }
 0x191   :  { %v3801_v4 = vpop.eup %3800  ;;  %1530 = vst.msk [vmem:[%s5956_s7 + $0x9c] sm:$0xf] %vm1490_vm2, %v3161_v36  ;;  %3820 = vrcp.f32 %v1015_v59  ;;  %v1020_v30 = vadd.f32 1.0, %v3799_v8  ;;  %v701_v17 = vmul.f32 %v5475_v44, %v6036_v37  ;;  %v5494_v9 = vadd.f32 %v5491_v5, %v1902_v50 }
 0x192   :  { %v3803_v53 = vpop.eup %3802  ;;  %2733 = vst.msk [vmem:[%s5957_s8 + $0x9c] sm:$0xf] %vm1490_vm2, %v3225_v38  ;;  %3822 = vrcp.f32 %v2219_v13  ;;  %v2224_v61 = vadd.f32 1.0, %v3801_v4  ;;  %v1905_v35 = vmul.f32 %v5452_v20, %v6037_v46  ;;  %v2879_v18 = vmul.f32 -1.442695, %v5466_v40 }
 0x193   :  { %v3805_v28 = vpop.eup %3804  ;;  %3824 = vrcp.f32 %v1020_v30  ;;  %v1018_v43 = vadd.f32 1.0, %v3803_v53  ;;  %v699_v47 = vmul.f32 %v5475_v44, %v6038_v23  ;;  %v5502_v10 = vadd.f32 %v5463_v11, %v696_v41 }
 0x194   :  { %v3807_v16 = vpop.eup %3806  ;;  %3826 = vrcp.f32 %v2224_v61  ;;  %v2222_v19 = vadd.f32 1.0, %v3805_v28  ;;  %v5505_v26 = vadd.f32 %v5491_v5, %v1900_v33  ;;  %v5508_v59 = vadd.f32 %v5463_v11, %v701_v17 }
 0x195   :  { %v3809_v45 = vpop.eup %3808  ;;  %3828 = vrcp.f32 %v1018_v43  ;;  %v1021_v49 = vadd.f32 1.0, %v3807_v16  ;;  %v1903_v50 = vmul.f32 %v5452_v20, %v6039_v62  ;;  %v3041_v13 = vmul.f32 -1.442695, %v5494_v9 }
 0x196   :  { %v3811_v42 = vpop.eup %3810  ;;  %3830 = vrcp.f32 %v2222_v19  ;;  %v2225_v36 = vadd.f32 1.0, %v3809_v45  ;;  %v5514_v4 = vadd.f32 %v5491_v5, %v1905_v35  ;;  %v5517_v41 = vadd.f32 %v5463_v11, %v699_v47  ;;  %v6041_v47 = vld [vmem:[#allocation29_spill] sm:$0xff] }
 0x197   :  { %v3813_v8 = vpop.eup %3812  ;;  %3832 = vrcp.f32 %v1021_v49  ;;  %v1019_v38 = vadd.f32 1.0, %v3811_v42  ;;  %v702_v33 = vmul.f32 %v5475_v44, %v6040_v14  ;;  %v2877_v37 = vmul.f32 -1.442695, %v5502_v10 }
 0x198   :  { %v3815_v30 = vpop.eup %3814  ;;  %3834 = vrcp.f32 %v2225_v36  ;;  %v2223_v32 = vadd.f32 1.0, %v3813_v8  ;;  %v5523_v17 = vadd.f32 %v5491_v5, %v1903_v50  ;;  %v3039_v46 = vmul.f32 -1.442695, %v5505_v26 }
 0x199   :  { %v3817_v53 = vpop.eup %3816  ;;  %3836 = vrcp.f32 %v1019_v38  ;;  %v1024_v61 = vadd.f32 1.0, %v3815_v30  ;;  %v2882_v35 = vmul.f32 -1.442695, %v5508_v59  ;;  %v3044_v23 = vmul.f32 -1.442695, %v5514_v4  ;;  %v6042_v30 = vld [vmem:[#allocation8_spill] sm:$0xff] }
 0x19a   :  { %v3819_v28 = vpop.eup %3818  ;;  %3838 = vrcp.f32 %v2223_v32  ;;  %v2228_v43 = vadd.f32 1.0, %v3817_v53  ;;  %v1906_v45 = vmul.f32 %v5452_v20, %v6041_v47  ;;  %v2880_v36 = vmul.f32 -1.442695, %v5517_v41 }
 0x19b   :  { %v3821_v16 = vpop.eup %3820  ;;  %3840 = vrcp.f32 %v1024_v61  ;;  %v1022_v19 = vadd.f32 1.0, %v3819_v28  ;;  %v5533_v62 = vadd.f32 %v5463_v11, %v702_v33  ;;  %v3042_v38 = vmul.f32 -1.442695, %v5523_v17 }
 0x19c   :  { %v3823_v49 = vpop.eup %3822  ;;  %v1207_v42 = vmul.f32 %v3821_v16, %v5292_v22  ;;  %3842 = vrcp.f32 %v2228_v43  ;;  %v700_v32 = vmul.f32 %v5475_v44, %v6042_v30  ;;  %v6043_v22 = vld [vmem:[#allocation30_spill] sm:$0xff]  ;;  %v6044_v30 = vld [vmem:[#allocation9_spill] sm:$0xff] }
 0x19d   :  { %v3825_v50 = vpop.eup %3824  ;;  %v2411_v8 = vmul.f32 %v3823_v49, %v5306_v6  ;;  %3844 = vrcp.f32 %v1022_v19  ;;  %v1904_v28 = vmul.f32 %v5452_v20, %v6043_v22  ;;  %v5544_v6 = vadd.f32 %v5491_v5, %v1906_v45 }
 0x19e   :  { %v3827_v14 = vpop.eup %3826  ;;  %v3159_v53 = vpack.c.bf16 %v1207_v42, %v1207_v42  ;;  %v1212_v61 = vmul.f32 %v3825_v50, %v5328_v24  ;;  %3846 = vpow2.f32 %v3038_v31  ;;  %v2883_v31 = vmul.f32 -1.442695, %v5533_v62 }
 0x19f   :  { %v3829_v43 = vpop.eup %3828  ;;  %v3223_v33 = vpack.c.bf16 %v2411_v8, %v2411_v8  ;;  %v2416_v16 = vmul.f32 %v3827_v14, %v5336_v34  ;;  %3848 = vpow2.f32 %v2879_v18  ;;  %v5558_v45 = vadd.f32 %v5463_v11, %v700_v32 }
 0x1a0   :  { %v3831_v19 = vpop.eup %3830  ;;  %1528 = vst.msk [vmem:[%s5956_s7 + $0x94] sm:$0xf] %vm1490_vm2, %v3159_v53  ;;  %v3164_v47 = vpack.c.bf16 %v1212_v61, %v1212_v61  ;;  %v1210_v24 = vmul.f32 %v3829_v43, %v5341_v39  ;;  %3850 = vpow2.f32 %v3041_v13  ;;  %v5566_v50 = vadd.f32 %v5491_v5, %v1904_v28 }
 0x1a1   :  { %v3833_v49 = vpop.eup %3832  ;;  %2731 = vst.msk [vmem:[%s5957_s8 + $0x94] sm:$0xf] %vm1490_vm2, %v3223_v33  ;;  %v3228_v34 = vpack.c.bf16 %v2416_v16, %v2416_v16  ;;  %v2414_v18 = vmul.f32 %v3831_v19, %v5347_v12  ;;  %3852 = vpow2.f32 %v2877_v37  ;;  %v705_v32 = vmul.f32 %v5475_v44, %v6044_v30 }
 0x1a2   :  { %v3835_v42 = vpop.eup %3834  ;;  %1533 = vst.msk [vmem:[%s5956_s7 + $0xa8] sm:$0xf] %vm1490_vm2, %v3164_v47  ;;  %v3162_v39 = vpack.c.bf16 %v1210_v24, %v1210_v24  ;;  %v1213_v13 = vmul.f32 %v3833_v49, %v5350_v21  ;;  %3854 = vpow2.f32 %v3039_v46  ;;  %v3045_v53 = vmul.f32 -1.442695, %v5544_v6 }
 0x1a3   :  { %v3837_v8 = vpop.eup %3836  ;;  %2736 = vst.msk [vmem:[%s5957_s8 + $0xa8] sm:$0xf] %vm1490_vm2, %v3228_v34  ;;  %v3226_v12 = vpack.c.bf16 %v2414_v18, %v2414_v18  ;;  %v2417_v37 = vmul.f32 %v3835_v42, %v5356_v25  ;;  %3856 = vpow2.f32 %v2882_v35  ;;  %v2881_v22 = vmul.f32 -1.442695, %v5558_v45  ;;  %v6046_v42 = vld [vmem:[#allocation11_spill] sm:$0xff] }
 0x1a4   :  { %v3839_v14 = vpop.eup %3838  ;;  %1531 = vst.msk [vmem:[%s5956_s7 + $0xa0] sm:$0xf] %vm1490_vm2, %v3162_v39  ;;  %v3165_v21 = vpack.c.bf16 %v1213_v13, %v1213_v13  ;;  %v1211_v46 = vmul.f32 %v3837_v8, %v5360_v51  ;;  %3858 = vpow2.f32 %v3044_v23  ;;  %v3043_v43 = vmul.f32 -1.442695, %v5566_v50 }
 0x1a5   :  { %v3841_v61 = vpop.eup %3840  ;;  %2734 = vst.msk [vmem:[%s5957_s8 + $0xa0] sm:$0xf] %vm1490_vm2, %v3226_v12  ;;  %v3229_v25 = vpack.c.bf16 %v2417_v37, %v2417_v37  ;;  %v2415_v35 = vmul.f32 %v3839_v14, %v5367_v52  ;;  %3860 = vpow2.f32 %v2880_v36  ;;  %v5599_v16 = vadd.f32 %v5463_v11, %v705_v32  ;;  %v6047_v37 = vld [vmem:[#allocation31_spill] sm:$0xff] }
 0x1a6   :  { %v3843_v28 = vpop.eup %3842  ;;  %1534 = vst.msk [vmem:[%s5956_s7 + $0xac] sm:$0xf] %vm1490_vm2, %v3165_v21  ;;  %v3163_v51 = vpack.c.bf16 %v1211_v46, %v1211_v46  ;;  %v1216_v23 = vmul.f32 %v3841_v61, %v5380_v27  ;;  %3862 = vpow2.f32 %v3042_v38  ;;  %v703_v39 = vmul.f32 %v5475_v44, %v6046_v42  ;;  %v6048_v21 = vld [vmem:[#allocation32_spill] sm:$0xff] }
 0x1a7   :  { %v3845_v33 = vpop.eup %3844  ;;  %2737 = vst.msk [vmem:[%s5957_s8 + $0xac] sm:$0xf] %vm1490_vm2, %v3229_v25  ;;  %v3227_v52 = vpack.c.bf16 %v2415_v35, %v2415_v35  ;;  %v2420_v36 = vmul.f32 %v3843_v28, %v5390_v2  ;;  %3864 = vpow2.f32 %v2883_v31  ;;  %v6045_v31 = vld [vmem:[#allocation10_spill] sm:$0xff]  ;;  %v5623_v12 = vmul.f32 -1.442695, %v5599_v16 }
 0x1a8   :  { %v3847_v19 = vpop.eup %3846  ;;  %1532 = vst.msk [vmem:[%s5956_s7 + $0xa4] sm:$0xf] %vm1490_vm2, %v3163_v51  ;;  %v3168_v27 = vpack.c.bf16 %v1216_v23, %v1216_v23  ;;  %v1214_v38 = vmul.f32 %v3845_v33, %v5398_v55  ;;  %3866 = vpow2.f32 %v3045_v53  ;;  %v1909_v49 = vmul.f32 %v5452_v20, %v6045_v31  ;;  %v6049_v53 = vld [vmem:[#allocation33_spill] sm:$0xff]  ;;  %v6050_v28 = vld [vmem:[#allocation34_spill] sm:$0xff] }
 0x1a9   :  { %v3849_v47 = vpop.eup %3848  ;;  %2735 = vst.msk [vmem:[%s5957_s8 + $0xa4] sm:$0xf] %vm1490_vm2, %v3227_v52  ;;  %v3232_v2 = vpack.c.bf16 %v2420_v36, %v2420_v36  ;;  %v2226_v24 = vadd.f32 1.0, %v3847_v19  ;;  %3868 = vpow2.f32 %v2881_v22  ;;  %v1907_v30 = vmul.f32 %v5452_v20, %v6047_v37  ;;  %v6051_v52 = vld [vmem:[#allocation35_spill] sm:$0xff] }
 0x1aa   :  { %v3851_v34 = vpop.eup %3850  ;;  %1537 = vst.msk [vmem:[%s5956_s7 + $0xb8] sm:$0xf] %vm1490_vm2, %v3168_v27  ;;  %v3166_v55 = vpack.c.bf16 %v1214_v38, %v1214_v38  ;;  %v1025_v18 = vadd.f32 1.0, %v3849_v47  ;;  %3870 = vpow2.f32 %v3043_v43  ;;  %v706_v46 = vmul.f32 %v5475_v44, %v6048_v21 }
 0x1ab   :  { %v3853_v13 = vpop.eup %3852  ;;  %2740 = vst.msk [vmem:[%s5957_s8 + $0xb8] sm:$0xf] %vm1490_vm2, %v3232_v2  ;;  %3872 = vrcp.f32 %v2226_v24  ;;  %v2229_v8 = vadd.f32 1.0, %v3851_v34  ;;  %v1910_v61 = vmul.f32 %v5452_v20, %v6049_v53  ;;  %v5636_v22 = vadd.f32 %v5491_v5, %v1909_v49 }
 0x1ac   :  { %v3855_v32 = vpop.eup %3854  ;;  %1535 = vst.msk [vmem:[%s5956_s7 + $0xb0] sm:$0xf] %vm1490_vm2, %v3166_v55  ;;  %3874 = vrcp.f32 %v1025_v18  ;;  %v1023_v14 = vadd.f32 1.0, %v3853_v13  ;;  %v704_v51 = vmul.f32 %v5475_v44, %v6050_v28  ;;  %v5641_v33 = vadd.f32 %v5463_v11, %v703_v39 }
 0x1ad   :  { %v3857_v25 = vpop.eup %3856  ;;  %3876 = vrcp.f32 %v2229_v8  ;;  %v2227_v35 = vadd.f32 1.0, %v3855_v32  ;;  %v1908_v36 = vmul.f32 %v5452_v20, %v6051_v52  ;;  %v5646_v38 = vadd.f32 %v5491_v5, %v1907_v30 }
 0x1ae   :  { %v3859_v23 = vpop.eup %3858  ;;  %3878 = vrcp.f32 %v1023_v14  ;;  %v1028_v43 = vadd.f32 1.0, %v3857_v25  ;;  %v709_v47 = vmul.f32 %v5475_v44, %v5060_v57  ;;  %v5651_v31 = vadd.f32 %v5463_v11, %v706_v46 }
 0x1af   :  { %v3861_v19 = vpop.eup %3860  ;;  %3880 = vrcp.f32 %v2227_v35  ;;  %v2232_v27 = vadd.f32 1.0, %v3859_v23  ;;  %v5654_v49 = vadd.f32 %v5491_v5, %v1910_v61  ;;  %v3048_v18 = vmul.f32 -1.442695, %v5636_v22 }
 0x1b0   :  { %v3863_v2 = vpop.eup %3862  ;;  %3882 = vrcp.f32 %v1028_v43  ;;  %v1026_v24 = vadd.f32 1.0, %v3861_v19  ;;  %v5658_v42 = vadd.f32 %v5463_v11, %v704_v51  ;;  %v2884_v13 = vmul.f32 -1.442695, %v5641_v33 }
 0x1b1   :  { %v3865_v34 = vpop.eup %3864  ;;  %3884 = vrcp.f32 %v2232_v27  ;;  %v2230_v55 = vadd.f32 1.0, %v3863_v2  ;;  %v5662_v8 = vadd.f32 %v5491_v5, %v1908_v36  ;;  %v3046_v32 = vmul.f32 -1.442695, %v5646_v38 }
 0x1b2   :  { %v3867_v39 = vpop.eup %3866  ;;  %3886 = vrcp.f32 %v1026_v24  ;;  %v1029_v57 = vadd.f32 1.0, %v3865_v34  ;;  %v5666_v14 = vadd.f32 %v5463_v11, %v709_v47  ;;  %v2887_v53 = vmul.f32 -1.442695, %v5651_v31 }
 0x1b3   :  { %v3869_v37 = vpop.eup %3868  ;;  %3888 = vrcp.f32 %v2230_v55  ;;  %v2233_v30 = vadd.f32 1.0, %v3867_v39  ;;  %v3049_v61 = vmul.f32 -1.442695, %v5654_v49  ;;  %v2885_v28 = vmul.f32 -1.442695, %v5658_v42 }
 0x1b4   :  { %v3871_v21 = vpop.eup %3870  ;;  %3890 = vrcp.f32 %v1029_v57  ;;  %v1027_v46 = vadd.f32 1.0, %v3869_v37  ;;  %v1913_v51 = vmul.f32 %v5452_v20, %v5062_v48  ;;  %v3047_v52 = vmul.f32 -1.442695, %v5662_v8 }
 0x1b5   :  { %v3873_v25 = vpop.eup %3872  ;;  %3892 = vrcp.f32 %v2233_v30  ;;  %v2231_v35 = vadd.f32 1.0, %v3871_v21  ;;  %v707_v36 = vmul.f32 %v5475_v44, %v5073_v29  ;;  %v2890_v47 = vmul.f32 -1.442695, %v5666_v14 }
 0x1b6   :  { %v3875_v23 = vpop.eup %3874  ;;  %v2418_v43 = vmul.f32 %v3873_v25, %v5443_v58  ;;  %3894 = vrcp.f32 %v1027_v46  ;;  %v1911_v2 = vmul.f32 %v5452_v20, %v5075_v7  ;;  %v710_v58 = vmul.f32 %v5475_v44, %v5084_v1 }
 0x1b7   :  { %v3877_v19 = vpop.eup %3876  ;;  %v1217_v27 = vmul.f32 %v3875_v23, %v5466_v40  ;;  %3896 = vrcp.f32 %v2231_v35  ;;  %v5687_v40 = vadd.f32 %v5491_v5, %v1913_v51  ;;  %v5695_v1 = vadd.f32 %v5463_v11, %v707_v36 }
 0x1b8   :  { %v3879_v24 = vpop.eup %3878  ;;  %v3230_v48 = vpack.c.bf16 %v2418_v43, %v2418_v43  ;;  %v2421_v34 = vmul.f32 %v3877_v19, %v5494_v9  ;;  %3898 = vpow2.f32 %v5623_v12  ;;  %v5703_v37 = vadd.f32 %v5491_v5, %v1911_v2 }
 0x1b9   :  { %v3881_v55 = vpop.eup %3880  ;;  %v3169_v29 = vpack.c.bf16 %v1217_v27, %v1217_v27  ;;  %v1215_v39 = vmul.f32 %v3879_v24, %v5502_v10  ;;  %3900 = vpow2.f32 %v3048_v18  ;;  %v5711_v21 = vadd.f32 %v5463_v11, %v710_v58 }
 0x1ba   :  { %v3883_v57 = vpop.eup %3882  ;;  %2738 = vst.msk [vmem:[%s5957_s8 + $0xb0] sm:$0xf] %vm1490_vm2, %v3230_v48  ;;  %v3233_v7 = vpack.c.bf16 %v2421_v34, %v2421_v34  ;;  %v2419_v9 = vmul.f32 %v3881_v55, %v5505_v26  ;;  %3902 = vpow2.f32 %v2884_v13  ;;  %v3052_v25 = vmul.f32 -1.442695, %v5687_v40 }
 0x1bb   :  { %v3885_v12 = vpop.eup %3884  ;;  %1538 = vst.msk [vmem:[%s5956_s7 + $0xbc] sm:$0xf] %vm1490_vm2, %v3169_v29  ;;  %v3167_v10 = vpack.c.bf16 %v1215_v39, %v1215_v39  ;;  %v1220_v18 = vmul.f32 %v3883_v57, %v5508_v59  ;;  %3904 = vpow2.f32 %v3046_v32  ;;  %v2888_v51 = vmul.f32 -1.442695, %v5695_v1 }
 0x1bc   :  { %v3887_v30 = vpop.eup %3886  ;;  %2741 = vst.msk [vmem:[%s5957_s8 + $0xbc] sm:$0xf] %vm1490_vm2, %v3233_v7  ;;  %v3231_v26 = vpack.c.bf16 %v2419_v9, %v2419_v9  ;;  %v2424_v13 = vmul.f32 %v3885_v12, %v5514_v4  ;;  %3906 = vpow2.f32 %v2887_v53  ;;  %v3050_v43 = vmul.f32 -1.442695, %v5703_v37 }
 0x1bd   :  { %v3889_v46 = vpop.eup %3888  ;;  %1536 = vst.msk [vmem:[%s5956_s7 + $0xb4] sm:$0xf] %vm1490_vm2, %v3167_v10  ;;  %v3172_v59 = vpack.c.bf16 %v1220_v18, %v1220_v18  ;;  %v1218_v32 = vmul.f32 %v3887_v30, %v5517_v41  ;;  %3908 = vpow2.f32 %v3049_v61  ;;  %v2891_v19 = vmul.f32 -1.442695, %v5711_v21 }
 0x1be   :  { %v3891_v35 = vpop.eup %3890  ;;  %2739 = vst.msk [vmem:[%s5957_s8 + $0xb4] sm:$0xf] %vm1490_vm2, %v3231_v26  ;;  %v3236_v4 = vpack.c.bf16 %v2424_v13, %v2424_v13  ;;  %v2422_v53 = vmul.f32 %v3889_v46, %v5523_v17  ;;  %3910 = vpow2.f32 %v2885_v28  ;;  %v1914_v24 = vmul.f32 %v5452_v20, %v5086_v63 }
 0x1bf   :  { %v3893_v23 = vpop.eup %3892  ;;  %1541 = vst.msk [vmem:[%s5956_s7 + $0xc8] sm:$0xf] %vm1490_vm2, %v3172_v59  ;;  %v3170_v41 = vpack.c.bf16 %v1218_v32, %v1218_v32  ;;  %v1221_v61 = vmul.f32 %v3891_v35, %v5533_v62  ;;  %3912 = vpow2.f32 %v3047_v52  ;;  %v708_v58 = vmul.f32 %v5475_v44, %v5097_v56 }
 0x1c0   :  { %v3895_v36 = vpop.eup %3894  ;;  %2744 = vst.msk [vmem:[%s5957_s8 + $0xc8] sm:$0xf] %vm1490_vm2, %v3236_v4  ;;  %v3234_v17 = vpack.c.bf16 %v2422_v53, %v2422_v53  ;;  %v2425_v28 = vmul.f32 %v3893_v23, %v5544_v6  ;;  %3914 = vpow2.f32 %v2890_v47  ;;  %v1912_v29 = vmul.f32 %v5452_v20, %v5099_v54 }
 0x1c1   :  { %v3897_v27 = vpop.eup %3896  ;;  %1539 = vst.msk [vmem:[%s5956_s7 + $0xc0] sm:$0xf] %vm1490_vm2, %v3170_v41  ;;  %v3173_v62 = vpack.c.bf16 %v1221_v61, %v1221_v61  ;;  %v1219_v52 = vmul.f32 %v3895_v36, %v5558_v45  ;;  %3916 = vpow2.f32 %v3052_v25  ;;  %v5770_v9 = vadd.f32 %v5491_v5, %v1914_v24 }
 0x1c2   :  { %v3899_v2 = vpop.eup %3898  ;;  %2742 = vst.msk [vmem:[%s5957_s8 + $0xc0] sm:$0xf] %vm1490_vm2, %v3234_v17  ;;  %v3237_v6 = vpack.c.bf16 %v2425_v28, %v2425_v28  ;;  %v2423_v47 = vmul.f32 %v3897_v27, %v5566_v50  ;;  %3918 = vpow2.f32 %v2888_v51  ;;  %v713_v54 = vmul.f32 %v5475_v44, %v5134_v3  ;;  %v6052_v27 = vld [vmem:[#allocation36_spill] sm:$0xff] }
 0x1c3   :  { %v3901_v48 = vpop.eup %3900  ;;  %1542 = vst.msk [vmem:[%s5956_s7 + $0xcc] sm:$0xf] %vm1490_vm2, %v3173_v62  ;;  %v3171_v45 = vpack.c.bf16 %v1219_v52, %v1219_v52  ;;  %v1032_v34 = vadd.f32 1.0, %v3899_v2  ;;  %3920 = vpow2.f32 %v3050_v43  ;;  %v5775_v18 = vadd.f32 %v5463_v11, %v708_v58  ;;  %v6054_v58 = vld [vmem:[#allocation38_spill] sm:$0xff] }
 0x1c4   :  { %v3903_v55 = vpop.eup %3902  ;;  %2745 = vst.msk [vmem:[%s5957_s8 + $0xcc] sm:$0xf] %vm1490_vm2, %v3237_v6  ;;  %v3235_v50 = vpack.c.bf16 %v2423_v47, %v2423_v47  ;;  %v2236_v63 = vadd.f32 1.0, %v3901_v48  ;;  %3922 = vpow2.f32 %v2891_v19  ;;  %v1917_v30 = vmul.f32 %v5452_v20, %v5136_v0  ;;  %v6053_v47 = vld [vmem:[#allocation37_spill] sm:$0xff] }
 0x1c5   :  { %v3905_v39 = vpop.eup %3904  ;;  %1540 = vst.msk [vmem:[%s5956_s7 + $0xc4] sm:$0xf] %vm1490_vm2, %v3171_v45  ;;  %3924 = vrcp.f32 %v1032_v34  ;;  %v1030_v56 = vadd.f32 1.0, %v3903_v55  ;;  %v5780_v46 = vadd.f32 %v5491_v5, %v1912_v29  ;;  %v711_v59 = vmul.f32 %v5475_v44, %v5146_v15 }
 0x1c6   :  { %v3907_v57 = vpop.eup %3906  ;;  %2743 = vst.msk [vmem:[%s5957_s8 + $0xc4] sm:$0xf] %vm1490_vm2, %v3235_v50  ;;  %3926 = vrcp.f32 %v2236_v63  ;;  %v2234_v7 = vadd.f32 1.0, %v3905_v39  ;;  %v1915_v25 = vmul.f32 %v5452_v20, %v5148_v60  ;;  %v3053_v0 = vmul.f32 -1.442695, %v5770_v9  ;;  %v6055_v39 = vld [vmem:[#allocation39_spill] sm:$0xff] }
 0x1c7   :  { %v3909_v12 = vpop.eup %3908  ;;  %3928 = vrcp.f32 %v1030_v56  ;;  %v1033_v10 = vadd.f32 1.0, %v3907_v57  ;;  %v5788_v53 = vadd.f32 %v5463_v11, %v713_v54  ;;  %v2889_v41 = vmul.f32 -1.442695, %v5775_v18 }
 0x1c8   :  { %v3911_v26 = vpop.eup %3910  ;;  %3930 = vrcp.f32 %v2234_v7  ;;  %v2237_v13 = vadd.f32 1.0, %v3909_v12  ;;  %v5792_v15 = vadd.f32 %v5491_v5, %v1917_v30  ;;  %v3051_v60 = vmul.f32 -1.442695, %v5780_v46 }
 0x1c9   :  { %v3913_v32 = vpop.eup %3912  ;;  %3932 = vrcp.f32 %v1033_v10  ;;  %v1031_v3 = vadd.f32 1.0, %v3911_v26  ;;  %v5796_v36 = vadd.f32 %v5463_v11, %v711_v59  ;;  %v5799_v19 = vadd.f32 %v5491_v5, %v1915_v25 }
 0x1ca   :  { %v3915_v35 = vpop.eup %3914  ;;  %3934 = vrcp.f32 %v2237_v13  ;;  %v2235_v4 = vadd.f32 1.0, %v3913_v32  ;;  %v714_v62 = vmul.f32 %v5475_v44, %v6052_v27  ;;  %v2894_v6 = vmul.f32 -1.442695, %v5788_v53 }
 0x1cb   :  { %v3917_v51 = vpop.eup %3916  ;;  %3936 = vrcp.f32 %v1031_v3  ;;  %v1036_v23 = vadd.f32 1.0, %v3915_v35  ;;  %v1918_v24 = vmul.f32 %v5452_v20, %v6053_v47  ;;  %v3056_v34 = vmul.f32 -1.442695, %v5792_v15 }
 0x1cc   :  { %v3919_v61 = vpop.eup %3918  ;;  %3938 = vrcp.f32 %v2235_v4  ;;  %v2240_v43 = vadd.f32 1.0, %v3917_v51  ;;  %v712_v55 = vmul.f32 %v5475_v44, %v6054_v58  ;;  %v2892_v29 = vmul.f32 -1.442695, %v5796_v36 }
 0x1cd   :  { %v3921_v17 = vpop.eup %3920  ;;  %3940 = vrcp.f32 %v1036_v23  ;;  %v1034_v28 = vadd.f32 1.0, %v3919_v61  ;;  %v1916_v56 = vmul.f32 %v5452_v20, %v6055_v39  ;;  %v3054_v54 = vmul.f32 -1.442695, %v5799_v19 }
 0x1ce   :  { %v3923_v52 = vpop.eup %3922  ;;  %3942 = vrcp.f32 %v2240_v43  ;;  %v2238_v2 = vadd.f32 1.0, %v3921_v17  ;;  %v5816_v12 = vadd.f32 %v5463_v11, %v714_v62 }
 0x1cf   :  { %v3925_v48 = vpop.eup %3924  ;;  %3944 = vrcp.f32 %v1034_v28  ;;  %v1037_v45 = vadd.f32 1.0, %v3923_v52  ;;  %v5832_v3 = vadd.f32 %v5491_v5, %v1916_v56 }
 0x1d0   :  { %v3927_v50 = vpop.eup %3926  ;;  %v1224_v63 = vmul.f32 %v3925_v48, %v5599_v16  ;;  %3946 = vrcp.f32 %v2238_v2  ;;  %v5820_v16 = vadd.f32 %v5491_v5, %v1918_v24  ;;  %v2895_v35 = vmul.f32 -1.442695, %v5816_v12 }
 0x1d1   :  { %v3929_v57 = vpop.eup %3928  ;;  %v2428_v7 = vmul.f32 %v3927_v50, %v5636_v22  ;;  %3948 = vrcp.f32 %v1037_v45  ;;  %v5824_v22 = vadd.f32 %v5463_v11, %v712_v55 }
 0x1d2   :  { %v3931_v10 = vpop.eup %3930  ;;  %v3176_v44 = vpack.c.bf16 %v1224_v63, %v1224_v63  ;;  %v1222_v30 = vmul.f32 %v3929_v57, %v5641_v33  ;;  %3950 = vpow2.f32 %v3053_v0  ;;  %v3057_v0 = vmul.f32 -1.442695, %v5820_v16 }
 0x1d3   :  { %v3933_v26 = vpop.eup %3932  ;;  %v3240_v13 = vpack.c.bf16 %v2428_v7, %v2428_v7  ;;  %v2426_v20 = vmul.f32 %v3931_v10, %v5646_v38  ;;  %3952 = vpow2.f32 %v2889_v41  ;;  %v2893_v41 = vmul.f32 -1.442695, %v5824_v22 }
 0x1d4   :  { %v3935_v59 = vpop.eup %3934  ;;  %1545 = vst.msk [vmem:[%s5956_s7 + $0xd8] sm:$0xf] %vm1490_vm2, %v3176_v44  ;;  %v3174_v32 = vpack.c.bf16 %v1222_v30, %v1222_v30  ;;  %v1225_v33 = vmul.f32 %v3933_v26, %v5651_v31  ;;  %3954 = vpow2.f32 %v3051_v60  ;;  %v3055_v60 = vmul.f32 -1.442695, %v5832_v3 }
 0x1d5   :  { %v3937_v25 = vpop.eup %3936  ;;  %2748 = vst.msk [vmem:[%s5957_s8 + $0xd8] sm:$0xf] %vm1490_vm2, %v3240_v13  ;;  %v3238_v11 = vpack.c.bf16 %v2426_v20, %v2426_v20  ;;  %v2429_v38 = vmul.f32 %v3935_v59, %v5654_v49  ;;  %3956 = vpow2.f32 %v2894_v6 }
 0x1d6   :  { %v3939_v4 = vpop.eup %3938  ;;  %1543 = vst.msk [vmem:[%s5956_s7 + $0xd0] sm:$0xf] %vm1490_vm2, %v3174_v32  ;;  %v3177_v5 = vpack.c.bf16 %v1225_v33, %v1225_v33  ;;  %v1223_v31 = vmul.f32 %v3937_v25, %v5658_v42  ;;  %3958 = vpow2.f32 %v3056_v34 }
 0x1d7   :  { %v3941_v51 = vpop.eup %3940  ;;  %2746 = vst.msk [vmem:[%s5957_s8 + $0xd0] sm:$0xf] %vm1490_vm2, %v3238_v11  ;;  %v3241_v49 = vpack.c.bf16 %v2429_v38, %v2429_v38  ;;  %v2427_v23 = vmul.f32 %v3939_v4, %v5662_v8  ;;  %3960 = vpow2.f32 %v2892_v29 }
 0x1d8   :  { %v3943_v61 = vpop.eup %3942  ;;  %1546 = vst.msk [vmem:[%s5956_s7 + $0xdc] sm:$0xf] %vm1490_vm2, %v3177_v5  ;;  %v3175_v42 = vpack.c.bf16 %v1223_v31, %v1223_v31  ;;  %v1228_v43 = vmul.f32 %v3941_v51, %v5666_v14  ;;  %3962 = vpow2.f32 %v3054_v54 }
 0x1d9   :  { %v3945_v17 = vpop.eup %3944  ;;  %2749 = vst.msk [vmem:[%s5957_s8 + $0xdc] sm:$0xf] %vm1490_vm2, %v3241_v49  ;;  %v3239_v8 = vpack.c.bf16 %v2427_v23, %v2427_v23  ;;  %v2432_v28 = vmul.f32 %v3943_v61, %v5687_v40  ;;  %3964 = vpow2.f32 %v2895_v35 }
 0x1da   :  { %v3947_v27 = vpop.eup %3946  ;;  %1544 = vst.msk [vmem:[%s5956_s7 + $0xd4] sm:$0xf] %vm1490_vm2, %v3175_v42  ;;  %v3180_v14 = vpack.c.bf16 %v1228_v43, %v1228_v43  ;;  %v1226_v62 = vmul.f32 %v3945_v17, %v5695_v1  ;;  %3966 = vpow2.f32 %v3057_v0 }
 0x1db   :  { %v3949_v52 = vpop.eup %3948  ;;  %2747 = vst.msk [vmem:[%s5957_s8 + $0xd4] sm:$0xf] %vm1490_vm2, %v3239_v8  ;;  %v3244_v2 = vpack.c.bf16 %v2432_v28, %v2432_v28  ;;  %v2430_v40 = vmul.f32 %v3947_v27, %v5703_v37  ;;  %3968 = vpow2.f32 %v2893_v41 }
 0x1dc   :  { %v3951_v6 = vpop.eup %3950  ;;  %1549 = vst.msk [vmem:[%s5956_s7 + $0xe8] sm:$0xf] %vm1490_vm2, %v3180_v14  ;;  %v3178_v47 = vpack.c.bf16 %v1226_v62, %v1226_v62  ;;  %v1229_v1 = vmul.f32 %v3949_v52, %v5711_v21  ;;  %3970 = vpow2.f32 %v3055_v60 }
 0x1dd   :  { %v3953_v24 = vpop.eup %3952  ;;  %2752 = vst.msk [vmem:[%s5957_s8 + $0xe8] sm:$0xf] %vm1490_vm2, %v3244_v2  ;;  %v3242_v48 = vpack.c.bf16 %v2430_v40, %v2430_v40  ;;  %v2241_v45 = vadd.f32 1.0, %v3951_v6 }
 0x1de   :  { %v3955_v37 = vpop.eup %3954  ;;  %1547 = vst.msk [vmem:[%s5956_s7 + $0xe0] sm:$0xf] %vm1490_vm2, %v3178_v47  ;;  %v3181_v34 = vpack.c.bf16 %v1229_v1, %v1229_v1  ;;  %v1035_v58 = vadd.f32 1.0, %v3953_v24 }
 0x1df   :  { %v3957_v55 = vpop.eup %3956  ;;  %2750 = vst.msk [vmem:[%s5957_s8 + $0xe0] sm:$0xf] %vm1490_vm2, %v3242_v48  ;;  %3972 = vrcp.f32 %v2241_v45  ;;  %v2239_v21 = vadd.f32 1.0, %v3955_v37 }
 0x1e0   :  { %v3959_v50 = vpop.eup %3958  ;;  %1550 = vst.msk [vmem:[%s5956_s7 + $0xec] sm:$0xf] %vm1490_vm2, %v3181_v34  ;;  %3974 = vrcp.f32 %v1035_v58  ;;  %v1040_v63 = vadd.f32 1.0, %v3957_v55 }
 0x1e1   :  { %v3961_v29 = vpop.eup %3960  ;;  %3976 = vrcp.f32 %v2239_v21  ;;  %v2244_v39 = vadd.f32 1.0, %v3959_v50 }
 0x1e2   :  { %v3963_v56 = vpop.eup %3962  ;;  %3978 = vrcp.f32 %v1040_v63  ;;  %v1038_v57 = vadd.f32 1.0, %v3961_v29 }
 0x1e3   :  { %v3965_v7 = vpop.eup %3964  ;;  %3980 = vrcp.f32 %v2244_v39  ;;  %v2242_v54 = vadd.f32 1.0, %v3963_v56 }
 0x1e4   :  { %v3967_v10 = vpop.eup %3966  ;;  %3982 = vrcp.f32 %v1038_v57  ;;  %v1041_v44 = vadd.f32 1.0, %v3965_v7 }
 0x1e5   :  { %v3969_v30 = vpop.eup %3968  ;;  %3984 = vrcp.f32 %v2242_v54  ;;  %v2245_v26 = vadd.f32 1.0, %v3967_v10 }
 0x1e6   :  { %v3971_v13 = vpop.eup %3970  ;;  %3986 = vrcp.f32 %v1041_v44  ;;  %v1039_v20 = vadd.f32 1.0, %v3969_v30 }
 0x1e7   :  { %3988 = vrcp.f32 %v2245_v26  ;;  %v2243_v59 = vadd.f32 1.0, %v3971_v13 }
 0x1e8   :  { %3990 = vrcp.f32 %v1039_v20 }
 0x1e9   :  { %v3973_v32 = vpop.eup %3972  ;;  %3992 = vrcp.f32 %v2243_v59 }
 0x1ea   :  { %v3975_v33 = vpop.eup %3974  ;;  %v2433_v25 = vmul.f32 %v3973_v32, %v5770_v9 }
 0x1eb   :  { %v3977_v11 = vpop.eup %3976  ;;  %v1227_v38 = vmul.f32 %v3975_v33, %v5775_v18 }
 0x1ec   :  { %v3979_v35 = vpop.eup %3978  ;;  %v3245_v4 = vpack.c.bf16 %v2433_v25, %v2433_v25  ;;  %v2431_v5 = vmul.f32 %v3977_v11, %v5780_v46 }
 0x1ed   :  { %v3981_v31 = vpop.eup %3980  ;;  %v3179_v0 = vpack.c.bf16 %v1227_v38, %v1227_v38  ;;  %v1232_v51 = vmul.f32 %v3979_v35, %v5788_v53 }
 0x1ee   :  { %v3983_v49 = vpop.eup %3982  ;;  %2753 = vst.msk [vmem:[%s5957_s8 + $0xec] sm:$0xf] %vm1490_vm2, %v3245_v4  ;;  %v3243_v23 = vpack.c.bf16 %v2431_v5, %v2431_v5  ;;  %v2436_v9 = vmul.f32 %v3981_v31, %v5792_v15 }
 0x1ef   :  { %v3985_v41 = vpop.eup %3984  ;;  %1548 = vst.msk [vmem:[%s5956_s7 + $0xe4] sm:$0xf] %vm1490_vm2, %v3179_v0  ;;  %v3184_v18 = vpack.c.bf16 %v1232_v51, %v1232_v51  ;;  %v1230_v46 = vmul.f32 %v3983_v49, %v5796_v36 }
 0x1f0   :  { %v3987_v61 = vpop.eup %3986  ;;  %2751 = vst.msk [vmem:[%s5957_s8 + $0xe4] sm:$0xf] %vm1490_vm2, %v3243_v23  ;;  %v3248_v53 = vpack.c.bf16 %v2436_v9, %v2436_v9  ;;  %v2434_v42 = vmul.f32 %v3985_v41, %v5799_v19 }
 0x1f1   :  { %v3989_v43 = vpop.eup %3988  ;;  %1553 = vst.msk [vmem:[%s5956_s7 + $0xf8] sm:$0xf] %vm1490_vm2, %v3184_v18  ;;  %v3182_v15 = vpack.c.bf16 %v1230_v46, %v1230_v46  ;;  %v1233_v60 = vmul.f32 %v3987_v61, %v5816_v12 }
 0x1f2   :  { %v3991_v17 = vpop.eup %3990  ;;  %2756 = vst.msk [vmem:[%s5957_s8 + $0xf8] sm:$0xf] %vm1490_vm2, %v3248_v53  ;;  %v3246_v36 = vpack.c.bf16 %v2434_v42, %v2434_v42  ;;  %v2437_v8 = vmul.f32 %v3989_v43, %v5820_v16 }
 0x1f3   :  { %v3993_v28 = vpop.eup %3992  ;;  %1551 = vst.msk [vmem:[%s5956_s7 + $0xf0] sm:$0xf] %vm1490_vm2, %v3182_v15  ;;  %v3185_v19 = vpack.c.bf16 %v1233_v60, %v1233_v60  ;;  %v1231_v27 = vmul.f32 %v3991_v17, %v5824_v22 }
 0x1f4   :  { %2754 = vst.msk [vmem:[%s5957_s8 + $0xf0] sm:$0xf] %vm1490_vm2, %v3246_v36  ;;  %v3249_v12 = vpack.c.bf16 %v2437_v8, %v2437_v8  ;;  %v2435_v14 = vmul.f32 %v3993_v28, %v5832_v3 }
 0x1f5   :  { %1554 = vst.msk [vmem:[%s5956_s7 + $0xfc] sm:$0xf] %vm1490_vm2, %v3185_v19  ;;  %v3183_v16 = vpack.c.bf16 %v1231_v27, %v1231_v27 }
 0x1f6   :  { %2757 = vst.msk [vmem:[%s5957_s8 + $0xfc] sm:$0xf] %vm1490_vm2, %v3249_v12  ;;  %v3247_v22 = vpack.c.bf16 %v2435_v14, %v2435_v14 }
 0x1f7   :  { %1552 = vst.msk [vmem:[%s5956_s7 + $0xf4] sm:$0xf] %vm1490_vm2, %v3183_v16 }
 0x1f8   :  { %2755 = vst.msk [vmem:[%s5957_s8 + $0xf4] sm:$0xf] %vm1490_vm2, %v3247_v22 }

// kernel: c3_forward.4
= control target key start
LH: loop header
LB: loop body
LE: loop exit
PB: predicated region body
PF: predicated region fallthrough
CT: control target
= control target key end

     0   :  { %s5645_s24 = smov 0   ;;  %s6966_s0 = inlined_call_operand.vmem [shape: bf16[2,16,16,4], index: 0, kind: input, shape index: {}]   ;;  %s6967_s1 = inlined_call_operand.vmem [shape: bf16[4,4], index: 1, kind: input, shape index: {}]   ;;  %s6968_s2 = inlined_call_operand.vmem [shape: f32[1,4], index: 2, kind: input, shape index: {}]   ;;  %s6969_s3 = inlined_call_operand.vmem [shape: f32[1,4], index: 3, kind: input, shape index: {}]   ;;  %s6970_s4 = inlined_call_operand.vmem [shape: bf16[9,4,4], index: 4, kind: input, shape index: {}]   ;;  %s6971_s5 = inlined_call_operand.vmem [shape: f32[1,4], index: 5, kind: input, shape index: {}]   ;;  %s6972_s6 = inlined_call_operand.vmem [shape: f32[1,4], index: 6, kind: input, shape index: {}]   ;;  %s6973_s7 = inlined_call_operand.vmem [shape: bf16[2,16,16,4], index: 7, kind: output, shape index: {}]  }
   0x1 LB: > { %s4178_s25 = sadd.s32 4294967295, %s5602_s24   ;;  %p4182_p0 = scmp.ge.s32.totalorder %s5602_s24, 1  ;;  %s5602_s24 = sphi %s5645_s24, %s17_s24  }
   0x2   : > { %p237_p1 = scmp.lt.s32.totalorder %s5602_s24, 3 }
   0x4   : > { %p238_p2 = pnand %p4182_p0, %p237_p1 }
   0x5   : > { %v312_v0 = vld [vmem:[%s6967_s1] sm:$0x3] (!%p238_p2)  ;;  %vm442_vm0 = vcmask (!%p238_p2), 1041408   ;;  %p269_p3 = scmp.lt.s32.totalorder (!%p238_p2), %s4178_s25, 1  ;;  %vm393_vm1 = vcmask (!%p238_p2), 31744   ;;  %v5604_v18 = vmov (!%p238_p2), 0.0  }
   0x6   : > { %241 = sbr.rel (%p238_p2) target bundleno = 862 (0x35e), region = 48  ;;  %5273 = vmatprep.subr.msk.bf16.mxu0 (!%p238_p2), %vm442_vm0, %v312_v0  ;;  %v444_v1 = vsel (!%p238_p2), %vm442_vm0, %v312_v0, 0  ;;  %918 = vst.msk [vmem:[#allocation2 + $0x48] sm:$0xff] (!%p238_p2), %vm393_vm1, %v5604_v18  ;;  %909 = vst.msk [vmem:[#allocation2] sm:$0xff] (!%p238_p2), %vm393_vm1, %v5604_v18  ;;  %v4253_v19 = vld [vmem:[%s6970_s4 + $0x2] sm:$0x3] (!%p238_p2) }
   0x7   : > { %4678 = vmatpush3.bf16.msra.mxu0 (!%p238_p2), %v444_v1  ;;  %910 = vst.msk [vmem:[#allocation2 + $0x8] sm:$0xff] (!%p238_p2), %vm393_vm1, %v5604_v18  ;;  %911 = vst.msk [vmem:[#allocation2 + $0x10] sm:$0xff] (!%p238_p2), %vm393_vm1, %v5604_v18  ;;  %v4320_v20 = vld [vmem:[%s6970_s4 + $0x8] sm:$0x3] (!%p238_p2)  ;;  %v1162_v21 = vsel (!%p238_p2), %vm442_vm0, %v4253_v19, 0  ;;  %vm4090_vm2 = vcmask (!%p238_p2), 27648  }
   0x8   : > { %912 = vst.msk [vmem:[#allocation2 + $0x18] sm:$0xff] (!%p238_p2), %vm393_vm1, %v5604_v18  ;;  %913 = vst.msk [vmem:[#allocation2 + $0x20] sm:$0xff] (!%p238_p2), %vm393_vm1, %v5604_v18  ;;  %5274 = vmatprep.subr.msk.bf16.mxu0 (!%p238_p2), %vm442_vm0, %v4253_v19  ;;  %5278 = vmatprep.subr.msk.bf16.mxu1 (!%p238_p2), %vm442_vm0, %v4320_v20  ;;  %v2224_v24 = vsel (!%p238_p2), %vm442_vm0, %v4320_v20, 0  ;;  %v5858_v26 = vld [vmem:[%s6970_s4 + $0xa] sm:$0x3] (!%p238_p2) }
   0x9   : > { %914 = vst.msk [vmem:[#allocation2 + $0x28] sm:$0xff] (!%p238_p2), %vm393_vm1, %v5604_v18  ;;  %915 = vst.msk [vmem:[#allocation2 + $0x30] sm:$0xff] (!%p238_p2), %vm393_vm1, %v5604_v18  ;;  %4848 = vmatpush3.bf16.msra.mxu1 (!%p238_p2), %v2224_v24  ;;  %v5865_v27 = vld [vmem:[%s6970_s4] sm:$0x3] (!%p238_p2) }
   0xa   : > { %916 = vst.msk [vmem:[#allocation2 + $0x38] sm:$0xff] (!%p238_p2), %vm393_vm1, %v5604_v18  ;;  %917 = vst.msk [vmem:[#allocation2 + $0x40] sm:$0xff] (!%p238_p2), %vm393_vm1, %v5604_v18  ;;  %5279 = vmatprep.subr.msk.bf16.mxu1 (!%p238_p2), %vm442_vm0, %v5858_v26  ;;  %v5872_v28 = vld [vmem:[%s6968_s2] ss:$0 sm:$0xff] (!%p238_p2) }
   0xb   : > { %919 = vst.msk [vmem:[#allocation2 + $0x50] sm:$0xff] (!%p238_p2), %vm393_vm1, %v5604_v18  ;;  %920 = vst.msk [vmem:[#allocation2 + $0x58] sm:$0xff] (!%p238_p2), %vm393_vm1, %v5604_v18  ;;  %v5877_v30 = vld [vmem:[%s6969_s3] ss:$0 sm:$0xff] (!%p238_p2) }
   0xc   : > { %921 = vst.msk [vmem:[#allocation2 + $0x60] sm:$0xff] (!%p238_p2), %vm393_vm1, %v5604_v18  ;;  %922 = vst.msk [vmem:[#allocation2 + $0x68] sm:$0xff] (!%p238_p2), %vm393_vm1, %v5604_v18 }
   0xd   : > { %s6989_s25 = smov (!%p269_p3, %s4178_s25), 1  ;;  %923 = vst.msk [vmem:[#allocation2 + $0x70] sm:$0xff] %vm393_vm1, %v5604_v18  ;;  %924 = vst.msk [vmem:[#allocation2 + $0x78] sm:$0xff] %vm393_vm1, %v5604_v18 }
   0xe   : > { %s4473_s28 = sshll.u32 %s6989_s25, 7  ;;  %925 = vst.msk [vmem:[#allocation2 + $0x80] sm:$0xff] %vm393_vm1, %v5604_v18  ;;  %926 = vst.msk [vmem:[#allocation2 + $0x88] sm:$0xff] %vm393_vm1, %v5604_v18  ;;  %v1063_v22 = vld [vmem:[#allocation2 + $0x8] sm:$0xff]  ;;  %v1064_v23 = vld [vmem:[#allocation2 + $0x10] sm:$0xff] }
   0xf   : > { %s5666_s8 = scalar_lea.vmem %s6966_s0, %s4473_s28  ;;  %927 = vst.msk [vmem:[#allocation2 + $0x90] sm:$0xff] %vm393_vm1, %v5604_v18  ;;  %928 = vst.msk [vmem:[#allocation2 + $0x98] sm:$0xff] %vm393_vm1, %v5604_v18  ;;  %v1095_v25 = vpack.c.bf16 %v1064_v23, %v1063_v22  ;;  %s6727_s18 = scalar_lea.vmem %s6973_s7, %s4473_s28 }
  0x10   : > { %v280_v2 = vld [vmem:[%s5666_s8] sm:$0xff]   ;;  %v282_v3 = vld [vmem:[%s5666_s8 + $0x8] sm:$0xff]   ;;  %v284_v4 = vld [vmem:[%s5666_s8 + $0x10] sm:$0xff]   ;;  %929 = vst.msk [vmem:[#allocation2 + $0xa0] sm:$0xff] %vm393_vm1, %v5604_v18 }
  0x11   : > { %4679 = vmatprep.mubr.msk.bf16.mxu0 %vm393_vm1, %v280_v2  ;;  %v286_v5 = vld [vmem:[%s5666_s8 + $0x18] sm:$0xff]   ;;  %v288_v6 = vld [vmem:[%s5666_s8 + $0x20] sm:$0xff]   ;;  %v290_v7 = vld [vmem:[%s5666_s8 + $0x28] sm:$0xff]   ;;  %930 = vst.msk [vmem:[#allocation2 + $0xa8] sm:$0xff] %vm393_vm1, %v5604_v18 }
  0x12   : > { %4680 = vmatmul.mubr.msk.bf16.vlgmr.msra.gmra.mrb[0].mxu0 %vm393_vm1, %v282_v3  ;;  %v292_v8 = vld [vmem:[%s5666_s8 + $0x30] sm:$0xff]   ;;  %v294_v9 = vld [vmem:[%s5666_s8 + $0x38] sm:$0xff]   ;;  %v296_v10 = vld [vmem:[%s5666_s8 + $0x40] sm:$0xff]   ;;  %931 = vst.msk [vmem:[#allocation2 + $0xb0] sm:$0xff] %vm393_vm1, %v5604_v18 }
  0x13   : > { %4683 = vmatprep.mubr.msk.bf16.mxu0 %vm393_vm1, %v284_v4  ;;  %v298_v11 = vld [vmem:[%s5666_s8 + $0x48] sm:$0xff]   ;;  %v300_v12 = vld [vmem:[%s5666_s8 + $0x50] sm:$0xff]   ;;  %v302_v13 = vld [vmem:[%s5666_s8 + $0x58] sm:$0xff]   ;;  %932 = vst.msk [vmem:[#allocation2 + $0xb8] sm:$0xff] %vm393_vm1, %v5604_v18  ;;  %4712 = vmatpush3.bf16.msra.mxu0 %v1162_v21 }
  0x14   : > { %v304_v14 = vld [vmem:[%s5666_s8 + $0x60] sm:$0xff]   ;;  %v306_v15 = vld [vmem:[%s5666_s8 + $0x68] sm:$0xff]   ;;  %v308_v16 = vld [vmem:[%s5666_s8 + $0x70] sm:$0xff]   ;;  %933 = vst.msk [vmem:[#allocation2 + $0xc0] sm:$0xff] %vm393_vm1, %v5604_v18  ;;  %5275 = vmatprep.subr.msk.bf16.mxu0 %vm442_vm0, %v5865_v27 }
  0x15   : > { %v310_v17 = vld [vmem:[%s5666_s8 + $0x78] sm:$0xff]   ;;  %934 = vst.msk [vmem:[#allocation2 + $0xc8] sm:$0xff] %vm393_vm1, %v5604_v18  ;;  %935 = vst.msk [vmem:[#allocation2 + $0xd0] sm:$0xff] %vm393_vm1, %v5604_v18 }
  0x16   : > { %936 = vst.msk [vmem:[#allocation2 + $0xd8] sm:$0xff] %vm393_vm1, %v5604_v18  ;;  %937 = vst.msk [vmem:[#allocation2 + $0xe0] sm:$0xff] %vm393_vm1, %v5604_v18 }
  0x17   : > { %938 = vst.msk [vmem:[#allocation2 + $0xe8] sm:$0xff] %vm393_vm1, %v5604_v18  ;;  %939 = vst.msk [vmem:[#allocation2 + $0xf0] sm:$0xff] %vm393_vm1, %v5604_v18 }
  0x18   : > { %940 = vst.msk [vmem:[#allocation2 + $0xf8] sm:$0xff] %vm393_vm1, %v5604_v18  ;;  %941 = vst.msk [vmem:[#allocation2 + $0x100] sm:$0xff] %vm393_vm1, %v5604_v18 }
  0x19   : > { %942 = vst.msk [vmem:[#allocation2 + $0x108] sm:$0xff] %vm393_vm1, %v5604_v18  ;;  %943 = vst.msk [vmem:[#allocation2 + $0x110] sm:$0xff] %vm393_vm1, %v5604_v18 }
  0x1a   : > { %4684 = vmatmul.mubr.msk.bf16.gmra.mrb[4].mxu0 %vm393_vm1, %v286_v5  ;;  %944 = vst.msk [vmem:[#allocation2 + $0x118] sm:$0xff] %vm393_vm1, %v5604_v18  ;;  %945 = vst.msk [vmem:[#allocation2 + $0x120] sm:$0xff] %vm393_vm1, %v5604_v18 }
  0x1b   : > { %4687 = vmatprep.mubr.msk.bf16.mxu0 %vm393_vm1, %v288_v6  ;;  %946 = vst.msk [vmem:[#allocation2 + $0x128] sm:$0xff] %vm393_vm1, %v5604_v18  ;;  %947 = vst.msk [vmem:[#allocation2 + $0x130] sm:$0xff] %vm393_vm1, %v5604_v18 }
  0x1c   : > { %948 = vst.msk [vmem:[#allocation2 + $0x138] sm:$0xff] %vm393_vm1, %v5604_v18  ;;  %949 = vst.msk [vmem:[#allocation2 + $0x140] sm:$0xff] %vm393_vm1, %v5604_v18 }
  0x1d   : > { %950 = vst.msk [vmem:[#allocation2 + $0x148] sm:$0xff] %vm393_vm1, %v5604_v18  ;;  %951 = vst.msk [vmem:[#allocation2 + $0x150] sm:$0xff] %vm393_vm1, %v5604_v18 }
  0x1e   : > { %952 = vst.msk [vmem:[#allocation2 + $0x158] sm:$0xff] %vm393_vm1, %v5604_v18  ;;  %953 = vst.msk [vmem:[#allocation2 + $0x160] sm:$0xff] %vm393_vm1, %v5604_v18 }
  0x1f   : > { %954 = vst.msk [vmem:[#allocation2 + $0x168] sm:$0xff] %vm393_vm1, %v5604_v18  ;;  %955 = vst.msk [vmem:[#allocation2 + $0x170] sm:$0xff] %vm393_vm1, %v5604_v18 }
  0x20   : > { %956 = vst.msk [vmem:[#allocation2 + $0x178] sm:$0xff] %vm393_vm1, %v5604_v18  ;;  %957 = vst.msk [vmem:[#allocation2 + $0x180] sm:$0xff] %vm393_vm1, %v5604_v18 }
  0x21   : > { %958 = vst.msk [vmem:[#allocation2 + $0x188] sm:$0xff] %vm393_vm1, %v5604_v18  ;;  %959 = vst.msk [vmem:[#allocation2 + $0x190] sm:$0xff] %vm393_vm1, %v5604_v18 }
  0x22   : > { %4688 = vmatmul.mubr.msk.bf16.gmra.mrb[8].mxu0 %vm393_vm1, %v290_v7  ;;  %960 = vst.msk [vmem:[#allocation2 + $0x198] sm:$0xff] %vm393_vm1, %v5604_v18  ;;  %961 = vst.msk [vmem:[#allocation2 + $0x1a0] sm:$0xff] %vm393_vm1, %v5604_v18 }
  0x23   : > { %4691 = vmatprep.mubr.msk.bf16.mxu0 %vm393_vm1, %v292_v8  ;;  %962 = vst.msk [vmem:[#allocation2 + $0x1a8] sm:$0xff] %vm393_vm1, %v5604_v18  ;;  %963 = vst.msk [vmem:[#allocation2 + $0x1b0] sm:$0xff] %vm393_vm1, %v5604_v18 }
  0x24   : > { %964 = vst.msk [vmem:[#allocation2 + $0x1b8] sm:$0xff] %vm393_vm1, %v5604_v18  ;;  %965 = vst.msk [vmem:[#allocation2 + $0x1c0] sm:$0xff] %vm393_vm1, %v5604_v18 }
  0x25   : > { %966 = vst.msk [vmem:[#allocation2 + $0x1c8] sm:$0xff] %vm393_vm1, %v5604_v18  ;;  %967 = vst.msk [vmem:[#allocation2 + $0x1d0] sm:$0xff] %vm393_vm1, %v5604_v18 }
  0x26   : > { %968 = vst.msk [vmem:[#allocation2 + $0x1d8] sm:$0xff] %vm393_vm1, %v5604_v18  ;;  %969 = vst.msk [vmem:[#allocation2 + $0x1e0] sm:$0xff] %vm393_vm1, %v5604_v18 }
  0x27   : > { %970 = vst.msk [vmem:[#allocation2 + $0x1e8] sm:$0xff] %vm393_vm1, %v5604_v18  ;;  %971 = vst.msk [vmem:[#allocation2 + $0x1f0] sm:$0xff] %vm393_vm1, %v5604_v18 }
  0x28   : > { %972 = vst.msk [vmem:[#allocation2 + $0x1f8] sm:$0xff] %vm393_vm1, %v5604_v18  ;;  %973 = vst.msk [vmem:[#allocation2 + $0x200] sm:$0xff] %vm393_vm1, %v5604_v18 }
  0x29   : > { %974 = vst.msk [vmem:[#allocation2 + $0x208] sm:$0xff] %vm393_vm1, %v5604_v18  ;;  %975 = vst.msk [vmem:[#allocation2 + $0x210] sm:$0xff] %vm393_vm1, %v5604_v18 }
  0x2a   : > { %4692 = vmatmul.mubr.msk.bf16.gmra.mrb[12].mxu0 %vm393_vm1, %v294_v9  ;;  %976 = vst.msk [vmem:[#allocation2 + $0x218] sm:$0xff] %vm393_vm1, %v5604_v18  ;;  %977 = vst.msk [vmem:[#allocation2 + $0x220] sm:$0xff] %vm393_vm1, %v5604_v18 }
  0x2b   : > { %4695 = vmatprep.mubr.msk.bf16.mxu0 %vm393_vm1, %v296_v10  ;;  %978 = vst.msk [vmem:[#allocation2 + $0x228] sm:$0xff] %vm393_vm1, %v5604_v18  ;;  %979 = vst.msk [vmem:[#allocation2 + $0x230] sm:$0xff] %vm393_vm1, %v5604_v18 }
  0x2c   : > { %980 = vst.msk [vmem:[#allocation2 + $0x238] sm:$0xff] %vm393_vm1, %v5604_v18 }
  0x32   : > { %4696 = vmatmul.mubr.msk.bf16.gmra.mrb[16].mxu0 %vm393_vm1, %v298_v11 }
  0x33   : > { %4699 = vmatprep.mubr.msk.bf16.mxu0 %vm393_vm1, %v300_v12 }
  0x3a   : > { %4700 = vmatmul.mubr.msk.bf16.gmra.mrb[20].mxu0 %vm393_vm1, %v302_v13 }
  0x3b   : > { %4703 = vmatprep.mubr.msk.bf16.mxu0 %vm393_vm1, %v304_v14 }
  0x42   : > { %4704 = vmatmul.mubr.msk.bf16.gmra.mrb[24].mxu0 %vm393_vm1, %v306_v15 }
  0x43   : > { %4707 = vmatprep.mubr.msk.bf16.mxu0 %vm393_vm1, %v308_v16 }
  0x4a   : > { %4708 = vmatmul.mubr.msk.bf16.gmra.mrb[28].mxu0 %vm393_vm1, %v310_v17 }
  0x4b   : > { %4713 = vmatprep.mubr.msk.bf16.mxu0 %vm393_vm1, %v1095_v25 }
  0xe5   : > { %v4681_v29 = vpop.f32.mrb[0].mxu0 }
  0xe6   : > { %v616_v31 = vmul.f32 %v4681_v29, %v5872_v28  ;;  %v480_v32 = vpop.f32.mrb[1].mxu0 }
  0xe7   : > { %v614_v33 = vmul.f32 %v5872_v28, %v480_v32  ;;  %v4682_v34 = vpop.f32.mrb[2].mxu0 }
  0xe8   : > { %v5882_v35 = vadd.f32 %v5877_v30, %v616_v31  ;;  %v617_v36 = vmul.f32 %v4682_v34, %v5872_v28  ;;  %v483_v37 = vpop.f32.mrb[3].mxu0 }
  0xe9   : > { %v5886_v38 = vadd.f32 %v5877_v30, %v614_v33  ;;  %v615_v39 = vmul.f32 %v5872_v28, %v483_v37 }
  0xea   : > { %v4223_v40 = vmul.f32 -1.442695, %v5882_v35  ;;  %v5891_v41 = vadd.f32 %v5877_v30, %v617_v36 }
  0xeb   : > { %v4221_v42 = vmul.f32 -1.442695, %v5886_v38  ;;  %v5895_v43 = vadd.f32 %v5877_v30, %v615_v39 }
  0xec   : > { %5324 = vpow2.f32 %v4223_v40  ;;  %v4224_v44 = vmul.f32 -1.442695, %v5891_v41 }
  0xed   : > { %5326 = vpow2.f32 %v4221_v42  ;;  %v4222_v45 = vmul.f32 -1.442695, %v5895_v43  ;;  %v4685_v46 = vpop.f32.mrb[4].mxu0 }
  0xee   : > { %5328 = vpow2.f32 %v4224_v44  ;;  %v620_v47 = vmul.f32 %v4685_v46, %v5872_v28  ;;  %v496_v48 = vpop.f32.mrb[5].mxu0 }
  0xef   : > { %5330 = vpow2.f32 %v4222_v45  ;;  %v618_v49 = vmul.f32 %v5872_v28, %v496_v48  ;;  %v4686_v50 = vpop.f32.mrb[6].mxu0 }
  0xf0   : > { %v5902_v51 = vadd.f32 %v5877_v30, %v620_v47  ;;  %v621_v52 = vmul.f32 %v4686_v50, %v5872_v28  ;;  %v499_v53 = vpop.f32.mrb[7].mxu0 }
  0xf1   : > { %v5906_v54 = vadd.f32 %v5877_v30, %v618_v49  ;;  %v619_v55 = vmul.f32 %v5872_v28, %v499_v53 }
  0xf2   : > { %v4227_v56 = vmul.f32 -1.442695, %v5902_v51  ;;  %v5911_v57 = vadd.f32 %v5877_v30, %v621_v52 }
  0xf3   : > { %v4225_v58 = vmul.f32 -1.442695, %v5906_v54  ;;  %v5915_v59 = vadd.f32 %v5877_v30, %v619_v55 }
  0xf4   : > { %5332 = vpow2.f32 %v4227_v56  ;;  %v4228_v60 = vmul.f32 -1.442695, %v5911_v57 }
  0xf5   : > { %5334 = vpow2.f32 %v4225_v58  ;;  %v4226_v61 = vmul.f32 -1.442695, %v5915_v59  ;;  %v4689_v62 = vpop.f32.mrb[8].mxu0 }
  0xf6   : > { %v5325_v63 = vpop.eup %5324  ;;  %5336 = vpow2.f32 %v4228_v60  ;;  %v624_v0 = vmul.f32 %v4689_v62, %v5872_v28  ;;  %v512_v1 = vpop.f32.mrb[9].mxu0 }
  0xf7   : > { %v5327_v2 = vpop.eup %5326  ;;  %v783_v3 = vadd.f32 1.0, %v5325_v63  ;;  %5338 = vpow2.f32 %v4226_v61  ;;  %v622_v4 = vmul.f32 %v5872_v28, %v512_v1  ;;  %v4690_v5 = vpop.f32.mrb[10].mxu0 }
  0xf8   : > { %v5329_v6 = vpop.eup %5328  ;;  %v781_v7 = vadd.f32 1.0, %v5327_v2  ;;  %v5922_v8 = vadd.f32 %v5877_v30, %v624_v0  ;;  %v625_v9 = vmul.f32 %v4690_v5, %v5872_v28  ;;  %v515_v10 = vpop.f32.mrb[11].mxu0 }
  0xf9   : > { %v5331_v11 = vpop.eup %5330  ;;  %5340 = vrcp.f32 %v783_v3  ;;  %v784_v12 = vadd.f32 1.0, %v5329_v6  ;;  %v5926_v13 = vadd.f32 %v5877_v30, %v622_v4  ;;  %v623_v14 = vmul.f32 %v5872_v28, %v515_v10 }
  0xfa   : > { %5342 = vrcp.f32 %v781_v7  ;;  %v782_v15 = vadd.f32 1.0, %v5331_v11  ;;  %v4231_v16 = vmul.f32 -1.442695, %v5922_v8  ;;  %v5931_v17 = vadd.f32 %v5877_v30, %v625_v9 }
  0xfb   : > { %5344 = vrcp.f32 %v784_v12  ;;  %v4229_v18 = vmul.f32 -1.442695, %v5926_v13  ;;  %v5935_v19 = vadd.f32 %v5877_v30, %v623_v14 }
  0xfc   : > { %5346 = vrcp.f32 %v782_v15  ;;  %v4232_v20 = vmul.f32 -1.442695, %v5931_v17 }
  0xfd   : > { %5348 = vpow2.f32 %v4231_v16  ;;  %v4230_v21 = vmul.f32 -1.442695, %v5935_v19  ;;  %v4693_v22 = vpop.f32.mrb[12].mxu0 }
  0xfe   : > { %v5333_v23 = vpop.eup %5332  ;;  %5350 = vpow2.f32 %v4229_v18  ;;  %v628_v24 = vmul.f32 %v4693_v22, %v5872_v28  ;;  %v528_v25 = vpop.f32.mrb[13].mxu0 }
  0xff   : > { %v5335_v29 = vpop.eup %5334  ;;  %v787_v31 = vadd.f32 1.0, %v5333_v23  ;;  %5352 = vpow2.f32 %v4232_v20  ;;  %v626_v32 = vmul.f32 %v5872_v28, %v528_v25  ;;  %v4694_v33 = vpop.f32.mrb[14].mxu0 }
 0x100   : > { %v5337_v34 = vpop.eup %5336  ;;  %v785_v36 = vadd.f32 1.0, %v5335_v29  ;;  %5354 = vpow2.f32 %v4230_v21  ;;  %v5942_v37 = vadd.f32 %v5877_v30, %v628_v24  ;;  %v629_v39 = vmul.f32 %v4694_v33, %v5872_v28  ;;  %v531_v40 = vpop.f32.mrb[15].mxu0 }
 0x101   : > { %v5339_v42 = vpop.eup %5338  ;;  %5356 = vrcp.f32 %v787_v31  ;;  %v788_v44 = vadd.f32 1.0, %v5337_v34  ;;  %v5946_v45 = vadd.f32 %v5877_v30, %v626_v32  ;;  %v627_v46 = vmul.f32 %v5872_v28, %v531_v40 }
 0x102   : > { %5358 = vrcp.f32 %v785_v36  ;;  %v786_v47 = vadd.f32 1.0, %v5339_v42  ;;  %v4235_v48 = vmul.f32 -1.442695, %v5942_v37  ;;  %v5951_v49 = vadd.f32 %v5877_v30, %v629_v39 }
 0x103   : > { %v5341_v50 = vpop.eup %5340  ;;  %5360 = vrcp.f32 %v788_v44  ;;  %v4233_v52 = vmul.f32 -1.442695, %v5946_v45  ;;  %v5955_v53 = vadd.f32 %v5877_v30, %v627_v46 }
 0x104   : > { %v5343_v55 = vpop.eup %5342  ;;  %v879_v56 = vmul.f32 %v5341_v50, %v5882_v35  ;;  %5362 = vrcp.f32 %v786_v47  ;;  %v4236_v58 = vmul.f32 -1.442695, %v5951_v49 }
 0x105   : > { %v5345_v60 = vpop.eup %5344  ;;  %v877_v61 = vmul.f32 %v5343_v55, %v5886_v38  ;;  %5364 = vpow2.f32 %v4235_v48  ;;  %v4234_v62 = vmul.f32 -1.442695, %v5955_v53  ;;  %v4697_v63 = vpop.f32.mrb[16].mxu0  ;;  %v2518_v48 = vsel %vm442_vm0, %v5858_v26, 0 }
 0x106   : > { %v5347_v0 = vpop.eup %5346  ;;  %984 = vst.msk [vmem:[#allocation2 + $0x48] sm:$0xff] %vm393_vm1, %v879_v56  ;;  %v880_v1 = vmul.f32 %v5345_v60, %v5891_v41  ;;  %5366 = vpow2.f32 %v4233_v52  ;;  %v632_v2 = vmul.f32 %v4697_v63, %v5872_v28  ;;  %v544_v3 = vpop.f32.mrb[17].mxu0 }
 0x107   : > { %v5349_v35 = vpop.eup %5348  ;;  %982 = vst.msk [vmem:[#allocation2 + $0x28] sm:$0xff] %vm393_vm1, %v877_v61  ;;  %v878_v4 = vmul.f32 %v5347_v0, %v5895_v43  ;;  %5368 = vpow2.f32 %v4236_v58  ;;  %v630_v38 = vmul.f32 %v5872_v28, %v544_v3  ;;  %v4698_v5 = vpop.f32.mrb[18].mxu0 }
 0x108   : > { %v5351_v6 = vpop.eup %5350  ;;  %985 = vst.msk [vmem:[#allocation2 + $0x50] sm:$0xff] %vm393_vm1, %v880_v1  ;;  %v791_v7 = vadd.f32 1.0, %v5349_v35  ;;  %5370 = vpow2.f32 %v4234_v62  ;;  %v5969_v41 = vadd.f32 %v5877_v30, %v632_v2  ;;  %v633_v9 = vmul.f32 %v4698_v5, %v5872_v28  ;;  %v547_v10 = vpop.f32.mrb[19].mxu0 }
 0x109   : > { %v5353_v11 = vpop.eup %5352  ;;  %983 = vst.msk [vmem:[#allocation2 + $0x30] sm:$0xff] %vm393_vm1, %v878_v4  ;;  %v789_v12 = vadd.f32 1.0, %v5351_v6  ;;  %v5974_v43 = vadd.f32 %v5877_v30, %v630_v38  ;;  %v631_v14 = vmul.f32 %v5872_v28, %v547_v10  ;;  %v1374_v10 = vsel %vm442_vm0, %v5865_v27, 0 }
 0x10a   : > { %v5355_v15 = vpop.eup %5354  ;;  %5372 = vrcp.f32 %v791_v7  ;;  %v792_v16 = vadd.f32 1.0, %v5353_v11  ;;  %v4239_v18 = vmul.f32 -1.442695, %v5969_v41  ;;  %v5979_v20 = vadd.f32 %v5877_v30, %v633_v9 }
 0x10b   : > { %v5357_v21 = vpop.eup %5356  ;;  %5374 = vrcp.f32 %v789_v12  ;;  %v790_v22 = vadd.f32 1.0, %v5355_v15  ;;  %v4237_v23 = vmul.f32 -1.442695, %v5974_v43  ;;  %v5983_v24 = vadd.f32 %v5877_v30, %v631_v14 }
 0x10c   : > { %v5359_v25 = vpop.eup %5358  ;;  %v883_v29 = vmul.f32 %v5357_v21, %v5902_v51  ;;  %5376 = vrcp.f32 %v792_v16  ;;  %v4240_v31 = vmul.f32 -1.442695, %v5979_v20 }
 0x10d   : > { %v5361_v32 = vpop.eup %5360  ;;  %v881_v33 = vmul.f32 %v5359_v25, %v5906_v54  ;;  %5378 = vrcp.f32 %v790_v22  ;;  %v4238_v34 = vmul.f32 -1.442695, %v5983_v24  ;;  %v4701_v36 = vpop.f32.mrb[20].mxu0  ;;  %v1067_v9 = vld [vmem:[#allocation2 + $0x48] sm:$0xff] }
 0x10e   : > { %v5363_v39 = vpop.eup %5362  ;;  %988 = vst.msk [vmem:[#allocation2 + $0x88] sm:$0xff] %vm393_vm1, %v883_v29  ;;  %v884_v40 = vmul.f32 %v5361_v32, %v5911_v57  ;;  %5380 = vpow2.f32 %v4239_v18  ;;  %v636_v42 = vmul.f32 %v4701_v36, %v5872_v28  ;;  %v560_v44 = vpop.f32.mrb[21].mxu0  ;;  %v1065_v38 = vld [vmem:[#allocation2 + $0x28] sm:$0xff] }
 0x10f   : > { %v5365_v51 = vpop.eup %5364  ;;  %986 = vst.msk [vmem:[#allocation2 + $0x68] sm:$0xff] %vm393_vm1, %v881_v33  ;;  %v882_v46 = vmul.f32 %v5363_v39, %v5915_v59  ;;  %5382 = vpow2.f32 %v4237_v23  ;;  %v634_v54 = vmul.f32 %v5872_v28, %v560_v44  ;;  %v4702_v47 = vpop.f32.mrb[22].mxu0  ;;  %v1068_v2 = vld [vmem:[#allocation2 + $0x50] sm:$0xff]  ;;  %v6034_v23 = vld [vmem:[%s6970_s4 + $0x4] sm:$0x3] }
 0x110   : > { %v5367_v50 = vpop.eup %5366  ;;  %989 = vst.msk [vmem:[#allocation2 + $0x90] sm:$0xff] %vm393_vm1, %v884_v40  ;;  %v795_v57 = vadd.f32 1.0, %v5365_v51  ;;  %5384 = vpow2.f32 %v4240_v31  ;;  %v5999_v52 = vadd.f32 %v5877_v30, %v636_v42  ;;  %v637_v55 = vmul.f32 %v4702_v47, %v5872_v28  ;;  %v563_v56 = vpop.f32.mrb[23].mxu0  ;;  %v1066_v61 = vld [vmem:[#allocation2 + $0x30] sm:$0xff] }
 0x111   : > { %v5369_v58 = vpop.eup %5368  ;;  %987 = vst.msk [vmem:[#allocation2 + $0x70] sm:$0xff] %vm393_vm1, %v882_v46  ;;  %v793_v59 = vadd.f32 1.0, %v5367_v50  ;;  %5386 = vpow2.f32 %v4238_v34  ;;  %v6004_v60 = vadd.f32 %v5877_v30, %v634_v54  ;;  %v635_v26 = vmul.f32 %v5872_v28, %v563_v56 }
 0x112   : > { %v5371_v62 = vpop.eup %5370  ;;  %5388 = vrcp.f32 %v795_v57  ;;  %v796_v63 = vadd.f32 1.0, %v5369_v58  ;;  %v4243_v0 = vmul.f32 -1.442695, %v5999_v52  ;;  %v6009_v1 = vadd.f32 %v5877_v30, %v637_v55 }
 0x113   : > { %5390 = vrcp.f32 %v793_v59  ;;  %v794_v3 = vadd.f32 1.0, %v5371_v62  ;;  %v4241_v35 = vmul.f32 -1.442695, %v6004_v60  ;;  %v6013_v4 = vadd.f32 %v5877_v30, %v635_v26 }
 0x114   : > { %v5373_v5 = vpop.eup %5372  ;;  %5392 = vrcp.f32 %v796_v63  ;;  %v4244_v6 = vmul.f32 -1.442695, %v6009_v1  ;;  %v1096_v7 = vpack.c.bf16 %v1066_v61, %v1065_v38  ;;  %v6020_v15 = vpack.c.bf16 %v1068_v2, %v1067_v9 }
 0x115   : > { %v5375_v11 = vpop.eup %5374  ;;  %v887_v12 = vmul.f32 %v5373_v5, %v5922_v8  ;;  %5394 = vrcp.f32 %v794_v3  ;;  %v4242_v14 = vmul.f32 -1.442695, %v6013_v4  ;;  %v4705_v16 = vpop.f32.mrb[24].mxu0  ;;  %v6029_v8 = vld [vmem:[%s6970_s4 + $0xc] sm:$0x3] }
 0x116   : > { %v5377_v18 = vpop.eup %5376  ;;  %v885_v21 = vmul.f32 %v5375_v11, %v5926_v13  ;;  %5396 = vpow2.f32 %v4243_v0  ;;  %4714 = vmatmul.mubr.msk.bf16.vlgmr.msra.gmra.mrb[32].mxu0 %vm393_vm1, %v1096_v7  ;;  %4849 = vmatprep.mubr.msk.bf16.mxu1 %vm393_vm1, %v1096_v7  ;;  %v640_v22 = vmul.f32 %v4705_v16, %v5872_v28  ;;  %v576_v27 = vpop.f32.mrb[25].mxu0  ;;  %v1069_v51 = vld [vmem:[#allocation2 + $0x68] sm:$0xff] }
 0x117   : > { %v5379_v25 = vpop.eup %5378  ;;  %992 = vst.msk [vmem:[#allocation2 + $0xc8] sm:$0xff] %vm393_vm1, %v887_v12  ;;  %v888_v13 = vmul.f32 %v5377_v18, %v5931_v17  ;;  %5398 = vpow2.f32 %v4241_v35  ;;  %4717 = vmatprep.mubr.msk.bf16.mxu0 %vm393_vm1, %v6020_v15  ;;  %4850 = vmatmul.mubr.msk.bf16.vlgmr.msra.gmra.mrb[0].mxu1 %vm393_vm1, %v6020_v15  ;;  %v638_v29 = vmul.f32 %v5872_v28, %v576_v27  ;;  %v4706_v31 = vpop.f32.mrb[26].mxu0  ;;  %v1072_v50 = vld [vmem:[#allocation2 + $0x90] sm:$0xff]  ;;  %v1071_v62 = vld [vmem:[#allocation2 + $0x88] sm:$0xff] }
 0x118   : > { %v5381_v32 = vpop.eup %5380  ;;  %990 = vst.msk [vmem:[#allocation2 + $0xa8] sm:$0xff] %vm393_vm1, %v885_v21  ;;  %v886_v33 = vmul.f32 %v5379_v25, %v5935_v19  ;;  %5400 = vpow2.f32 %v4244_v6  ;;  %4882 = vmatpush3.bf16.msra.mxu1 %v2518_v48  ;;  %v6046_v34 = vadd.f32 %v5877_v30, %v640_v22  ;;  %v641_v17 = vmul.f32 %v4706_v31, %v5872_v28  ;;  %v579_v36 = vpop.f32.mrb[27].mxu0  ;;  %v1070_v39 = vld [vmem:[#allocation2 + $0x70] sm:$0xff] }
 0x119   : > { %4746 = vmatpush3.bf16.msra.mxu0 %v1374_v10  ;;  %v5383_v40 = vpop.eup %5382  ;;  %993 = vst.msk [vmem:[#allocation2 + $0xd0] sm:$0xff] %vm393_vm1, %v888_v13  ;;  %v799_v42 = vadd.f32 1.0, %v5381_v32  ;;  %5402 = vpow2.f32 %v4242_v14  ;;  %v6051_v44 = vadd.f32 %v5877_v30, %v638_v29  ;;  %v639_v19 = vmul.f32 %v5872_v28, %v579_v36  ;;  %5280 = vmatprep.subr.msk.bf16.mxu1 %vm442_vm0, %v6029_v8 }
 0x11a   : > { %5276 = vmatprep.subr.msk.bf16.mxu0 %vm442_vm0, %v6034_v23  ;;  %v5385_v46 = vpop.eup %5384  ;;  %991 = vst.msk [vmem:[#allocation2 + $0xb0] sm:$0xff] %vm393_vm1, %v886_v33  ;;  %v797_v54 = vadd.f32 1.0, %v5383_v40  ;;  %v6060_v47 = vadd.f32 %v5877_v30, %v641_v17  ;;  %v6062_v48 = vpack.c.bf16 %v1070_v39, %v1069_v51  ;;  %v4247_v56 = vmul.f32 -1.442695, %v6046_v34 }
 0x11b   : > { %v5387_v57 = vpop.eup %5386  ;;  %5404 = vrcp.f32 %v799_v42  ;;  %v800_v55 = vadd.f32 1.0, %v5385_v46  ;;  %v6066_v58 = vadd.f32 %v5877_v30, %v639_v19  ;;  %v4245_v61 = vmul.f32 -1.442695, %v6051_v44 }
 0x11c   : > { %v5389_v59 = vpop.eup %5388  ;;  %5406 = vrcp.f32 %v797_v54  ;;  %v798_v26 = vadd.f32 1.0, %v5387_v57  ;;  %4853 = vmatprep.mubr.msk.bf16.mxu1 %vm393_vm1, %v6062_v48  ;;  %v4248_v2 = vmul.f32 -1.442695, %v6060_v47  ;;  %v6073_v3 = vpack.c.bf16 %v1072_v50, %v1071_v62 }
 0x11d   : > { %v5391_v63 = vpop.eup %5390  ;;  %v891_v0 = vmul.f32 %v5389_v59, %v5942_v37  ;;  %5408 = vrcp.f32 %v800_v55  ;;  %v4709_v35 = vpop.f32.mrb[28].mxu0  ;;  %v4246_v6 = vmul.f32 -1.442695, %v6066_v58 }
 0x11e   : > { %v5393_v38 = vpop.eup %5392  ;;  %v889_v5 = vmul.f32 %v5391_v63, %v5946_v45  ;;  %5410 = vrcp.f32 %v798_v26  ;;  %4718 = vmatmul.mubr.msk.bf16.gmra.mrb[36].mxu0 %vm393_vm1, %v6062_v48  ;;  %v644_v7 = vmul.f32 %v4709_v35, %v5872_v28  ;;  %v592_v9 = vpop.f32.mrb[29].mxu0  ;;  %v1075_v51 = vld [vmem:[#allocation2 + $0xc8] sm:$0xff] }
 0x11f   : > { %v5395_v10 = vpop.eup %5394  ;;  %996 = vst.msk [vmem:[#allocation2 + $0x108] sm:$0xff] %vm393_vm1, %v891_v0  ;;  %v892_v37 = vmul.f32 %v5393_v38, %v5951_v49  ;;  %5412 = vpow2.f32 %v4247_v56  ;;  %4721 = vmatprep.mubr.msk.bf16.mxu0 %vm393_vm1, %v6073_v3  ;;  %4854 = vmatmul.mubr.msk.bf16.gmra.mrb[4].mxu1 %vm393_vm1, %v6073_v3  ;;  %v642_v45 = vmul.f32 %v5872_v28, %v592_v9  ;;  %v4710_v11 = vpop.f32.mrb[30].mxu0  ;;  %v1073_v40 = vld [vmem:[#allocation2 + $0xa8] sm:$0xff] }
 0x120   : > { %v5397_v12 = vpop.eup %5396  ;;  %994 = vst.msk [vmem:[#allocation2 + $0xe8] sm:$0xff] %vm393_vm1, %v889_v5  ;;  %v890_v14 = vmul.f32 %v5395_v10, %v5955_v53  ;;  %5414 = vpow2.f32 %v4245_v61  ;;  %v6090_v16 = vadd.f32 %v5877_v30, %v644_v7  ;;  %v645_v49 = vmul.f32 %v4710_v11, %v5872_v28  ;;  %v595_v18 = vpop.f32.mrb[31].mxu0  ;;  %v1076_v32 = vld [vmem:[#allocation2 + $0xd0] sm:$0xff] }
 0x121   : > { %v5399_v21 = vpop.eup %5398  ;;  %997 = vst.msk [vmem:[#allocation2 + $0x110] sm:$0xff] %vm393_vm1, %v892_v37  ;;  %v803_v22 = vadd.f32 1.0, %v5397_v12  ;;  %5416 = vpow2.f32 %v4248_v2  ;;  %v6095_v27 = vadd.f32 %v5877_v30, %v642_v45  ;;  %v643_v25 = vmul.f32 %v5872_v28, %v595_v18  ;;  %v1074_v13 = vld [vmem:[#allocation2 + $0xb0] sm:$0xff] }
 0x122   : > { %v5401_v29 = vpop.eup %5400  ;;  %995 = vst.msk [vmem:[#allocation2 + $0xf0] sm:$0xff] %vm393_vm1, %v890_v14  ;;  %v801_v53 = vadd.f32 1.0, %v5399_v21  ;;  %5418 = vpow2.f32 %v4246_v6  ;;  %v6100_v31 = vadd.f32 %v5877_v30, %v645_v49  ;;  %v4251_v36 = vmul.f32 -1.442695, %v6090_v16 }
 0x123   : > { %v5403_v33 = vpop.eup %5402  ;;  %5420 = vrcp.f32 %v803_v22  ;;  %v804_v17 = vadd.f32 1.0, %v5401_v29  ;;  %v6104_v39 = vadd.f32 %v5877_v30, %v643_v25  ;;  %v4249_v42 = vmul.f32 -1.442695, %v6095_v27 }
 0x124   : > { %5422 = vrcp.f32 %v801_v53  ;;  %v802_v28 = vadd.f32 1.0, %v5403_v33  ;;  %v6107_v19 = vpack.c.bf16 %v1074_v13, %v1073_v40  ;;  %v4252_v54 = vmul.f32 -1.442695, %v6100_v31 }
 0x125   : > { %v5405_v46 = vpop.eup %5404  ;;  %5424 = vrcp.f32 %v804_v17  ;;  %v6110_v50 = vpack.c.bf16 %v1076_v32, %v1075_v51  ;;  %v4250_v30 = vmul.f32 -1.442695, %v6104_v39 }
 0x126   : > { %v5407_v57 = vpop.eup %5406  ;;  %v895_v55 = vmul.f32 %v5405_v46, %v5969_v41  ;;  %5426 = vrcp.f32 %v802_v28  ;;  %4722 = vmatmul.mubr.msk.bf16.gmra.mrb[40].mxu0 %vm393_vm1, %v6107_v19  ;;  %4857 = vmatprep.mubr.msk.bf16.mxu1 %vm393_vm1, %v6107_v19 }
 0x127   : > { %v5409_v56 = vpop.eup %5408  ;;  %v893_v59 = vmul.f32 %v5407_v57, %v5974_v43  ;;  %5428 = vpow2.f32 %v4251_v36  ;;  %4725 = vmatprep.mubr.msk.bf16.mxu0 %vm393_vm1, %v6110_v50  ;;  %4858 = vmatmul.mubr.msk.bf16.gmra.mrb[8].mxu1 %vm393_vm1, %v6110_v50  ;;  %v1077_v43 = vld [vmem:[#allocation2 + $0xe8] sm:$0xff] }
 0x128   : > { %v5411_v41 = vpop.eup %5410  ;;  %1000 = vst.msk [vmem:[#allocation2 + $0x148] sm:$0xff] %vm393_vm1, %v895_v55  ;;  %v896_v26 = vmul.f32 %v5409_v56, %v5979_v20  ;;  %5430 = vpow2.f32 %v4249_v42  ;;  %v1080_v38 = vld [vmem:[#allocation2 + $0x110] sm:$0xff] }
 0x129   : > { %v5413_v61 = vpop.eup %5412  ;;  %998 = vst.msk [vmem:[#allocation2 + $0x128] sm:$0xff] %vm393_vm1, %v893_v59  ;;  %v894_v62 = vmul.f32 %v5411_v41, %v5983_v24  ;;  %5432 = vpow2.f32 %v4252_v54  ;;  %v1078_v63 = vld [vmem:[#allocation2 + $0xf0] sm:$0xff]  ;;  %v1079_v24 = vld [vmem:[#allocation2 + $0x108] sm:$0xff] }
 0x12a   : > { %v5415_v0 = vpop.eup %5414  ;;  %1001 = vst.msk [vmem:[#allocation2 + $0x150] sm:$0xff] %vm393_vm1, %v896_v26  ;;  %v807_v2 = vadd.f32 1.0, %v5413_v61  ;;  %5434 = vpow2.f32 %v4250_v30  ;;  %v6128_v35 = vpack.c.bf16 %v1078_v63, %v1077_v43  ;;  %v6133_v37 = vpack.c.bf16 %v1080_v38, %v1079_v24  ;;  %v2419_v24 = vld [vmem:[#allocation2 + $0x29] sm:$0xff] }
 0x12b   : > { %v5417_v5 = vpop.eup %5416  ;;  %999 = vst.msk [vmem:[#allocation2 + $0x130] sm:$0xff] %vm393_vm1, %v894_v62  ;;  %v805_v20 = vadd.f32 1.0, %v5415_v0 }
 0x12c   : > { %v5419_v6 = vpop.eup %5418  ;;  %5436 = vrcp.f32 %v807_v2  ;;  %v808_v7 = vadd.f32 1.0, %v5417_v5  ;;  %4861 = vmatprep.mubr.msk.bf16.mxu1 %vm393_vm1, %v6128_v35 }
 0x12d   : > { %v5421_v9 = vpop.eup %5420  ;;  %5438 = vrcp.f32 %v805_v20  ;;  %v806_v10 = vadd.f32 1.0, %v5419_v6 }
 0x12e   : > { %v5423_v45 = vpop.eup %5422  ;;  %v899_v11 = vmul.f32 %v5421_v9, %v5999_v52  ;;  %5440 = vrcp.f32 %v808_v7  ;;  %4726 = vmatmul.mubr.msk.bf16.gmra.mrb[44].mxu0 %vm393_vm1, %v6128_v35 }
 0x12f   : > { %v5425_v12 = vpop.eup %5424  ;;  %v897_v14 = vmul.f32 %v5423_v45, %v6004_v60  ;;  %5442 = vrcp.f32 %v806_v10  ;;  %4729 = vmatprep.mubr.msk.bf16.mxu0 %vm393_vm1, %v6133_v37  ;;  %4862 = vmatmul.mubr.msk.bf16.gmra.mrb[12].mxu1 %vm393_vm1, %v6133_v37  ;;  %v1083_v36 = vld [vmem:[#allocation2 + $0x148] sm:$0xff]  ;;  %v2420_v45 = vld [vmem:[#allocation2 + $0x31] sm:$0xff] }
 0x130   : > { %v5427_v49 = vpop.eup %5426  ;;  %1004 = vst.msk [vmem:[#allocation2 + $0x188] sm:$0xff] %vm393_vm1, %v899_v11  ;;  %v900_v18 = vmul.f32 %v5425_v12, %v6009_v1  ;;  %v1081_v25 = vld [vmem:[#allocation2 + $0x128] sm:$0xff] }
 0x131   : > { %v5429_v52 = vpop.eup %5428  ;;  %1002 = vst.msk [vmem:[#allocation2 + $0x168] sm:$0xff] %vm393_vm1, %v897_v14  ;;  %v898_v21 = vmul.f32 %v5427_v49, %v6013_v4  ;;  %v1084_v29 = vld [vmem:[#allocation2 + $0x150] sm:$0xff] }
 0x132   : > { %v5431_v22 = vpop.eup %5430  ;;  %1005 = vst.msk [vmem:[#allocation2 + $0x190] sm:$0xff] %vm393_vm1, %v900_v18  ;;  %v811_v60 = vadd.f32 1.0, %v5429_v52  ;;  %v1082_v13 = vld [vmem:[#allocation2 + $0x130] sm:$0xff]  ;;  %v6153_v4 = vpack.c.bf16 %v1084_v29, %v1083_v36  ;;  %v6209_v18 = vpack.c.bf16 %v2420_v45, %v2419_v24  ;;  %v2813_v36 = vsel %vm442_vm0, %v6029_v8, 0  ;;  %v6242_v8 = vld [vmem:[%s6970_s4 + $0x6] sm:$0x3] }
 0x133   : > { %v5433_v53 = vpop.eup %5432  ;;  %1003 = vst.msk [vmem:[#allocation2 + $0x170] sm:$0xff] %vm393_vm1, %v898_v21  ;;  %v809_v32 = vadd.f32 1.0, %v5431_v22  ;;  %v6149_v33 = vpack.c.bf16 %v1082_v13, %v1081_v25  ;;  %v1017_v52 = vld [vmem:[#allocation2 + $0x2f] sm:$0xff]  ;;  %v1016_v25 = vld [vmem:[#allocation2 + $0x27] sm:$0xff] }
 0x134   : > { %v5435_v17 = vpop.eup %5434  ;;  %5444 = vrcp.f32 %v811_v60  ;;  %v812_v1 = vadd.f32 1.0, %v5433_v53  ;;  %v1019_v21 = vld [vmem:[#allocation2 + $0x4f] sm:$0xff]  ;;  %v6216_v53 = vpack.c.bf16 %v1017_v52, %v1016_v25  ;;  %v1030_v52 = vld [vmem:[#allocation2 + $0x107] sm:$0xff] }
 0x135   : > { %5446 = vrcp.f32 %v809_v32  ;;  %v810_v40 = vadd.f32 1.0, %v5435_v17  ;;  %4865 = vmatprep.mubr.msk.bf16.mxu1 %vm393_vm1, %v6149_v33  ;;  %v2421_v22 = vld [vmem:[#allocation2 + $0x49] sm:$0xff]  ;;  %v2422_v60 = vld [vmem:[#allocation2 + $0x51] sm:$0xff] }
 0x136   : > { %v5437_v28 = vpop.eup %5436  ;;  %5448 = vrcp.f32 %v812_v1  ;;  %4730 = vmatmul.mubr.msk.bf16.gmra.mrb[48].mxu0 %vm393_vm1, %v6149_v33  ;;  %v2423_v13 = vld [vmem:[#allocation2 + $0x69] sm:$0xff]  ;;  %v2424_v29 = vld [vmem:[#allocation2 + $0x71] sm:$0xff]  ;;  %v6220_v1 = vpack.c.bf16 %v2422_v60, %v2421_v22 }
 0x137   : > { %v5439_v42 = vpop.eup %5438  ;;  %v903_v51 = vmul.f32 %v5437_v28, %v6046_v34  ;;  %5450 = vrcp.f32 %v810_v40  ;;  %4733 = vmatprep.mubr.msk.bf16.mxu0 %vm393_vm1, %v6153_v4  ;;  %4866 = vmatmul.mubr.msk.bf16.gmra.mrb[16].mxu1 %vm393_vm1, %v6153_v4  ;;  %v1087_v26 = vld [vmem:[#allocation2 + $0x188] sm:$0xff]  ;;  %v6226_v40 = vpack.c.bf16 %v2424_v29, %v2423_v13  ;;  %v1636_v28 = vsel %vm442_vm0, %v6034_v23, 0 }
 0x138   : > { %v5441_v46 = vpop.eup %5440  ;;  %v901_v54 = vmul.f32 %v5439_v42, %v6051_v44  ;;  %v1085_v34 = vld [vmem:[#allocation2 + $0x168] sm:$0xff] }
 0x139   : > { %v5443_v57 = vpop.eup %5442  ;;  %1008 = vst.msk [vmem:[#allocation2 + $0x1c8] sm:$0xff] %vm393_vm1, %v903_v51  ;;  %v904_v55 = vmul.f32 %v5441_v46, %v6060_v47  ;;  %v1088_v59 = vld [vmem:[#allocation2 + $0x190] sm:$0xff]  ;;  %v1018_v32 = vld [vmem:[#allocation2 + $0x47] sm:$0xff] }
 0x13a   : > { %1006 = vst.msk [vmem:[#allocation2 + $0x1a8] sm:$0xff] %vm393_vm1, %v901_v54  ;;  %v902_v30 = vmul.f32 %v5443_v57, %v6066_v58  ;;  %v1086_v56 = vld [vmem:[#allocation2 + $0x170] sm:$0xff]  ;;  %v6173_v44 = vpack.c.bf16 %v1088_v59, %v1087_v26  ;;  %v6218_v17 = vpack.c.bf16 %v1019_v21, %v1018_v32  ;;  %v6233_v42 = vld [vmem:[%s6970_s4 + $0xe] sm:$0x3] }
 0x13b   : > { %1009 = vst.msk [vmem:[#allocation2 + $0x1d0] sm:$0xff] %vm393_vm1, %v904_v55  ;;  %v6168_v41 = vpack.c.bf16 %v1086_v56, %v1085_v34  ;;  %v1021_v23 = vld [vmem:[#allocation2 + $0x6f] sm:$0xff]  ;;  %v1020_v57 = vld [vmem:[#allocation2 + $0x67] sm:$0xff] }
 0x13c   : > { %1007 = vst.msk [vmem:[#allocation2 + $0x1b0] sm:$0xff] %vm393_vm1, %v902_v30  ;;  %v1023_v51 = vld [vmem:[#allocation2 + $0x8f] sm:$0xff]  ;;  %v6250_v34 = vpack.c.bf16 %v1021_v23, %v1020_v57  ;;  %v1022_v56 = vld [vmem:[#allocation2 + $0x87] sm:$0xff] }
 0x13d   : > { %4869 = vmatprep.mubr.msk.bf16.mxu1 %vm393_vm1, %v6168_v41  ;;  %v2425_v46 = vld [vmem:[#allocation2 + $0x89] sm:$0xff]  ;;  %v2426_v54 = vld [vmem:[#allocation2 + $0x91] sm:$0xff]  ;;  %v6252_v59 = vpack.c.bf16 %v1023_v51, %v1022_v56 }
 0x13e   : > { %v5445_v47 = vpop.eup %5444  ;;  %4734 = vmatmul.mubr.msk.bf16.gmra.mrb[52].mxu0 %vm393_vm1, %v6168_v41  ;;  %v2427_v55 = vld [vmem:[#allocation2 + $0xa9] sm:$0xff]  ;;  %v2428_v30 = vld [vmem:[#allocation2 + $0xb1] sm:$0xff]  ;;  %v6254_v26 = vpack.c.bf16 %v2426_v54, %v2425_v46 }
 0x13f   : > { %v5447_v58 = vpop.eup %5446  ;;  %v907_v61 = vmul.f32 %v5445_v47, %v6090_v16  ;;  %4737 = vmatprep.mubr.msk.bf16.mxu0 %vm393_vm1, %v6173_v44  ;;  %4870 = vmatmul.mubr.msk.bf16.gmra.mrb[20].mxu1 %vm393_vm1, %v6173_v44  ;;  %v6258_v47 = vpack.c.bf16 %v2428_v30, %v2427_v55  ;;  %v2433_v24 = vld [vmem:[#allocation2 + $0x109] sm:$0xff]  ;;  %v2438_v32 = vld [vmem:[#allocation2 + $0x151] sm:$0xff] }
 0x140   : > { %v5449_v62 = vpop.eup %5448  ;;  %v905_v43 = vmul.f32 %v5447_v58, %v6095_v27  ;;  %v1091_v6 = vld [vmem:[#allocation2 + $0x1c8] sm:$0xff]  ;;  %v2440_v23 = vld [vmem:[#allocation2 + $0x171] sm:$0xff] }
 0x141   : > { %v5451_v63 = vpop.eup %5450  ;;  %1012 = vst.msk [vmem:[#allocation2 + $0x208] sm:$0xff] %vm393_vm1, %v907_v61  ;;  %v908_v0 = vmul.f32 %v5449_v62, %v6100_v31  ;;  %v1089_v16 = vld [vmem:[#allocation2 + $0x1a8] sm:$0xff] }
 0x142   : > { %1010 = vst.msk [vmem:[#allocation2 + $0x1e8] sm:$0xff] %vm393_vm1, %v905_v43  ;;  %v906_v2 = vmul.f32 %v5451_v63, %v6104_v39  ;;  %v1092_v38 = vld [vmem:[#allocation2 + $0x1d0] sm:$0xff]  ;;  %v1014_v31 = vld [vmem:[#allocation2 + $0x7] sm:$0xff] }
 0x143   : > { %1013 = vst.msk [vmem:[#allocation2 + $0x210] sm:$0xff] %vm393_vm1, %v908_v0  ;;  %v1090_v5 = vld [vmem:[#allocation2 + $0x1b0] sm:$0xff]  ;;  %v6191_v27 = vpack.c.bf16 %v1092_v38, %v1091_v6  ;;  %v1024_v63 = vld [vmem:[#allocation2 + $0xa7] sm:$0xff] }
 0x144   : > { %1011 = vst.msk [vmem:[#allocation2 + $0x1f0] sm:$0xff] %vm393_vm1, %v906_v2  ;;  %v6189_v20 = vpack.c.bf16 %v1090_v5, %v1089_v16  ;;  %v1015_v39 = vld [vmem:[#allocation2 + $0xf] sm:$0xff]  ;;  %v1026_v16 = vld [vmem:[#allocation2 + $0xc7] sm:$0xff] }
 0x145   : > { %v1046_v11 = vpack.c.bf16 %v1015_v39, %v1014_v31  ;;  %v1025_v58 = vld [vmem:[#allocation2 + $0xaf] sm:$0xff]  ;;  %v1034_v46 = vld [vmem:[#allocation2 + $0x147] sm:$0xff] }
 0x146   : > { %4738 = vmatmul.mubr.msk.bf16.gmra.mrb[56].mxu0 %vm393_vm1, %v6189_v20  ;;  %4873 = vmatprep.mubr.msk.bf16.mxu1 %vm393_vm1, %v6189_v20  ;;  %v1027_v61 = vld [vmem:[#allocation2 + $0xcf] sm:$0xff]  ;;  %v6266_v38 = vpack.c.bf16 %v1025_v58, %v1024_v63 }
 0x147   : > { %4741 = vmatprep.mubr.msk.bf16.mxu0 %vm393_vm1, %v6191_v27  ;;  %4874 = vmatmul.mubr.msk.bf16.gmra.mrb[24].mxu1 %vm393_vm1, %v6191_v27  ;;  %v2429_v62 = vld [vmem:[#allocation2 + $0xc9] sm:$0xff]  ;;  %v2430_v43 = vld [vmem:[#allocation2 + $0xd1] sm:$0xff]  ;;  %v6268_v5 = vpack.c.bf16 %v1027_v61, %v1026_v16 }
 0x148   : > { %v2155_v14 = vld [vmem:[#allocation2 + $0x208] sm:$0xff]  ;;  %v2432_v2 = vld [vmem:[#allocation2 + $0xf1] sm:$0xff]  ;;  %v6270_v6 = vpack.c.bf16 %v2430_v43, %v2429_v62 }
 0x149   : > { %v1093_v9 = vld [vmem:[#allocation2 + $0x1e8] sm:$0xff]  ;;  %v2442_v61 = vld [vmem:[#allocation2 + $0x191] sm:$0xff] }
 0x14a   : > { %v2156_v7 = vld [vmem:[#allocation2 + $0x210] sm:$0xff]  ;;  %v1036_v62 = vld [vmem:[#allocation2 + $0x167] sm:$0xff] }
 0x14b   : > { %v1094_v10 = vld [vmem:[#allocation2 + $0x1f0] sm:$0xff]  ;;  %v6203_v49 = vpack.c.bf16 %v2156_v7, %v2155_v14 }
 0x14c   : > { %v6201_v12 = vpack.c.bf16 %v1094_v10, %v1093_v9  ;;  %v2431_v0 = vld [vmem:[#allocation2 + $0xe9] sm:$0xff]  ;;  %v2434_v9 = vld [vmem:[#allocation2 + $0x111] sm:$0xff] }
 0x14d   : > { %v6274_v31 = vpack.c.bf16 %v2432_v2, %v2431_v0  ;;  %v1029_v39 = vld [vmem:[#allocation2 + $0xef] sm:$0xff]  ;;  %v1028_v10 = vld [vmem:[#allocation2 + $0xe7] sm:$0xff]  ;;  %v6286_v22 = vpack.c.bf16 %v2434_v9, %v2433_v24 }
 0x14e   : > { %4742 = vmatmul.mubr.msk.bf16.gmra.mrb[60].mxu0 %vm393_vm1, %v6201_v12  ;;  %4877 = vmatprep.mubr.msk.bf16.mxu1 %vm393_vm1, %v6201_v12  ;;  %v1031_v7 = vld [vmem:[#allocation2 + $0x10f] sm:$0xff]  ;;  %v6282_v14 = vpack.c.bf16 %v1029_v39, %v1028_v10  ;;  %v1038_v2 = vld [vmem:[#allocation2 + $0x187] sm:$0xff] }
 0x14f   : > { %4878 = vmatmul.mubr.msk.bf16.gmra.mrb[28].mxu1 %vm393_vm1, %v6203_v49  ;;  %4747 = vmatprep.mubr.msk.bf16.mxu0 %vm393_vm1, %v1046_v11  ;;  %v2435_v45 = vld [vmem:[#allocation2 + $0x129] sm:$0xff]  ;;  %v2436_v11 = vld [vmem:[#allocation2 + $0x131] sm:$0xff]  ;;  %v6284_v21 = vpack.c.bf16 %v1031_v7, %v1030_v52 }
 0x150   : > { %4883 = vmatprep.mubr.msk.bf16.mxu1 %vm393_vm1, %v6209_v18  ;;  %v6290_v60 = vpack.c.bf16 %v2436_v11, %v2435_v45  ;;  %v1033_v25 = vld [vmem:[#allocation2 + $0x12f] sm:$0xff]  ;;  %v1040_v11 = vld [vmem:[#allocation2 + $0x1a7] sm:$0xff] }
 0x151   : > { %v1035_v13 = vld [vmem:[#allocation2 + $0x14f] sm:$0xff] }
 0x152   : > { %v2437_v29 = vld [vmem:[#allocation2 + $0x149] sm:$0xff]  ;;  %v6300_v54 = vpack.c.bf16 %v1035_v13, %v1034_v46  ;;  %v2444_v63 = vld [vmem:[#allocation2 + $0x1b1] sm:$0xff] }
 0x153   : > { %v6302_v57 = vpack.c.bf16 %v2438_v32, %v2437_v29  ;;  %v1037_v30 = vld [vmem:[#allocation2 + $0x16f] sm:$0xff]  ;;  %v1042_v29 = vld [vmem:[#allocation2 + $0x1c7] sm:$0xff] }
 0x154   : > { %v1039_v56 = vld [vmem:[#allocation2 + $0x18f] sm:$0xff]  ;;  %v6314_v0 = vpack.c.bf16 %v1037_v30, %v1036_v62 }
 0x155   : > { %v2441_v58 = vld [vmem:[#allocation2 + $0x189] sm:$0xff]  ;;  %v6316_v16 = vpack.c.bf16 %v1039_v56, %v1038_v2  ;;  %v2446_v45 = vld [vmem:[#allocation2 + $0x1d1] sm:$0xff]  ;;  %v3107_v2 = vsel %vm442_vm0, %v6233_v42, 0 }
 0x156   : > { %4748 = vmatmul.mubr.msk.bf16.vlgmr.msra.gmra.mrb[32].mxu0 %vm393_vm1, %v6216_v53  ;;  %v2443_v43 = vld [vmem:[#allocation2 + $0x1a9] sm:$0xff]  ;;  %v6318_v39 = vpack.c.bf16 %v2442_v61, %v2441_v58  ;;  %v1538_v46 = vld [vmem:[#allocation2 + $0x11] sm:$0xff] }
 0x157   : > { %4751 = vmatprep.mubr.msk.bf16.mxu0 %vm393_vm1, %v6218_v17  ;;  %4884 = vmatmul.mubr.msk.bf16.vlgmr.msra.gmra.mrb[0].mxu1 %vm393_vm1, %v6220_v1  ;;  %v6322_v7 = vpack.c.bf16 %v2444_v63, %v2443_v43  ;;  %v1041_v24 = vld [vmem:[#allocation2 + $0x1af] sm:$0xff]  ;;  %v1044_v61 = vld [vmem:[#allocation2 + $0x1e7] sm:$0xff] }
 0x158   : > { %4916 = vmatpush3.bf16.msra.mxu1 %v2813_v36  ;;  %4887 = vmatprep.mubr.msk.bf16.mxu1 %vm393_vm1, %v6226_v40  ;;  %v1032_v36 = vld [vmem:[#allocation2 + $0x127] sm:$0xff]  ;;  %v1043_v9 = vld [vmem:[#allocation2 + $0x1cf] sm:$0xff]  ;;  %v6330_v13 = vpack.c.bf16 %v1041_v24, %v1040_v11  ;;  %v1930_v24 = vsel %vm442_vm0, %v6242_v8, 0 }
 0x159   : > { %4780 = vmatpush3.bf16.msra.mxu0 %v1636_v28  ;;  %5281 = vmatprep.subr.msk.bf16.mxu1 %vm442_vm0, %v6233_v42  ;;  %v2439_v28 = vld [vmem:[#allocation2 + $0x169] sm:$0xff]  ;;  %v6298_v51 = vpack.c.bf16 %v1033_v25, %v1032_v36  ;;  %v2448_v25 = vld [vmem:[#allocation2 + $0x1f1] sm:$0xff]  ;;  %v6332_v32 = vpack.c.bf16 %v1043_v9, %v1042_v29 }
 0x15a   : > { %5277 = vmatprep.subr.msk.bf16.mxu0 %vm442_vm0, %v6242_v8  ;;  %v6306_v55 = vpack.c.bf16 %v2440_v23, %v2439_v28  ;;  %v2445_v10 = vld [vmem:[#allocation2 + $0x1c9] sm:$0xff]  ;;  %v2450_v58 = vld [vmem:[#allocation2 + $0x211] sm:$0xff] }
 0x15b   : > { %v2447_v52 = vld [vmem:[#allocation2 + $0x1e9] sm:$0xff]  ;;  %v6334_v36 = vpack.c.bf16 %v2446_v45, %v2445_v10 }
 0x15c   : > { %v6338_v28 = vpack.c.bf16 %v2448_v25, %v2447_v52  ;;  %v1537_v23 = vld [vmem:[#allocation2 + $0x9] sm:$0xff]  ;;  %v6570_v25 = vld [vmem:[%s6971_s5] ss:$0 sm:$0xff] }
 0x15d   : > { %v1045_v30 = vld [vmem:[#allocation2 + $0x1ef] sm:$0xff]  ;;  %v1569_v62 = vpack.c.bf16 %v1538_v46, %v1537_v23  ;;  %v2742_v42 = vld [vmem:[#allocation2 + $0x207] sm:$0xff] }
 0x15e   : > { %4752 = vmatmul.mubr.msk.bf16.gmra.mrb[36].mxu0 %vm393_vm1, %v6250_v34  ;;  %v2449_v56 = vld [vmem:[#allocation2 + $0x209] sm:$0xff]  ;;  %v6346_v43 = vpack.c.bf16 %v1045_v30, %v1044_v61 }
 0x15f   : > { %4755 = vmatprep.mubr.msk.bf16.mxu0 %vm393_vm1, %v6252_v59  ;;  %4888 = vmatmul.mubr.msk.bf16.gmra.mrb[4].mxu1 %vm393_vm1, %v6254_v26  ;;  %v6348_v63 = vpack.c.bf16 %v2450_v58, %v2449_v56  ;;  %v4388_v9 = vld [vmem:[%s6970_s4 + $0x10] sm:$0x3]  ;;  %v2744_v10 = vld [vmem:[#allocation2 + $0x227] sm:$0xff] }
 0x160   : > { %4891 = vmatprep.mubr.msk.bf16.mxu1 %vm393_vm1, %v6258_v47  ;;  %v2745_v45 = vld [vmem:[#allocation2 + $0x22f] sm:$0xff]  ;;  %v3401_v52 = vsel %vm442_vm0, %v4388_v9, 0 }
 0x161   : > { %v2761_v11 = vpack.c.bf16 %v2745_v45, %v2744_v10 }
 0x166   : > { %4756 = vmatmul.mubr.msk.bf16.gmra.mrb[40].mxu0 %vm393_vm1, %v6266_v38 }
 0x167   : > { %4759 = vmatprep.mubr.msk.bf16.mxu0 %vm393_vm1, %v6268_v5  ;;  %4892 = vmatmul.mubr.msk.bf16.gmra.mrb[8].mxu1 %vm393_vm1, %v6270_v6 }
 0x168   : > { %4895 = vmatprep.mubr.msk.bf16.mxu1 %vm393_vm1, %v6274_v31 }
 0x16e   : > { %4760 = vmatmul.mubr.msk.bf16.gmra.mrb[44].mxu0 %vm393_vm1, %v6282_v14 }
 0x16f   : > { %4763 = vmatprep.mubr.msk.bf16.mxu0 %vm393_vm1, %v6284_v21  ;;  %4896 = vmatmul.mubr.msk.bf16.gmra.mrb[12].mxu1 %vm393_vm1, %v6286_v22 }
 0x170   : > { %4899 = vmatprep.mubr.msk.bf16.mxu1 %vm393_vm1, %v6290_v60 }
 0x176   : > { %4764 = vmatmul.mubr.msk.bf16.gmra.mrb[48].mxu0 %vm393_vm1, %v6298_v51 }
 0x177   : > { %4767 = vmatprep.mubr.msk.bf16.mxu0 %vm393_vm1, %v6300_v54  ;;  %4900 = vmatmul.mubr.msk.bf16.gmra.mrb[16].mxu1 %vm393_vm1, %v6302_v57 }
 0x178   : > { %4903 = vmatprep.mubr.msk.bf16.mxu1 %vm393_vm1, %v6306_v55 }
 0x17e   : > { %4768 = vmatmul.mubr.msk.bf16.gmra.mrb[52].mxu0 %vm393_vm1, %v6314_v0 }
 0x17f   : > { %4771 = vmatprep.mubr.msk.bf16.mxu0 %vm393_vm1, %v6316_v16  ;;  %4904 = vmatmul.mubr.msk.bf16.gmra.mrb[20].mxu1 %vm393_vm1, %v6318_v39 }
 0x180   : > { %4907 = vmatprep.mubr.msk.bf16.mxu1 %vm393_vm1, %v6322_v7 }
 0x186   : > { %4772 = vmatmul.mubr.msk.bf16.gmra.mrb[56].mxu0 %vm393_vm1, %v6330_v13 }
 0x187   : > { %4775 = vmatprep.mubr.msk.bf16.mxu0 %vm393_vm1, %v6332_v32  ;;  %4908 = vmatmul.mubr.msk.bf16.gmra.mrb[24].mxu1 %vm393_vm1, %v6334_v36 }
 0x188   : > { %4911 = vmatprep.mubr.msk.bf16.mxu1 %vm393_vm1, %v6338_v28 }
 0x18e   : > { %4776 = vmatmul.mubr.msk.bf16.gmra.mrb[60].mxu0 %vm393_vm1, %v6346_v43 }
 0x18f   : > { %4912 = vmatmul.mubr.msk.bf16.gmra.mrb[28].mxu1 %vm393_vm1, %v6348_v63  ;;  %4781 = vmatprep.mubr.msk.bf16.mxu0 %vm393_vm1, %v1569_v62 }
 0x190   : > { %4917 = vmatprep.mubr.msk.bf16.mxu1 %vm393_vm1, %v6218_v17 }
 0x196   : > { %4782 = vmatmul.mubr.msk.bf16.vlgmr.msra.gmra.mrb[32].mxu0 %vm393_vm1, %v6209_v18  ;;  %v2743_v18 = vld [vmem:[#allocation2 + $0x20f] sm:$0xff] }
 0x197   : > { %4785 = vmatprep.mubr.msk.bf16.mxu0 %vm393_vm1, %v6220_v1  ;;  %4918 = vmatmul.mubr.msk.bf16.vlgmr.msra.gmra.mrb[0].mxu1 %vm393_vm1, %v6250_v34  ;;  %v2760_v8 = vpack.c.bf16 %v2743_v18, %v2742_v42 }
 0x198   : > { %4950 = vmatpush3.bf16.msra.mxu1 %v3107_v2  ;;  %4921 = vmatprep.mubr.msk.bf16.mxu1 %vm393_vm1, %v6252_v59 }
 0x199   : > { %4814 = vmatpush3.bf16.msra.mxu0 %v1930_v24  ;;  %5282 = vmatprep.subr.msk.bf16.mxu1 %vm442_vm0, %v4388_v9 }
 0x19e   : > { %4786 = vmatmul.mubr.msk.bf16.gmra.mrb[36].mxu0 %vm393_vm1, %v6226_v40 }
 0x19f   : > { %4789 = vmatprep.mubr.msk.bf16.mxu0 %vm393_vm1, %v6254_v26  ;;  %4922 = vmatmul.mubr.msk.bf16.gmra.mrb[4].mxu1 %vm393_vm1, %v6266_v38 }
 0x1a0   : > { %4925 = vmatprep.mubr.msk.bf16.mxu1 %vm393_vm1, %v6268_v5 }
 0x1a6   : > { %4790 = vmatmul.mubr.msk.bf16.gmra.mrb[40].mxu0 %vm393_vm1, %v6258_v47 }
 0x1a7   : > { %4793 = vmatprep.mubr.msk.bf16.mxu0 %vm393_vm1, %v6270_v6  ;;  %4926 = vmatmul.mubr.msk.bf16.gmra.mrb[8].mxu1 %vm393_vm1, %v6282_v14 }
 0x1a8   : > { %4929 = vmatprep.mubr.msk.bf16.mxu1 %vm393_vm1, %v6284_v21 }
 0x1ae   : > { %4794 = vmatmul.mubr.msk.bf16.gmra.mrb[44].mxu0 %vm393_vm1, %v6274_v31 }
 0x1af   : > { %4797 = vmatprep.mubr.msk.bf16.mxu0 %vm393_vm1, %v6286_v22  ;;  %4930 = vmatmul.mubr.msk.bf16.gmra.mrb[12].mxu1 %vm393_vm1, %v6298_v51 }
 0x1b0   : > { %4933 = vmatprep.mubr.msk.bf16.mxu1 %vm393_vm1, %v6300_v54 }
 0x1b6   : > { %4798 = vmatmul.mubr.msk.bf16.gmra.mrb[48].mxu0 %vm393_vm1, %v6290_v60 }
 0x1b7   : > { %4801 = vmatprep.mubr.msk.bf16.mxu0 %vm393_vm1, %v6302_v57  ;;  %4934 = vmatmul.mubr.msk.bf16.gmra.mrb[16].mxu1 %vm393_vm1, %v6314_v0 }
 0x1b8   : > { %4937 = vmatprep.mubr.msk.bf16.mxu1 %vm393_vm1, %v6316_v16 }
 0x1be   : > { %4802 = vmatmul.mubr.msk.bf16.gmra.mrb[52].mxu0 %vm393_vm1, %v6306_v55 }
 0x1bf   : > { %4805 = vmatprep.mubr.msk.bf16.mxu0 %vm393_vm1, %v6318_v39  ;;  %4938 = vmatmul.mubr.msk.bf16.gmra.mrb[20].mxu1 %vm393_vm1, %v6330_v13 }
 0x1c0   : > { %4941 = vmatprep.mubr.msk.bf16.mxu1 %vm393_vm1, %v6332_v32 }
 0x1c6   : > { %4806 = vmatmul.mubr.msk.bf16.gmra.mrb[56].mxu0 %vm393_vm1, %v6322_v7 }
 0x1c7   : > { %4809 = vmatprep.mubr.msk.bf16.mxu0 %vm393_vm1, %v6334_v36  ;;  %4942 = vmatmul.mubr.msk.bf16.gmra.mrb[24].mxu1 %vm393_vm1, %v6346_v43 }
 0x1c8   : > { %4945 = vmatprep.mubr.msk.bf16.mxu1 %vm393_vm1, %v2760_v8 }
 0x1ce   : > { %4810 = vmatmul.mubr.msk.bf16.gmra.mrb[60].mxu0 %vm393_vm1, %v6338_v28 }
 0x1cf   : > { %4815 = vmatprep.mubr.msk.bf16.mxu0 %vm393_vm1, %v6216_v53  ;;  %4946 = vmatmul.mubr.msk.bf16.gmra.mrb[28].mxu1 %vm393_vm1, %v2761_v11 }
 0x1d0   : > { %4951 = vmatprep.mubr.msk.bf16.mxu1 %vm393_vm1, %v6020_v15  ;;  %v3038_v15 = vld [vmem:[#allocation2 + $0x228] sm:$0xff] }
 0x1d6   : > { %4816 = vmatmul.mubr.msk.bf16.vlgmr.msra.gmra.mrb[32].mxu0 %vm393_vm1, %v6218_v17 }
 0x1d7   : > { %4819 = vmatprep.mubr.msk.bf16.mxu0 %vm393_vm1, %v6250_v34  ;;  %4952 = vmatmul.mubr.msk.bf16.vlgmr.msra.gmra.mrb[0].mxu1 %vm393_vm1, %v6062_v48  ;;  %v3039_v48 = vld [vmem:[#allocation2 + $0x230] sm:$0xff] }
 0x1d8   : > { %4984 = vmatpush3.bf16.msra.mxu1 %v3401_v52  ;;  %4955 = vmatprep.mubr.msk.bf16.mxu1 %vm393_vm1, %v6073_v3  ;;  %v3055_v3 = vpack.c.bf16 %v3039_v48, %v3038_v15  ;;  %v6598_v48 = vld [vmem:[%s5666_s8] sm:$0xff]  }
 0x1de   : > { %4820 = vmatmul.mubr.msk.bf16.gmra.mrb[36].mxu0 %vm393_vm1, %v6252_v59 }
 0x1df   : > { %4823 = vmatprep.mubr.msk.bf16.mxu0 %vm393_vm1, %v6266_v38  ;;  %4956 = vmatmul.mubr.msk.bf16.gmra.mrb[4].mxu1 %vm393_vm1, %v6107_v19  ;;  %v3332_v19 = vld [vmem:[#allocation2 + $0x229] sm:$0xff] }
 0x1e0   : > { %4959 = vmatprep.mubr.msk.bf16.mxu1 %vm393_vm1, %v6110_v50  ;;  %v3333_v50 = vld [vmem:[#allocation2 + $0x231] sm:$0xff] }
 0x1e6   : > { %4824 = vmatmul.mubr.msk.bf16.gmra.mrb[40].mxu0 %vm393_vm1, %v6268_v5 }
 0x1e7   : > { %4827 = vmatprep.mubr.msk.bf16.mxu0 %vm393_vm1, %v6282_v14  ;;  %4960 = vmatmul.mubr.msk.bf16.gmra.mrb[8].mxu1 %vm393_vm1, %v6128_v35  ;;  %v3349_v35 = vpack.c.bf16 %v3333_v50, %v3332_v19 }
 0x1e8   : > { %4963 = vmatprep.mubr.msk.bf16.mxu1 %vm393_vm1, %v6133_v37 }
 0x1ee   : > { %4828 = vmatmul.mubr.msk.bf16.gmra.mrb[44].mxu0 %vm393_vm1, %v6284_v21 }
 0x1ef   : > { %4831 = vmatprep.mubr.msk.bf16.mxu0 %vm393_vm1, %v6298_v51  ;;  %4964 = vmatmul.mubr.msk.bf16.gmra.mrb[12].mxu1 %vm393_vm1, %v6149_v33 }
 0x1f0   : > { %4967 = vmatprep.mubr.msk.bf16.mxu1 %vm393_vm1, %v6153_v4 }
 0x1f6   : > { %4832 = vmatmul.mubr.msk.bf16.gmra.mrb[48].mxu0 %vm393_vm1, %v6300_v54 }
 0x1f7   : > { %4835 = vmatprep.mubr.msk.bf16.mxu0 %vm393_vm1, %v6314_v0  ;;  %4968 = vmatmul.mubr.msk.bf16.gmra.mrb[16].mxu1 %vm393_vm1, %v6168_v41 }
 0x1f8   : > { %4971 = vmatprep.mubr.msk.bf16.mxu1 %vm393_vm1, %v6173_v44 }
 0x1fe   : > { %4836 = vmatmul.mubr.msk.bf16.gmra.mrb[52].mxu0 %vm393_vm1, %v6316_v16 }
 0x1ff   : > { %4839 = vmatprep.mubr.msk.bf16.mxu0 %vm393_vm1, %v6330_v13  ;;  %4972 = vmatmul.mubr.msk.bf16.gmra.mrb[20].mxu1 %vm393_vm1, %v6189_v20 }
 0x200   : > { %4975 = vmatprep.mubr.msk.bf16.mxu1 %vm393_vm1, %v6191_v27 }
 0x206   : > { %4840 = vmatmul.mubr.msk.bf16.gmra.mrb[56].mxu0 %vm393_vm1, %v6332_v32  ;;  %v6575_v32 = vld [vmem:[%s6972_s6] ss:$0 sm:$0xff] }
 0x207   : > { %4843 = vmatprep.mubr.msk.bf16.mxu0 %vm393_vm1, %v6346_v43  ;;  %4976 = vmatmul.mubr.msk.bf16.gmra.mrb[24].mxu1 %vm393_vm1, %v6201_v12 }
 0x208   : > { %4979 = vmatprep.mubr.msk.bf16.mxu1 %vm393_vm1, %v6203_v49 }
 0x20e   : > { %4844 = vmatmul.mubr.msk.bf16.gmra.mrb[60].mxu0 %vm393_vm1, %v2760_v8 }
 0x20f   : > { %4980 = vmatmul.mubr.msk.bf16.gmra.mrb[28].mxu1 %vm393_vm1, %v3055_v3  ;;  %v3898_v3 = vunpack.c.l.bf16 %v6598_v48 }
 0x210   : > { %4985 = vmatprep.mubr.msk.bf16.mxu1 %vm393_vm1, %v6220_v1 }
 0x217   : > { %4986 = vmatmul.mubr.msk.bf16.vlgmr.msra.gmra.mrb[0].mxu1 %vm393_vm1, %v6226_v40 }
 0x218   : > { %4989 = vmatprep.mubr.msk.bf16.mxu1 %vm393_vm1, %v6254_v26 }
 0x21f   : > { %4990 = vmatmul.mubr.msk.bf16.gmra.mrb[4].mxu1 %vm393_vm1, %v6258_v47 }
 0x220   : > { %4993 = vmatprep.mubr.msk.bf16.mxu1 %vm393_vm1, %v6270_v6 }
 0x227   : > { %4994 = vmatmul.mubr.msk.bf16.gmra.mrb[8].mxu1 %vm393_vm1, %v6274_v31 }
 0x228   : > { %4997 = vmatprep.mubr.msk.bf16.mxu1 %vm393_vm1, %v6286_v22 }
 0x22f   : > { %4998 = vmatmul.mubr.msk.bf16.gmra.mrb[12].mxu1 %vm393_vm1, %v6290_v60 }
 0x230   : > { %5001 = vmatprep.mubr.msk.bf16.mxu1 %vm393_vm1, %v6302_v57 }
 0x237   : > { %5002 = vmatmul.mubr.msk.bf16.gmra.mrb[16].mxu1 %vm393_vm1, %v6306_v55 }
 0x238   : > { %5005 = vmatprep.mubr.msk.bf16.mxu1 %vm393_vm1, %v6318_v39 }
 0x23f   : > { %5006 = vmatmul.mubr.msk.bf16.gmra.mrb[20].mxu1 %vm393_vm1, %v6322_v7 }
 0x240   : > { %5009 = vmatprep.mubr.msk.bf16.mxu1 %vm393_vm1, %v6334_v36 }
 0x247   : > { %5010 = vmatmul.mubr.msk.bf16.gmra.mrb[24].mxu1 %vm393_vm1, %v6338_v28 }
 0x248   : > { %5013 = vmatprep.mubr.msk.bf16.mxu1 %vm393_vm1, %v6348_v63 }
 0x24f   : > { %5014 = vmatmul.mubr.msk.bf16.gmra.mrb[28].mxu1 %vm393_vm1, %v3349_v35 }
 0x2a9   : > { %v4817_v37 = vpop.f32.mrb[32].mxu0 }
 0x2aa   : > { %v1966_v33 = vpop.f32.mrb[33].mxu0 }
 0x2ab   : > { %v4818_v4 = vpop.f32.mrb[34].mxu0 }
 0x2ac   : > { %v1969_v41 = vpop.f32.mrb[35].mxu0 }
 0x2b1   : > { %v4821_v44 = vpop.f32.mrb[36].mxu0 }
 0x2b2   : > { %v1982_v20 = vpop.f32.mrb[37].mxu0 }
 0x2b3   : > { %v4822_v27 = vpop.f32.mrb[38].mxu0 }
 0x2b4   : > { %v6517_v12 = vpop.f32.mrb[39].mxu0 }
 0x2b9   : > { %v6519_v49 = vpop.f32.mrb[40].mxu0 }
 0x2ba   : > { %v6521_v53 = vpop.f32.mrb[41].mxu0 }
 0x2bb   : > { %v6523_v17 = vpop.f32.mrb[42].mxu0 }
 0x2bc   : > { %v6525_v1 = vpop.f32.mrb[43].mxu0 }
 0x2c1   : > { %v6527_v40 = vpop.f32.mrb[44].mxu0 }
 0x2c2   : > { %v6529_v34 = vpop.f32.mrb[45].mxu0 }
 0x2c3   : > { %v6531_v59 = vpop.f32.mrb[46].mxu0 }
 0x2c4   : > { %v6533_v26 = vpop.f32.mrb[47].mxu0 }
 0x2c9   : > { %v6535_v47 = vpop.f32.mrb[48].mxu0 }
 0x2ca   : > { %v6537_v38 = vpop.f32.mrb[49].mxu0 }
 0x2cb   : > { %v6539_v5 = vpop.f32.mrb[50].mxu0 }
 0x2cc   : > { %v6541_v6 = vpop.f32.mrb[51].mxu0 }
 0x2d1   : > { %v6543_v31 = vpop.f32.mrb[52].mxu0 }
 0x2d2   : > { %v6545_v14 = vpop.f32.mrb[53].mxu0 }
 0x2d3   : > { %v6547_v21 = vpop.f32.mrb[54].mxu0 }
 0x2d4   : > { %v6549_v22 = vpop.f32.mrb[55].mxu0 }
 0x2d9   : > { %v6551_v60 = vpop.f32.mrb[56].mxu0 }
 0x2da   : > { %v6553_v51 = vpop.f32.mrb[57].mxu0 }
 0x2db   : > { %v6555_v54 = vpop.f32.mrb[58].mxu0 }
 0x2dc   : > { %v6557_v57 = vpop.f32.mrb[59].mxu0 }
 0x2e1   : > { %v6559_v55 = vpop.f32.mrb[60].mxu0 }
 0x2e2   : > { %v6561_v0 = vpop.f32.mrb[61].mxu0 }
 0x2e3   : > { %v6563_v16 = vpop.f32.mrb[62].mxu0 }
 0x2e4   : > { %v6565_v39 = vpop.f32.mrb[63].mxu0 }
 0x2ea   : > { %v4987_v7 = vpop.f32.mrb[0].mxu1 }
 0x2eb   : > { %v5017_v13 = vadd.f32 %v4987_v7, %v4817_v37  ;;  %v3437_v29 = vpop.f32.mrb[1].mxu1  ;;  %v3899_v37 = vunpack.c.h.bf16 %v6598_v48 }
 0x2ec   : > { %v5018_v36 = vadd.f32 %v3437_v29, %v1966_v33  ;;  %v4988_v28 = vpop.f32.mrb[2].mxu1 }
 0x2ed   : > { %v3605_v23 = vmul.f32 %v5017_v13, %v6570_v25  ;;  %v5019_v46 = vadd.f32 %v4988_v28, %v4818_v4  ;;  %v3440_v30 = vpop.f32.mrb[3].mxu1  ;;  %v6615_v13 = vld [vmem:[%s5666_s8 + $0x10] sm:$0xff]  }
 0x2ee   : > { %v3603_v56 = vmul.f32 %v5018_v36, %v6570_v25  ;;  %v5020_v58 = vadd.f32 %v3440_v30, %v1969_v41  ;;  %v6606_v41 = vld [vmem:[%s5666_s8 + $0x8] sm:$0xff]  }
 0x2ef   : > { %v6580_v61 = vadd.f32 %v6575_v32, %v3605_v23  ;;  %v3606_v62 = vmul.f32 %v5019_v46, %v6570_v25  ;;  %v6624_v23 = vld [vmem:[%s5666_s8 + $0x18] sm:$0xff]   ;;  %v6689_v36 = vld [vmem:[%s5666_s8 + $0x48] sm:$0xff]  }
 0x2f0   : > { %v6584_v43 = vadd.f32 %v6575_v32, %v3603_v56  ;;  %v3604_v63 = vmul.f32 %v5020_v58, %v6570_v25 }
 0x2f1   : > { %v4409_v2 = vmul.f32 -1.442695, %v6580_v61  ;;  %v6589_v24 = vadd.f32 %v6575_v32, %v3606_v62  ;;  %v6633_v62 = vld [vmem:[%s5666_s8 + $0x20] sm:$0xff]  }
 0x2f2   : > { %v4407_v9 = vmul.f32 -1.442695, %v6584_v43  ;;  %v6593_v18 = vadd.f32 %v6575_v32, %v3604_v63  ;;  %v4991_v42 = vpop.f32.mrb[4].mxu1 }
 0x2f3   : > { %5452 = vpow2.f32 %v4409_v2  ;;  %v4410_v8 = vmul.f32 -1.442695, %v6589_v24  ;;  %v5021_v10 = vadd.f32 %v4991_v42, %v4821_v44  ;;  %v3453_v45 = vpop.f32.mrb[5].mxu1  ;;  %v3900_v44 = vunpack.c.l.bf16 %v6606_v41 }
 0x2f4   : > { %5454 = vpow2.f32 %v4407_v9  ;;  %v4408_v11 = vmul.f32 -1.442695, %v6593_v18  ;;  %v5022_v52 = vadd.f32 %v3453_v45, %v1982_v20  ;;  %v4992_v15 = vpop.f32.mrb[6].mxu1  ;;  %v3901_v20 = vunpack.c.h.bf16 %v6606_v41 }
 0x2f5   : > { %5456 = vpow2.f32 %v4410_v8  ;;  %v3609_v19 = vmul.f32 %v5021_v10, %v6570_v25  ;;  %v5023_v50 = vadd.f32 %v4992_v15, %v4822_v27  ;;  %v3456_v35 = vpop.f32.mrb[7].mxu1  ;;  %v6642_v10 = vld [vmem:[%s5666_s8 + $0x28] sm:$0xff]  }
 0x2f6   : > { %5458 = vpow2.f32 %v4408_v11  ;;  %v3607_v33 = vmul.f32 %v5022_v52, %v6570_v25  ;;  %v5024_v4 = vadd.f32 %v3456_v35, %v6517_v12 }
 0x2f7   : > { %v6611_v7 = vadd.f32 %v6575_v32, %v3609_v19  ;;  %v3610_v27 = vmul.f32 %v5023_v50, %v6570_v25 }
 0x2f8   : > { %v6620_v12 = vadd.f32 %v6575_v32, %v3607_v33  ;;  %v3608_v28 = vmul.f32 %v5024_v4, %v6570_v25 }
 0x2f9   : > { %v4413_v56 = vmul.f32 -1.442695, %v6611_v7  ;;  %v6630_v58 = vadd.f32 %v6575_v32, %v3610_v27  ;;  %v6651_v27 = vld [vmem:[%s5666_s8 + $0x30] sm:$0xff]  }
 0x2fa   : > { %v4411_v9 = vmul.f32 -1.442695, %v6620_v12  ;;  %v6639_v42 = vadd.f32 %v6575_v32, %v3608_v28  ;;  %v4995_v8 = vpop.f32.mrb[8].mxu1 }
 0x2fb   : > { %5460 = vpow2.f32 %v4413_v56  ;;  %v4414_v11 = vmul.f32 -1.442695, %v6630_v58  ;;  %v5025_v52 = vadd.f32 %v4995_v8, %v6519_v49  ;;  %v3469_v15 = vpop.f32.mrb[9].mxu1 }
 0x2fc   : > { %5462 = vpow2.f32 %v4411_v9  ;;  %v4412_v50 = vmul.f32 -1.442695, %v6639_v42  ;;  %v5026_v35 = vadd.f32 %v3469_v15, %v6521_v53  ;;  %v4996_v33 = vpop.f32.mrb[10].mxu1 }
 0x2fd   : > { %v5453_v4 = vpop.eup %5452  ;;  %5464 = vpow2.f32 %v4414_v11  ;;  %v3613_v56 = vmul.f32 %v5025_v52, %v6570_v25  ;;  %v5027_v2 = vadd.f32 %v4996_v33, %v6523_v17  ;;  %v3472_v49 = vpop.f32.mrb[11].mxu1 }
 0x2fe   : > { %v5455_v8 = vpop.eup %5454  ;;  %v3772_v63 = vadd.f32 1.0, %v5453_v4  ;;  %5466 = vpow2.f32 %v4412_v50  ;;  %v3611_v9 = vmul.f32 %v5026_v35, %v6570_v25  ;;  %v5028_v53 = vadd.f32 %v3472_v49, %v6525_v1 }
 0x2ff   : > { %v5457_v15 = vpop.eup %5456  ;;  %v3770_v45 = vadd.f32 1.0, %v5455_v8  ;;  %v6660_v28 = vadd.f32 %v6575_v32, %v3613_v56  ;;  %v3614_v11 = vmul.f32 %v5027_v2, %v6570_v25  ;;  %v6672_v56 = vld [vmem:[%s5666_s8 + $0x38] sm:$0xff]  }
 0x300   : > { %v5459_v52 = vpop.eup %5458  ;;  %5468 = vrcp.f32 %v3772_v63  ;;  %v3773_v17 = vadd.f32 1.0, %v5457_v15  ;;  %v6664_v33 = vadd.f32 %v6575_v32, %v3611_v9  ;;  %v3612_v50 = vmul.f32 %v5028_v53, %v6570_v25 }
 0x301   : > { %5470 = vrcp.f32 %v3770_v45  ;;  %v3771_v1 = vadd.f32 1.0, %v5459_v52  ;;  %v4417_v35 = vmul.f32 -1.442695, %v6660_v28  ;;  %v6669_v4 = vadd.f32 %v6575_v32, %v3614_v11  ;;  %v6683_v11 = vld [vmem:[%s5666_s8 + $0x40] sm:$0xff]  }
 0x302   : > { %5472 = vrcp.f32 %v3773_v17  ;;  %v4415_v63 = vmul.f32 -1.442695, %v6664_v33  ;;  %v6677_v49 = vadd.f32 %v6575_v32, %v3612_v50  ;;  %v4999_v8 = vpop.f32.mrb[12].mxu1 }
 0x303   : > { %5474 = vrcp.f32 %v3771_v1  ;;  %v4418_v9 = vmul.f32 -1.442695, %v6669_v4  ;;  %v5029_v53 = vadd.f32 %v4999_v8, %v6527_v40  ;;  %v3485_v15 = vpop.f32.mrb[13].mxu1 }
 0x304   : > { %5476 = vpow2.f32 %v4417_v35  ;;  %v4416_v17 = vmul.f32 -1.442695, %v6677_v49  ;;  %v5030_v19 = vadd.f32 %v3485_v15, %v6529_v34  ;;  %v5000_v50 = vpop.f32.mrb[14].mxu1 }
 0x305   : > { %v5461_v2 = vpop.eup %5460  ;;  %5478 = vpow2.f32 %v4415_v63  ;;  %v3617_v45 = vmul.f32 %v5029_v53, %v6570_v25  ;;  %v5031_v40 = vadd.f32 %v5000_v50, %v6531_v59  ;;  %v3488_v8 = vpop.f32.mrb[15].mxu1 }
 0x306   : > { %v5463_v30 = vpop.eup %5462  ;;  %v3776_v29 = vadd.f32 1.0, %v5461_v2  ;;  %5480 = vpow2.f32 %v4418_v9  ;;  %v3615_v35 = vmul.f32 %v5030_v19, %v6570_v25  ;;  %v5032_v52 = vadd.f32 %v3488_v8, %v6533_v26 }
 0x307   : > { %v5465_v34 = vpop.eup %5464  ;;  %v3774_v15 = vadd.f32 1.0, %v5463_v30  ;;  %5482 = vpow2.f32 %v4416_v17  ;;  %v6697_v46 = vadd.f32 %v6575_v32, %v3617_v45  ;;  %v3618_v63 = vmul.f32 %v5031_v40, %v6570_v25 }
 0x308   : > { %v5467_v1 = vpop.eup %5466  ;;  %5484 = vrcp.f32 %v3776_v29  ;;  %v3777_v53 = vadd.f32 1.0, %v5465_v34  ;;  %v6701_v59 = vadd.f32 %v6575_v32, %v3615_v35  ;;  %v3616_v2 = vmul.f32 %v5032_v52, %v6570_v25 }
 0x309   : > { %5486 = vrcp.f32 %v3774_v15  ;;  %v3775_v19 = vadd.f32 1.0, %v5467_v1  ;;  %v4421_v26 = vmul.f32 -1.442695, %v6697_v46  ;;  %v6706_v30 = vadd.f32 %v6575_v32, %v3618_v63 }
 0x30a   : > { %v5469_v9 = vpop.eup %5468  ;;  %5488 = vrcp.f32 %v3777_v53  ;;  %v4419_v45 = vmul.f32 -1.442695, %v6701_v59  ;;  %v6710_v29 = vadd.f32 %v6575_v32, %v3616_v2  ;;  %v5003_v17 = vpop.f32.mrb[16].mxu1 }
 0x30b   : > { %v5471_v50 = vpop.eup %5470  ;;  %v3868_v40 = vmul.f32 %v5469_v9, %v6580_v61  ;;  %5490 = vrcp.f32 %v3775_v19  ;;  %v4422_v52 = vmul.f32 -1.442695, %v6706_v30  ;;  %v5033_v1 = vadd.f32 %v5003_v17, %v6535_v47  ;;  %v3501_v8 = vpop.f32.mrb[17].mxu1 }
 0x30c   : > { %v5473_v35 = vpop.eup %5472  ;;  %v3866_v34 = vmul.f32 %v5471_v50, %v6584_v43  ;;  %5492 = vpow2.f32 %v4421_v26  ;;  %v4420_v15 = vmul.f32 -1.442695, %v6710_v29  ;;  %v5034_v63 = vadd.f32 %v3501_v8, %v6537_v38  ;;  %v5004_v53 = vpop.f32.mrb[18].mxu1 }
 0x30d   : > { %v5475_v2 = vpop.eup %5474  ;;  %v3932_v61 = vadd.f32 %v3900_v44, %v3868_v40  ;;  %v3869_v19 = vmul.f32 %v5473_v35, %v6589_v24  ;;  %5494 = vpow2.f32 %v4419_v45  ;;  %v3621_v9 = vmul.f32 %v5033_v1, %v6570_v25  ;;  %v3504_v47 = vpop.f32.mrb[19].mxu1 }
 0x30e   : > { %v5477_v17 = vpop.eup %5476  ;;  %v3930_v38 = vadd.f32 %v3898_v3, %v3866_v34  ;;  %v3867_v43 = vmul.f32 %v5475_v2, %v6593_v18  ;;  %5496 = vpow2.f32 %v4422_v52  ;;  %v3619_v24 = vmul.f32 %v5034_v63, %v6570_v25 }
 0x30f   : > { %v5479_v44 = vpop.eup %5478  ;;  %v4477_v26 = vpack.c.bf16 %v3932_v61, %v3932_v61  ;;  %v3933_v45 = vadd.f32 %v3901_v20, %v3869_v19  ;;  %v3780_v50 = vadd.f32 1.0, %v5477_v17  ;;  %5498 = vpow2.f32 %v4420_v15 }
 0x310   : > { %v5481_v40 = vpop.eup %5480  ;;  %v4475_v1 = vpack.c.bf16 %v3930_v38, %v3930_v38  ;;  %v3931_v8 = vadd.f32 %v3899_v37, %v3867_v43  ;;  %v3778_v35 = vadd.f32 1.0, %v5479_v44  ;;  %v6738_v18 = vadd.f32 %v6575_v32, %v3621_v9 }
 0x311   : > { %v5483_v3 = vpop.eup %5482  ;;  %4093 = vst.msk [vmem:[%s6727_s18 + $0x8] sm:$0xf] %vm4090_vm2, %v4477_v26  ;;  %v4478_v52 = vpack.c.bf16 %v3933_v45, %v3933_v45  ;;  %5500 = vrcp.f32 %v3780_v50  ;;  %v3781_v41 = vadd.f32 1.0, %v5481_v40  ;;  %v6743_v20 = vadd.f32 %v6575_v32, %v3619_v24 }
 0x312   : > { %v5485_v34 = vpop.eup %5484  ;;  %4091 = vst.msk [vmem:[%s6727_s18] sm:$0xf] %vm4090_vm2, %v4475_v1  ;;  %v4476_v48 = vpack.c.bf16 %v3931_v8, %v3931_v8  ;;  %5502 = vrcp.f32 %v3778_v35  ;;  %v3779_v37 = vadd.f32 1.0, %v5483_v3  ;;  %v4425_v15 = vmul.f32 -1.442695, %v6738_v18  ;;  %v5007_v63 = vpop.f32.mrb[20].mxu1 }
 0x313   : > { %v5487_v2 = vpop.eup %5486  ;;  %4094 = vst.msk [vmem:[%s6727_s18 + $0xc] sm:$0xf] %vm4090_vm2, %v4478_v52  ;;  %v3872_v61 = vmul.f32 %v5485_v34, %v6611_v7  ;;  %5504 = vrcp.f32 %v3781_v41  ;;  %v4423_v19 = vmul.f32 -1.442695, %v6743_v20  ;;  %v5035_v9 = vadd.f32 %v5004_v53, %v6539_v5  ;;  %v3517_v17 = vpop.f32.mrb[21].mxu1 }
 0x314   : > { %v5489_v38 = vpop.eup %5488  ;;  %4092 = vst.msk [vmem:[%s6727_s18 + $0x4] sm:$0xf] %vm4090_vm2, %v4476_v48  ;;  %v3870_v43 = vmul.f32 %v5487_v2, %v6620_v12  ;;  %5506 = vrcp.f32 %v3779_v37  ;;  %v5036_v24 = vadd.f32 %v3504_v47, %v6541_v6  ;;  %v5037_v44 = vadd.f32 %v5007_v63, %v6543_v31  ;;  %v5008_v26 = vpop.f32.mrb[22].mxu1 }
 0x315   : > { %v5491_v45 = vpop.eup %5490  ;;  %v6974_v7 = vunpack.c.l.bf16 %v6624_v23  ;;  %v3873_v40 = vmul.f32 %v5489_v38, %v6630_v58  ;;  %5508 = vpow2.f32 %v4425_v15  ;;  %v3622_v5 = vmul.f32 %v5035_v9, %v6570_v25  ;;  %v3520_v53 = vpop.f32.mrb[23].mxu1 }
 0x316   : > { %v5493_v1 = vpop.eup %5492  ;;  %v6975_v8 = vunpack.c.l.bf16 %v6615_v13  ;;  %v3871_v6 = vmul.f32 %v5491_v45, %v6639_v42  ;;  %5510 = vpow2.f32 %v4423_v19  ;;  %v3620_v31 = vmul.f32 %v5036_v24, %v6570_v25 }
 0x317   : > { %v3936_v50 = vadd.f32 %v6974_v7, %v3872_v61  ;;  %v5495_v47 = vpop.eup %5494  ;;  %v6976_v3 = vunpack.c.h.bf16 %v6624_v23  ;;  %v3784_v52 = vadd.f32 1.0, %v5493_v1  ;;  %v6769_v41 = vadd.f32 %v6575_v32, %v3622_v5 }
 0x318   : > { %v3934_v12 = vadd.f32 %v6975_v8, %v3870_v43  ;;  %v5497_v34 = vpop.eup %5496  ;;  %v6977_v37 = vunpack.c.h.bf16 %v6615_v13  ;;  %v3782_v42 = vadd.f32 1.0, %v5495_v47  ;;  %v6774_v63 = vadd.f32 %v6575_v32, %v3620_v31 }
 0x319   : > { %v4481_v35 = vpack.c.bf16 %v3936_v50, %v3936_v50  ;;  %v3937_v58 = vadd.f32 %v6976_v3, %v3873_v40  ;;  %v5499_v2 = vpop.eup %5498  ;;  %5512 = vrcp.f32 %v3784_v52  ;;  %v3785_v23 = vadd.f32 1.0, %v5497_v34 }
 0x31a   : > { %v4479_v48 = vpack.c.bf16 %v3934_v12, %v3934_v12  ;;  %v3935_v15 = vadd.f32 %v6977_v37, %v3871_v6  ;;  %v4426_v19 = vmul.f32 -1.442695, %v6769_v41  ;;  %5514 = vrcp.f32 %v3782_v42  ;;  %v5011_v43 = vpop.f32.mrb[24].mxu1 }
 0x31b   : > { %4097 = vst.msk [vmem:[%s6727_s18 + $0x18] sm:$0xf] %vm4090_vm2, %v4481_v35  ;;  %v4482_v61 = vpack.c.bf16 %v3937_v58, %v3937_v58  ;;  %v3783_v13 = vadd.f32 1.0, %v5499_v2  ;;  %v4424_v38 = vmul.f32 -1.442695, %v6774_v63  ;;  %v5501_v24 = vpop.eup %5500  ;;  %5516 = vrcp.f32 %v3785_v23  ;;  %v3533_v40 = vpop.f32.mrb[25].mxu1 }
 0x31c   : > { %4095 = vst.msk [vmem:[%s6727_s18 + $0x10] sm:$0xf] %vm4090_vm2, %v4479_v48  ;;  %v4480_v9 = vpack.c.bf16 %v3935_v15, %v3935_v15  ;;  %v3625_v45 = vmul.f32 %v5037_v44, %v6570_v25  ;;  %v5038_v7 = vadd.f32 %v3517_v17, %v6545_v14  ;;  %v5039_v50 = vadd.f32 %v5008_v26, %v6547_v21  ;;  %v5503_v5 = vpop.eup %5502  ;;  %v5012_v6 = vpop.f32.mrb[26].mxu1 }
 0x31d   : > { %4098 = vst.msk [vmem:[%s6727_s18 + $0x1c] sm:$0xf] %vm4090_vm2, %v4482_v61  ;;  %v3876_v1 = vmul.f32 %v5501_v24, %v6660_v28  ;;  %5518 = vrcp.f32 %v3783_v13  ;;  %v5040_v8 = vadd.f32 %v3520_v53, %v6549_v22  ;;  %v5041_v12 = vadd.f32 %v5011_v43, %v6551_v60  ;;  %v5505_v31 = vpop.eup %5504  ;;  %v6797_v17 = vpop.f32.mrb[27].mxu1 }
 0x31e   : > { %4096 = vst.msk [vmem:[%s6727_s18 + $0x14] sm:$0xf] %vm4090_vm2, %v4480_v9  ;;  %v3874_v47 = vmul.f32 %v5503_v5, %v6664_v33  ;;  %5520 = vpow2.f32 %v4426_v19  ;;  %v6794_v14 = vadd.f32 %v6575_v32, %v3625_v45  ;;  %v3623_v21 = vmul.f32 %v5038_v7, %v6570_v25  ;;  %v5507_v44 = vpop.eup %5506 }
 0x31f   : > { %v6978_v28 = vunpack.c.l.bf16 %v6642_v10  ;;  %v3877_v22 = vmul.f32 %v5505_v31, %v6669_v4  ;;  %5522 = vpow2.f32 %v4424_v38  ;;  %v3626_v60 = vmul.f32 %v5039_v50, %v6570_v25  ;;  %v5509_v53 = vpop.eup %5508 }
 0x320   : > { %v6979_v33 = vunpack.c.l.bf16 %v6633_v62  ;;  %v3875_v3 = vmul.f32 %v5507_v44, %v6677_v49  ;;  %v4429_v58 = vmul.f32 -1.442695, %v6794_v14  ;;  %v6808_v52 = vadd.f32 %v6575_v32, %v3623_v21  ;;  %v5511_v34 = vpop.eup %5510 }
 0x321   : > { %v3940_v26 = vadd.f32 %v6978_v28, %v3876_v1  ;;  %v6980_v4 = vunpack.c.h.bf16 %v6642_v10  ;;  %v3788_v15 = vadd.f32 1.0, %v5509_v53  ;;  %v6813_v42 = vadd.f32 %v6575_v32, %v3626_v60 }
 0x322   : > { %v3938_v35 = vadd.f32 %v6979_v33, %v3874_v47  ;;  %v6981_v61 = vunpack.c.h.bf16 %v6633_v62  ;;  %v3786_v49 = vadd.f32 1.0, %v5511_v34  ;;  %5524 = vpow2.f32 %v4429_v58  ;;  %v5015_v13 = vpop.f32.mrb[28].mxu1 }
 0x323   : > { %v4485_v48 = vpack.c.bf16 %v3940_v26, %v3940_v26  ;;  %v3941_v37 = vadd.f32 %v6980_v4, %v3877_v22  ;;  %5526 = vrcp.f32 %v3788_v15  ;;  %v4427_v9 = vmul.f32 -1.442695, %v6808_v52  ;;  %v5513_v38 = vpop.eup %5512  ;;  %v3549_v45 = vpop.f32.mrb[29].mxu1 }
 0x324   : > { %v4483_v2 = vpack.c.bf16 %v3938_v35, %v3938_v35  ;;  %v3939_v23 = vadd.f32 %v6981_v61, %v3875_v3  ;;  %v4430_v10 = vmul.f32 -1.442695, %v6813_v42  ;;  %5528 = vrcp.f32 %v3786_v49  ;;  %v5515_v7 = vpop.eup %5514  ;;  %v5016_v31 = vpop.f32.mrb[30].mxu1 }
 0x325   : > { %4101 = vst.msk [vmem:[%s6727_s18 + $0x28] sm:$0xf] %vm4090_vm2, %v4485_v48  ;;  %v4486_v19 = vpack.c.bf16 %v3941_v37, %v3941_v37  ;;  %v3624_v62 = vmul.f32 %v5040_v8, %v6570_v25  ;;  %v3629_v24 = vmul.f32 %v5041_v12, %v6570_v25  ;;  %v3880_v50 = vmul.f32 %v5513_v38, %v6697_v46  ;;  %v5517_v47 = vpop.eup %5516  ;;  %v6839_v44 = vpop.f32.mrb[31].mxu1 }
 0x326   : > { %4099 = vst.msk [vmem:[%s6727_s18 + $0x20] sm:$0xf] %vm4090_vm2, %v4483_v2  ;;  %v4484_v43 = vpack.c.bf16 %v3939_v23, %v3939_v23  ;;  %5530 = vpow2.f32 %v4427_v9  ;;  %v5042_v5 = vadd.f32 %v3533_v40, %v6553_v51  ;;  %v5043_v1 = vadd.f32 %v5012_v6, %v6555_v54 }
 0x327   : > { %4102 = vst.msk [vmem:[%s6727_s18 + $0x2c] sm:$0xf] %vm4090_vm2, %v4486_v19  ;;  %v3878_v21 = vmul.f32 %v5515_v7, %v6701_v59  ;;  %5532 = vpow2.f32 %v4430_v10  ;;  %v6834_v8 = vadd.f32 %v6575_v32, %v3624_v62  ;;  %v6837_v12 = vadd.f32 %v6575_v32, %v3629_v24  ;;  %v5519_v46 = vpop.eup %5518 }
 0x328   : > { %4100 = vst.msk [vmem:[%s6727_s18 + $0x24] sm:$0xf] %vm4090_vm2, %v4484_v43  ;;  %v6982_v51 = vunpack.c.l.bf16 %v6672_v56  ;;  %v3881_v54 = vmul.f32 %v5517_v47, %v6706_v30  ;;  %v3627_v6 = vmul.f32 %v5042_v5, %v6570_v25  ;;  %v3630_v59 = vmul.f32 %v5043_v1, %v6570_v25  ;;  %v5521_v28 = vpop.eup %5520 }
 0x329   : > { %v6983_v26 = vunpack.c.l.bf16 %v6651_v27  ;;  %v3879_v60 = vmul.f32 %v5519_v46, %v6710_v29  ;;  %v4428_v53 = vmul.f32 -1.442695, %v6834_v8  ;;  %v4433_v33 = vmul.f32 -1.442695, %v6837_v12  ;;  %v5523_v35 = vpop.eup %5522 }
 0x32a   : > { %v3944_v40 = vadd.f32 %v6982_v51, %v3880_v50  ;;  %v6984_v30 = vunpack.c.h.bf16 %v6672_v56  ;;  %v3789_v34 = vadd.f32 1.0, %v5521_v28  ;;  %v6854_v48 = vadd.f32 %v6575_v32, %v3627_v6 }
 0x32b   : > { %v3942_v22 = vadd.f32 %v6983_v26, %v3878_v21  ;;  %v6985_v37 = vunpack.c.h.bf16 %v6651_v27  ;;  %v3787_v29 = vadd.f32 1.0, %v5523_v35  ;;  %5534 = vpow2.f32 %v4428_v53 }
 0x32c   : > { %v4489_v3 = vpack.c.bf16 %v3944_v40, %v3944_v40  ;;  %v3945_v58 = vadd.f32 %v6984_v30, %v3881_v54  ;;  %5536 = vrcp.f32 %v3789_v34  ;;  %v4431_v61 = vmul.f32 -1.442695, %v6854_v48  ;;  %v5525_v23 = vpop.eup %5524 }
 0x32d   : > { %v4487_v4 = vpack.c.bf16 %v3942_v22, %v3942_v22  ;;  %v3943_v15 = vadd.f32 %v6985_v37, %v3879_v60  ;;  %v6862_v56 = vadd.f32 %v6575_v32, %v3630_v59  ;;  %5538 = vrcp.f32 %v3787_v29  ;;  %v5527_v9 = vpop.eup %5526 }
 0x32e   : > { %4105 = vst.msk [vmem:[%s6727_s18 + $0x38] sm:$0xf] %vm4090_vm2, %v4489_v3  ;;  %v4490_v2 = vpack.c.bf16 %v3945_v58, %v3945_v58  ;;  %v5044_v27 = vadd.f32 %v6797_v17, %v6557_v57  ;;  %v5045_v19 = vadd.f32 %v5015_v13, %v6559_v55  ;;  %v3792_v10 = vadd.f32 1.0, %v5525_v23  ;;  %v5529_v62 = vpop.eup %5528 }
 0x32f   : > { %4103 = vst.msk [vmem:[%s6727_s18 + $0x30] sm:$0xf] %vm4090_vm2, %v4487_v4  ;;  %v4488_v49 = vpack.c.bf16 %v3943_v15, %v3943_v15  ;;  %5540 = vpow2.f32 %v4433_v33  ;;  %v4434_v38 = vmul.f32 -1.442695, %v6862_v56  ;;  %v5046_v43 = vadd.f32 %v3549_v45, %v6561_v0  ;;  %v5590_v4 = vld [vmem:[%s5666_s8 + $0x58] sm:$0xff]  }
 0x330   : > { %4106 = vst.msk [vmem:[%s6727_s18 + $0x3c] sm:$0xf] %vm4090_vm2, %v4490_v2  ;;  %v3884_v24 = vmul.f32 %v5527_v9, %v6738_v18  ;;  %5542 = vpow2.f32 %v4431_v61  ;;  %v3628_v7 = vmul.f32 %v5044_v27, %v6570_v25  ;;  %v3633_v57 = vmul.f32 %v5045_v19, %v6570_v25  ;;  %v5531_v55 = vpop.eup %5530  ;;  %v5591_v27 = vld [vmem:[%s5666_s8 + $0x50] sm:$0xff]  }
 0x331   : > { %4104 = vst.msk [vmem:[%s6727_s18 + $0x34] sm:$0xf] %vm4090_vm2, %v4488_v49  ;;  %v3882_v17 = vmul.f32 %v5529_v62, %v6743_v20  ;;  %5544 = vrcp.f32 %v3792_v10  ;;  %v3631_v13 = vmul.f32 %v5046_v43, %v6570_v25  ;;  %v5047_v50 = vadd.f32 %v5016_v31, %v6563_v16  ;;  %v5533_v5 = vpop.eup %5532 }
 0x332   : > { %v6986_v0 = vunpack.c.l.bf16 %v6689_v36  ;;  %v3790_v1 = vadd.f32 1.0, %v5531_v55  ;;  %5546 = vpow2.f32 %v4434_v38  ;;  %v6884_v18 = vadd.f32 %v6575_v32, %v3628_v7 }
 0x333   : > { %v6987_v47 = vunpack.c.l.bf16 %v6683_v11  ;;  %v3793_v46 = vadd.f32 1.0, %v5533_v5  ;;  %v6889_v20 = vadd.f32 %v6575_v32, %v3633_v57  ;;  %v6892_v51 = vadd.f32 %v6575_v32, %v3631_v13 }
 0x334   : > { %v3948_v45 = vadd.f32 %v6986_v0, %v3884_v24  ;;  %5548 = vrcp.f32 %v3790_v1  ;;  %v4432_v31 = vmul.f32 -1.442695, %v6884_v18  ;;  %v3634_v40 = vmul.f32 %v5047_v50, %v6570_v25 }
 0x335   : > { %v3946_v21 = vadd.f32 %v6987_v47, %v3882_v17  ;;  %5550 = vrcp.f32 %v3793_v46  ;;  %v4437_v6 = vmul.f32 -1.442695, %v6889_v20  ;;  %v4435_v59 = vmul.f32 -1.442695, %v6892_v51  ;;  %v5535_v28 = vpop.eup %5534 }
 0x336   : > { %v4493_v16 = vpack.c.bf16 %v3948_v45, %v3948_v45  ;;  %v3917_v26 = vunpack.c.h.bf16 %v6689_v36  ;;  %5552 = vpow2.f32 %v4432_v31  ;;  %v6902_v22 = vadd.f32 %v6575_v32, %v3634_v40  ;;  %v5537_v53 = vpop.eup %5536 }
 0x337   : > { %v4491_v54 = vpack.c.bf16 %v3946_v21, %v3946_v21  ;;  %v5048_v60 = vadd.f32 %v6839_v44, %v6565_v39  ;;  %v3915_v33 = vunpack.c.h.bf16 %v6683_v11  ;;  %v3791_v35 = vadd.f32 1.0, %v5535_v28  ;;  %v5539_v3 = vpop.eup %5538 }
 0x338   : > { %4109 = vst.msk [vmem:[%s6727_s18 + $0x48] sm:$0xf] %vm4090_vm2, %v4493_v16  ;;  %5554 = vpow2.f32 %v4437_v6  ;;  %v3885_v36 = vmul.f32 %v5537_v53, %v6769_v41  ;;  %v4438_v30 = vmul.f32 -1.442695, %v6902_v22  ;;  %v3920_v37 = vunpack.c.l.bf16 %v5590_v4  ;;  %v5592_v16 = vld [vmem:[%s5666_s8 + $0x68] sm:$0xff]   ;;  %v5593_v6 = vld [vmem:[%s5666_s8 + $0x60] sm:$0xff]  }
 0x339   : > { %4107 = vst.msk [vmem:[%s6727_s18 + $0x40] sm:$0xf] %vm4090_vm2, %v4491_v54  ;;  %5556 = vpow2.f32 %v4435_v59  ;;  %v3632_v58 = vmul.f32 %v5048_v60, %v6570_v25  ;;  %v5541_v34 = vpop.eup %5540  ;;  %v3883_v39 = vmul.f32 %v5539_v3, %v6774_v63  ;;  %v3918_v19 = vunpack.c.l.bf16 %v5591_v27 }
 0x33a   : > { %5558 = vrcp.f32 %v3791_v35  ;;  %v5543_v11 = vpop.eup %5542  ;;  %v3949_v44 = vadd.f32 %v3917_v26, %v3885_v36  ;;  %v3796_v15 = vadd.f32 1.0, %v5541_v34  ;;  %v3919_v5 = vunpack.c.h.bf16 %v5591_v27 }
 0x33b   : > { %5560 = vpow2.f32 %v4438_v30  ;;  %v6915_v29 = vadd.f32 %v6575_v32, %v3632_v58  ;;  %v5545_v41 = vpop.eup %5544  ;;  %v3947_v2 = vadd.f32 %v3915_v33, %v3883_v39  ;;  %v3794_v61 = vadd.f32 1.0, %v5543_v11 }
 0x33c   : > { %v5547_v23 = vpop.eup %5546  ;;  %v4494_v25 = vpack.c.bf16 %v3949_v44, %v3949_v44  ;;  %v3888_v49 = vmul.f32 %v5545_v41, %v6794_v14  ;;  %5562 = vrcp.f32 %v3796_v15  ;;  %v3921_v32 = vunpack.c.h.bf16 %v5590_v4  ;;  %v5594_v44 = vld [vmem:[%s5666_s8 + $0x78] sm:$0xff]   ;;  %v5595_v41 = vld [vmem:[%s5666_s8 + $0x70] sm:$0xff]  }
 0x33d   : > { %v4436_v63 = vmul.f32 -1.442695, %v6915_v29  ;;  %v4492_v9 = vpack.c.bf16 %v3947_v2, %v3947_v2  ;;  %5564 = vrcp.f32 %v3794_v61  ;;  %v3797_v10 = vadd.f32 1.0, %v5547_v23 }
 0x33e   : > { %v5549_v38 = vpop.eup %5548  ;;  %4110 = vst.msk [vmem:[%s6727_s18 + $0x4c] sm:$0xf] %vm4090_vm2, %v4494_v25  ;;  %v3952_v43 = vadd.f32 %v3920_v37, %v3888_v49  ;;  %v3924_v31 = vunpack.c.l.bf16 %v5592_v16  ;;  %v3922_v59 = vunpack.c.l.bf16 %v5593_v6  ;;  %v3928_v15 = vunpack.c.l.bf16 %v5594_v44 }
 0x33f   : > { %5566 = vpow2.f32 %v4436_v63  ;;  %v5551_v62 = vpop.eup %5550  ;;  %4108 = vst.msk [vmem:[%s6727_s18 + $0x44] sm:$0xf] %vm4090_vm2, %v4492_v9  ;;  %v3886_v14 = vmul.f32 %v5549_v38, %v6808_v52  ;;  %v3926_v2 = vunpack.c.l.bf16 %v5595_v41  ;;  %v3929_v49 = vunpack.c.h.bf16 %v5594_v44 }
 0x340   : > { %5568 = vrcp.f32 %v3797_v10  ;;  %v5553_v24 = vpop.eup %5552  ;;  %v4497_v7 = vpack.c.bf16 %v3952_v43, %v3952_v43  ;;  %v3889_v57 = vmul.f32 %v5551_v62, %v6813_v42  ;;  %v3927_v43 = vunpack.c.h.bf16 %v5595_v41 }
 0x341   : > { %v3950_v17 = vadd.f32 %v3918_v19, %v3886_v14  ;;  %v3795_v13 = vadd.f32 1.0, %v5553_v24 }
 0x342   : > { %v5555_v55 = vpop.eup %5554  ;;  %4113 = vst.msk [vmem:[%s6727_s18 + $0x58] sm:$0xf] %vm4090_vm2, %v4497_v7  ;;  %v3953_v0 = vadd.f32 %v3921_v32, %v3889_v57 }
 0x343   : > { %v5557_v50 = vpop.eup %5556  ;;  %v3800_v45 = vadd.f32 1.0, %v5555_v55  ;;  %v4495_v52 = vpack.c.bf16 %v3950_v17, %v3950_v17  ;;  %5570 = vrcp.f32 %v3795_v13 }
 0x344   : > { %v5559_v1 = vpop.eup %5558  ;;  %v3798_v47 = vadd.f32 1.0, %v5557_v50  ;;  %v4498_v46 = vpack.c.bf16 %v3953_v0, %v3953_v0 }
 0x345   : > { %v5561_v21 = vpop.eup %5560  ;;  %v3887_v42 = vmul.f32 %v5559_v1, %v6834_v8  ;;  %5572 = vrcp.f32 %v3800_v45  ;;  %4111 = vst.msk [vmem:[%s6727_s18 + $0x50] sm:$0xf] %vm4090_vm2, %v4495_v52  ;;  %v3925_v8 = vunpack.c.h.bf16 %v5592_v16 }
 0x346   : > { %5574 = vrcp.f32 %v3798_v47  ;;  %v3801_v40 = vadd.f32 1.0, %v5561_v21  ;;  %v5563_v54 = vpop.eup %5562  ;;  %4114 = vst.msk [vmem:[%s6727_s18 + $0x5c] sm:$0xf] %vm4090_vm2, %v4498_v46 }
 0x347   : > { %v3951_v28 = vadd.f32 %v3919_v5, %v3887_v42  ;;  %v5565_v26 = vpop.eup %5564  ;;  %v3892_v60 = vmul.f32 %v5563_v54, %v6837_v12  ;;  %v3923_v12 = vunpack.c.h.bf16 %v5593_v6 }
 0x348   : > { %5576 = vrcp.f32 %v3801_v40  ;;  %v3890_v35 = vmul.f32 %v5565_v26, %v6854_v48 }
 0x349   : > { %v5567_v53 = vpop.eup %5566  ;;  %v4496_v33 = vpack.c.bf16 %v3951_v28, %v3951_v28  ;;  %v3956_v36 = vadd.f32 %v3924_v31, %v3892_v60 }
 0x34a   : > { %v5569_v3 = vpop.eup %5568  ;;  %v3799_v30 = vadd.f32 1.0, %v5567_v53  ;;  %v3954_v58 = vadd.f32 %v3922_v59, %v3890_v35 }
 0x34b   : > { %4112 = vst.msk [vmem:[%s6727_s18 + $0x54] sm:$0xf] %vm4090_vm2, %v4496_v33  ;;  %v3893_v34 = vmul.f32 %v5569_v3, %v6862_v56  ;;  %v4501_v4 = vpack.c.bf16 %v3956_v36, %v3956_v36 }
 0x34c   : > { %5578 = vrcp.f32 %v3799_v30  ;;  %v4499_v37 = vpack.c.bf16 %v3954_v58, %v3954_v58 }
 0x34d   : > { %v3957_v39 = vadd.f32 %v3925_v8, %v3893_v34  ;;  %v5571_v11 = vpop.eup %5570  ;;  %4117 = vst.msk [vmem:[%s6727_s18 + $0x68] sm:$0xf] %vm4090_vm2, %v4501_v4 }
 0x34e   : > { %4115 = vst.msk [vmem:[%s6727_s18 + $0x60] sm:$0xf] %vm4090_vm2, %v4499_v37  ;;  %v3891_v56 = vmul.f32 %v5571_v11, %v6884_v18 }
 0x34f   : > { %v5573_v48 = vpop.eup %5572  ;;  %v4502_v61 = vpack.c.bf16 %v3957_v39, %v3957_v39 }
 0x350   : > { %v5575_v23 = vpop.eup %5574  ;;  %v3896_v25 = vmul.f32 %v5573_v48, %v6889_v20  ;;  %v3955_v63 = vadd.f32 %v3923_v12, %v3891_v56 }
 0x351   : > { %4118 = vst.msk [vmem:[%s6727_s18 + $0x6c] sm:$0xf] %vm4090_vm2, %v4502_v61  ;;  %v3894_v27 = vmul.f32 %v5575_v23, %v6892_v51 }
 0x352   : > { %v5577_v19 = vpop.eup %5576  ;;  %v3960_v9 = vadd.f32 %v3928_v15, %v3896_v25  ;;  %v4500_v10 = vpack.c.bf16 %v3955_v63, %v3955_v63 }
 0x353   : > { %v3958_v38 = vadd.f32 %v3926_v2, %v3894_v27  ;;  %v3897_v32 = vmul.f32 %v5577_v19, %v6902_v22 }
 0x354   : > { %v4505_v18 = vpack.c.bf16 %v3960_v9, %v3960_v9  ;;  %4116 = vst.msk [vmem:[%s6727_s18 + $0x64] sm:$0xf] %vm4090_vm2, %v4500_v10 }
 0x355   : > { %v4503_v20 = vpack.c.bf16 %v3958_v38, %v3958_v38  ;;  %v3961_v62 = vadd.f32 %v3929_v49, %v3897_v32 }
 0x356   : > { %v5579_v14 = vpop.eup %5578  ;;  %4121 = vst.msk [vmem:[%s6727_s18 + $0x78] sm:$0xf] %vm4090_vm2, %v4505_v18 }
 0x357   : > { %4119 = vst.msk [vmem:[%s6727_s18 + $0x70] sm:$0xf] %vm4090_vm2, %v4503_v20  ;;  %v4506_v51 = vpack.c.bf16 %v3961_v62, %v3961_v62  ;;  %v3895_v24 = vmul.f32 %v5579_v14, %v6915_v29 }
 0x359   : > { %4122 = vst.msk [vmem:[%s6727_s18 + $0x7c] sm:$0xf] %vm4090_vm2, %v4506_v51  ;;  %v3959_v7 = vadd.f32 %v3927_v43, %v3895_v24 }
 0x35b   : > { %v4504_v57 = vpack.c.bf16 %v3959_v7, %v3959_v7 }
 0x35d   : > { %4120 = vst.msk [vmem:[%s6727_s18 + $0x74] sm:$0xf] %vm4090_vm2, %v4504_v57 }
 0x35e PF: > { %s17_s24 = sadd.s32 1, %s5602_s24  }
 0x35f   : > { %p14_p4 = scmp.ge.s32.totalorder %s17_s24, 4  }
 0x361   :  { %16 = sbr.rel (!%p14_p4) target bundleno = 1 (0x1), region = 88 }

</bundles_post_ra>
